<compile_context>
chip_gen: v6e
topology: v6e:2x2x1
jax: 0.10.0
libtpu: 0.0.40
codegen_flags: <defaults>
</compile_context>

<pallas_src>
import functools

import jax
import jax.numpy as jnp
from jax import lax
from jax.experimental import pallas as pl
from jax.experimental.pallas import tpu as pltpu


# ----------------------------------------------------------------------------
# Rational activation, version "A", degrees (5, 4):
#   R(x) = (a0 + a1 x + ... + a5 x^5) / (1 + |b1 x + b2 x^2 + b3 x^3 + b4 x^4|)
# Default init (leaky_relu fit).  Coefficients are per-instance (trainable in the
# PyTorch module), so they are plumbed into the kernels as SMEM scalars.
# ----------------------------------------------------------------------------
_RAT_NUM = (0.02996348, 0.61690165, 2.37539147, 3.06608078, 1.52474449, 0.25281987)
_RAT_DEN = (1.19160814, 4.40811795, 0.91111034, 0.34885983)


def _pick_epilogue_dtype():
    """bf16 epilogue on chips with bf16 VPU/EUP (v6e/Trillium, v7x); f32 otherwise (v5e-)."""
    try:
        kind = jax.devices()[0].device_kind.lower()
    except Exception:
        return jnp.float32
    for tag in ("v6", "v7", "tpu7", "trillium"):
        if tag in kind:
            return jnp.bfloat16
    return jnp.float32


_EPI_DTYPE = _pick_epilogue_dtype()


def _rational(y_f32, coef_ref):
    """Rational activation on the f32 MXU result.

    coef_ref: (10,) f32 SMEM ref; [0:6] numerator a0..a5, [6:10] denominator b1..b4.
    Horner chains run in _EPI_DTYPE (bf16 on v6e/v7x, f32 on v5e); the divide uses the
    f32 EUP approximate reciprocal (q >= 1 keeps it stable).  Returns f32.
    """
    dt = _EPI_DTYPE
    x = y_f32.astype(dt)
    c = [coef_ref[i].astype(dt) for i in range(10)]
    # Numerator P(x), Horner, degree 5.
    p = x * c[5] + c[4]
    p = p * x + c[3]
    p = p * x + c[2]
    p = p * x + c[1]
    p = p * x + c[0]
    # Denominator Q(x) = 1 + |b1 x + b2 x^2 + b3 x^3 + b4 x^4|
    q = x * c[9] + c[8]
    q = q * x + c[7]
    q = q * x + c[6]
    q = jnp.abs(q * x).astype(jnp.float32) + 1.0
    return p.astype(jnp.float32) * pl.reciprocal(q, approx=True)


# ----------------------------------------------------------------------------
# Pallas kernels
# ----------------------------------------------------------------------------
def _matmul_bias_rational_kernel(coef_ref, x_ref, w_ref, b_ref, o_ref):
    # bf16 x bf16 -> f32 accumulation on the MXU; epilogue bf16/f32; store bf16.
    y = jnp.dot(x_ref[...], w_ref[...], preferred_element_type=jnp.float32)
    o_ref[...] = _rational(y + b_ref[...], coef_ref).astype(o_ref.dtype)


def _head_kernel(coef_ref, x_ref, w1_ref, b1_ref, w2_ref, b2_ref, o_ref):
    # Fused fc1 (+rational) + fc2: removes one pallas_call and the (B,512) HBM round trip.
    h = jnp.dot(x_ref[...], w1_ref[...], preferred_element_type=jnp.float32)
    h = _rational(h + b1_ref[...], coef_ref)
    y = jnp.dot(h.astype(jnp.bfloat16), w2_ref[...], preferred_element_type=jnp.float32)
    o_ref[...] = y + b2_ref[...]


_COMPILER_PARAMS = pltpu.CompilerParams(dimension_semantics=("parallel",))
_SMEM_SPEC = pl.BlockSpec(memory_space=pltpu.MemorySpace.SMEM)


# ----------------------------------------------------------------------------
# Helpers
# ----------------------------------------------------------------------------
def _round_up(x, m):
    return (x + m - 1) // m * m


def _choose_m_tiling(M, max_bm=512):
    """Pick (bm, Mp): bm multiple of 16 (bf16 sublane-dense), Mp = padded row count.

    Prefers bm | M (no pad rows -> no trailing-row slice copy) and >= 2 grid steps
    (so dimension_semantics=("parallel",) can use both v7x TensorCores).
    """
    max_bm = max(16, max_bm - max_bm % 16)
    M16 = _round_up(M, 16)
    if M16 <= 32:                                   # tiny M: one or two 16-row blocks
        return 16, M16
    half = (M16 // 2) - ((M16 // 2) % 16)
    cap = min(max_bm, max(16, half))
    # 1) largest 16-aligned divisor of M that keeps >= 2 steps
    for bm in range(cap, 15, -16):
        if M % bm == 0:
            return bm, M
    # 2) otherwise pad M, preferring larger blocks with modest (<= ~12.5%) waste
    for bm in range(cap, 15, -16):
        Mp = _round_up(M, bm)
        if Mp - M <= max(32, Mp // 8):
            return bm, Mp
    return 16, M16


def _pad_rows(x, Mp):
    M = x.shape[0]
    return x if Mp == M else jnp.pad(x, ((0, Mp - M), (0, 0)))


# ----------------------------------------------------------------------------
# Pallas wrappers
# ----------------------------------------------------------------------------
def matmul_bias_rational(x, w, b2d, coef, block_m=512):
    """rational(x @ w + b) -> bf16.  x:(M,K) bf16 ; w:(K,128) bf16 ; b2d:(1,128) f32."""
    M, K = x.shape
    Kw, Np = w.shape
    assert K == Kw, (K, Kw)
    bm, Mp = _choose_m_tiling(M, block_m)
    xp = _pad_rows(x, Mp)
    out = pl.pallas_call(
        _matmul_bias_rational_kernel,
        out_shape=jax.ShapeDtypeStruct((Mp, Np), jnp.bfloat16),
        grid=(Mp // bm,),
        in_specs=[
            _SMEM_SPEC,                                   # (10,) rational coefficients
            pl.BlockSpec((bm, K), lambda i: (i, 0)),      # K left unpadded (full extent)
            pl.BlockSpec((K, Np), lambda i: (0, 0)),
            pl.BlockSpec((1, Np), lambda i: (0, 0)),
        ],
        out_specs=pl.BlockSpec((bm, Np), lambda i: (i, 0)),
        compiler_params=_COMPILER_PARAMS,
    )(coef, xp, w, b2d)
    return out  # (Mp, 128) bf16; pad rows/channels sliced lazily by consumers


def fused_head(x, w1, b1, w2, b2, coef, n_out, block_m=256):
    """fc2(rational(fc1(x))).  x:(M,3136) bf16 ; w1:(3136,512) bf16 ; w2:(512,128) bf16."""
    M, K = x.shape
    N1 = w1.shape[1]
    N2p = w2.shape[1]
    bm, Mp = _choose_m_tiling(M, block_m)   # capped block keeps the (bm,512) f32 h small
    xp = _pad_rows(x, Mp)
    out = pl.pallas_call(
        _head_kernel,
        out_shape=jax.ShapeDtypeStruct((Mp, N2p), jnp.float32),
        grid=(Mp // bm,),
        in_specs=[
            _SMEM_SPEC,
            pl.BlockSpec((bm, K), lambda i: (i, 0)),
            pl.BlockSpec((K, N1), lambda i: (0, 0)),
            pl.BlockSpec((1, N1), lambda i: (0, 0)),
            pl.BlockSpec((N1, N2p), lambda i: (0, 0)),
            pl.BlockSpec((1, N2p), lambda i: (0, 0)),
        ],
        out_specs=pl.BlockSpec((bm, N2p), lambda i: (i, 0)),
        compiler_params=_COMPILER_PARAMS,
    )(coef, xp, w1, b1, w2, b2)
    return out[:M, :n_out]


# ----------------------------------------------------------------------------
# im2col via strided slices (valid conv, square kernel, stride s, NHWC, bf16).
# The channel slice [0:cin] is folded into the same lax.slice, so channel-padded
# inputs (128 lanes, only `cin` real) need no separate copy.
# Patch feature layout is (kh, kw, cin) -> matches the weight transpose below.
# ----------------------------------------------------------------------------
def _im2col(x_nhwc, k, s, cin):
    B, H, W, _ = x_nhwc.shape
    Ho = (H - k) // s + 1
    Wo = (W - k) // s + 1
    cols = []
    for dh in range(k):
        for dw in range(k):
            sl = lax.slice(
                x_nhwc,
                (0, dh, dw, 0),
                (B, dh + (Ho - 1) * s + 1, dw + (Wo - 1) * s + 1, cin),
                (1, s, s, 1),
            )
            cols.append(sl)  # (B, Ho, Wo, cin)
    patches = jnp.concatenate(cols, axis=-1)  # (B, Ho, Wo, k*k*cin)
    return patches.reshape(B * Ho * Wo, k * k * cin), Ho, Wo


def conv_rational(x_nhwc, wm, b2d, coef, k, s, block_m=512):
    # TODO(synk): do the patch extraction inside the Pallas kernel on a VMEM-resident
    # batch tile to remove this XLA-side patch materialization entirely.
    B = x_nhwc.shape[0]
    cin = wm.shape[0] // (k * k)
    patches, Ho, Wo = _im2col(x_nhwc, k, s, cin)
    y = matmul_bias_rational(patches, wm, b2d, coef, block_m=block_m)
    M = B * Ho * Wo
    if y.shape[0] != M:
        y = y[:M]
    # Keep the 128-padded channel dim (lane-dense stores); the next layer slices [0:cin].
    return y.reshape(B, Ho, Wo, y.shape[-1])


# ----------------------------------------------------------------------------
# Parameter init (deterministic; matches PyTorch xavier_uniform_ + default bias init)
# ----------------------------------------------------------------------------
def _xavier_uniform(key, shape, fan_in, fan_out, gain):
    bound = gain * (6.0 / (fan_in + fan_out)) ** 0.5
    return jax.random.uniform(key, shape, jnp.float32, -bound, bound)


def _bias_init(key, shape, fan_in):
    bound = 1.0 / (fan_in ** 0.5)
    return jax.random.uniform(key, shape, jnp.float32, -bound, bound)


def init_params(key, n_input, n_output, n_features=512):
    gain_relu = 2.0 ** 0.5
    ks = jax.random.split(key, 10)
    p = {}
    # Conv2d(n_input, 32, k=8, s=4)
    p["w1"] = _xavier_uniform(ks[0], (32, n_input, 8, 8), n_input * 64, 32 * 64, gain_relu)
    p["b1"] = _bias_init(ks[1], (32,), n_input * 64)
    # Conv2d(32, 64, k=4, s=2)
    p["w2"] = _xavier_uniform(ks[2], (64, 32, 4, 4), 32 * 16, 64 * 16, gain_relu)
    p["b2"] = _bias_init(ks[3], (64,), 32 * 16)
    # Conv2d(64, 64, k=3, s=1)
    p["w3"] = _xavier_uniform(ks[4], (64, 64, 3, 3), 64 * 9, 64 * 9, gain_relu)
    p["b3"] = _bias_init(ks[5], (64,), 64 * 9)
    # Linear(3136, n_features)
    p["w4"] = _xavier_uniform(ks[6], (n_features, 3136), 3136, n_features, gain_relu)
    p["b4"] = _bias_init(ks[7], (n_features,), 3136)
    # Linear(n_features, n_output), gain('linear') == 1
    p["w5"] = _xavier_uniform(ks[8], (n_output, n_features), n_features, n_output, 1.0)
    p["b5"] = _bias_init(ks[9], (n_output,), n_features)
    return p


def prepare_params(params, n_features=512):
    """One-time conversion to matmul-ready layouts: bf16 weights, N padded to 128,
    K left unpadded, biases f32 (1, Np), per-activation rational coeffs as (10,) f32."""

    def pad_n(wm):
        K, N = wm.shape
        Np = _round_up(N, 128)
        return jnp.pad(wm, ((0, 0), (0, Np - N))).astype(jnp.bfloat16)

    def pad_b(b):
        N = b.shape[0]
        Np = _round_up(N, 128)
        return jnp.pad(b, (0, Np - N)).reshape(1, Np).astype(jnp.float32)

    def conv_w(w_oihw):
        cout = w_oihw.shape[0]
        # (Cout,Cin,kh,kw) -> (kh,kw,Cin,Cout), flattened to match the im2col patch layout.
        return jnp.transpose(w_oihw, (2, 3, 1, 0)).reshape(-1, cout)

    prep = {
        "w1": pad_n(conv_w(params["w1"])), "b1": pad_b(params["b1"]),
        "w2": pad_n(conv_w(params["w2"])), "b2": pad_b(params["b2"]),
        "w3": pad_n(conv_w(params["w3"])), "b3": pad_b(params["b3"]),
    }
    # fc1: permute columns from PyTorch's NCHW flatten order (C,H,W) to our NHWC
    # flatten order (H,W,C) so no runtime activation transpose is needed.
    w4 = params["w4"].reshape(n_features, 64, 7, 7)
    w4 = jnp.transpose(w4, (0, 2, 3, 1)).reshape(n_features, 3136)
    prep["w4"] = pad_n(w4.T)               # (3136, 512) bf16 (K unpadded)
    prep["b4"] = pad_b(params["b4"])       # (1, 512)
    prep["w5"] = pad_n(params["w5"].T)     # (512, 128) bf16
    prep["b5"] = pad_b(params["b5"])       # (1, 128)
    # Rational coefficients: per-instance (trainable in PyTorch); default init here.
    coef = jnp.asarray(list(_RAT_NUM) + list(_RAT_DEN), dtype=jnp.float32)  # (10,)
    prep["c1"] = coef
    prep["c2"] = coef
    prep["c3"] = coef
    prep["c4"] = coef
    return prep


# ----------------------------------------------------------------------------
# Forward pass (mirrors RationalNetwork.forward)
# ----------------------------------------------------------------------------
def rational_network_forward(x_nchw, prep, n_output):
    x = jnp.transpose(x_nchw, (0, 2, 3, 1)).astype(jnp.bfloat16)        # NCHW->NHWC + bf16 once
    B = x.shape[0]

    h = conv_rational(x, prep["w1"], prep["b1"], prep["c1"], k=8, s=4)  # (B, 20, 20, 128)
    h = conv_rational(h, prep["w2"], prep["b2"], prep["c2"], k=4, s=2)  # (B,  9,  9, 128)
    h = conv_rational(h, prep["w3"], prep["b3"], prep["c3"], k=3, s=1)  # (B,  7,  7, 128)

    h = h[..., :64].reshape(B, 3136)                                    # real channels, NHWC flatten
    return fused_head(h, prep["w4"], prep["b4"],
                      prep["w5"], prep["b5"], prep["c4"], n_output)     # (B, n_output) f32


if __name__ == "__main__":
    key = jax.random.PRNGKey(0)
    k_params, k_x = jax.random.split(key)

    n_input, n_output = 4, 6                 # input_shape=(4,84,84), output_shape=(6,)
    params = init_params(k_params, n_input, n_output)
    prep = prepare_params(params)

    # Spatial size must be 84x84 so the conv stack yields 64*7*7 = 3136 fc features.
    x = jax.random.normal(k_x, (2, n_input, 84, 84), dtype=jnp.float32)

    fwd = jax.jit(functools.partial(rational_network_forward, n_output=n_output))
    out = jax.block_until_ready(fwd(x, prep))

    assert out.shape == (2, n_output), out.shape
    assert bool(jnp.all(jnp.isfinite(out)))
    print("KERNEL_OK")
</pallas_src>

<mosaic_0001>
module attributes {stable_mosaic.version = 11 : i64} {
  func.func @_matmul_bias_rational_kernel(%arg0: i32, %arg1: memref<10xf32, #tpu.memory_space<smem>>, %arg2: memref<400x256xbf16, #tpu.memory_space<vmem>>, %arg3: memref<256x128xbf16, #tpu.memory_space<vmem>>, %arg4: memref<1x128xf32, #tpu.memory_space<vmem>>, %arg5: memref<400x128xbf16, #tpu.memory_space<vmem>>) attributes {dimension_semantics = [#tpu.dimension_semantics<parallel>], iteration_bounds = array<i64: 2>, scalar_prefetch = 0 : i64, scratch_operands = 0 : i64, tpu.core_type = #tpu.core_type<tc>, window_params = [{transform_indices = @transform_0, window_bounds = array<i64: 10>}, {transform_indices = @transform_1, window_bounds = array<i64: 400, 256>}, {pipeline_mode = #tpu.pipeline_mode<synchronous>, transform_indices = @transform_2, window_bounds = array<i64: 256, 128>}, {pipeline_mode = #tpu.pipeline_mode<synchronous>, transform_indices = @transform_3, window_bounds = array<i64: 1, 128>}, {transform_indices = @transform_4, window_bounds = array<i64: 400, 128>}]} {
    %c0 = arith.constant 0 : index
    %c0_0 = arith.constant 0 : index
    %0 = vector.load %arg2[%c0, %c0_0] : memref<400x256xbf16, #tpu.memory_space<vmem>>, vector<400x256xbf16>
    %c0_1 = arith.constant 0 : index
    %c0_2 = arith.constant 0 : index
    %1 = vector.load %arg3[%c0_1, %c0_2] : memref<256x128xbf16, #tpu.memory_space<vmem>>, vector<256x128xbf16>
    %cst = arith.constant dense<0.000000e+00> : vector<400x128xf32>
    %2 = tpu.matmul %0, %1, %cst {dimension_numbers = #tpu.dot_dimension_numbers<[1], [0], [0], [1], [0, 0, 1, 1], [], []>} : vector<400x256xbf16>, vector<256x128xbf16>, vector<400x128xf32> -> vector<400x128xf32>
    %c0_3 = arith.constant 0 : index
    %c0_4 = arith.constant 0 : index
    %3 = vector.load %arg4[%c0_3, %c0_4] : memref<1x128xf32, #tpu.memory_space<vmem>>, vector<1x128xf32>
    %4 = vector.broadcast %3 : vector<1x128xf32> to vector<400x128xf32>
    %5 = arith.addf %2, %4 : vector<400x128xf32>
    %c0_5 = arith.constant 0 : index
    %6 = memref.load %arg1[%c0_5] : memref<10xf32, #tpu.memory_space<smem>>
    %c1 = arith.constant 1 : index
    %7 = memref.load %arg1[%c1] : memref<10xf32, #tpu.memory_space<smem>>
    %c2 = arith.constant 2 : index
    %8 = memref.load %arg1[%c2] : memref<10xf32, #tpu.memory_space<smem>>
    %c3 = arith.constant 3 : index
    %9 = memref.load %arg1[%c3] : memref<10xf32, #tpu.memory_space<smem>>
    %c4 = arith.constant 4 : index
    %10 = memref.load %arg1[%c4] : memref<10xf32, #tpu.memory_space<smem>>
    %c5 = arith.constant 5 : index
    %11 = memref.load %arg1[%c5] : memref<10xf32, #tpu.memory_space<smem>>
    %c6 = arith.constant 6 : index
    %12 = memref.load %arg1[%c6] : memref<10xf32, #tpu.memory_space<smem>>
    %c7 = arith.constant 7 : index
    %13 = memref.load %arg1[%c7] : memref<10xf32, #tpu.memory_space<smem>>
    %c8 = arith.constant 8 : index
    %14 = memref.load %arg1[%c8] : memref<10xf32, #tpu.memory_space<smem>>
    %c9 = arith.constant 9 : index
    %15 = memref.load %arg1[%c9] : memref<10xf32, #tpu.memory_space<smem>>
    %16 = vector.broadcast %11 : f32 to vector<400x128xf32>
    %17 = arith.mulf %5, %16 : vector<400x128xf32>
    %18 = vector.broadcast %10 : f32 to vector<400x128xf32>
    %19 = arith.addf %17, %18 : vector<400x128xf32>
    %20 = arith.mulf %19, %5 : vector<400x128xf32>
    %21 = vector.broadcast %9 : f32 to vector<400x128xf32>
    %22 = arith.addf %20, %21 : vector<400x128xf32>
    %23 = arith.mulf %22, %5 : vector<400x128xf32>
    %24 = vector.broadcast %8 : f32 to vector<400x128xf32>
    %25 = arith.addf %23, %24 : vector<400x128xf32>
    %26 = arith.mulf %25, %5 : vector<400x128xf32>
    %27 = vector.broadcast %7 : f32 to vector<400x128xf32>
    %28 = arith.addf %26, %27 : vector<400x128xf32>
    %29 = arith.mulf %28, %5 : vector<400x128xf32>
    %30 = vector.broadcast %6 : f32 to vector<400x128xf32>
    %31 = arith.addf %29, %30 : vector<400x128xf32>
    %32 = vector.broadcast %15 : f32 to vector<400x128xf32>
    %33 = arith.mulf %5, %32 : vector<400x128xf32>
    %34 = vector.broadcast %14 : f32 to vector<400x128xf32>
    %35 = arith.addf %33, %34 : vector<400x128xf32>
    %36 = arith.mulf %35, %5 : vector<400x128xf32>
    %37 = vector.broadcast %13 : f32 to vector<400x128xf32>
    %38 = arith.addf %36, %37 : vector<400x128xf32>
    %39 = arith.mulf %38, %5 : vector<400x128xf32>
    %40 = vector.broadcast %12 : f32 to vector<400x128xf32>
    %41 = arith.addf %39, %40 : vector<400x128xf32>
    %42 = arith.mulf %41, %5 : vector<400x128xf32>
    %43 = math.absf %42 : vector<400x128xf32>
    %cst_6 = arith.constant 1.000000e+00 : f32
    %44 = vector.broadcast %cst_6 : f32 to vector<400x128xf32>
    %45 = arith.addf %43, %44 : vector<400x128xf32>
    %46 = tpu.reciprocal %45 {approx = true} : vector<400x128xf32> -> vector<400x128xf32>
    %47 = arith.mulf %31, %46 : vector<400x128xf32>
    %48 = arith.truncf %47 : vector<400x128xf32> to vector<400x128xbf16>
    %c0_7 = arith.constant 0 : index
    %c0_8 = arith.constant 0 : index
    %49 = vector.load %arg5[%c0_7, %c0_8] : memref<400x128xbf16, #tpu.memory_space<vmem>>, vector<400x128xbf16>
    tpu.vector_store %arg5[%c0_7, %c0_8], %48 {strides = array<i32>} : memref<400x128xbf16, #tpu.memory_space<vmem>>, vector<400x128xbf16>,
    return
  }
  func.func @transform_0(%arg0: i32) -> i32 {
    %c0_i32 = arith.constant 0 : i32
    %c0_i32_0 = arith.constant 0 : i32
    return %c0_i32 : i32
  }
  func.func @transform_1(%arg0: i32) -> (i32, i32) {
    %c0_i32 = arith.constant 0 : i32
    %c0_i32_0 = arith.constant 0 : i32
    return %arg0, %c0_i32 : i32, i32
  }
  func.func @transform_2(%arg0: i32) -> (i32, i32) {
    %c0_i32 = arith.constant 0 : i32
    %c0_i32_0 = arith.constant 0 : i32
    %c0_i32_1 = arith.constant 0 : i32
    return %c0_i32, %c0_i32_0 : i32, i32
  }
  func.func @transform_3(%arg0: i32) -> (i32, i32) {
    %c0_i32 = arith.constant 0 : i32
    %c0_i32_0 = arith.constant 0 : i32
    %c0_i32_1 = arith.constant 0 : i32
    return %c0_i32, %c0_i32_0 : i32, i32
  }
  func.func @transform_4(%arg0: i32) -> (i32, i32) {
    %c0_i32 = arith.constant 0 : i32
    %c0_i32_0 = arith.constant 0 : i32
    return %arg0, %c0_i32 : i32, i32
  }
}

module attributes {stable_mosaic.version = 11 : i64} {
  func.func @_matmul_bias_rational_kernel(%arg0: i32, %arg1: memref<10xf32, #tpu.memory_space<smem>>, %arg2: memref<64x512xbf16, #tpu.memory_space<vmem>>, %arg3: memref<512x128xbf16, #tpu.memory_space<vmem>>, %arg4: memref<1x128xf32, #tpu.memory_space<vmem>>, %arg5: memref<64x128xbf16, #tpu.memory_space<vmem>>) attributes {dimension_semantics = [#tpu.dimension_semantics<parallel>], iteration_bounds = array<i64: 3>, scalar_prefetch = 0 : i64, scratch_operands = 0 : i64, tpu.core_type = #tpu.core_type<tc>, window_params = [{transform_indices = @transform_0, window_bounds = array<i64: 10>}, {transform_indices = @transform_1, window_bounds = array<i64: 64, 512>}, {pipeline_mode = #tpu.pipeline_mode<synchronous>, transform_indices = @transform_2, window_bounds = array<i64: 512, 128>}, {pipeline_mode = #tpu.pipeline_mode<synchronous>, transform_indices = @transform_3, window_bounds = array<i64: 1, 128>}, {transform_indices = @transform_4, window_bounds = array<i64: 64, 128>}]} {
    %c0 = arith.constant 0 : index
    %c0_0 = arith.constant 0 : index
    %0 = vector.load %arg2[%c0, %c0_0] : memref<64x512xbf16, #tpu.memory_space<vmem>>, vector<64x512xbf16>
    %c0_1 = arith.constant 0 : index
    %c0_2 = arith.constant 0 : index
    %1 = vector.load %arg3[%c0_1, %c0_2] : memref<512x128xbf16, #tpu.memory_space<vmem>>, vector<512x128xbf16>
    %cst = arith.constant dense<0.000000e+00> : vector<64x128xf32>
    %2 = tpu.matmul %0, %1, %cst {dimension_numbers = #tpu.dot_dimension_numbers<[1], [0], [0], [1], [0, 0, 1, 1], [], []>} : vector<64x512xbf16>, vector<512x128xbf16>, vector<64x128xf32> -> vector<64x128xf32>
    %c0_3 = arith.constant 0 : index
    %c0_4 = arith.constant 0 : index
    %3 = vector.load %arg4[%c0_3, %c0_4] : memref<1x128xf32, #tpu.memory_space<vmem>>, vector<1x128xf32>
    %4 = vector.broadcast %3 : vector<1x128xf32> to vector<64x128xf32>
    %5 = arith.addf %2, %4 : vector<64x128xf32>
    %c0_5 = arith.constant 0 : index
    %6 = memref.load %arg1[%c0_5] : memref<10xf32, #tpu.memory_space<smem>>
    %c1 = arith.constant 1 : index
    %7 = memref.load %arg1[%c1] : memref<10xf32, #tpu.memory_space<smem>>
    %c2 = arith.constant 2 : index
    %8 = memref.load %arg1[%c2] : memref<10xf32, #tpu.memory_space<smem>>
    %c3 = arith.constant 3 : index
    %9 = memref.load %arg1[%c3] : memref<10xf32, #tpu.memory_space<smem>>
    %c4 = arith.constant 4 : index
    %10 = memref.load %arg1[%c4] : memref<10xf32, #tpu.memory_space<smem>>
    %c5 = arith.constant 5 : index
    %11 = memref.load %arg1[%c5] : memref<10xf32, #tpu.memory_space<smem>>
    %c6 = arith.constant 6 : index
    %12 = memref.load %arg1[%c6] : memref<10xf32, #tpu.memory_space<smem>>
    %c7 = arith.constant 7 : index
    %13 = memref.load %arg1[%c7] : memref<10xf32, #tpu.memory_space<smem>>
    %c8 = arith.constant 8 : index
    %14 = memref.load %arg1[%c8] : memref<10xf32, #tpu.memory_space<smem>>
    %c9 = arith.constant 9 : index
    %15 = memref.load %arg1[%c9] : memref<10xf32, #tpu.memory_space<smem>>
    %16 = vector.broadcast %11 : f32 to vector<64x128xf32>
    %17 = arith.mulf %5, %16 : vector<64x128xf32>
    %18 = vector.broadcast %10 : f32 to vector<64x128xf32>
    %19 = arith.addf %17, %18 : vector<64x128xf32>
    %20 = arith.mulf %19, %5 : vector<64x128xf32>
    %21 = vector.broadcast %9 : f32 to vector<64x128xf32>
    %22 = arith.addf %20, %21 : vector<64x128xf32>
    %23 = arith.mulf %22, %5 : vector<64x128xf32>
    %24 = vector.broadcast %8 : f32 to vector<64x128xf32>
    %25 = arith.addf %23, %24 : vector<64x128xf32>
    %26 = arith.mulf %25, %5 : vector<64x128xf32>
    %27 = vector.broadcast %7 : f32 to vector<64x128xf32>
    %28 = arith.addf %26, %27 : vector<64x128xf32>
    %29 = arith.mulf %28, %5 : vector<64x128xf32>
    %30 = vector.broadcast %6 : f32 to vector<64x128xf32>
    %31 = arith.addf %29, %30 : vector<64x128xf32>
    %32 = vector.broadcast %15 : f32 to vector<64x128xf32>
    %33 = arith.mulf %5, %32 : vector<64x128xf32>
    %34 = vector.broadcast %14 : f32 to vector<64x128xf32>
    %35 = arith.addf %33, %34 : vector<64x128xf32>
    %36 = arith.mulf %35, %5 : vector<64x128xf32>
    %37 = vector.broadcast %13 : f32 to vector<64x128xf32>
    %38 = arith.addf %36, %37 : vector<64x128xf32>
    %39 = arith.mulf %38, %5 : vector<64x128xf32>
    %40 = vector.broadcast %12 : f32 to vector<64x128xf32>
    %41 = arith.addf %39, %40 : vector<64x128xf32>
    %42 = arith.mulf %41, %5 : vector<64x128xf32>
    %43 = math.absf %42 : vector<64x128xf32>
    %cst_6 = arith.constant 1.000000e+00 : f32
    %44 = vector.broadcast %cst_6 : f32 to vector<64x128xf32>
    %45 = arith.addf %43, %44 : vector<64x128xf32>
    %46 = tpu.reciprocal %45 {approx = true} : vector<64x128xf32> -> vector<64x128xf32>
    %47 = arith.mulf %31, %46 : vector<64x128xf32>
    %48 = arith.truncf %47 : vector<64x128xf32> to vector<64x128xbf16>
    %c0_7 = arith.constant 0 : index
    %c0_8 = arith.constant 0 : index
    %49 = vector.load %arg5[%c0_7, %c0_8] : memref<64x128xbf16, #tpu.memory_space<vmem>>, vector<64x128xbf16>
    tpu.vector_store %arg5[%c0_7, %c0_8], %48 {strides = array<i32>} : memref<64x128xbf16, #tpu.memory_space<vmem>>, vector<64x128xbf16>,
    return
  }
  func.func @transform_0(%arg0: i32) -> i32 {
    %c0_i32 = arith.constant 0 : i32
    %c0_i32_0 = arith.constant 0 : i32
    return %c0_i32 : i32
  }
  func.func @transform_1(%arg0: i32) -> (i32, i32) {
    %c0_i32 = arith.constant 0 : i32
    %c0_i32_0 = arith.constant 0 : i32
    return %arg0, %c0_i32 : i32, i32
  }
  func.func @transform_2(%arg0: i32) -> (i32, i32) {
    %c0_i32 = arith.constant 0 : i32
    %c0_i32_0 = arith.constant 0 : i32
    %c0_i32_1 = arith.constant 0 : i32
    return %c0_i32, %c0_i32_0 : i32, i32
  }
  func.func @transform_3(%arg0: i32) -> (i32, i32) {
    %c0_i32 = arith.constant 0 : i32
    %c0_i32_0 = arith.constant 0 : i32
    %c0_i32_1 = arith.constant 0 : i32
    return %c0_i32, %c0_i32_0 : i32, i32
  }
  func.func @transform_4(%arg0: i32) -> (i32, i32) {
    %c0_i32 = arith.constant 0 : i32
    %c0_i32_0 = arith.constant 0 : i32
    return %arg0, %c0_i32 : i32, i32
  }
}

module attributes {stable_mosaic.version = 11 : i64} {
  func.func @_matmul_bias_rational_kernel(%arg0: i32, %arg1: memref<10xf32, #tpu.memory_space<smem>>, %arg2: memref<32x576xbf16, #tpu.memory_space<vmem>>, %arg3: memref<576x128xbf16, #tpu.memory_space<vmem>>, %arg4: memref<1x128xf32, #tpu.memory_space<vmem>>, %arg5: memref<32x128xbf16, #tpu.memory_space<vmem>>) attributes {dimension_semantics = [#tpu.dimension_semantics<parallel>], iteration_bounds = array<i64: 4>, scalar_prefetch = 0 : i64, scratch_operands = 0 : i64, tpu.core_type = #tpu.core_type<tc>, window_params = [{transform_indices = @transform_0, window_bounds = array<i64: 10>}, {transform_indices = @transform_1, window_bounds = array<i64: 32, 576>}, {pipeline_mode = #tpu.pipeline_mode<synchronous>, transform_indices = @transform_2, window_bounds = array<i64: 576, 128>}, {pipeline_mode = #tpu.pipeline_mode<synchronous>, transform_indices = @transform_3, window_bounds = array<i64: 1, 128>}, {transform_indices = @transform_4, window_bounds = array<i64: 32, 128>}]} {
    %c0 = arith.constant 0 : index
    %c0_0 = arith.constant 0 : index
    %0 = vector.load %arg2[%c0, %c0_0] : memref<32x576xbf16, #tpu.memory_space<vmem>>, vector<32x576xbf16>
    %c0_1 = arith.constant 0 : index
    %c0_2 = arith.constant 0 : index
    %1 = vector.load %arg3[%c0_1, %c0_2] : memref<576x128xbf16, #tpu.memory_space<vmem>>, vector<576x128xbf16>
    %cst = arith.constant dense<0.000000e+00> : vector<32x128xf32>
    %2 = tpu.matmul %0, %1, %cst {dimension_numbers = #tpu.dot_dimension_numbers<[1], [0], [0], [1], [0, 0, 1, 1], [], []>} : vector<32x576xbf16>, vector<576x128xbf16>, vector<32x128xf32> -> vector<32x128xf32>
    %c0_3 = arith.constant 0 : index
    %c0_4 = arith.constant 0 : index
    %3 = vector.load %arg4[%c0_3, %c0_4] : memref<1x128xf32, #tpu.memory_space<vmem>>, vector<1x128xf32>
    %4 = vector.broadcast %3 : vector<1x128xf32> to vector<32x128xf32>
    %5 = arith.addf %2, %4 : vector<32x128xf32>
    %c0_5 = arith.constant 0 : index
    %6 = memref.load %arg1[%c0_5] : memref<10xf32, #tpu.memory_space<smem>>
    %c1 = arith.constant 1 : index
    %7 = memref.load %arg1[%c1] : memref<10xf32, #tpu.memory_space<smem>>
    %c2 = arith.constant 2 : index
    %8 = memref.load %arg1[%c2] : memref<10xf32, #tpu.memory_space<smem>>
    %c3 = arith.constant 3 : index
    %9 = memref.load %arg1[%c3] : memref<10xf32, #tpu.memory_space<smem>>
    %c4 = arith.constant 4 : index
    %10 = memref.load %arg1[%c4] : memref<10xf32, #tpu.memory_space<smem>>
    %c5 = arith.constant 5 : index
    %11 = memref.load %arg1[%c5] : memref<10xf32, #tpu.memory_space<smem>>
    %c6 = arith.constant 6 : index
    %12 = memref.load %arg1[%c6] : memref<10xf32, #tpu.memory_space<smem>>
    %c7 = arith.constant 7 : index
    %13 = memref.load %arg1[%c7] : memref<10xf32, #tpu.memory_space<smem>>
    %c8 = arith.constant 8 : index
    %14 = memref.load %arg1[%c8] : memref<10xf32, #tpu.memory_space<smem>>
    %c9 = arith.constant 9 : index
    %15 = memref.load %arg1[%c9] : memref<10xf32, #tpu.memory_space<smem>>
    %16 = vector.broadcast %11 : f32 to vector<32x128xf32>
    %17 = arith.mulf %5, %16 : vector<32x128xf32>
    %18 = vector.broadcast %10 : f32 to vector<32x128xf32>
    %19 = arith.addf %17, %18 : vector<32x128xf32>
    %20 = arith.mulf %19, %5 : vector<32x128xf32>
    %21 = vector.broadcast %9 : f32 to vector<32x128xf32>
    %22 = arith.addf %20, %21 : vector<32x128xf32>
    %23 = arith.mulf %22, %5 : vector<32x128xf32>
    %24 = vector.broadcast %8 : f32 to vector<32x128xf32>
    %25 = arith.addf %23, %24 : vector<32x128xf32>
    %26 = arith.mulf %25, %5 : vector<32x128xf32>
    %27 = vector.broadcast %7 : f32 to vector<32x128xf32>
    %28 = arith.addf %26, %27 : vector<32x128xf32>
    %29 = arith.mulf %28, %5 : vector<32x128xf32>
    %30 = vector.broadcast %6 : f32 to vector<32x128xf32>
    %31 = arith.addf %29, %30 : vector<32x128xf32>
    %32 = vector.broadcast %15 : f32 to vector<32x128xf32>
    %33 = arith.mulf %5, %32 : vector<32x128xf32>
    %34 = vector.broadcast %14 : f32 to vector<32x128xf32>
    %35 = arith.addf %33, %34 : vector<32x128xf32>
    %36 = arith.mulf %35, %5 : vector<32x128xf32>
    %37 = vector.broadcast %13 : f32 to vector<32x128xf32>
    %38 = arith.addf %36, %37 : vector<32x128xf32>
    %39 = arith.mulf %38, %5 : vector<32x128xf32>
    %40 = vector.broadcast %12 : f32 to vector<32x128xf32>
    %41 = arith.addf %39, %40 : vector<32x128xf32>
    %42 = arith.mulf %41, %5 : vector<32x128xf32>
    %43 = math.absf %42 : vector<32x128xf32>
    %cst_6 = arith.constant 1.000000e+00 : f32
    %44 = vector.broadcast %cst_6 : f32 to vector<32x128xf32>
    %45 = arith.addf %43, %44 : vector<32x128xf32>
    %46 = tpu.reciprocal %45 {approx = true} : vector<32x128xf32> -> vector<32x128xf32>
    %47 = arith.mulf %31, %46 : vector<32x128xf32>
    %48 = arith.truncf %47 : vector<32x128xf32> to vector<32x128xbf16>
    %c0_7 = arith.constant 0 : index
    %c0_8 = arith.constant 0 : index
    %49 = vector.load %arg5[%c0_7, %c0_8] : memref<32x128xbf16, #tpu.memory_space<vmem>>, vector<32x128xbf16>
    tpu.vector_store %arg5[%c0_7, %c0_8], %48 {strides = array<i32>} : memref<32x128xbf16, #tpu.memory_space<vmem>>, vector<32x128xbf16>,
    return
  }
  func.func @transform_0(%arg0: i32) -> i32 {
    %c0_i32 = arith.constant 0 : i32
    %c0_i32_0 = arith.constant 0 : i32
    return %c0_i32 : i32
  }
  func.func @transform_1(%arg0: i32) -> (i32, i32) {
    %c0_i32 = arith.constant 0 : i32
    %c0_i32_0 = arith.constant 0 : i32
    return %arg0, %c0_i32 : i32, i32
  }
  func.func @transform_2(%arg0: i32) -> (i32, i32) {
    %c0_i32 = arith.constant 0 : i32
    %c0_i32_0 = arith.constant 0 : i32
    %c0_i32_1 = arith.constant 0 : i32
    return %c0_i32, %c0_i32_0 : i32, i32
  }
  func.func @transform_3(%arg0: i32) -> (i32, i32) {
    %c0_i32 = arith.constant 0 : i32
    %c0_i32_0 = arith.constant 0 : i32
    %c0_i32_1 = arith.constant 0 : i32
    return %c0_i32, %c0_i32_0 : i32, i32
  }
  func.func @transform_4(%arg0: i32) -> (i32, i32) {
    %c0_i32 = arith.constant 0 : i32
    %c0_i32_0 = arith.constant 0 : i32
    return %arg0, %c0_i32 : i32, i32
  }
}

module attributes {stable_mosaic.version = 11 : i64} {
  func.func @_head_kernel(%arg0: i32, %arg1: memref<10xf32, #tpu.memory_space<smem>>, %arg2: memref<16x3136xbf16, #tpu.memory_space<vmem>>, %arg3: memref<3136x512xbf16, #tpu.memory_space<vmem>>, %arg4: memref<1x512xf32, #tpu.memory_space<vmem>>, %arg5: memref<512x128xbf16, #tpu.memory_space<vmem>>, %arg6: memref<1x128xf32, #tpu.memory_space<vmem>>, %arg7: memref<16x128xf32, #tpu.memory_space<vmem>>) attributes {dimension_semantics = [#tpu.dimension_semantics<parallel>], iteration_bounds = array<i64: 1>, scalar_prefetch = 0 : i64, scratch_operands = 0 : i64, tpu.core_type = #tpu.core_type<tc>, window_params = [{transform_indices = @transform_0, window_bounds = array<i64: 10>}, {transform_indices = @transform_1, window_bounds = array<i64: 16, 3136>}, {pipeline_mode = #tpu.pipeline_mode<synchronous>, transform_indices = @transform_2, window_bounds = array<i64: 3136, 512>}, {pipeline_mode = #tpu.pipeline_mode<synchronous>, transform_indices = @transform_3, window_bounds = array<i64: 1, 512>}, {pipeline_mode = #tpu.pipeline_mode<synchronous>, transform_indices = @transform_4, window_bounds = array<i64: 512, 128>}, {pipeline_mode = #tpu.pipeline_mode<synchronous>, transform_indices = @transform_5, window_bounds = array<i64: 1, 128>}, {transform_indices = @transform_6, window_bounds = array<i64: 16, 128>}]} {
    %c0 = arith.constant 0 : index
    %c0_0 = arith.constant 0 : index
    %0 = vector.load %arg2[%c0, %c0_0] : memref<16x3136xbf16, #tpu.memory_space<vmem>>, vector<16x3136xbf16>
    %c0_1 = arith.constant 0 : index
    %c0_2 = arith.constant 0 : index
    %1 = vector.load %arg3[%c0_1, %c0_2] : memref<3136x512xbf16, #tpu.memory_space<vmem>>, vector<3136x512xbf16>
    %cst = arith.constant dense<0.000000e+00> : vector<16x512xf32>
    %2 = tpu.matmul %0, %1, %cst {dimension_numbers = #tpu.dot_dimension_numbers<[1], [0], [0], [1], [0, 0, 1, 1], [], []>} : vector<16x3136xbf16>, vector<3136x512xbf16>, vector<16x512xf32> -> vector<16x512xf32>
    %c0_3 = arith.constant 0 : index
    %c0_4 = arith.constant 0 : index
    %3 = vector.load %arg4[%c0_3, %c0_4] : memref<1x512xf32, #tpu.memory_space<vmem>>, vector<1x512xf32>
    %4 = vector.broadcast %3 : vector<1x512xf32> to vector<16x512xf32>
    %5 = arith.addf %2, %4 : vector<16x512xf32>
    %c0_5 = arith.constant 0 : index
    %6 = memref.load %arg1[%c0_5] : memref<10xf32, #tpu.memory_space<smem>>
    %c1 = arith.constant 1 : index
    %7 = memref.load %arg1[%c1] : memref<10xf32, #tpu.memory_space<smem>>
    %c2 = arith.constant 2 : index
    %8 = memref.load %arg1[%c2] : memref<10xf32, #tpu.memory_space<smem>>
    %c3 = arith.constant 3 : index
    %9 = memref.load %arg1[%c3] : memref<10xf32, #tpu.memory_space<smem>>
    %c4 = arith.constant 4 : index
    %10 = memref.load %arg1[%c4] : memref<10xf32, #tpu.memory_space<smem>>
    %c5 = arith.constant 5 : index
    %11 = memref.load %arg1[%c5] : memref<10xf32, #tpu.memory_space<smem>>
    %c6 = arith.constant 6 : index
    %12 = memref.load %arg1[%c6] : memref<10xf32, #tpu.memory_space<smem>>
    %c7 = arith.constant 7 : index
    %13 = memref.load %arg1[%c7] : memref<10xf32, #tpu.memory_space<smem>>
    %c8 = arith.constant 8 : index
    %14 = memref.load %arg1[%c8] : memref<10xf32, #tpu.memory_space<smem>>
    %c9 = arith.constant 9 : index
    %15 = memref.load %arg1[%c9] : memref<10xf32, #tpu.memory_space<smem>>
    %16 = vector.broadcast %11 : f32 to vector<16x512xf32>
    %17 = arith.mulf %5, %16 : vector<16x512xf32>
    %18 = vector.broadcast %10 : f32 to vector<16x512xf32>
    %19 = arith.addf %17, %18 : vector<16x512xf32>
    %20 = arith.mulf %19, %5 : vector<16x512xf32>
    %21 = vector.broadcast %9 : f32 to vector<16x512xf32>
    %22 = arith.addf %20, %21 : vector<16x512xf32>
    %23 = arith.mulf %22, %5 : vector<16x512xf32>
    %24 = vector.broadcast %8 : f32 to vector<16x512xf32>
    %25 = arith.addf %23, %24 : vector<16x512xf32>
    %26 = arith.mulf %25, %5 : vector<16x512xf32>
    %27 = vector.broadcast %7 : f32 to vector<16x512xf32>
    %28 = arith.addf %26, %27 : vector<16x512xf32>
    %29 = arith.mulf %28, %5 : vector<16x512xf32>
    %30 = vector.broadcast %6 : f32 to vector<16x512xf32>
    %31 = arith.addf %29, %30 : vector<16x512xf32>
    %32 = vector.broadcast %15 : f32 to vector<16x512xf32>
    %33 = arith.mulf %5, %32 : vector<16x512xf32>
    %34 = vector.broadcast %14 : f32 to vector<16x512xf32>
    %35 = arith.addf %33, %34 : vector<16x512xf32>
    %36 = arith.mulf %35, %5 : vector<16x512xf32>
    %37 = vector.broadcast %13 : f32 to vector<16x512xf32>
    %38 = arith.addf %36, %37 : vector<16x512xf32>
    %39 = arith.mulf %38, %5 : vector<16x512xf32>
    %40 = vector.broadcast %12 : f32 to vector<16x512xf32>
    %41 = arith.addf %39, %40 : vector<16x512xf32>
    %42 = arith.mulf %41, %5 : vector<16x512xf32>
    %43 = math.absf %42 : vector<16x512xf32>
    %cst_6 = arith.constant 1.000000e+00 : f32
    %44 = vector.broadcast %cst_6 : f32 to vector<16x512xf32>
    %45 = arith.addf %43, %44 : vector<16x512xf32>
    %46 = tpu.reciprocal %45 {approx = true} : vector<16x512xf32> -> vector<16x512xf32>
    %47 = arith.mulf %31, %46 : vector<16x512xf32>
    %48 = arith.truncf %47 : vector<16x512xf32> to vector<16x512xbf16>
    %c0_7 = arith.constant 0 : index
    %c0_8 = arith.constant 0 : index
    %49 = vector.load %arg5[%c0_7, %c0_8] : memref<512x128xbf16, #tpu.memory_space<vmem>>, vector<512x128xbf16>
    %cst_9 = arith.constant dense<0.000000e+00> : vector<16x128xf32>
    %50 = tpu.matmul %48, %49, %cst_9 {dimension_numbers = #tpu.dot_dimension_numbers<[1], [0], [0], [1], [0, 0, 1, 1], [], []>} : vector<16x512xbf16>, vector<512x128xbf16>, vector<16x128xf32> -> vector<16x128xf32>
    %c0_10 = arith.constant 0 : index
    %c0_11 = arith.constant 0 : index
    %51 = vector.load %arg6[%c0_10, %c0_11] : memref<1x128xf32, #tpu.memory_space<vmem>>, vector<1x128xf32>
    %52 = vector.broadcast %51 : vector<1x128xf32> to vector<16x128xf32>
    %53 = arith.addf %50, %52 : vector<16x128xf32>
    %c0_12 = arith.constant 0 : index
    %c0_13 = arith.constant 0 : index
    %54 = vector.load %arg7[%c0_12, %c0_13] : memref<16x128xf32, #tpu.memory_space<vmem>>, vector<16x128xf32>
    tpu.vector_store %arg7[%c0_12, %c0_13], %53 {strides = array<i32>} : memref<16x128xf32, #tpu.memory_space<vmem>>, vector<16x128xf32>,
    return
  }
  func.func @transform_0(%arg0: i32) -> i32 {
    %c0_i32 = arith.constant 0 : i32
    %c0_i32_0 = arith.constant 0 : i32
    return %c0_i32 : i32
  }
  func.func @transform_1(%arg0: i32) -> (i32, i32) {
    %c0_i32 = arith.constant 0 : i32
    %c0_i32_0 = arith.constant 0 : i32
    return %arg0, %c0_i32 : i32, i32
  }
  func.func @transform_2(%arg0: i32) -> (i32, i32) {
    %c0_i32 = arith.constant 0 : i32
    %c0_i32_0 = arith.constant 0 : i32
    %c0_i32_1 = arith.constant 0 : i32
    return %c0_i32, %c0_i32_0 : i32, i32
  }
  func.func @transform_3(%arg0: i32) -> (i32, i32) {
    %c0_i32 = arith.constant 0 : i32
    %c0_i32_0 = arith.constant 0 : i32
    %c0_i32_1 = arith.constant 0 : i32
    return %c0_i32, %c0_i32_0 : i32, i32
  }
  func.func @transform_4(%arg0: i32) -> (i32, i32) {
    %c0_i32 = arith.constant 0 : i32
    %c0_i32_0 = arith.constant 0 : i32
    %c0_i32_1 = arith.constant 0 : i32
    return %c0_i32, %c0_i32_0 : i32, i32
  }
  func.func @transform_5(%arg0: i32) -> (i32, i32) {
    %c0_i32 = arith.constant 0 : i32
    %c0_i32_0 = arith.constant 0 : i32
    %c0_i32_1 = arith.constant 0 : i32
    return %c0_i32, %c0_i32_0 : i32, i32
  }
  func.func @transform_6(%arg0: i32) -> (i32, i32) {
    %c0_i32 = arith.constant 0 : i32
    %c0_i32_0 = arith.constant 0 : i32
    return %arg0, %c0_i32 : i32, i32
  }
}

</mosaic_0001>

<bundles_post_ra>
// kernel: rational_network_forward.4
= control target key start
LH: loop header
LB: loop body
LE: loop exit
PB: predicated region body
PF: predicated region fallthrough
CT: control target
= control target key end

     0   :  { %9 = vsyncpa [#allocation3], 0  ;;  %s2912_s15 = smov 0   ;;  %s4431_s0 = inlined_call_operand.vmem [shape: f32[10], index: 0, kind: input, shape index: {}]   ;;  %s4432_s1 = inlined_call_operand.vmem [shape: bf16[800,256], index: 1, kind: input, shape index: {}]   ;;  %s4433_s2 = inlined_call_operand.vmem [shape: bf16[256,128], index: 2, kind: input, shape index: {}]   ;;  %s4434_s3 = inlined_call_operand.vmem [shape: f32[1,128], index: 3, kind: input, shape index: {}]   ;;  %s4435_s4 = inlined_call_operand.vmem [shape: bf16[800,128], index: 4, kind: output, shape index: {}]  }
   0x1 LB: > { %s2275_s16 = sadd.s32 4294967295, %s2883_s15   ;;  %p2277_p0 = scmp.ge.s32.totalorder %s2883_s15, 1  ;;  %s2883_s15 = sphi %s2912_s15, %s15_s15  }
   0x2   : > { %p135_p1 = scmp.lt.s32.totalorder %s2883_s15, 3  ;;  %s148_s19 = sshll.u32 %s4431_s0, 4  ;;  %s149_s19 = int_to_ptr.vmem [resolvable:$true] %s148_s19 }
   0x3   : > { %p2927_p3 = scmp.eq.s32.totalorder %s2275_s16, 0  ;;  %s2858_s22 = scalar_lea.vmem %s149_s19, 16 }
   0x4   : > { %p2923_p2 = pnand %p2277_p0, %p135_p1  ;;  %p2859_p6 = scmp.ne.s32.totalorder %s149_s19, %s2858_s22 }
   0x5   : > { %p2866_p10 = scmp.lt.s32.totalorder %s149_s19, %s149_s19  ;;  %p2867_p11 = scmp.lt.s32.totalorder %s2858_s22, %s2858_s22 }
   0x6   : > { %p2649_p4 = pneg %p2923_p2 }
   0x7   : > { %p2868_p12 = por %p2867_p11, %p2866_p10 }
   0x8   : > { %p2650_p5 = pnand %p2927_p3, %p2649_p4 }
   0xa   : > { %p2860_p7 = pneg %p2650_p5 }
   0xc   : > { %p2861_p8 = pnand %p2860_p7, %p2859_p6 }
   0xe   : > { %p2862_p9 = pneg %p2861_p8 }
  0x10   : > { %p2869_p13 = pnand %p2868_p12, %p2862_p9 }
  0x12   : > { %2872 = shalt.err (!%p2869_p13)
}
  0x13   : > { %s2885_s23 = smov [#allocation2]   ;;  %177 = sbr.rel (%p2923_p2) target bundleno = 590 (0x24e), region = 36 }
  0x14   : > { %2652 = dma.vmem_to_smem (!%p2650_p5), %s149_s19, 16, %s2885_s23, [#allocation3]  }
  0x18   : > { %2878 = dma.done.wait (%p2927_p3), [#allocation3], 16  }
  0x19   : > { %2880 = vsyncadd (%p2927_p3), [#allocation3], 4294967280 }
  0x1a   : > { %183 = sfence }
  0x1b   : > { %v2665_v0 = vld [vmem:[%s4433_s2 + $0x38] sm:$0xff]   ;;  %v2886_v1 = vmov 0   ;;  %s205_s26 = smul.u32 50, %s2275_s16  ;;  %v2666_v2 = vld [vmem:[%s4433_s2 + $0x30] sm:$0xff]   ;;  %v2667_v3 = vld [vmem:[%s4433_s2 + $0x28] sm:$0xff]   ;;  %s2356_s11 = sld [smem:[#allocation2 + $0x5]] }
  0x1c   : > { %654 = vmatprep.subr.bf16.mxu0 %v2886_v1  ;;  %2613 = vmatprep.subr.bf16.mxu1 %v2886_v1  ;;  %v2668_v4 = vld [vmem:[%s4433_s2 + $0x20] sm:$0xff]   ;;  %v2669_v5 = vld [vmem:[%s4433_s2 + $0x18] sm:$0xff]   ;;  %v2670_v7 = vld [vmem:[%s4433_s2 + $0x10] sm:$0xff]   ;;  %s2360_s13 = sld [smem:[#allocation2 + $0x9]] }
  0x1d   : > { %655 = vmatpush1.bf16.msra.mxu0 %v2665_v0  ;;  %2629 = vmatpush1.bf16.msra.mxu1 %v2665_v0  ;;  %p206_p0 = scmp.lt.s32.totalorder %s205_s26, 99  ;;  %v2671_v9 = vld [vmem:[%s4433_s2 + $0x8] sm:$0xff]   ;;  %v2672_v10 = vld [vmem:[%s4433_s2] sm:$0xff]   ;;  %v2673_v11 = vld [vmem:[%s4433_s2 + $0x78] sm:$0xff]   ;;  %s2355_s14 = sld [smem:[#allocation2 + $0x4]] }
  0x1e   : > { %656 = vmatprep.subr.bf16.mxu0 %v2886_v1  ;;  %2614 = vmatprep.subr.bf16.mxu1 %v2886_v1  ;;  %v2674_v12 = vld [vmem:[%s4433_s2 + $0x70] sm:$0xff]   ;;  %v2675_v13 = vld [vmem:[%s4433_s2 + $0x68] sm:$0xff]   ;;  %v2676_v14 = vld [vmem:[%s4433_s2 + $0x60] sm:$0xff]   ;;  %s2359_s16 = sld [smem:[#allocation2 + $0x8]] }
  0x1f   : > { %s4439_s26 = smov (!%p206_p0, %s205_s26), 99  ;;  %v2677_v15 = vld [vmem:[%s4433_s2 + $0x58] sm:$0xff]   ;;  %v2678_v16 = vld [vmem:[%s4433_s2 + $0x50] sm:$0xff]   ;;  %v2679_v17 = vld [vmem:[%s4433_s2 + $0x48] sm:$0xff]   ;;  %s2353_s17 = sld [smem:[#allocation2 + $0x2]] }
  0x20   : > { %s2413_s7 = sshll.u32 %s4439_s26, 3  ;;  %v2680_v18 = vld [vmem:[%s4433_s2 + $0x40] sm:$0xff]   ;;  %s2354_s18 = sld [smem:[#allocation2 + $0x3]] }
  0x21   : > { %657 = vmatpush1.bf16.msra.mxu0 %v2666_v2  ;;  %2630 = vmatpush1.bf16.msra.mxu1 %v2666_v2  ;;  %s2970_s12 = scalar_lea.vmem %s4432_s1, %s2413_s7  ;;  %s2357_s19 = sld [smem:[#allocation2 + $0x6]] }
  0x22   : > { %658 = vmatprep.subr.bf16.mxu0 %v2886_v1  ;;  %2615 = vmatprep.subr.bf16.mxu1 %v2886_v1  ;;  %v2683_v6 = vld [vmem:[%s2970_s12 + $0x4] ss:$8 sps:$4 sm:$0xff]   ;;  %v2686_v8 = vld [vmem:[%s2970_s12 + $0xd4] ss:$8 sps:$4 sm:$0xff]   ;;  %v2681_v19 = vld [vmem:[%s2970_s12] ss:$8 sps:$4 sm:$0xff]  }
  0x23   : > { %686 = vmatprep.mubr.bf16.mxu0 %v2683_v6  ;;  %790 = vmatprep.mubr.bf16.mxu1 %v2686_v8  ;;  %v2684_v20 = vld [vmem:[%s2970_s12 + $0xd0] ss:$8 sps:$4 sm:$0xff]   ;;  %v2687_v21 = vld [vmem:[%s2970_s12 + $0x14] ss:$8 sps:$4 sm:$0xff]   ;;  %v2689_v22 = vld [vmem:[%s2970_s12 + $0xe4] ss:$8 sps:$4 sm:$0xff]   ;;  %v3086_v6 = vstv %s2360_s13 }
  0x24   : > { %v2691_v23 = vld [vmem:[%s2970_s12 + $0x10] ss:$8 sps:$4 sm:$0xff]   ;;  %v2692_v24 = vld [vmem:[%s2970_s12 + $0xe0] ss:$8 sps:$4 sm:$0xff]   ;;  %v2693_v25 = vld [vmem:[%s2970_s12 + $0x24] ss:$8 sps:$4 sm:$0xff]  }
  0x25   : > { %659 = vmatpush1.bf16.msra.mxu0 %v2667_v3  ;;  %2631 = vmatpush1.bf16.msra.mxu1 %v2667_v3  ;;  %v2695_v26 = vld [vmem:[%s2970_s12 + $0xf4] ss:$8 sps:$4 sm:$0xff]   ;;  %v2697_v27 = vld [vmem:[%s2970_s12 + $0x20] ss:$8 sps:$4 sm:$0xff]   ;;  %v2698_v28 = vld [vmem:[%s2970_s12 + $0xf0] ss:$8 sps:$4 sm:$0xff]  }
  0x26   : > { %660 = vmatprep.subr.bf16.mxu0 %v2886_v1  ;;  %2616 = vmatprep.subr.bf16.mxu1 %v2886_v1  ;;  %v2699_v29 = vld [vmem:[%s2970_s12 + $0x34] ss:$8 sps:$4 sm:$0xff]   ;;  %v2701_v30 = vld [vmem:[%s2970_s12 + $0x104] ss:$8 sps:$4 sm:$0xff]   ;;  %v2703_v31 = vld [vmem:[%s2970_s12 + $0x30] ss:$8 sps:$4 sm:$0xff]  }
  0x27   : > { %v2704_v32 = vld [vmem:[%s2970_s12 + $0x100] ss:$8 sps:$4 sm:$0xff]   ;;  %v2705_v33 = vld [vmem:[%s2970_s12 + $0x44] ss:$8 sps:$4 sm:$0xff]   ;;  %v2707_v34 = vld [vmem:[%s2970_s12 + $0x114] ss:$8 sps:$4 sm:$0xff]  }
  0x28   : > { %v2709_v35 = vld [vmem:[%s2970_s12 + $0x40] ss:$8 sps:$4 sm:$0xff]   ;;  %v2710_v36 = vld [vmem:[%s2970_s12 + $0x110] ss:$8 sps:$4 sm:$0xff]   ;;  %v2711_v37 = vld [vmem:[%s2970_s12 + $0x54] ss:$8 sps:$4 sm:$0xff]  }
  0x29   : > { %661 = vmatpush1.bf16.msra.mxu0 %v2668_v4  ;;  %2632 = vmatpush1.bf16.msra.mxu1 %v2668_v4  ;;  %v2713_v38 = vld [vmem:[%s2970_s12 + $0x124] ss:$8 sps:$4 sm:$0xff]   ;;  %v2715_v39 = vld [vmem:[%s2970_s12 + $0x50] ss:$8 sps:$4 sm:$0xff]   ;;  %v2716_v40 = vld [vmem:[%s2970_s12 + $0x120] ss:$8 sps:$4 sm:$0xff]  }
  0x2a   : > { %662 = vmatprep.subr.bf16.mxu0 %v2886_v1  ;;  %2617 = vmatprep.subr.bf16.mxu1 %v2886_v1  ;;  %v2717_v41 = vld [vmem:[%s2970_s12 + $0x64] ss:$8 sps:$4 sm:$0xff]   ;;  %v2719_v42 = vld [vmem:[%s2970_s12 + $0x134] ss:$8 sps:$4 sm:$0xff]   ;;  %v2721_v43 = vld [vmem:[%s2970_s12 + $0x60] ss:$8 sps:$4 sm:$0xff]  }
  0x2b   : > { %v2722_v44 = vld [vmem:[%s2970_s12 + $0x130] ss:$8 sps:$4 sm:$0xff]   ;;  %v2723_v45 = vld [vmem:[%s2970_s12 + $0x74] ss:$8 sps:$4 sm:$0xff]   ;;  %v2725_v46 = vld [vmem:[%s2970_s12 + $0x144] ss:$8 sps:$4 sm:$0xff]  }
  0x2c   : > { %v2727_v47 = vld [vmem:[%s2970_s12 + $0x70] ss:$8 sps:$4 sm:$0xff]   ;;  %v2728_v48 = vld [vmem:[%s2970_s12 + $0x140] ss:$8 sps:$4 sm:$0xff]   ;;  %v2729_v49 = vld [vmem:[%s2970_s12 + $0x84] ss:$8 sps:$4 sm:$0xff]  }
  0x2d   : > { %663 = vmatpush1.bf16.msra.mxu0 %v2669_v5  ;;  %2633 = vmatpush1.bf16.msra.mxu1 %v2669_v5  ;;  %v2731_v50 = vld [vmem:[%s2970_s12 + $0x154] ss:$8 sps:$4 sm:$0xff]   ;;  %v2733_v51 = vld [vmem:[%s2970_s12 + $0x80] ss:$8 sps:$4 sm:$0xff]   ;;  %v2734_v52 = vld [vmem:[%s2970_s12 + $0x150] ss:$8 sps:$4 sm:$0xff]   ;;  %v3084_v5 = vstv %s2356_s11 }
  0x2e   : > { %664 = vmatprep.subr.bf16.mxu0 %v2886_v1  ;;  %2618 = vmatprep.subr.bf16.mxu1 %v2886_v1  ;;  %v2735_v53 = vld [vmem:[%s2970_s12 + $0x94] ss:$8 sps:$4 sm:$0xff]   ;;  %v2737_v54 = vld [vmem:[%s2970_s12 + $0x164] ss:$8 sps:$4 sm:$0xff]   ;;  %v2739_v55 = vld [vmem:[%s2970_s12 + $0x90] ss:$8 sps:$4 sm:$0xff]  }
  0x2f   : > { %v2740_v56 = vld [vmem:[%s2970_s12 + $0x160] ss:$8 sps:$4 sm:$0xff]   ;;  %v2741_v57 = vld [vmem:[%s2970_s12 + $0xa4] ss:$8 sps:$4 sm:$0xff]   ;;  %v2743_v58 = vld [vmem:[%s2970_s12 + $0x174] ss:$8 sps:$4 sm:$0xff]  }
  0x30   : > { %v2745_v59 = vld [vmem:[%s2970_s12 + $0xa0] ss:$8 sps:$4 sm:$0xff]   ;;  %v2746_v60 = vld [vmem:[%s2970_s12 + $0x170] ss:$8 sps:$4 sm:$0xff]   ;;  %v2747_v61 = vld [vmem:[%s2970_s12 + $0xb4] ss:$8 sps:$4 sm:$0xff]  }
  0x31   : > { %665 = vmatpush1.bf16.msra.mxu0 %v2670_v7  ;;  %2634 = vmatpush1.bf16.msra.mxu1 %v2670_v7  ;;  %v2749_v62 = vld [vmem:[%s2970_s12 + $0x184] ss:$8 sps:$4 sm:$0xff]   ;;  %v2751_v63 = vld [vmem:[%s2970_s12 + $0xb0] ss:$8 sps:$4 sm:$0xff]   ;;  %v2752_v0 = vld [vmem:[%s2970_s12 + $0x180] ss:$8 sps:$4 sm:$0xff]  }
  0x32   : > { %666 = vmatprep.subr.bf16.mxu0 %v2886_v1  ;;  %2619 = vmatprep.subr.bf16.mxu1 %v2886_v1  ;;  %v2755_v2 = vld [vmem:[%s2970_s12 + $0xc0] ss:$8 sps:$4 sm:$0xff]   ;;  %s2358_s20 = sld [smem:[#allocation2 + $0x7]] }
  0x33   : > { %s887_s21 = sld [smem:[#allocation2]]  ;;  %v3082_v3 = vld [vmem:[%s4434_s3] ss:$0 sm:$0xff] }
  0x34   : > { %s2352_s24 = sld [smem:[#allocation2 + $0x1]] }
  0x35   : > { %667 = vmatpush1.bf16.msra.mxu0 %v2671_v9  ;;  %2635 = vmatpush1.bf16.msra.mxu1 %v2671_v9 }
  0x36   : > { %668 = vmatprep.subr.bf16.mxu0 %v2886_v1  ;;  %2620 = vmatprep.subr.bf16.mxu1 %v2886_v1 }
  0x39   : > { %669 = vmatpush1.bf16.msra.mxu0 %v2672_v10  ;;  %2636 = vmatpush1.bf16.msra.mxu1 %v2672_v10  ;;  %v3094_v10 = vstv %s2355_s14 }
  0x3a   : > { %670 = vmatprep.subr.bf16.mxu0 %v2886_v1  ;;  %2621 = vmatprep.subr.bf16.mxu1 %v2886_v1 }
  0x3d   : > { %671 = vmatpush2.bf16.msra.mxu0 %v2673_v11  ;;  %2637 = vmatpush2.bf16.msra.mxu1 %v2673_v11  ;;  %v3096_v11 = vstv %s2359_s16 }
  0x3e   : > { %672 = vmatprep.subr.bf16.mxu0 %v2886_v1  ;;  %2622 = vmatprep.subr.bf16.mxu1 %v2886_v1 }
  0x41   : > { %673 = vmatpush2.bf16.msra.mxu0 %v2674_v12  ;;  %2638 = vmatpush2.bf16.msra.mxu1 %v2674_v12 }
  0x42   : > { %674 = vmatprep.subr.bf16.mxu0 %v2886_v1  ;;  %2623 = vmatprep.subr.bf16.mxu1 %v2886_v1 }
  0x45   : > { %675 = vmatpush2.bf16.msra.mxu0 %v2675_v13  ;;  %2639 = vmatpush2.bf16.msra.mxu1 %v2675_v13 }
  0x46   : > { %676 = vmatprep.subr.bf16.mxu0 %v2886_v1  ;;  %2624 = vmatprep.subr.bf16.mxu1 %v2886_v1 }
  0x49   : > { %677 = vmatpush2.bf16.msra.mxu0 %v2676_v14  ;;  %2640 = vmatpush2.bf16.msra.mxu1 %v2676_v14 }
  0x4a   : > { %678 = vmatprep.subr.bf16.mxu0 %v2886_v1  ;;  %2625 = vmatprep.subr.bf16.mxu1 %v2886_v1 }
  0x4d   : > { %679 = vmatpush2.bf16.msra.mxu0 %v2677_v15  ;;  %2641 = vmatpush2.bf16.msra.mxu1 %v2677_v15 }
  0x4e   : > { %680 = vmatprep.subr.bf16.mxu0 %v2886_v1  ;;  %2626 = vmatprep.subr.bf16.mxu1 %v2886_v1 }
  0x51   : > { %681 = vmatpush2.bf16.msra.mxu0 %v2678_v16  ;;  %2642 = vmatpush2.bf16.msra.mxu1 %v2678_v16 }
  0x52   : > { %682 = vmatprep.subr.bf16.mxu0 %v2886_v1  ;;  %2627 = vmatprep.subr.bf16.mxu1 %v2886_v1 }
  0x55   : > { %683 = vmatpush2.bf16.msra.mxu0 %v2679_v17  ;;  %2643 = vmatpush2.bf16.msra.mxu1 %v2679_v17 }
  0x56   : > { %684 = vmatprep.subr.bf16.mxu0 %v2886_v1  ;;  %2628 = vmatprep.subr.bf16.mxu1 %v2886_v1  ;;  %v2753_v1 = vld [vmem:[%s2970_s12 + $0xc4] ss:$8 sps:$4 sm:$0xff]   ;;  %s2284_s12 = sshll.u32 %s4439_s26, 2 }
  0x57   : > { %s3321_s27 = scalar_lea.vmem %s4435_s4, %s2284_s12 }
  0x59   : > { %685 = vmatpush2.bf16.msra.mxu0 %v2680_v18  ;;  %2644 = vmatpush2.bf16.msra.mxu1 %v2680_v18  ;;  %v3106_v18 = vstv %s2354_s18 }
  0x5c   : > { %687 = vmatmul.mubr.bf16.vlgmr.msra.gmra.mxu0 %v2681_v19  ;;  %791 = vmatmul.mubr.bf16.vlgmr.msra.gmra.mxu1 %v2684_v20  ;;  %v3108_v19 = vstv %s2353_s17  ;;  %v3110_v20 = vstv %s2358_s20 }
  0x5d   : > { %694 = vmatprep.mubr.bf16.mxu0 %v2687_v21  ;;  %798 = vmatprep.mubr.bf16.mxu1 %v2689_v22  ;;  %v3112_v21 = vstv %s2357_s19 }
  0x64   : > { %695 = vmatmul.mubr.bf16.gmra.mxu0 %v2691_v23  ;;  %799 = vmatmul.mubr.bf16.gmra.mxu1 %v2692_v24 }
  0x65   : > { %702 = vmatprep.mubr.bf16.mxu0 %v2693_v25  ;;  %806 = vmatprep.mubr.bf16.mxu1 %v2695_v26 }
  0x6c   : > { %703 = vmatmul.mubr.bf16.gmra.mxu0 %v2697_v27  ;;  %807 = vmatmul.mubr.bf16.gmra.mxu1 %v2698_v28  ;;  %v3118_v28 = vstv %s2352_s24 }
  0x6d   : > { %710 = vmatprep.mubr.bf16.mxu0 %v2699_v29  ;;  %814 = vmatprep.mubr.bf16.mxu1 %v2701_v30  ;;  %v3120_v29 = vstv %s887_s21 }
  0x74   : > { %711 = vmatmul.mubr.bf16.gmra.mxu0 %v2703_v31  ;;  %815 = vmatmul.mubr.bf16.gmra.mxu1 %v2704_v32 }
  0x75   : > { %718 = vmatprep.mubr.bf16.mxu0 %v2705_v33  ;;  %822 = vmatprep.mubr.bf16.mxu1 %v2707_v34 }
  0x7c   : > { %719 = vmatmul.mubr.bf16.gmra.mxu0 %v2709_v35  ;;  %823 = vmatmul.mubr.bf16.gmra.mxu1 %v2710_v36 }
  0x7d   : > { %726 = vmatprep.mubr.bf16.mxu0 %v2711_v37  ;;  %830 = vmatprep.mubr.bf16.mxu1 %v2713_v38 }
  0x84   : > { %727 = vmatmul.mubr.bf16.gmra.mxu0 %v2715_v39  ;;  %831 = vmatmul.mubr.bf16.gmra.mxu1 %v2716_v40 }
  0x85   : > { %734 = vmatprep.mubr.bf16.mxu0 %v2717_v41  ;;  %838 = vmatprep.mubr.bf16.mxu1 %v2719_v42 }
  0x8c   : > { %735 = vmatmul.mubr.bf16.gmra.mxu0 %v2721_v43  ;;  %839 = vmatmul.mubr.bf16.gmra.mxu1 %v2722_v44 }
  0x8d   : > { %742 = vmatprep.mubr.bf16.mxu0 %v2723_v45  ;;  %846 = vmatprep.mubr.bf16.mxu1 %v2725_v46 }
  0x94   : > { %743 = vmatmul.mubr.bf16.gmra.mxu0 %v2727_v47  ;;  %847 = vmatmul.mubr.bf16.gmra.mxu1 %v2728_v48 }
  0x95   : > { %750 = vmatprep.mubr.bf16.mxu0 %v2729_v49  ;;  %854 = vmatprep.mubr.bf16.mxu1 %v2731_v50 }
  0x9c   : > { %751 = vmatmul.mubr.bf16.gmra.mxu0 %v2733_v51  ;;  %855 = vmatmul.mubr.bf16.gmra.mxu1 %v2734_v52 }
  0x9d   : > { %758 = vmatprep.mubr.bf16.mxu0 %v2735_v53  ;;  %862 = vmatprep.mubr.bf16.mxu1 %v2737_v54 }
  0xa4   : > { %759 = vmatmul.mubr.bf16.gmra.mxu0 %v2739_v55  ;;  %863 = vmatmul.mubr.bf16.gmra.mxu1 %v2740_v56 }
  0xa5   : > { %766 = vmatprep.mubr.bf16.mxu0 %v2741_v57  ;;  %870 = vmatprep.mubr.bf16.mxu1 %v2743_v58 }
  0xac   : > { %767 = vmatmul.mubr.bf16.gmra.mxu0 %v2745_v59  ;;  %871 = vmatmul.mubr.bf16.gmra.mxu1 %v2746_v60 }
  0xad   : > { %774 = vmatprep.mubr.bf16.mxu0 %v2747_v61  ;;  %878 = vmatprep.mubr.bf16.mxu1 %v2749_v62 }
  0xb4   : > { %775 = vmatmul.mubr.bf16.gmra.mxu0 %v2751_v63  ;;  %879 = vmatmul.mubr.bf16.gmra.mxu1 %v2752_v0 }
  0xb5   : > { %782 = vmatprep.mubr.bf16.mxu0 %v2753_v1 }
  0xbc   : > { %783 = vmatmul.mubr.bf16.gmra.mxu0 %v2755_v2 }
 0x11c   : > { %v688_v4 = vpop.f32.mrf.mxu0  ;;  %v792_v7 = vpop.f32.mrf.mxu1 }
 0x11d   : > { %v3089_v8 = vadd.f32 %v3082_v3, %v688_v4  ;;  %v3092_v9 = vadd.f32 %v3082_v3, %v792_v7 }
 0x11e   : > { %v690_v12 = vpop.f32.mrf.mxu0  ;;  %v794_v13 = vpop.f32.mrf.mxu1 }
 0x11f   : > { %v898_v14 = vmul.f32 %v3084_v5, %v3089_v8  ;;  %v1404_v15 = vmul.f32 %v3086_v6, %v3089_v8  ;;  %v924_v16 = vmul.f32 %v3084_v5, %v3092_v9  ;;  %v1430_v17 = vmul.f32 %v3086_v6, %v3092_v9 }
 0x120   : > { %v691_v22 = vpop.f32.mrf.mxu0  ;;  %v795_v23 = vpop.f32.mrf.mxu1 }
 0x121   : > { %v949_v24 = vadd.f32 %v3094_v10, %v898_v14  ;;  %v1455_v25 = vadd.f32 %v3096_v11, %v1404_v15  ;;  %v975_v26 = vadd.f32 %v3094_v10, %v924_v16  ;;  %v1481_v27 = vadd.f32 %v3096_v11, %v1430_v17 }
 0x122   : > { %v3123_v30 = vadd.f32 %v3082_v3, %v691_v22  ;;  %v3126_v31 = vadd.f32 %v3082_v3, %v795_v23  ;;  %v693_v32 = vpop.f32.mrf.mxu0  ;;  %v797_v33 = vpop.f32.mrf.mxu1 }
 0x123   : > { %v999_v34 = vmul.f32 %v949_v24, %v3089_v8  ;;  %v1505_v35 = vmul.f32 %v1455_v25, %v3089_v8  ;;  %v1025_v36 = vmul.f32 %v975_v26, %v3092_v9  ;;  %v1531_v37 = vmul.f32 %v1481_v27, %v3092_v9 }
 0x124   : > { %v899_v38 = vmul.f32 %v3084_v5, %v3123_v30  ;;  %v1405_v39 = vmul.f32 %v3086_v6, %v3123_v30  ;;  %v925_v40 = vmul.f32 %v3084_v5, %v3126_v31  ;;  %v1431_v41 = vmul.f32 %v3086_v6, %v3126_v31  ;;  %v3140_v42 = vpop.f32.mrf.mxu0  ;;  %v3142_v43 = vpop.f32.mrf.mxu1 }
 0x125   : > { %v1050_v44 = vadd.f32 %v3106_v18, %v999_v34  ;;  %v1556_v45 = vadd.f32 %v3110_v20, %v1505_v35  ;;  %v1076_v46 = vadd.f32 %v3106_v18, %v1025_v36  ;;  %v1582_v47 = vadd.f32 %v3110_v20, %v1531_v37 }
 0x126   : > { %v950_v48 = vadd.f32 %v3094_v10, %v899_v38  ;;  %v1456_v49 = vadd.f32 %v3096_v11, %v1405_v39  ;;  %v976_v50 = vadd.f32 %v3094_v10, %v925_v40  ;;  %v1482_v51 = vadd.f32 %v3096_v11, %v1431_v41  ;;  %v698_v52 = vpop.f32.mrf.mxu0  ;;  %v802_v53 = vpop.f32.mrf.mxu1 }
 0x127   : > { %v1100_v54 = vmul.f32 %v1050_v44, %v3089_v8  ;;  %v1606_v55 = vmul.f32 %v1556_v45, %v3089_v8  ;;  %v1126_v56 = vmul.f32 %v1076_v46, %v3092_v9  ;;  %v1632_v57 = vmul.f32 %v1582_v47, %v3092_v9 }
 0x128   : > { %v1000_v58 = vmul.f32 %v950_v48, %v3123_v30  ;;  %v1506_v59 = vmul.f32 %v1456_v49, %v3123_v30  ;;  %v1026_v60 = vmul.f32 %v976_v50, %v3126_v31  ;;  %v1532_v61 = vmul.f32 %v1482_v51, %v3126_v31  ;;  %v699_v62 = vpop.f32.mrf.mxu0  ;;  %v3160_v63 = vpop.f32.mrf.mxu1 }
 0x129   : > { %v1151_v0 = vadd.f32 %v3108_v19, %v1100_v54  ;;  %v1657_v1 = vadd.f32 %v3112_v21, %v1606_v55  ;;  %v1177_v2 = vadd.f32 %v3108_v19, %v1126_v56  ;;  %v1683_v4 = vadd.f32 %v3112_v21, %v1632_v57 }
 0x12a   : > { %v1051_v7 = vadd.f32 %v3106_v18, %v1000_v58  ;;  %v1557_v12 = vadd.f32 %v3110_v20, %v1506_v59  ;;  %v1077_v13 = vadd.f32 %v3106_v18, %v1026_v60  ;;  %v1583_v14 = vadd.f32 %v3110_v20, %v1532_v61  ;;  %v701_v15 = vpop.f32.mrf.mxu0  ;;  %v805_v16 = vpop.f32.mrf.mxu1 }
 0x12b   : > { %v1201_v17 = vmul.f32 %v1151_v0, %v3089_v8  ;;  %v1707_v22 = vmul.f32 %v1657_v1, %v3089_v8  ;;  %v1227_v23 = vmul.f32 %v1177_v2, %v3092_v9  ;;  %v1733_v24 = vmul.f32 %v1683_v4, %v3092_v9 }
 0x12c   : > { %v1101_v25 = vmul.f32 %v1051_v7, %v3123_v30  ;;  %v1607_v26 = vmul.f32 %v1557_v12, %v3123_v30  ;;  %v1127_v27 = vmul.f32 %v1077_v13, %v3126_v31  ;;  %v1633_v32 = vmul.f32 %v1583_v14, %v3126_v31  ;;  %v3178_v33 = vpop.f32.mrf.mxu0  ;;  %v3180_v34 = vpop.f32.mrf.mxu1 }
 0x12d   : > { %v1252_v35 = vadd.f32 %v3118_v28, %v1201_v17  ;;  %v1757_v36 = vand.u32 2147483647, %v1707_v22  ;;  %v1278_v37 = vadd.f32 %v3118_v28, %v1227_v23  ;;  %v1783_v38 = vand.u32 2147483647, %v1733_v24 }
 0x12e   : > { %v1152_v39 = vadd.f32 %v3108_v19, %v1101_v25  ;;  %v1658_v40 = vadd.f32 %v3112_v21, %v1607_v26  ;;  %v1178_v41 = vadd.f32 %v3108_v19, %v1127_v27  ;;  %v1684_v44 = vadd.f32 %v3112_v21, %v1633_v32  ;;  %v706_v45 = vpop.f32.mrf.mxu0  ;;  %v810_v46 = vpop.f32.mrf.mxu1 }
 0x12f   : > { %v1302_v47 = vmul.f32 %v1252_v35, %v3089_v8  ;;  %v1807_v48 = vadd.f32 1.0, %v1757_v36  ;;  %v1833_v49 = vadd.f32 1.0, %v1783_v38  ;;  %v1328_v8 = vmul.f32 %v1278_v37, %v3092_v9 }
 0x130   : > { %v1202_v50 = vmul.f32 %v1152_v39, %v3123_v30  ;;  %v1708_v51 = vmul.f32 %v1658_v40, %v3123_v30  ;;  %v1228_v52 = vmul.f32 %v1178_v41, %v3126_v31  ;;  %v1734_v53 = vmul.f32 %v1684_v44, %v3126_v31  ;;  %v3193_v54 = vpop.f32.mrf.mxu0  ;;  %v3195_v55 = vpop.f32.mrf.mxu1 }
 0x131   : > { %v3198_v56 = vadd.f32 %v3120_v29, %v1302_v47  ;;  %2756 = vrcp.f32 %v1807_v48  ;;  %v3203_v57 = vadd.f32 %v3082_v3, %v3140_v42  ;;  %v3213_v9 = vadd.f32 %v3082_v3, %v3142_v43 }
 0x132   : > { %2758 = vrcp.f32 %v1833_v49  ;;  %v1253_v58 = vadd.f32 %v3118_v28, %v1202_v50  ;;  %v1758_v59 = vand.u32 2147483647, %v1708_v51  ;;  %v1279_v60 = vadd.f32 %v3118_v28, %v1228_v52  ;;  %v709_v61 = vpop.f32.mrf.mxu0  ;;  %v813_v0 = vpop.f32.mrf.mxu1 }
 0x133   : > { %v1784_v1 = vand.u32 2147483647, %v1734_v53  ;;  %v900_v2 = vmul.f32 %v3084_v5, %v3203_v57  ;;  %v1406_v4 = vmul.f32 %v3086_v6, %v3203_v57  ;;  %v3218_v13 = vadd.f32 %v3082_v3, %v699_v62 }
 0x134   : > { %v1303_v42 = vmul.f32 %v1253_v58, %v3123_v30  ;;  %v1808_v7 = vadd.f32 1.0, %v1758_v59  ;;  %v1329_v12 = vmul.f32 %v1279_v60, %v3126_v31  ;;  %v3220_v14 = vpop.f32.mrf.mxu0  ;;  %v3222_v15 = vpop.f32.mrf.mxu1  ;;  %v926_v43 = vmul.f32 %v3084_v5, %v3213_v9 }
 0x135   : > { %v1834_v16 = vadd.f32 1.0, %v1784_v1  ;;  %v951_v17 = vadd.f32 %v3094_v10, %v900_v2  ;;  %v1457_v22 = vadd.f32 %v3096_v11, %v1406_v4  ;;  %v3229_v30 = vadd.f32 %v3120_v29, %v1328_v8 }
 0x136   : > { %v3232_v31 = vadd.f32 %v3120_v29, %v1303_v42  ;;  %2760 = vrcp.f32 %v1808_v7  ;;  %v1432_v62 = vmul.f32 %v3086_v6, %v3213_v9  ;;  %v714_v23 = vpop.f32.mrf.mxu0  ;;  %v818_v24 = vpop.f32.mrf.mxu1  ;;  %v977_v27 = vadd.f32 %v3094_v10, %v926_v43 }
 0x137   : > { %2762 = vrcp.f32 %v1834_v16  ;;  %v1001_v25 = vmul.f32 %v951_v17, %v3203_v57  ;;  %v1507_v26 = vmul.f32 %v1457_v22, %v3203_v57  ;;  %v901_v35 = vmul.f32 %v3084_v5, %v3218_v13 }
 0x138   : > { %v1483_v32 = vadd.f32 %v3096_v11, %v1432_v62  ;;  %v1407_v36 = vmul.f32 %v3086_v6, %v3218_v13  ;;  %v3246_v37 = vadd.f32 %v3082_v3, %v3160_v63  ;;  %v3248_v38 = vpop.f32.mrf.mxu0  ;;  %v3250_v39 = vpop.f32.mrf.mxu1  ;;  %v3253_v40 = vadd.f32 %v3120_v29, %v1329_v12 }
 0x139   : > { %v1052_v41 = vadd.f32 %v3106_v18, %v1001_v25  ;;  %v1558_v44 = vadd.f32 %v3110_v20, %v1507_v26  ;;  %v1027_v45 = vmul.f32 %v977_v27, %v3213_v9  ;;  %v952_v47 = vadd.f32 %v3094_v10, %v901_v35 }
 0x13a   : > { %v1533_v46 = vmul.f32 %v1483_v32, %v3213_v9  ;;  %v1458_v63 = vadd.f32 %v3096_v11, %v1407_v36  ;;  %v927_v48 = vmul.f32 %v3084_v5, %v3246_v37  ;;  %v717_v49 = vpop.f32.mrf.mxu0  ;;  %v821_v50 = vpop.f32.mrf.mxu1  ;;  %v1433_v8 = vmul.f32 %v3086_v6, %v3246_v37 }
 0x13b   : > { %v1102_v51 = vmul.f32 %v1052_v41, %v3203_v57  ;;  %v1608_v52 = vmul.f32 %v1558_v44, %v3203_v57  ;;  %v1078_v53 = vadd.f32 %v3106_v18, %v1027_v45  ;;  %v1002_v59 = vmul.f32 %v952_v47, %v3218_v13 }
 0x13c   : > { %v1584_v58 = vadd.f32 %v3110_v20, %v1533_v46  ;;  %v1508_v60 = vmul.f32 %v1458_v63, %v3218_v13  ;;  %v978_v61 = vadd.f32 %v3094_v10, %v927_v48  ;;  %v3272_v0 = vpop.f32.mrf.mxu0  ;;  %v3274_v1 = vpop.f32.mrf.mxu1  ;;  %v1484_v7 = vadd.f32 %v3096_v11, %v1433_v8 }
 0x13d   : > { %v1153_v2 = vadd.f32 %v3108_v19, %v1102_v51  ;;  %v1659_v4 = vadd.f32 %v3112_v21, %v1608_v52  ;;  %v1128_v42 = vmul.f32 %v1078_v53, %v3213_v9  ;;  %v1053_v17 = vadd.f32 %v3106_v18, %v1002_v59 }
 0x13e   : > { %v2757_v12 = vpop.eup %2756  ;;  %v1634_v16 = vmul.f32 %v1584_v58, %v3213_v9  ;;  %v1559_v22 = vadd.f32 %v3110_v20, %v1508_v60  ;;  %v1028_v43 = vmul.f32 %v978_v61, %v3246_v37  ;;  %v722_v62 = vpop.f32.mrf.mxu0  ;;  %v3289_v32 = vadd.f32 %v3082_v3, %v3178_v33 }
 0x13f   : > { %v826_v23 = vpop.f32.mrf.mxu1  ;;  %v2759_v24 = vpop.eup %2758  ;;  %v1203_v25 = vmul.f32 %v1153_v2, %v3203_v57  ;;  %v1709_v26 = vmul.f32 %v1659_v4, %v3203_v57  ;;  %v1179_v27 = vadd.f32 %v3108_v19, %v1128_v42  ;;  %v1907_v35 = vmul.f32 %v2757_v12, %v3198_v56 }
 0x140   : > { %v1685_v36 = vadd.f32 %v3112_v21, %v1634_v16  ;;  %v1103_v41 = vmul.f32 %v1053_v17, %v3218_v13  ;;  %v1609_v44 = vmul.f32 %v1559_v22, %v3218_v13  ;;  %v3295_v45 = vpop.f32.mrf.mxu0  ;;  %v1079_v33 = vadd.f32 %v3106_v18, %v1028_v43 }
 0x141   : > { %v3297_v46 = vpop.f32.mrf.mxu1  ;;  %v1254_v47 = vadd.f32 %v3118_v28, %v1203_v25  ;;  %v1759_v63 = vand.u32 2147483647, %v1709_v26  ;;  %v1229_v48 = vmul.f32 %v1179_v27, %v3213_v9  ;;  %v1534_v51 = vmul.f32 %v1484_v7, %v3246_v37 }
 0x142   : > { %v1735_v56 = vmul.f32 %v1685_v36, %v3213_v9  ;;  %v1154_v49 = vadd.f32 %v3108_v19, %v1103_v41  ;;  %v1660_v50 = vadd.f32 %v3112_v21, %v1609_v44  ;;  %v725_v52 = vpop.f32.mrf.mxu0  ;;  %v1129_v61 = vmul.f32 %v1079_v33, %v3246_v37 }
 0x143   : > { %v829_v53 = vpop.f32.mrf.mxu1  ;;  %v2761_v8 = vpop.eup %2760  ;;  %v1304_v58 = vmul.f32 %v1254_v47, %v3203_v57  ;;  %v1809_v59 = vadd.f32 1.0, %v1759_v63  ;;  %v1280_v60 = vadd.f32 %v3118_v28, %v1229_v48  ;;  %v1933_v22 = vmul.f32 %v2759_v24, %v3229_v30 }
 0x144   : > { %v2763_v2 = vpop.eup %2762  ;;  %v1908_v4 = vmul.f32 %v2761_v8, %v3232_v31  ;;  %v1785_v42 = vand.u32 2147483647, %v1735_v56  ;;  %v1204_v12 = vmul.f32 %v1154_v49, %v3218_v13  ;;  %v1710_v16 = vmul.f32 %v1660_v50, %v3218_v13  ;;  %v3313_v17 = vpop.f32.mrf.mxu0 }
 0x145   : > { %v3315_v7 = vpop.f32.mrf.mxu1  ;;  %v1934_v57 = vmul.f32 %v2763_v2, %v3253_v40  ;;  %2764 = vrcp.f32 %v1809_v59  ;;  %v1330_v43 = vmul.f32 %v1280_v60, %v3213_v9  ;;  %v1180_v30 = vadd.f32 %v3108_v19, %v1129_v61 }
 0x146   : > { %v2467_v31 = vpack.c.bf16 %v1908_v4, %v1907_v35  ;;  %v1835_v62 = vadd.f32 1.0, %v1785_v42  ;;  %v1760_v23 = vand.u32 2147483647, %v1710_v16  ;;  %v730_v25 = vpop.f32.mrf.mxu0  ;;  %v1585_v24 = vadd.f32 %v3110_v20, %v1534_v51 }
 0x147   : > { %v834_v26 = vpop.f32.mrf.mxu1  ;;  %v2532_v27 = vpack.c.bf16 %v1934_v57, %v1933_v22  ;;  %v3329_v36 = vadd.f32 %v3120_v29, %v1304_v58  ;;  %v1255_v40 = vadd.f32 %v3118_v28, %v1204_v12  ;;  %v902_v35 = vmul.f32 %v3084_v5, %v3289_v32 }
 0x148   : > { %2468 = vst [vmem:[%s3321_s27] sm:$0xff] %v2467_v31   ;;  %v1810_v41 = vadd.f32 1.0, %v1760_v23  ;;  %v3334_v9 = vpop.f32.mrf.mxu0  ;;  %2766 = vrcp.f32 %v1835_v62  ;;  %v1635_v47 = vmul.f32 %v1585_v24, %v3246_v37  ;;  %v1408_v63 = vmul.f32 %v3086_v6, %v3289_v32 }
 0x149   : > { %v3336_v44 = vpop.f32.mrf.mxu1  ;;  %2601 = vst [vmem:[%s3321_s27 + $0x68] sm:$0xff] %v2532_v27   ;;  %v3344_v48 = vadd.f32 %v3082_v3, %v3180_v34  ;;  %v3347_v33 = vadd.f32 %v3120_v29, %v1330_v43  ;;  %v953_v56 = vadd.f32 %v3094_v10, %v902_v35  ;;  %v3352_v49 = vadd.f32 %v3082_v3, %v3193_v54 }
 0x14a   : > { %2768 = vrcp.f32 %v1810_v41  ;;  %v733_v50 = vpop.f32.mrf.mxu0  ;;  %v1230_v52 = vmul.f32 %v1180_v30, %v3246_v37  ;;  %v1686_v53 = vadd.f32 %v3112_v21, %v1635_v47  ;;  %v1459_v8 = vadd.f32 %v3096_v11, %v1408_v63 }
 0x14b   : > { %v837_v51 = vpop.f32.mrf.mxu1  ;;  %v928_v34 = vmul.f32 %v3084_v5, %v3344_v48  ;;  %v1003_v58 = vmul.f32 %v953_v56, %v3289_v32  ;;  %v1434_v59 = vmul.f32 %v3086_v6, %v3344_v48  ;;  %v903_v54 = vmul.f32 %v3084_v5, %v3352_v49 }
 0x14c   : > { %v1409_v60 = vmul.f32 %v3086_v6, %v3352_v49  ;;  %v3366_v61 = vpop.f32.mrf.mxu0  ;;  %v1305_v4 = vmul.f32 %v1255_v40, %v3218_v13  ;;  %v1736_v42 = vmul.f32 %v1686_v53, %v3246_v37  ;;  %v1509_v12 = vmul.f32 %v1459_v8, %v3289_v32 }
 0x14d   : > { %v3368_v2 = vpop.f32.mrf.mxu1  ;;  %v979_v16 = vadd.f32 %v3094_v10, %v928_v34  ;;  %v1054_v22 = vadd.f32 %v3106_v18, %v1003_v58  ;;  %v1485_v57 = vadd.f32 %v3096_v11, %v1434_v59  ;;  %v954_v31 = vadd.f32 %v3094_v10, %v903_v54 }
 0x14e   : > { %v1460_v43 = vadd.f32 %v3096_v11, %v1409_v60  ;;  %v738_v62 = vpop.f32.mrf.mxu0  ;;  %v1281_v25 = vadd.f32 %v3118_v28, %v1230_v52  ;;  %v1786_v26 = vand.u32 2147483647, %v1736_v42  ;;  %v1560_v13 = vadd.f32 %v3110_v20, %v1509_v12 }
 0x14f   : > { %v842_v23 = vpop.f32.mrf.mxu1  ;;  %v1029_v27 = vmul.f32 %v979_v16, %v3344_v48  ;;  %v1104_v30 = vmul.f32 %v1054_v22, %v3289_v32  ;;  %v1535_v24 = vmul.f32 %v1485_v57, %v3344_v48  ;;  %v1004_v40 = vmul.f32 %v954_v31, %v3352_v49 }
 0x150   : > { %v1510_v41 = vmul.f32 %v1460_v43, %v3352_v49  ;;  %v3385_v35 = vpop.f32.mrf.mxu0  ;;  %v1836_v63 = vadd.f32 1.0, %v1786_v26  ;;  %v1610_v56 = vmul.f32 %v1560_v13, %v3289_v32  ;;  %v3393_v51 = vadd.f32 %v3082_v3, %v3195_v55 }
 0x151   : > { %v3387_v47 = vpop.f32.mrf.mxu1  ;;  %v1080_v50 = vadd.f32 %v3106_v18, %v1029_v27  ;;  %v1155_v53 = vadd.f32 %v3108_v19, %v1104_v30  ;;  %v1586_v8 = vadd.f32 %v3110_v20, %v1535_v24  ;;  %v1055_v34 = vadd.f32 %v3106_v18, %v1004_v40 }
 0x152   : > { %v2765_v52 = vpop.eup %2764  ;;  %v1561_v58 = vadd.f32 %v3110_v20, %v1510_v41  ;;  %v741_v59 = vpop.f32.mrf.mxu0  ;;  %v1356_v60 = vadd.f32 %v3120_v29, %v1305_v4  ;;  %2770 = vrcp.f32 %v1836_v63  ;;  %v1661_v42 = vadd.f32 %v3112_v21, %v1610_v56 }
 0x153   : > { %v845_v54 = vpop.f32.mrf.mxu1  ;;  %v1130_v12 = vmul.f32 %v1080_v50, %v3344_v48  ;;  %v1205_v55 = vmul.f32 %v1155_v53, %v3289_v32  ;;  %v1636_v16 = vmul.f32 %v1586_v8, %v3344_v48  ;;  %v1105_v22 = vmul.f32 %v1055_v34, %v3352_v49 }
 0x154   : > { %v1611_v57 = vmul.f32 %v1561_v58, %v3352_v49  ;;  %v3406_v31 = vpop.f32.mrf.mxu0  ;;  %v1331_v62 = vmul.f32 %v1281_v25, %v3246_v37  ;;  %v1711_v4 = vmul.f32 %v1661_v42, %v3289_v32  ;;  %v929_v26 = vmul.f32 %v3084_v5, %v3393_v51 }
 0x155   : > { %v3408_v43 = vpop.f32.mrf.mxu1  ;;  %v1181_v23 = vadd.f32 %v3108_v19, %v1130_v12  ;;  %v2767_v13 = vpop.eup %2766  ;;  %v1909_v27 = vmul.f32 %v2765_v52, %v3329_v36  ;;  %v1256_v30 = vadd.f32 %v3118_v28, %v1205_v55  ;;  %v1687_v24 = vadd.f32 %v3112_v21, %v1636_v16 }
 0x156   : > { %v1156_v40 = vadd.f32 %v3108_v19, %v1105_v22  ;;  %v746_v41 = vpop.f32.mrf.mxu0  ;;  %v1761_v37 = vand.u32 2147483647, %v1711_v4  ;;  %v1662_v50 = vadd.f32 %v3112_v21, %v1611_v57  ;;  %v980_v53 = vadd.f32 %v3094_v10, %v929_v26 }
 0x157   : > { %v850_v63 = vpop.f32.mrf.mxu1  ;;  %v2769_v56 = vpop.eup %2768  ;;  %v1231_v25 = vmul.f32 %v1181_v23, %v3344_v48  ;;  %v1306_v34 = vmul.f32 %v1256_v30, %v3289_v32  ;;  %v1737_v36 = vmul.f32 %v1687_v24, %v3344_v48  ;;  %v1435_v52 = vmul.f32 %v3086_v6, %v3393_v51 }
 0x158   : > { %v1910_v8 = vmul.f32 %v2769_v56, %v1356_v60  ;;  %v3426_v58 = vpop.f32.mrf.mxu0  ;;  %v1811_v54 = vadd.f32 1.0, %v1761_v37  ;;  %v1206_v42 = vmul.f32 %v1156_v40, %v3352_v49  ;;  %v1712_v12 = vmul.f32 %v1662_v50, %v3352_v49 }
 0x159   : > { %v3428_v59 = vpop.f32.mrf.mxu1  ;;  %v1030_v55 = vmul.f32 %v980_v53, %v3393_v51  ;;  %v1382_v32 = vadd.f32 %v3120_v29, %v1331_v62  ;;  %v1282_v16 = vadd.f32 %v3118_v28, %v1231_v25  ;;  %v1787_v22 = vand.u32 2147483647, %v1737_v36 }
 0x15a   : > { %v2472_v60 = vpack.c.bf16 %v1910_v8, %v1909_v27  ;;  %v749_v57 = vpop.f32.mrf.mxu0  ;;  %v1935_v23 = vmul.f32 %v2767_v13, %v3347_v33  ;;  %v3437_v26 = vadd.f32 %v3120_v29, %v1306_v34  ;;  %v1762_v30 = vand.u32 2147483647, %v1712_v12 }
 0x15b   : > { %v853_v4 = vpop.f32.mrf.mxu1  ;;  %v1081_v24 = vadd.f32 %v3106_v18, %v1030_v55  ;;  %2772 = vrcp.f32 %v1811_v54  ;;  %v1837_v40 = vadd.f32 1.0, %v1787_v22  ;;  %v1486_v27 = vadd.f32 %v3096_v11, %v1435_v52 }
 0x15c   : > { %2589 = vst [vmem:[%s3321_s27 + $0x8] sm:$0xff] %v2472_v60   ;;  %v3444_v62 = vadd.f32 %v3082_v3, %v3220_v14  ;;  %v3446_v41 = vpop.f32.mrf.mxu0  ;;  %v1257_v33 = vadd.f32 %v3118_v28, %v1206_v42  ;;  %v1812_v13 = vadd.f32 1.0, %v1762_v30  ;;  %v3454_v37 = vadd.f32 %v3082_v3, %v3222_v15 }
 0x15d   : > { %v3448_v63 = vpop.f32.mrf.mxu1  ;;  %v1131_v56 = vmul.f32 %v1081_v24, %v3393_v51  ;;  %v3457_v25 = vmul.f32 %v1282_v16, %v3344_v48  ;;  %2774 = vrcp.f32 %v1837_v40  ;;  %v1536_v14 = vmul.f32 %v1486_v27, %v3393_v51 }
 0x15e   : > { %v904_v50 = vmul.f32 %v3084_v5, %v3444_v62  ;;  %v754_v53 = vpop.f32.mrf.mxu0  ;;  %2776 = vrcp.f32 %v1812_v13  ;;  %v1410_v36 = vmul.f32 %v3086_v6, %v3444_v62  ;;  %v930_v15 = vmul.f32 %v3084_v5, %v3454_v37 }
 0x15f   : > { %v858_v8 = vpop.f32.mrf.mxu1  ;;  %v1182_v34 = vadd.f32 %v3108_v19, %v1131_v56  ;;  %v2771_v52 = vpop.eup %2770  ;;  %v1587_v48 = vadd.f32 %v3110_v20, %v1536_v14  ;;  %v1436_v42 = vmul.f32 %v3086_v6, %v3454_v37  ;;  %v3473_v12 = vadd.f32 %v3082_v3, %v3248_v38 }
 0x160   : > { %v955_v54 = vadd.f32 %v3094_v10, %v904_v50  ;;  %v3475_v55 = vpop.f32.mrf.mxu0  ;;  %v1936_v16 = vmul.f32 %v2771_v52, %v1382_v32  ;;  %v1461_v57 = vadd.f32 %v3096_v11, %v1410_v36  ;;  %v981_v4 = vadd.f32 %v3094_v10, %v930_v15 }
 0x161   : > { %v3477_v60 = vpop.f32.mrf.mxu1  ;;  %v1232_v22 = vmul.f32 %v1182_v34, %v3393_v51  ;;  %v1637_v30 = vmul.f32 %v1587_v48, %v3393_v51  ;;  %v1487_v40 = vadd.f32 %v3096_v11, %v1436_v42  ;;  %v905_v38 = vmul.f32 %v3084_v5, %v3473_v12 }
 0x162   : > { %v1005_v24 = vmul.f32 %v955_v54, %v3444_v62  ;;  %v757_v27 = vpop.f32.mrf.mxu0  ;;  %v2537_v56 = vpack.c.bf16 %v1936_v16, %v1935_v23  ;;  %v1307_v32 = vmul.f32 %v1257_v33, %v3352_v49  ;;  %v1511_v14 = vmul.f32 %v1461_v57, %v3444_v62 }
 0x163   : > { %v861_v13 = vpop.f32.mrf.mxu1  ;;  %v1031_v50 = vmul.f32 %v981_v4, %v3454_v37  ;;  %v1688_v53 = vadd.f32 %v3112_v21, %v1637_v30  ;;  %v1537_v34 = vmul.f32 %v1487_v40, %v3454_v37  ;;  %v956_v36 = vadd.f32 %v3094_v10, %v905_v38 }
 0x164   : > { %v1056_v8 = vadd.f32 %v3106_v18, %v1005_v24  ;;  %v3494_v15 = vpop.f32.mrf.mxu0  ;;  %2602 = vst [vmem:[%s3321_s27 + $0x70] sm:$0xff] %v2537_v56   ;;  %v1283_v23 = vadd.f32 %v3118_v28, %v1232_v22  ;;  %v1562_v49 = vadd.f32 %v3110_v20, %v1511_v14  ;;  %v1411_v48 = vmul.f32 %v3086_v6, %v3473_v12 }
 0x165   : > { %v3496_v52 = vpop.f32.mrf.mxu1  ;;  %v1082_v33 = vadd.f32 %v3106_v18, %v1031_v50  ;;  %v1738_v54 = vmul.f32 %v1688_v53, %v3393_v51  ;;  %v1588_v16 = vadd.f32 %v3110_v20, %v1537_v34  ;;  %v1006_v57 = vmul.f32 %v956_v36, %v3473_v12 }
 0x166   : > { %v1106_v42 = vmul.f32 %v1056_v8, %v3444_v62  ;;  %v762_v4 = vpop.f32.mrf.mxu0  ;;  %v1358_v24 = vadd.f32 %v3120_v29, %v1307_v32  ;;  %v1612_v22 = vmul.f32 %v1562_v49, %v3444_v62  ;;  %v1462_v38 = vadd.f32 %v3096_v11, %v1411_v48 }
 0x167   : > { %v866_v30 = vpop.f32.mrf.mxu1  ;;  %v1132_v40 = vmul.f32 %v1082_v33, %v3454_v37  ;;  %v1788_v27 = vand.u32 2147483647, %v1738_v54  ;;  %v1638_v56 = vmul.f32 %v1588_v16, %v3454_v37  ;;  %v1057_v14 = vadd.f32 %v3106_v18, %v1006_v57 }
 0x168   : > { %v1157_v13 = vadd.f32 %v3108_v19, %v1106_v42  ;;  %v2773_v50 = vpop.eup %2772  ;;  %v1333_v53 = vmul.f32 %v1283_v23, %v3393_v51  ;;  %v1663_v8 = vadd.f32 %v3112_v21, %v1612_v22  ;;  %v1512_v34 = vmul.f32 %v1462_v38, %v3473_v12 }
 0x169   : > { %v1183_v32 = vadd.f32 %v3108_v19, %v1132_v40  ;;  %v1838_v36 = vadd.f32 1.0, %v1788_v27  ;;  %v1689_v33 = vadd.f32 %v3112_v21, %v1638_v56  ;;  %v1107_v48 = vmul.f32 %v1057_v14, %v3473_v12 }
 0x16a   : > { %v1207_v49 = vmul.f32 %v1157_v13, %v3444_v62  ;;  %v2775_v54 = vpop.eup %2774  ;;  %v1713_v42 = vmul.f32 %v1663_v8, %v3444_v62  ;;  %v1563_v51 = vadd.f32 %v3110_v20, %v1512_v34  ;;  %v3527_v23 = vadd.f32 %v3082_v3, %v3250_v39  ;;  %v3541_v8 = vpop.f32.mrf.mxu1 }
 0x16b   : > { %v1233_v16 = vmul.f32 %v1183_v32, %v3454_v37  ;;  %v2777_v57 = vpop.eup %2776  ;;  %v1911_v4 = vmul.f32 %v2773_v50, %v3437_v26  ;;  %2778 = vrcp.f32 %v1838_v36  ;;  %v1739_v22 = vmul.f32 %v1689_v33, %v3454_v37  ;;  %v3539_v50 = vpop.f32.mrf.mxu0 }
 0x16c   : > { %v1258_v30 = vadd.f32 %v3118_v28, %v1207_v49  ;;  %v1912_v40 = vmul.f32 %v2777_v57, %v1358_v24  ;;  %v1763_v38 = vand.u32 2147483647, %v1713_v42  ;;  %v1158_v13 = vadd.f32 %v3108_v19, %v1107_v48  ;;  %v869_v42 = vpop.f32.mrf.mxu1 }
 0x16d   : > { %v1284_v27 = vadd.f32 %v3118_v28, %v1233_v16  ;;  %v1383_v56 = vadd.f32 %v3120_v29, %v3457_v25  ;;  %v1789_v39 = vand.u32 2147483647, %v1739_v22  ;;  %v1613_v14 = vmul.f32 %v1563_v51, %v3473_v12  ;;  %v765_v48 = vpop.f32.mrf.mxu0 }
 0x16e   : > { %v931_v26 = vmul.f32 %v3084_v5, %v3527_v23  ;;  %v2477_v24 = vpack.c.bf16 %v1912_v40, %v1911_v4  ;;  %v1813_v32 = vadd.f32 1.0, %v1763_v38  ;;  %v1208_v34 = vmul.f32 %v1158_v13, %v3473_v12 }
 0x16f   : > { %v3544_v36 = vmul.f32 %v2775_v54, %v1383_v56  ;;  %v1384_v49 = vadd.f32 %v3120_v29, %v1333_v53  ;;  %v1664_v25 = vadd.f32 %v3112_v21, %v1613_v14  ;;  %v1308_v16 = vmul.f32 %v1258_v30, %v3444_v62  ;;  %v3570_v30 = vpop.f32.mrf.mxu0 }
 0x170   : > { %v982_v33 = vadd.f32 %v3094_v10, %v931_v26  ;;  %2590 = vst [vmem:[%s3321_s27 + $0x10] sm:$0xff] %v2477_v24   ;;  %v1334_v51 = vmul.f32 %v1284_v27, %v3454_v37  ;;  %v1839_v57 = vadd.f32 1.0, %v1789_v39  ;;  %v1437_v4 = vmul.f32 %v3086_v6, %v3527_v23 }
 0x171   : > { %2780 = vrcp.f32 %v1813_v32  ;;  %v1714_v54 = vmul.f32 %v1664_v25, %v3473_v12  ;;  %v3558_v22 = vadd.f32 %v3082_v3, %v3272_v0  ;;  %v1259_v40 = vadd.f32 %v3118_v28, %v1208_v34  ;;  %v770_v14 = vpop.f32.mrf.mxu0 }
 0x172   : > { %v1032_v53 = vmul.f32 %v982_v33, %v3527_v23  ;;  %v1488_v38 = vadd.f32 %v3096_v11, %v1437_v4  ;;  %v3564_v62 = vadd.f32 %v3082_v3, %v3274_v1  ;;  %v3568_v37 = vadd.f32 %v3082_v3, %v3295_v45 }
 0x173   : > { %v1764_v27 = vand.u32 2147483647, %v1714_v54  ;;  %v906_v0 = vmul.f32 %v3084_v5, %v3558_v22  ;;  %v1412_v56 = vmul.f32 %v3086_v6, %v3558_v22  ;;  %2782 = vrcp.f32 %v1839_v57 }
 0x174   : > { %v1083_v13 = vadd.f32 %v3106_v18, %v1032_v53  ;;  %v1538_v39 = vmul.f32 %v1488_v38, %v3527_v23  ;;  %v932_v1 = vmul.f32 %v3084_v5, %v3564_v62  ;;  %v1438_v45 = vmul.f32 %v3086_v6, %v3564_v62 }
 0x175   : > { %v1814_v26 = vadd.f32 1.0, %v1764_v27  ;;  %v957_v32 = vadd.f32 %v3094_v10, %v906_v0  ;;  %v1463_v34 = vadd.f32 %v3096_v11, %v1412_v56  ;;  %v907_v42 = vmul.f32 %v3084_v5, %v3568_v37 }
 0x176   : > { %v1133_v24 = vmul.f32 %v1083_v13, %v3527_v23  ;;  %v1589_v25 = vadd.f32 %v3110_v20, %v1538_v39  ;;  %v983_v33 = vadd.f32 %v3094_v10, %v932_v1  ;;  %v1489_v48 = vadd.f32 %v3096_v11, %v1438_v45 }
 0x177   : > { %2784 = vrcp.f32 %v1814_v26  ;;  %v1007_v4 = vmul.f32 %v957_v32, %v3558_v22  ;;  %v1513_v54 = vmul.f32 %v1463_v34, %v3558_v22  ;;  %v958_v0 = vadd.f32 %v3094_v10, %v907_v42  ;;  %v3604_v34 = vpop.f32.mrf.mxu1 }
 0x178   : > { %v1184_v57 = vadd.f32 %v3108_v19, %v1133_v24  ;;  %v2779_v53 = vpop.eup %2778  ;;  %v1639_v38 = vmul.f32 %v1589_v25, %v3527_v23  ;;  %v1033_v27 = vmul.f32 %v983_v33, %v3564_v62  ;;  %v1539_v13 = vmul.f32 %v1489_v48, %v3564_v62 }
 0x179   : > { %v1938_v56 = vmul.f32 %v2779_v53, %v1384_v49  ;;  %v1058_v1 = vadd.f32 %v3106_v18, %v1007_v4  ;;  %v1564_v45 = vadd.f32 %v3110_v20, %v1513_v54  ;;  %v1008_v32 = vmul.f32 %v958_v0, %v3568_v37  ;;  %v874_v53 = vpop.f32.mrf.mxu1 }
 0x17a   : > { %v1234_v39 = vmul.f32 %v1184_v57, %v3527_v23  ;;  %v1690_v14 = vadd.f32 %v3112_v21, %v1639_v38  ;;  %v1084_v26 = vadd.f32 %v3106_v18, %v1033_v27  ;;  %v1590_v24 = vadd.f32 %v3110_v20, %v1539_v13 }
 0x17b   : > { %v2542_v25 = vpack.c.bf16 %v1938_v56, %v3544_v36  ;;  %v1108_v33 = vmul.f32 %v1058_v1, %v3558_v22  ;;  %v1614_v48 = vmul.f32 %v1564_v45, %v3558_v22  ;;  %v1059_v54 = vadd.f32 %v3106_v18, %v1008_v32 }
 0x17c   : > { %v1285_v49 = vadd.f32 %v3118_v28, %v1234_v39  ;;  %v1740_v42 = vmul.f32 %v1690_v14, %v3527_v23  ;;  %v1134_v57 = vmul.f32 %v1084_v26, %v3564_v62  ;;  %v1640_v4 = vmul.f32 %v1590_v24, %v3564_v62 }
 0x17d   : > { %2603 = vst [vmem:[%s3321_s27 + $0x78] sm:$0xff] %v2542_v25   ;;  %v1359_v38 = vadd.f32 %v3120_v29, %v1308_v16  ;;  %v1159_v36 = vadd.f32 %v3108_v19, %v1108_v33  ;;  %v1665_v27 = vadd.f32 %v3112_v21, %v1614_v48  ;;  %v1413_v13 = vmul.f32 %v3086_v6, %v3568_v37 }
 0x17e   : > { %v2781_v0 = vpop.eup %2780  ;;  %v1385_v56 = vadd.f32 %v3120_v29, %v1334_v51  ;;  %v1790_v39 = vand.u32 2147483647, %v1740_v42  ;;  %v1185_v1 = vadd.f32 %v3108_v19, %v1134_v57  ;;  %v1691_v45 = vadd.f32 %v3112_v21, %v1640_v4 }
 0x17f   : > { %v1309_v14 = vmul.f32 %v1259_v40, %v3473_v12  ;;  %v1335_v26 = vmul.f32 %v1285_v49, %v3527_v23  ;;  %v1209_v16 = vmul.f32 %v1159_v36, %v3558_v22  ;;  %v1715_v24 = vmul.f32 %v1665_v27, %v3558_v22  ;;  %v3636_v23 = vpop.f32.mrf.mxu0  ;;  %v3638_v40 = vpop.f32.mrf.mxu1 }
 0x180   : > { %v1840_v32 = vadd.f32 1.0, %v1790_v39  ;;  %v1235_v25 = vmul.f32 %v1185_v1, %v3564_v62  ;;  %v1741_v33 = vmul.f32 %v1691_v45, %v3564_v62  ;;  %v1109_v51 = vmul.f32 %v1059_v54, %v3568_v37  ;;  %v2783_v48 = vpop.eup %2782 }
 0x181   : > { %v1260_v42 = vadd.f32 %v3118_v28, %v1209_v16  ;;  %v1765_v57 = vand.u32 2147483647, %v1715_v24  ;;  %v1464_v4 = vadd.f32 %v3096_v11, %v1413_v13  ;;  %v3634_v12 = vadd.f32 %v3082_v3, %v3297_v46  ;;  %v773_v3 = vpop.f32.mrf.mxu0  ;;  %v877_v46 = vpop.f32.mrf.mxu1 }
 0x182   : > { %2786 = vrcp.f32 %v1840_v32  ;;  %v1286_v49 = vadd.f32 %v3118_v28, %v1235_v25  ;;  %v1791_v53 = vand.u32 2147483647, %v1741_v33  ;;  %v1160_v54 = vadd.f32 %v3108_v19, %v1109_v51 }
 0x183   : > { %v1360_v36 = vadd.f32 %v3120_v29, %v1309_v14  ;;  %v1815_v27 = vadd.f32 1.0, %v1765_v57  ;;  %v1514_v39 = vmul.f32 %v1464_v4, %v3568_v37  ;;  %v933_v13 = vmul.f32 %v3084_v5, %v3634_v12 }
 0x184   : > { %v2785_v1 = vpop.eup %2784  ;;  %v1913_v45 = vmul.f32 %v2781_v0, %v1359_v38  ;;  %v3646_v16 = vmul.f32 %v2783_v48, %v1385_v56  ;;  %v1841_v24 = vadd.f32 1.0, %v1791_v53  ;;  %v1439_v32 = vmul.f32 %v3086_v6, %v3634_v12 }
 0x185   : > { %v1914_v25 = vmul.f32 %v2785_v1, %v1360_v36  ;;  %v1386_v33 = vadd.f32 %v3120_v29, %v1335_v26  ;;  %v1310_v14 = vmul.f32 %v1260_v42, %v3558_v22  ;;  %v1565_v51 = vadd.f32 %v3110_v20, %v1514_v39  ;;  %v3663_v26 = vld [vmem:[%s4434_s3] ss:$0 sm:$0xff] }
 0x186   : > { %2788 = vrcp.f32 %v1815_v27  ;;  %v3654_v57 = vmul.f32 %v1286_v49, %v3564_v62  ;;  %v1210_v38 = vmul.f32 %v1160_v54, %v3568_v37  ;;  %v984_v0 = vadd.f32 %v3094_v10, %v933_v13  ;;  %v3685_v27 = vpop.f32.mrf.mxu0 }
 0x187   : > { %v2482_v56 = vpack.c.bf16 %v1914_v25, %v1913_v45  ;;  %v1615_v48 = vmul.f32 %v1565_v51, %v3568_v37  ;;  %v1490_v4 = vadd.f32 %v3096_v11, %v1439_v32  ;;  %v3667_v22 = vadd.f32 %v3663_v26, %v3313_v17 }
 0x188   : > { %2790 = vrcp.f32 %v1841_v24  ;;  %v1034_v62 = vmul.f32 %v984_v0, %v3634_v12  ;;  %v3672_v42 = vadd.f32 %v3663_v26, %v3315_v7  ;;  %v3676_v49 = vadd.f32 %v3663_v26, %v3334_v9  ;;  %v778_v24 = vpop.f32.mrf.mxu0 }
 0x189   : > { %2591 = vst [vmem:[%s3321_s27 + $0x18] sm:$0xff] %v2482_v56   ;;  %v1666_v53 = vadd.f32 %v3112_v21, %v1615_v48  ;;  %v1540_v54 = vmul.f32 %v1490_v4, %v3634_v12  ;;  %v908_v17 = vmul.f32 %v3084_v5, %v3667_v22  ;;  %v1414_v36 = vmul.f32 %v3086_v6, %v3667_v22 }
 0x18a   : > { %v1261_v7 = vadd.f32 %v3118_v28, %v1210_v38  ;;  %v1085_v39 = vadd.f32 %v3106_v18, %v1034_v62  ;;  %v934_v9 = vmul.f32 %v3084_v5, %v3672_v42  ;;  %v1440_v13 = vmul.f32 %v3086_v6, %v3672_v42 }
 0x18b   : > { %v1716_v3 = vmul.f32 %v1666_v53, %v3568_v37  ;;  %v1591_v46 = vadd.f32 %v3110_v20, %v1540_v54  ;;  %v959_v1 = vadd.f32 %v3094_v10, %v908_v17  ;;  %v1465_v45 = vadd.f32 %v3096_v11, %v1414_v36 }
 0x18c   : > { %v1135_v32 = vmul.f32 %v1085_v39, %v3634_v12  ;;  %v985_v25 = vadd.f32 %v3094_v10, %v934_v9  ;;  %v1491_v51 = vadd.f32 %v3096_v11, %v1440_v13  ;;  %v909_v38 = vmul.f32 %v3084_v5, %v3676_v49 }
 0x18d   : > { %v1766_v0 = vand.u32 2147483647, %v1716_v3  ;;  %v1641_v56 = vmul.f32 %v1591_v46, %v3634_v12  ;;  %v1009_v48 = vmul.f32 %v959_v1, %v3667_v22  ;;  %v1515_v4 = vmul.f32 %v1465_v45, %v3667_v22 }
 0x18e   : > { %v1186_v62 = vadd.f32 %v3108_v19, %v1135_v32  ;;  %v1035_v53 = vmul.f32 %v985_v25, %v3672_v42  ;;  %v1541_v54 = vmul.f32 %v1491_v51, %v3672_v42  ;;  %v960_v17 = vadd.f32 %v3094_v10, %v909_v38  ;;  %v3718_v38 = vpop.f32.mrf.mxu1 }
 0x18f   : > { %v2787_v36 = vpop.eup %2786  ;;  %v1816_v39 = vadd.f32 1.0, %v1766_v0  ;;  %v1692_v9 = vadd.f32 %v3112_v21, %v1641_v56  ;;  %v1060_v13 = vadd.f32 %v3106_v18, %v1009_v48  ;;  %v1566_v3 = vadd.f32 %v3110_v20, %v1515_v4 }
 0x190   : > { %v1940_v46 = vmul.f32 %v2787_v36, %v1386_v33  ;;  %v1236_v1 = vmul.f32 %v1186_v62, %v3634_v12  ;;  %v1086_v45 = vadd.f32 %v3106_v18, %v1035_v53  ;;  %v1592_v24 = vadd.f32 %v3110_v20, %v1541_v54 }
 0x191   : > { %2792 = vrcp.f32 %v1816_v39  ;;  %v1742_v32 = vmul.f32 %v1692_v9, %v3634_v12  ;;  %v1110_v25 = vmul.f32 %v1060_v13, %v3667_v22  ;;  %v1616_v51 = vmul.f32 %v1566_v3, %v3667_v22  ;;  %v882_v39 = vpop.f32.mrf.mxu1 }
 0x192   : > { %v2547_v0 = vpack.c.bf16 %v1940_v46, %v3646_v16  ;;  %v1287_v33 = vadd.f32 %v3118_v28, %v1236_v1  ;;  %v1136_v56 = vmul.f32 %v1086_v45, %v3672_v42  ;;  %v1642_v48 = vmul.f32 %v1592_v24, %v3672_v42 }
 0x193   : > { %v2789_v4 = vpop.eup %2788  ;;  %v1361_v62 = vadd.f32 %v3120_v29, %v1310_v14  ;;  %v1792_v53 = vand.u32 2147483647, %v1742_v32  ;;  %v1161_v54 = vadd.f32 %v3108_v19, %v1110_v25  ;;  %v1667_v36 = vadd.f32 %v3112_v21, %v1616_v51 }
 0x194   : > { %2604 = vst [vmem:[%s3321_s27 + $0x80] sm:$0xff] %v2547_v0   ;;  %v1387_v9 = vadd.f32 %v3120_v29, %v3654_v57  ;;  %v1311_v16 = vmul.f32 %v1261_v7, %v3568_v37  ;;  %v1187_v13 = vadd.f32 %v3108_v19, %v1136_v56  ;;  %v1693_v3 = vadd.f32 %v3112_v21, %v1642_v48  ;;  %v3743_v56 = vpop.f32.mrf.mxu0  ;;  %v3745_v48 = vpop.f32.mrf.mxu1 }
 0x195   : > { %v2791_v46 = vpop.eup %2790  ;;  %v1842_v1 = vadd.f32 1.0, %v1792_v53  ;;  %v1211_v14 = vmul.f32 %v1161_v54, %v3667_v22  ;;  %v1717_v45 = vmul.f32 %v1667_v36, %v3667_v22  ;;  %v1010_v24 = vmul.f32 %v960_v17, %v3676_v49 }
 0x196   : > { %v1337_v32 = vmul.f32 %v1287_v33, %v3634_v12  ;;  %v1237_v25 = vmul.f32 %v1187_v13, %v3672_v42  ;;  %v1743_v57 = vmul.f32 %v1693_v3, %v3672_v42  ;;  %v1415_v37 = vmul.f32 %v3086_v6, %v3676_v49  ;;  %v781_v3 = vpop.f32.mrf.mxu0 }
 0x197   : > { %2794 = vrcp.f32 %v1842_v1  ;;  %v1262_v7 = vadd.f32 %v3118_v28, %v1211_v14  ;;  %v1767_v51 = vand.u32 2147483647, %v1717_v45  ;;  %v1061_v0 = vadd.f32 %v3106_v18, %v1010_v24  ;;  %v885_v1 = vpop.f32.mrf.mxu1 }
 0x198   : > { %v1288_v17 = vadd.f32 %v3118_v28, %v1237_v25  ;;  %v1793_v12 = vand.u32 2147483647, %v1743_v57  ;;  %v1466_v33 = vadd.f32 %v3096_v11, %v1415_v37  ;;  %v3751_v53 = vadd.f32 %v3663_v26, %v3336_v44 }
 0x199   : > { %v1362_v54 = vadd.f32 %v3120_v29, %v1311_v16  ;;  %v1817_v36 = vadd.f32 1.0, %v1767_v51  ;;  %v1111_v39 = vmul.f32 %v1061_v0, %v3676_v49  ;;  %v3757_v13 = vadd.f32 %v3663_v26, %v3366_v61 }
 0x19a   : > { %v1915_v14 = vmul.f32 %v2789_v4, %v1361_v62  ;;  %v1843_v45 = vadd.f32 1.0, %v1793_v12  ;;  %v1516_v24 = vmul.f32 %v1466_v33, %v3676_v49  ;;  %v935_v25 = vmul.f32 %v3084_v5, %v3751_v53 }
 0x19b   : > { %v1941_v44 = vmul.f32 %v2791_v46, %v1387_v9  ;;  %v1388_v57 = vadd.f32 %v3120_v29, %v1337_v32  ;;  %v1162_v16 = vadd.f32 %v3108_v19, %v1111_v39  ;;  %v1441_v37 = vmul.f32 %v3086_v6, %v3751_v53 }
 0x19c   : > { %v3767_v61 = vmul.f32 %v1262_v7, %v3667_v22  ;;  %v3770_v51 = vmul.f32 %v1288_v17, %v3672_v42  ;;  %v1567_v4 = vadd.f32 %v3110_v20, %v1516_v24  ;;  %v986_v62 = vadd.f32 %v3094_v10, %v935_v25  ;;  %v3793_v24 = vpop.f32.mrf.mxu0 }
 0x19d   : > { %2796 = vrcp.f32 %v1817_v36  ;;  %v1492_v9 = vadd.f32 %v3096_v11, %v1441_v37  ;;  %v910_v46 = vmul.f32 %v3084_v5, %v3757_v13  ;;  %v1416_v32 = vmul.f32 %v3086_v6, %v3757_v13 }
 0x19e   : > { %v2793_v0 = vpop.eup %2792  ;;  %2798 = vrcp.f32 %v1843_v45  ;;  %v1617_v22 = vmul.f32 %v1567_v4, %v3676_v49  ;;  %v1036_v42 = vmul.f32 %v986_v62, %v3751_v53  ;;  %v3783_v7 = vadd.f32 %v3663_v26, %v3368_v2 }
 0x19f   : > { %v1916_v17 = vmul.f32 %v2793_v0, %v1362_v54  ;;  %v1212_v12 = vmul.f32 %v1162_v16, %v3676_v49  ;;  %v1542_v33 = vmul.f32 %v1492_v9, %v3751_v53  ;;  %v961_v36 = vadd.f32 %v3094_v10, %v910_v46  ;;  %v786_v46 = vpop.f32.mrf.mxu0 }
 0x1a0   : > { %v1668_v39 = vadd.f32 %v3112_v21, %v1617_v22  ;;  %v1087_v3 = vadd.f32 %v3106_v18, %v1036_v42  ;;  %v1467_v1 = vadd.f32 %v3096_v11, %v1416_v32  ;;  %v936_v45 = vmul.f32 %v3084_v5, %v3783_v7 }
 0x1a1   : > { %v2487_v2 = vpack.c.bf16 %v1916_v17, %v1915_v14  ;;  %v1593_v54 = vadd.f32 %v3110_v20, %v1542_v33  ;;  %v1011_v25 = vmul.f32 %v961_v36, %v3757_v13  ;;  %v3799_v16 = vadd.f32 %v3663_v26, %v3385_v35 }
 0x1a2   : > { %v1718_v37 = vmul.f32 %v1668_v39, %v3676_v49  ;;  %v1137_v4 = vmul.f32 %v1087_v3, %v3751_v53  ;;  %v1517_v62 = vmul.f32 %v1467_v1, %v3757_v13  ;;  %v987_v9 = vadd.f32 %v3094_v10, %v936_v45 }
 0x1a3   : > { %2592 = vst [vmem:[%s3321_s27 + $0x20] sm:$0xff] %v2487_v2   ;;  %v1263_v14 = vadd.f32 %v3118_v28, %v1212_v12  ;;  %v1643_v32 = vmul.f32 %v1593_v54, %v3751_v53  ;;  %v1062_v0 = vadd.f32 %v3106_v18, %v1011_v25  ;;  %v1442_v35 = vmul.f32 %v3086_v6, %v3783_v7 }
 0x1a4   : > { %v2795_v22 = vpop.eup %2794  ;;  %v1768_v42 = vand.u32 2147483647, %v1718_v37  ;;  %v1188_v17 = vadd.f32 %v3108_v19, %v1137_v4  ;;  %v1568_v33 = vadd.f32 %v3110_v20, %v1517_v62  ;;  %v1037_v36 = vmul.f32 %v987_v9, %v3783_v7 }
 0x1a5   : > { %v1942_v39 = vmul.f32 %v2795_v22, %v1388_v57  ;;  %v1694_v3 = vadd.f32 %v3112_v21, %v1643_v32  ;;  %v1112_v12 = vmul.f32 %v1062_v0, %v3757_v13  ;;  %v1493_v1 = vadd.f32 %v3096_v11, %v1442_v35 }
 0x1a6   : > { %v1818_v45 = vadd.f32 1.0, %v1768_v42  ;;  %v1238_v2 = vmul.f32 %v1188_v17, %v3751_v53  ;;  %v1618_v54 = vmul.f32 %v1568_v33, %v3757_v13  ;;  %v1088_v25 = vadd.f32 %v3106_v18, %v1037_v36 }
 0x1a7   : > { %v2552_v37 = vpack.c.bf16 %v1942_v39, %v1941_v44  ;;  %v1744_v4 = vmul.f32 %v1694_v3, %v3751_v53  ;;  %v1163_v62 = vadd.f32 %v3108_v19, %v1112_v12  ;;  %v1543_v57 = vmul.f32 %v1493_v1, %v3783_v7  ;;  %v3839_v1 = vpop.f32.mrf.mxu0 }
 0x1a8   : > { %2800 = vrcp.f32 %v1818_v45  ;;  %v1289_v9 = vadd.f32 %v3118_v28, %v1238_v2  ;;  %v1669_v46 = vadd.f32 %v3112_v21, %v1618_v54  ;;  %v1138_v32 = vmul.f32 %v1088_v25, %v3783_v7 }
 0x1a9   : > { %2605 = vst [vmem:[%s3321_s27 + $0x88] sm:$0xff] %v2552_v37   ;;  %v1313_v0 = vmul.f32 %v1263_v14, %v3676_v49  ;;  %v1794_v35 = vand.u32 2147483647, %v1744_v4  ;;  %v1213_v22 = vmul.f32 %v1163_v62, %v3757_v13  ;;  %v1594_v44 = vadd.f32 %v3110_v20, %v1543_v57  ;;  %v789_v4 = vpop.f32.mrf.mxu0 }
 0x1aa   : > { %v2797_v42 = vpop.eup %2796  ;;  %v1363_v17 = vadd.f32 %v3120_v29, %v3767_v61  ;;  %v1719_v33 = vmul.f32 %v1669_v46, %v3757_v13  ;;  %v1189_v36 = vadd.f32 %v3108_v19, %v1138_v32  ;;  %v1389_v3 = vadd.f32 %v3120_v29, %v3770_v51 }
 0x1ab   : > { %v2799_v39 = vpop.eup %2798  ;;  %v1844_v12 = vadd.f32 1.0, %v1794_v35  ;;  %v1644_v49 = vmul.f32 %v1594_v44, %v3783_v7  ;;  %v911_v14 = vmul.f32 %v3084_v5, %v3799_v16  ;;  %v1339_v45 = vmul.f32 %v1289_v9, %v3751_v53 }
 0x1ac   : > { %v1264_v61 = vadd.f32 %v3118_v28, %v1213_v22  ;;  %v1769_v2 = vand.u32 2147483647, %v1719_v33  ;;  %v1417_v54 = vmul.f32 %v3086_v6, %v3799_v16  ;;  %v1364_v25 = vadd.f32 %v3120_v29, %v1313_v0 }
 0x1ad   : > { %2802 = vrcp.f32 %v1844_v12  ;;  %v1695_v51 = vadd.f32 %v3112_v21, %v1644_v49  ;;  %v962_v37 = vadd.f32 %v3094_v10, %v911_v14  ;;  %v1917_v62 = vmul.f32 %v2797_v42, %v1363_v17 }
 0x1ae   : > { %v1239_v57 = vmul.f32 %v1189_v36, %v3783_v7  ;;  %v1468_v46 = vadd.f32 %v3096_v11, %v1417_v54  ;;  %v3852_v53 = vadd.f32 %v3663_v26, %v3387_v47  ;;  %v3854_v9 = vmul.f32 %v2799_v39, %v1389_v3 }
 0x1af   : > { %v1819_v32 = vadd.f32 1.0, %v1769_v2  ;;  %v1012_v0 = vmul.f32 %v962_v37, %v3799_v16  ;;  %v3859_v35 = vadd.f32 %v3663_v26, %v3406_v31  ;;  %v1390_v22 = vadd.f32 %v3120_v29, %v1339_v45 }
 0x1b0   : > { %v1314_v44 = vmul.f32 %v1264_v61, %v3757_v13  ;;  %v1518_v42 = vmul.f32 %v1468_v46, %v3799_v16  ;;  %v937_v17 = vmul.f32 %v3084_v5, %v3852_v53  ;;  %v1745_v47 = vmul.f32 %v1695_v51, %v3783_v7 }
 0x1b1   : > { %v1063_v33 = vadd.f32 %v3106_v18, %v1012_v0  ;;  %v1443_v36 = vmul.f32 %v3086_v6, %v3852_v53  ;;  %v912_v31 = vmul.f32 %v3084_v5, %v3859_v35  ;;  %v1290_v39 = vadd.f32 %v3118_v28, %v1239_v57 }
 0x1b2   : > { %v1569_v3 = vadd.f32 %v3110_v20, %v1518_v42  ;;  %v988_v13 = vadd.f32 %v3094_v10, %v937_v17  ;;  %v1418_v12 = vmul.f32 %v3086_v6, %v3859_v35  ;;  %2804 = vrcp.f32 %v1819_v32 }
 0x1b3   : > { %v1113_v49 = vmul.f32 %v1063_v33, %v3799_v16  ;;  %v1494_v14 = vadd.f32 %v3096_v11, %v1443_v36  ;;  %v963_v45 = vadd.f32 %v3094_v10, %v912_v31  ;;  %v3885_v51 = vadd.f32 %v3663_v26, %v3408_v43 }
 0x1b4   : > { %v1619_v61 = vmul.f32 %v1569_v3, %v3799_v16  ;;  %v1038_v2 = vmul.f32 %v988_v13, %v3852_v53  ;;  %v1469_v54 = vadd.f32 %v3096_v11, %v1418_v12  ;;  %v1795_v4 = vand.u32 2147483647, %v1745_v47 }
 0x1b5   : > { %v2801_v37 = vpop.eup %2800  ;;  %v1164_v57 = vadd.f32 %v3108_v19, %v1113_v49  ;;  %v1544_v46 = vmul.f32 %v1494_v14, %v3852_v53  ;;  %v1013_v32 = vmul.f32 %v963_v45, %v3859_v35  ;;  %v938_v31 = vmul.f32 %v3084_v5, %v3885_v51 }
 0x1b6   : > { %v1918_v0 = vmul.f32 %v2801_v37, %v1364_v25  ;;  %v1670_v42 = vadd.f32 %v3112_v21, %v1619_v61  ;;  %v1089_v17 = vadd.f32 %v3106_v18, %v1038_v2  ;;  %v1519_v33 = vmul.f32 %v1469_v54, %v3859_v35 }
 0x1b7   : > { %v1214_v36 = vmul.f32 %v1164_v57, %v3799_v16  ;;  %v1595_v43 = vadd.f32 %v3110_v20, %v1544_v46  ;;  %v1064_v47 = vadd.f32 %v3106_v18, %v1013_v32  ;;  %v1845_v49 = vadd.f32 1.0, %v1795_v4 }
 0x1b8   : > { %v2492_v3 = vpack.c.bf16 %v1918_v0, %v1917_v62  ;;  %v1720_v13 = vmul.f32 %v1670_v42, %v3799_v16  ;;  %v1139_v25 = vmul.f32 %v1089_v17, %v3852_v53  ;;  %v1570_v12 = vadd.f32 %v3110_v20, %v1519_v33 }
 0x1b9   : > { %v1645_v14 = vmul.f32 %v1595_v43, %v3852_v53  ;;  %v1114_v45 = vmul.f32 %v1064_v47, %v3859_v35  ;;  %v989_v61 = vadd.f32 %v3094_v10, %v938_v31  ;;  %v1265_v54 = vadd.f32 %v3118_v28, %v1214_v36 }
 0x1ba   : > { %v2803_v2 = vpop.eup %2802  ;;  %2593 = vst [vmem:[%s3321_s27 + $0x28] sm:$0xff] %v2492_v3   ;;  %v1770_v37 = vand.u32 2147483647, %v1720_v13  ;;  %v1190_v62 = vadd.f32 %v3108_v19, %v1139_v25  ;;  %v1620_v57 = vmul.f32 %v1570_v12, %v3859_v35  ;;  %v1444_v0 = vmul.f32 %v3086_v6, %v3885_v51 }
 0x1bb   : > { %v1944_v46 = vmul.f32 %v2803_v2, %v1390_v22  ;;  %v1696_v32 = vadd.f32 %v3112_v21, %v1645_v14  ;;  %v1165_v4 = vadd.f32 %v3108_v19, %v1114_v45  ;;  %v1039_v36 = vmul.f32 %v989_v61, %v3885_v51 }
 0x1bc   : > { %v1820_v42 = vadd.f32 1.0, %v1770_v37  ;;  %v1240_v17 = vmul.f32 %v1190_v62, %v3852_v53  ;;  %v1671_v33 = vadd.f32 %v3112_v21, %v1620_v57  ;;  %2806 = vrcp.f32 %v1845_v49 }
 0x1bd   : > { %v2557_v43 = vpack.c.bf16 %v1944_v46, %v3854_v9  ;;  %v1746_v22 = vmul.f32 %v1696_v32, %v3852_v53  ;;  %v1215_v47 = vmul.f32 %v1165_v4, %v3859_v35  ;;  %v1365_v31 = vadd.f32 %v3120_v29, %v1314_v44 }
 0x1be   : > { %v1340_v3 = vmul.f32 %v1290_v39, %v3783_v7  ;;  %2808 = vrcp.f32 %v1820_v42  ;;  %v1721_v13 = vmul.f32 %v1671_v33, %v3859_v35  ;;  %v1315_v25 = vmul.f32 %v1265_v54, %v3799_v16 }
 0x1bf   : > { %2606 = vst [vmem:[%s3321_s27 + $0x90] sm:$0xff] %v2557_v43   ;;  %v1796_v12 = vand.u32 2147483647, %v1746_v22  ;;  %v1090_v14 = vadd.f32 %v3106_v18, %v1039_v36  ;;  %v1495_v9 = vadd.f32 %v3096_v11, %v1444_v0  ;;  %v2805_v49 = vpop.eup %2804  ;;  %v1291_v45 = vadd.f32 %v3118_v28, %v1240_v17 }
 0x1c0   : > { %v1266_v61 = vadd.f32 %v3118_v28, %v1215_v47  ;;  %v1771_v2 = vand.u32 2147483647, %v1721_v13  ;;  %v3929_v7 = vadd.f32 %v3663_v26, %v3426_v58  ;;  %v3935_v54 = vadd.f32 %v3663_v26, %v3428_v59 }
 0x1c1   : > { %v1846_v44 = vadd.f32 1.0, %v1796_v12  ;;  %v1140_v39 = vmul.f32 %v1090_v14, %v3885_v51  ;;  %v1545_v16 = vmul.f32 %v1495_v9, %v3885_v51  ;;  %v1391_v37 = vadd.f32 %v3120_v29, %v1340_v3 }
 0x1c2   : > { %v1821_v62 = vadd.f32 1.0, %v1771_v2  ;;  %v913_v57 = vmul.f32 %v3084_v5, %v3929_v7  ;;  %v1419_v46 = vmul.f32 %v3086_v6, %v3929_v7  ;;  %v1919_v58 = vmul.f32 %v2805_v49, %v1365_v31 }
 0x1c3   : > { %v1366_v32 = vadd.f32 %v3120_v29, %v1315_v25  ;;  %2810 = vrcp.f32 %v1846_v44  ;;  %v1191_v4 = vadd.f32 %v3108_v19, %v1140_v39  ;;  %v1341_v0 = vmul.f32 %v1291_v45, %v3852_v53 }
 0x1c4   : > { %v1596_v59 = vadd.f32 %v3110_v20, %v1545_v16  ;;  %v964_v42 = vadd.f32 %v3094_v10, %v913_v57  ;;  %v1470_v17 = vadd.f32 %v3096_v11, %v1419_v46  ;;  %v1316_v33 = vmul.f32 %v1266_v61, %v3859_v35 }
 0x1c5   : > { %v939_v36 = vmul.f32 %v3084_v5, %v3935_v54  ;;  %v1445_v43 = vmul.f32 %v3086_v6, %v3935_v54  ;;  %v3955_v22 = vadd.f32 %v3663_v26, %v3446_v41  ;;  %2812 = vrcp.f32 %v1821_v62 }
 0x1c6   : > { %v1646_v53 = vmul.f32 %v1596_v59, %v3885_v51  ;;  %v1014_v47 = vmul.f32 %v964_v42, %v3929_v7  ;;  %v1520_v31 = vmul.f32 %v1470_v17, %v3929_v7  ;;  %v1241_v3 = vmul.f32 %v1191_v4, %v3885_v51 }
 0x1c7   : > { %v990_v35 = vadd.f32 %v3094_v10, %v939_v36  ;;  %v1496_v13 = vadd.f32 %v3096_v11, %v1445_v43  ;;  %v914_v25 = vmul.f32 %v3084_v5, %v3955_v22  ;;  %v1420_v9 = vmul.f32 %v3086_v6, %v3955_v22 }
 0x1c8   : > { %v1697_v12 = vadd.f32 %v3112_v21, %v1646_v53  ;;  %v1065_v41 = vadd.f32 %v3106_v18, %v1014_v47  ;;  %v1571_v14 = vadd.f32 %v3110_v20, %v1520_v31  ;;  %v3975_v2 = vadd.f32 %v3663_v26, %v3448_v63 }
 0x1c9   : > { %v1040_v49 = vmul.f32 %v990_v35, %v3935_v54  ;;  %v1546_v45 = vmul.f32 %v1496_v13, %v3935_v54  ;;  %v965_v61 = vadd.f32 %v3094_v10, %v914_v25  ;;  %v2807_v44 = vpop.eup %2806  ;;  %v1471_v57 = vadd.f32 %v3096_v11, %v1420_v9 }
 0x1ca   : > { %v1747_v39 = vmul.f32 %v1697_v12, %v3885_v51  ;;  %v1115_v16 = vmul.f32 %v1065_v41, %v3929_v7  ;;  %v1621_v62 = vmul.f32 %v1571_v14, %v3929_v7  ;;  %v1292_v4 = vadd.f32 %v3118_v28, %v1241_v3 }
 0x1cb   : > { %v2809_v46 = vpop.eup %2808  ;;  %v1091_v59 = vadd.f32 %v3106_v18, %v1040_v49  ;;  %v1597_v42 = vadd.f32 %v3110_v20, %v1546_v45  ;;  %v1015_v17 = vmul.f32 %v965_v61, %v3955_v22  ;;  %v1521_v3 = vmul.f32 %v1471_v57, %v3955_v22 }
 0x1cc   : > { %v1920_v63 = vmul.f32 %v2809_v46, %v1366_v32  ;;  %v1797_v36 = vand.u32 2147483647, %v1747_v39  ;;  %v1166_v43 = vadd.f32 %v3108_v19, %v1115_v16  ;;  %v1672_v53 = vadd.f32 %v3112_v21, %v1621_v62 }
 0x1cd   : > { %v1141_v47 = vmul.f32 %v1091_v59, %v3935_v54  ;;  %v1647_v31 = vmul.f32 %v1597_v42, %v3935_v54  ;;  %v1066_v35 = vadd.f32 %v3106_v18, %v1015_v17  ;;  %v1392_v25 = vadd.f32 %v3120_v29, %v1341_v0 }
 0x1ce   : > { %v2497_v13 = vpack.c.bf16 %v1920_v63, %v1919_v58  ;;  %v1216_v12 = vmul.f32 %v1166_v43, %v3929_v7  ;;  %v1722_v32 = vmul.f32 %v1672_v53, %v3929_v7  ;;  %v1847_v41 = vadd.f32 1.0, %v1797_v36 }
 0x1cf   : > { %v1192_v14 = vadd.f32 %v3108_v19, %v1141_v47  ;;  %v1698_v9 = vadd.f32 %v3112_v21, %v1647_v31  ;;  %v1572_v49 = vadd.f32 %v3110_v20, %v1521_v3  ;;  %v1945_v61 = vmul.f32 %v2807_v44, %v1391_v37 }
 0x1d0   : > { %v2811_v45 = vpop.eup %2810  ;;  %2594 = vst [vmem:[%s3321_s27 + $0x30] sm:$0xff] %v2497_v13   ;;  %v1772_v39 = vand.u32 2147483647, %v1722_v32  ;;  %v1116_v16 = vmul.f32 %v1066_v35, %v3955_v22  ;;  %v940_v58 = vmul.f32 %v3084_v5, %v3975_v2  ;;  %v1342_v62 = vmul.f32 %v1292_v4, %v3885_v51 }
 0x1d1   : > { %v1946_v0 = vmul.f32 %v2811_v45, %v1392_v25  ;;  %v1267_v57 = vadd.f32 %v3118_v28, %v1216_v12  ;;  %v1748_v46 = vmul.f32 %v1698_v9, %v3935_v54  ;;  %v1367_v59 = vadd.f32 %v3120_v29, %v1316_v33 }
 0x1d2   : > { %v1822_v42 = vadd.f32 1.0, %v1772_v39  ;;  %v1622_v37 = vmul.f32 %v1572_v49, %v3955_v22  ;;  %v2813_v44 = vpop.eup %2812  ;;  %2814 = vrcp.f32 %v1847_v41  ;;  %v1242_v63 = vmul.f32 %v1192_v14, %v3935_v54 }
 0x1d3   : > { %v2562_v17 = vpack.c.bf16 %v1946_v0, %v1945_v61  ;;  %v1798_v36 = vand.u32 2147483647, %v1748_v46  ;;  %v1167_v43 = vadd.f32 %v3108_v19, %v1116_v16  ;;  %v991_v4 = vadd.f32 %v3094_v10, %v940_v58 }
 0x1d4   : > { %2816 = vrcp.f32 %v1822_v42  ;;  %v1673_v51 = vadd.f32 %v3112_v21, %v1622_v37  ;;  %v4012_v53 = vadd.f32 %v3120_v29, %v1342_v62  ;;  %v1317_v33 = vmul.f32 %v1267_v57, %v3929_v7 }
 0x1d5   : > { %2607 = vst [vmem:[%s3321_s27 + $0x98] sm:$0xff] %v2562_v17   ;;  %v1848_v47 = vadd.f32 1.0, %v1798_v36  ;;  %v1446_v31 = vmul.f32 %v3086_v6, %v3975_v2  ;;  %v1041_v3 = vmul.f32 %v991_v4, %v3975_v2  ;;  %v4021_v13 = vadd.f32 %v3663_v26, %v3475_v55 }
 0x1d6   : > { %v1723_v35 = vmul.f32 %v1673_v51, %v3955_v22  ;;  %v4025_v25 = vadd.f32 %v3663_v26, %v3477_v60  ;;  %v4027_v12 = vmul.f32 %v2813_v44, %v1367_v59  ;;  %v1293_v7 = vadd.f32 %v3118_v28, %v1242_v63 }
 0x1d7   : > { %2818 = vrcp.f32 %v1848_v47  ;;  %v1497_v32 = vadd.f32 %v3096_v11, %v1446_v31  ;;  %v1217_v41 = vmul.f32 %v1167_v43, %v3955_v22  ;;  %v1092_v14 = vadd.f32 %v3106_v18, %v1041_v3 }
 0x1d8   : > { %v915_v9 = vmul.f32 %v3084_v5, %v4021_v13  ;;  %v1421_v55 = vmul.f32 %v3086_v6, %v4021_v13  ;;  %v1368_v60 = vadd.f32 %v3120_v29, %v1317_v33  ;;  %v941_v45 = vmul.f32 %v3084_v5, %v4025_v25 }
 0x1d9   : > { %v1547_v49 = vmul.f32 %v1497_v32, %v3975_v2  ;;  %v1447_v61 = vmul.f32 %v3086_v6, %v4025_v25  ;;  %v1773_v39 = vand.u32 2147483647, %v1723_v35  ;;  %v1142_v16 = vmul.f32 %v1092_v14, %v3975_v2 }
 0x1da   : > { %v966_v58 = vadd.f32 %v3094_v10, %v915_v9  ;;  %v1472_v0 = vadd.f32 %v3096_v11, %v1421_v55  ;;  %v992_v57 = vadd.f32 %v3094_v10, %v941_v45  ;;  %v4051_v59 = vadd.f32 %v3663_v26, %v3494_v15 }
 0x1db   : > { %v1598_v62 = vadd.f32 %v3110_v20, %v1547_v49  ;;  %v1498_v46 = vadd.f32 %v3096_v11, %v1447_v61  ;;  %v1343_v42 = vmul.f32 %v1293_v7, %v3935_v54  ;;  %v1193_v37 = vadd.f32 %v3108_v19, %v1142_v16 }
 0x1dc   : > { %v1016_v44 = vmul.f32 %v966_v58, %v4021_v13  ;;  %v1522_v17 = vmul.f32 %v1472_v0, %v4021_v13  ;;  %v1042_v36 = vmul.f32 %v992_v57, %v4025_v25  ;;  %v916_v51 = vmul.f32 %v3084_v5, %v4051_v59 }
 0x1dd   : > { %v1648_v63 = vmul.f32 %v1598_v62, %v3975_v2  ;;  %v1548_v43 = vmul.f32 %v1498_v46, %v4025_v25  ;;  %v1823_v4 = vadd.f32 1.0, %v1773_v39  ;;  %v1243_v15 = vmul.f32 %v1193_v37, %v3975_v2 }
 0x1de   : > { %v1067_v54 = vadd.f32 %v3106_v18, %v1016_v44  ;;  %v1573_v33 = vadd.f32 %v3110_v20, %v1522_v17  ;;  %v1093_v31 = vadd.f32 %v3106_v18, %v1042_v36  ;;  %v967_v3 = vadd.f32 %v3094_v10, %v916_v51 }
 0x1df   : > { %v1699_v47 = vadd.f32 %v3112_v21, %v1648_v63  ;;  %v1599_v35 = vadd.f32 %v3110_v20, %v1548_v43  ;;  %v2815_v7 = vpop.eup %2814  ;;  %v1394_v32 = vadd.f32 %v3120_v29, %v1343_v42  ;;  %v1268_v14 = vadd.f32 %v3118_v28, %v1217_v41 }
 0x1e0   : > { %v1117_v9 = vmul.f32 %v1067_v54, %v4021_v13  ;;  %v1623_v55 = vmul.f32 %v1573_v33, %v4021_v13  ;;  %v1143_v61 = vmul.f32 %v1093_v31, %v4025_v25  ;;  %v1017_v16 = vmul.f32 %v967_v3, %v4051_v59 }
 0x1e1   : > { %v2817_v49 = vpop.eup %2816  ;;  %v1749_v45 = vmul.f32 %v1699_v47, %v3975_v2  ;;  %v1649_v39 = vmul.f32 %v1599_v35, %v4025_v25  ;;  %v1294_v0 = vadd.f32 %v3118_v28, %v1243_v15  ;;  %v1422_v41 = vmul.f32 %v3086_v6, %v4051_v59 }
 0x1e2   : > { %v1922_v58 = vmul.f32 %v2817_v49, %v1368_v60  ;;  %v1674_v62 = vadd.f32 %v3112_v21, %v1623_v55  ;;  %2820 = vrcp.f32 %v1823_v4  ;;  %v1168_v46 = vadd.f32 %v3108_v19, %v1117_v9 }
 0x1e3   : > { %v1799_v57 = vand.u32 2147483647, %v1749_v45  ;;  %v1700_v42 = vadd.f32 %v3112_v21, %v1649_v39  ;;  %v1947_v44 = vmul.f32 %v2815_v7, %v4012_v53  ;;  %v1194_v63 = vadd.f32 %v3108_v19, %v1143_v61 }
 0x1e4   : > { %v2819_v37 = vpop.eup %2818  ;;  %v2502_v17 = vpack.c.bf16 %v1922_v58, %v4027_v12  ;;  %v1724_v60 = vmul.f32 %v1674_v62, %v4021_v13  ;;  %v1068_v4 = vadd.f32 %v3106_v18, %v1017_v16  ;;  %v1318_v15 = vmul.f32 %v1268_v14, %v3955_v22 }
 0x1e5   : > { %v1948_v36 = vmul.f32 %v2819_v37, %v1394_v32  ;;  %v1849_v43 = vadd.f32 1.0, %v1799_v57  ;;  %v1750_v51 = vmul.f32 %v1700_v42, %v4025_v25  ;;  %v1344_v54 = vmul.f32 %v1294_v0, %v3975_v2 }
 0x1e6   : > { %2595 = vst [vmem:[%s3321_s27 + $0x38] sm:$0xff] %v2502_v17   ;;  %v1774_v33 = vand.u32 2147483647, %v1724_v60  ;;  %v1473_v53 = vadd.f32 %v3096_v11, %v1422_v41  ;;  %v1218_v47 = vmul.f32 %v1168_v46, %v4021_v13  ;;  %v1244_v3 = vmul.f32 %v1194_v63, %v4025_v25 }
 0x1e7   : > { %v2567_v12 = vpack.c.bf16 %v1948_v36, %v1947_v44  ;;  %2822 = vrcp.f32 %v1849_v43  ;;  %v1800_v31 = vand.u32 2147483647, %v1750_v51  ;;  %v1118_v9 = vmul.f32 %v1068_v4, %v4051_v59 }
 0x1e8   : > { %v1824_v35 = vadd.f32 1.0, %v1774_v33  ;;  %v1523_v7 = vmul.f32 %v1473_v53, %v4051_v59  ;;  %v4100_v22 = vadd.f32 %v3663_v26, %v3496_v52  ;;  %v4104_v2 = vadd.f32 %v3663_v26, %v3539_v50 }
 0x1e9   : > { %2608 = vst [vmem:[%s3321_s27 + $0xa0] sm:$0xff] %v2567_v12   ;;  %v1850_v32 = vadd.f32 1.0, %v1800_v31  ;;  %v1369_v14 = vadd.f32 %v3120_v29, %v1318_v15  ;;  %v1395_v55 = vadd.f32 %v3120_v29, %v1344_v54  ;;  %v1269_v49 = vadd.f32 %v3118_v28, %v1218_v47 }
 0x1ea   : > { %2824 = vrcp.f32 %v1824_v35  ;;  %v1574_v45 = vadd.f32 %v3110_v20, %v1523_v7  ;;  %v942_v61 = vmul.f32 %v3084_v5, %v4100_v22  ;;  %v1295_v52 = vadd.f32 %v3118_v28, %v1244_v3 }
 0x1eb   : > { %2826 = vrcp.f32 %v1850_v32  ;;  %v1448_v39 = vmul.f32 %v3086_v6, %v4100_v22  ;;  %v917_v50 = vmul.f32 %v3084_v5, %v4104_v2  ;;  %v1423_v16 = vmul.f32 %v3086_v6, %v4104_v2 }
 0x1ec   : > { %v1169_v58 = vadd.f32 %v3108_v19, %v1118_v9  ;;  %v1624_v0 = vmul.f32 %v1574_v45, %v4051_v59  ;;  %v993_v62 = vadd.f32 %v3094_v10, %v942_v61  ;;  %v4124_v41 = vadd.f32 %v3663_v26, %v3541_v8 }
 0x1ed   : > { %v1499_v57 = vadd.f32 %v3096_v11, %v1448_v39  ;;  %v968_v46 = vadd.f32 %v3094_v10, %v917_v50  ;;  %v1474_v42 = vadd.f32 %v3096_v11, %v1423_v16  ;;  %v4131_v37 = vadd.f32 %v3663_v26, %v3570_v30 }
 0x1ee   : > { %v1675_v44 = vadd.f32 %v3112_v21, %v1624_v0  ;;  %v1043_v17 = vmul.f32 %v993_v62, %v4100_v22  ;;  %v943_v60 = vmul.f32 %v3084_v5, %v4124_v41  ;;  %v1449_v8 = vmul.f32 %v3086_v6, %v4124_v41 }
 0x1ef   : > { %v2821_v63 = vpop.eup %2820  ;;  %v1319_v36 = vmul.f32 %v1269_v49, %v4021_v13  ;;  %v1549_v43 = vmul.f32 %v1499_v57, %v4100_v22  ;;  %v1018_v51 = vmul.f32 %v968_v46, %v4104_v2  ;;  %v1524_v30 = vmul.f32 %v1474_v42, %v4104_v2 }
 0x1f0   : > { %v1725_v26 = vmul.f32 %v1675_v44, %v4051_v59  ;;  %v1094_v4 = vadd.f32 %v3106_v18, %v1043_v17  ;;  %v994_v15 = vadd.f32 %v3094_v10, %v943_v60  ;;  %v1500_v54 = vadd.f32 %v3096_v11, %v1449_v8 }
 0x1f1   : > { %v1600_v33 = vadd.f32 %v3110_v20, %v1549_v43  ;;  %v1069_v53 = vadd.f32 %v3106_v18, %v1018_v51  ;;  %v1575_v13 = vadd.f32 %v3110_v20, %v1524_v30  ;;  %v918_v12 = vmul.f32 %v3084_v5, %v4131_v37 }
 0x1f2   : > { %v1345_v47 = vmul.f32 %v1295_v52, %v4025_v25  ;;  %v1219_v31 = vmul.f32 %v1169_v58, %v4051_v59  ;;  %v1044_v35 = vmul.f32 %v994_v15, %v4124_v41  ;;  %v1550_v3 = vmul.f32 %v1500_v54, %v4124_v41 }
 0x1f3   : > { %v1775_v32 = vand.u32 2147483647, %v1725_v26  ;;  %v1650_v9 = vmul.f32 %v1600_v33, %v4100_v22  ;;  %v1119_v49 = vmul.f32 %v1069_v53, %v4104_v2  ;;  %v1625_v45 = vmul.f32 %v1575_v13, %v4104_v2 }
 0x1f4   : > { %v2823_v7 = vpop.eup %2822  ;;  %v1923_v61 = vmul.f32 %v2821_v63, %v1369_v14  ;;  %v1370_v39 = vadd.f32 %v3120_v29, %v1319_v36  ;;  %v1144_v50 = vmul.f32 %v1094_v4, %v4100_v22  ;;  %v1095_v25 = vadd.f32 %v3106_v18, %v1044_v35 }
 0x1f5   : > { %v1701_v52 = vadd.f32 %v3112_v21, %v1650_v9  ;;  %v1676_v16 = vadd.f32 %v3112_v21, %v1625_v45  ;;  %v1601_v58 = vadd.f32 %v3110_v20, %v1550_v3  ;;  %v969_v0 = vadd.f32 %v3094_v10, %v918_v12  ;;  %v4189_v9 = vld [vmem:[%s4434_s3] ss:$0 sm:$0xff] }
 0x1f6   : > { %v1949_v57 = vmul.f32 %v2823_v7, %v1395_v55  ;;  %v1396_v46 = vadd.f32 %v3120_v29, %v1345_v47  ;;  %v1270_v14 = vadd.f32 %v3118_v28, %v1219_v31  ;;  %v1170_v42 = vadd.f32 %v3108_v19, %v1119_v49 }
 0x1f7   : > { %v2825_v62 = vpop.eup %2824  ;;  %v1825_v60 = vadd.f32 1.0, %v1775_v32  ;;  %v1751_v8 = vmul.f32 %v1701_v52, %v4100_v22  ;;  %v1726_v63 = vmul.f32 %v1676_v16, %v4104_v2  ;;  %v1195_v43 = vadd.f32 %v3108_v19, %v1144_v50 }
 0x1f8   : > { %v2827_v44 = vpop.eup %2826  ;;  %v1924_v17 = vmul.f32 %v2825_v62, %v1370_v39  ;;  %v1145_v55 = vmul.f32 %v1095_v25, %v4124_v41  ;;  %v1651_v51 = vmul.f32 %v1601_v58, %v4124_v41  ;;  %v1019_v15 = vmul.f32 %v969_v0, %v4131_v37 }
 0x1f9   : > { %v1950_v36 = vmul.f32 %v2827_v44, %v1396_v46  ;;  %v1801_v26 = vand.u32 2147483647, %v1751_v8  ;;  %v1776_v4 = vand.u32 2147483647, %v1726_v63  ;;  %v1220_v33 = vmul.f32 %v1170_v42, %v4104_v2 }
 0x1fa   : > { %v2507_v30 = vpack.c.bf16 %v1924_v17, %v1923_v61  ;;  %v1702_v53 = vadd.f32 %v3112_v21, %v1651_v51  ;;  %2828 = vrcp.f32 %v1825_v60  ;;  %v1196_v47 = vadd.f32 %v3108_v19, %v1145_v55 }
 0x1fb   : > { %v2572_v54 = vpack.c.bf16 %v1950_v36, %v1949_v57  ;;  %v1851_v13 = vadd.f32 1.0, %v1801_v26  ;;  %v1826_v12 = vadd.f32 1.0, %v1776_v4  ;;  %v1424_v35 = vmul.f32 %v3086_v6, %v4131_v37 }
 0x1fc   : > { %2596 = vst [vmem:[%s3321_s27 + $0x40] sm:$0xff] %v2507_v30   ;;  %v1752_v31 = vmul.f32 %v1702_v53, %v4124_v41  ;;  %v1320_v3 = vmul.f32 %v1270_v14, %v4051_v59  ;;  %v1245_v7 = vmul.f32 %v1195_v43, %v4100_v22  ;;  %v1070_v32 = vadd.f32 %v3106_v18, %v1019_v15 }
 0x1fd   : > { %2609 = vst [vmem:[%s3321_s27 + $0xa8] sm:$0xff] %v2572_v54   ;;  %v4193_v49 = vadd.f32 %v4189_v9, %v3604_v34  ;;  %v1271_v45 = vadd.f32 %v3118_v28, %v1220_v33  ;;  %2830 = vrcp.f32 %v1826_v12  ;;  %v1475_v39 = vadd.f32 %v3096_v11, %v1424_v35 }
 0x1fe   : > { %v1802_v61 = vand.u32 2147483647, %v1752_v31  ;;  %2832 = vrcp.f32 %v1851_v13  ;;  %v4203_v25 = vadd.f32 %v4189_v9, %v3636_v23  ;;  %v1246_v34 = vmul.f32 %v1196_v47, %v4124_v41 }
 0x1ff   : > { %v944_v59 = vmul.f32 %v3084_v5, %v4193_v49  ;;  %v1450_v50 = vmul.f32 %v3086_v6, %v4193_v49  ;;  %v1525_v16 = vmul.f32 %v1475_v39, %v4131_v37  ;;  %v4209_v58 = vadd.f32 %v4189_v9, %v3638_v40 }
 0x200   : > { %v1852_v52 = vadd.f32 1.0, %v1802_v61  ;;  %v1120_v0 = vmul.f32 %v1070_v32, %v4131_v37  ;;  %v919_v46 = vmul.f32 %v3084_v5, %v4203_v25  ;;  %v1425_v14 = vmul.f32 %v3086_v6, %v4203_v25 }
 0x201   : > { %v995_v62 = vadd.f32 %v3094_v10, %v944_v59  ;;  %v1501_v57 = vadd.f32 %v3096_v11, %v1450_v50  ;;  %v1576_v23 = vadd.f32 %v3110_v20, %v1525_v16  ;;  %v945_v42 = vmul.f32 %v3084_v5, %v4209_v58 }
 0x202   : > { %2834 = vrcp.f32 %v1852_v52  ;;  %v1296_v40 = vadd.f32 %v3118_v28, %v1245_v7  ;;  %v970_v60 = vadd.f32 %v3094_v10, %v919_v46  ;;  %v1321_v8 = vmul.f32 %v1271_v45, %v4104_v2 }
 0x203   : > { %v1045_v44 = vmul.f32 %v995_v62, %v4193_v49  ;;  %v1551_v17 = vmul.f32 %v1501_v57, %v4193_v49  ;;  %v1626_v63 = vmul.f32 %v1576_v23, %v4131_v37  ;;  %v1476_v36 = vadd.f32 %v3096_v11, %v1425_v14 }
 0x204   : > { %v996_v43 = vadd.f32 %v3094_v10, %v945_v42  ;;  %v1297_v55 = vadd.f32 %v3118_v28, %v1246_v34  ;;  %v1171_v51 = vadd.f32 %v3108_v19, %v1120_v0  ;;  %v1020_v26 = vmul.f32 %v970_v60, %v4203_v25 }
 0x205   : > { %v1602_v30 = vadd.f32 %v3110_v20, %v1551_v17  ;;  %v1677_v4 = vadd.f32 %v3112_v21, %v1626_v63  ;;  %v1526_v15 = vmul.f32 %v1476_v36, %v4203_v25  ;;  %v1451_v54 = vmul.f32 %v3086_v6, %v4209_v58 }
 0x206   : > { %v1046_v2 = vmul.f32 %v996_v43, %v4209_v58  ;;  %v1371_v33 = vadd.f32 %v3120_v29, %v1320_v3  ;;  %v1096_v53 = vadd.f32 %v3106_v18, %v1045_v44  ;;  %v1071_v12 = vadd.f32 %v3106_v18, %v1020_v26 }
 0x207   : > { %v1652_v13 = vmul.f32 %v1602_v30, %v4193_v49  ;;  %v2829_v47 = vpop.eup %2828  ;;  %v1727_v31 = vmul.f32 %v1677_v4, %v4131_v37  ;;  %v1577_v35 = vadd.f32 %v3110_v20, %v1526_v15  ;;  %v1502_v32 = vadd.f32 %v3096_v11, %v1451_v54 }
 0x208   : > { %v1097_v7 = vadd.f32 %v3106_v18, %v1046_v2  ;;  %v1346_v45 = vmul.f32 %v1296_v40, %v4100_v22  ;;  %v1372_v61 = vadd.f32 %v3120_v29, %v1321_v8  ;;  %v1221_v3 = vmul.f32 %v1171_v51, %v4131_v37 }
 0x209   : > { %v1703_v39 = vadd.f32 %v3112_v21, %v1652_v13  ;;  %v1347_v59 = vmul.f32 %v1297_v55, %v4124_v41  ;;  %v1777_v50 = vand.u32 2147483647, %v1727_v31  ;;  %v1627_v34 = vmul.f32 %v1577_v35, %v4203_v25 }
 0x20a   : > { %v1552_v52 = vmul.f32 %v1502_v32, %v4209_v58  ;;  %v2831_v16 = vpop.eup %2830  ;;  %v1925_v0 = vmul.f32 %v2829_v47, %v1371_v33  ;;  %v1146_v62 = vmul.f32 %v1096_v53, %v4193_v49  ;;  %v1121_v22 = vmul.f32 %v1071_v12, %v4203_v25 }
 0x20b   : > { %v1753_v57 = vmul.f32 %v1703_v39, %v4193_v49  ;;  %v2833_v46 = vpop.eup %2832  ;;  %v1926_v23 = vmul.f32 %v2831_v16, %v1372_v61  ;;  %v1678_v14 = vadd.f32 %v3112_v21, %v1627_v34  ;;  %v1147_v41 = vmul.f32 %v1097_v7, %v4209_v58 }
 0x20c   : > { %v4260_v42 = vadd.f32 %v4189_v9, %v3685_v27  ;;  %v1397_v40 = vadd.f32 %v3120_v29, %v1346_v45  ;;  %v1272_v44 = vadd.f32 %v3118_v28, %v1221_v3  ;;  %v1827_v17 = vadd.f32 1.0, %v1777_v50 }
 0x20d   : > { %v1603_v60 = vadd.f32 %v3110_v20, %v1552_v52  ;;  %v2512_v8 = vpack.c.bf16 %v1926_v23, %v1925_v0  ;;  %v1398_v63 = vadd.f32 %v3120_v29, %v1347_v59  ;;  %v1803_v36 = vand.u32 2147483647, %v1753_v57 }
 0x20e   : > { %v1728_v43 = vmul.f32 %v1678_v14, %v4203_v25  ;;  %v1951_v51 = vmul.f32 %v2833_v46, %v1397_v40  ;;  %v1197_v30 = vadd.f32 %v3108_v19, %v1146_v62  ;;  %v1172_v27 = vadd.f32 %v3108_v19, %v1121_v22 }
 0x20f   : > { %v2835_v55 = vpop.eup %2834  ;;  %v1653_v26 = vmul.f32 %v1603_v60, %v4209_v58  ;;  %2597 = vst [vmem:[%s3321_s27 + $0x48] sm:$0xff] %v2512_v8   ;;  %v1198_v2 = vadd.f32 %v3108_v19, %v1147_v41  ;;  %v920_v54 = vmul.f32 %v3084_v5, %v4260_v42  ;;  %v1322_v33 = vmul.f32 %v1272_v44, %v4131_v37 }
 0x210   : > { %v1952_v4 = vmul.f32 %v2835_v55, %v1398_v63  ;;  %v1778_v15 = vand.u32 2147483647, %v1728_v43  ;;  %2836 = vrcp.f32 %v1827_v17  ;;  %v1853_v12 = vadd.f32 1.0, %v1803_v36 }
 0x211   : > { %v1704_v53 = vadd.f32 %v3112_v21, %v1653_v26  ;;  %v971_v31 = vadd.f32 %v3094_v10, %v920_v54  ;;  %v1247_v35 = vmul.f32 %v1197_v30, %v4193_v49  ;;  %v1426_v32 = vmul.f32 %v3086_v6, %v4260_v42 }
 0x212   : > { %v2577_v13 = vpack.c.bf16 %v1952_v4, %v1951_v51  ;;  %v1828_v47 = vadd.f32 1.0, %v1778_v15  ;;  %v4283_v45 = vadd.f32 %v4189_v9, %v3718_v38  ;;  %v1222_v37 = vmul.f32 %v1172_v27, %v4203_v25 }
 0x213   : > { %v1754_v7 = vmul.f32 %v1704_v53, %v4209_v58  ;;  %v1248_v61 = vmul.f32 %v1198_v2, %v4209_v58  ;;  %v4290_v3 = vadd.f32 %v4189_v9, %v3743_v56  ;;  %v1021_v59 = vmul.f32 %v971_v31, %v4260_v42 }
 0x214   : > { %2610 = vst [vmem:[%s3321_s27 + $0xb0] sm:$0xff] %v2577_v13   ;;  %2838 = vrcp.f32 %v1828_v47  ;;  %v1477_v50 = vadd.f32 %v3096_v11, %v1426_v32  ;;  %v1452_v34 = vmul.f32 %v3086_v6, %v4283_v45  ;;  %v4302_v16 = vadd.f32 %v4189_v9, %v3745_v48 }
 0x215   : > { %v1804_v39 = vand.u32 2147483647, %v1754_v7  ;;  %2840 = vrcp.f32 %v1853_v12  ;;  %v921_v38 = vmul.f32 %v3084_v5, %v4290_v3  ;;  %v1427_v52 = vmul.f32 %v3086_v6, %v4290_v3 }
 0x216   : > { %v1527_v0 = vmul.f32 %v1477_v50, %v4260_v42  ;;  %v946_v62 = vmul.f32 %v3084_v5, %v4283_v45  ;;  %v1503_v57 = vadd.f32 %v3096_v11, %v1452_v34  ;;  %v1273_v22 = vadd.f32 %v3118_v28, %v1222_v37 }
 0x217   : > { %v1854_v56 = vadd.f32 1.0, %v1804_v39  ;;  %v972_v46 = vadd.f32 %v3094_v10, %v921_v38  ;;  %v1478_v23 = vadd.f32 %v3096_v11, %v1427_v52  ;;  %v947_v14 = vmul.f32 %v3084_v5, %v4302_v16 }
 0x218   : > { %v1072_v48 = vadd.f32 %v3106_v18, %v1021_v59  ;;  %v1578_v41 = vadd.f32 %v3110_v20, %v1527_v0  ;;  %v1553_v40 = vmul.f32 %v1503_v57, %v4283_v45  ;;  %v1298_v44 = vadd.f32 %v3118_v28, %v1247_v35 }
 0x219   : > { %2842 = vrcp.f32 %v1854_v56  ;;  %v1299_v17 = vadd.f32 %v3118_v28, %v1248_v61  ;;  %v1022_v60 = vmul.f32 %v972_v46, %v4290_v3  ;;  %v1528_v8 = vmul.f32 %v1478_v23, %v4290_v3 }
 0x21a   : > { %v1628_v63 = vmul.f32 %v1578_v41, %v4260_v42  ;;  %v997_v36 = vadd.f32 %v3094_v10, %v946_v62  ;;  %v1604_v43 = vadd.f32 %v3110_v20, %v1553_v40  ;;  %v1453_v55 = vmul.f32 %v3086_v6, %v4302_v16 }
 0x21b   : > { %v1323_v51 = vmul.f32 %v1273_v22, %v4203_v25  ;;  %v1073_v30 = vadd.f32 %v3106_v18, %v1022_v60  ;;  %v1579_v27 = vadd.f32 %v3110_v20, %v1528_v8  ;;  %v998_v26 = vadd.f32 %v3094_v10, %v947_v14 }
 0x21c   : > { %v1122_v4 = vmul.f32 %v1072_v48, %v4260_v42  ;;  %v1679_v15 = vadd.f32 %v3112_v21, %v1628_v63  ;;  %v1654_v2 = vmul.f32 %v1604_v43, %v4283_v45  ;;  %v1373_v53 = vadd.f32 %v3120_v29, %v1322_v33 }
 0x21d   : > { %v2837_v54 = vpop.eup %2836  ;;  %v1348_v13 = vmul.f32 %v1298_v44, %v4193_v49  ;;  %v1629_v12 = vmul.f32 %v1579_v27, %v4290_v3  ;;  %v1504_v25 = vadd.f32 %v3096_v11, %v1453_v55  ;;  %v1047_v31 = vmul.f32 %v997_v36, %v4283_v45 }
 0x21e   : > { %v1729_v47 = vmul.f32 %v1679_v15, %v4260_v42  ;;  %v1705_v35 = vadd.f32 %v3112_v21, %v1654_v2  ;;  %v1123_v7 = vmul.f32 %v1073_v30, %v4290_v3  ;;  %v1374_v32 = vadd.f32 %v3120_v29, %v1323_v51 }
 0x21f   : > { %v1349_v37 = vmul.f32 %v1299_v17, %v4209_v58  ;;  %v1680_v33 = vadd.f32 %v3112_v21, %v1629_v12  ;;  %v1048_v49 = vmul.f32 %v998_v26, %v4302_v16  ;;  %v1173_v39 = vadd.f32 %v3108_v19, %v1122_v4 }
 0x220   : > { %v1779_v59 = vand.u32 2147483647, %v1729_v47  ;;  %v1755_v50 = vmul.f32 %v1705_v35, %v4283_v45  ;;  %v1554_v34 = vmul.f32 %v1504_v25, %v4302_v16  ;;  %v1927_v38 = vmul.f32 %v2837_v54, %v1373_v53 }
 0x221   : > { %v2839_v61 = vpop.eup %2838  ;;  %v1730_v56 = vmul.f32 %v1680_v33, %v4290_v3  ;;  %v1098_v58 = vadd.f32 %v3106_v18, %v1047_v31  ;;  %v1174_v57 = vadd.f32 %v3108_v19, %v1123_v7  ;;  %v1099_v23 = vadd.f32 %v3106_v18, %v1048_v49 }
 0x222   : > { %v1928_v52 = vmul.f32 %v2839_v61, %v1374_v32  ;;  %v2841_v0 = vpop.eup %2840  ;;  %v1829_v62 = vadd.f32 1.0, %v1779_v59  ;;  %v1605_v14 = vadd.f32 %v3110_v20, %v1554_v34  ;;  %v1399_v48 = vadd.f32 %v3120_v29, %v1348_v13 }
 0x223   : > { %v1780_v46 = vand.u32 2147483647, %v1730_v56  ;;  %v1400_v41 = vadd.f32 %v3120_v29, %v1349_v37  ;;  %v1223_v40 = vmul.f32 %v1173_v39, %v4260_v42  ;;  %v1805_v44 = vand.u32 2147483647, %v1755_v50 }
 0x224   : > { %v2517_v22 = vpack.c.bf16 %v1928_v52, %v1927_v38  ;;  %2844 = vrcp.f32 %v1829_v62  ;;  %v1655_v8 = vmul.f32 %v1605_v14, %v4302_v16  ;;  %v4359_v63 = vadd.f32 %v4189_v9, %v3793_v24 }
 0x225   : > { %v1830_v60 = vadd.f32 1.0, %v1780_v46  ;;  %v1953_v36 = vmul.f32 %v2841_v0, %v1399_v48  ;;  %v1148_v55 = vmul.f32 %v1098_v58, %v4283_v45  ;;  %v1224_v51 = vmul.f32 %v1174_v57, %v4290_v3 }
 0x226   : > { %v2843_v17 = vpop.eup %2842  ;;  %2598 = vst [vmem:[%s3321_s27 + $0x50] sm:$0xff] %v2517_v22   ;;  %v1149_v30 = vmul.f32 %v1099_v23, %v4302_v16  ;;  %v1706_v27 = vadd.f32 %v3112_v21, %v1655_v8  ;;  %v922_v26 = vmul.f32 %v3084_v5, %v4359_v63  ;;  %v1428_v15 = vmul.f32 %v3086_v6, %v4359_v63 }
 0x227   : > { %v1954_v43 = vmul.f32 %v2843_v17, %v1400_v41  ;;  %2846 = vrcp.f32 %v1830_v60  ;;  %v4371_v24 = vadd.f32 %v4189_v9, %v3839_v1  ;;  %v1855_v2 = vadd.f32 1.0, %v1805_v44 }
 0x228   : > { %v1756_v54 = vmul.f32 %v1706_v27, %v4302_v16  ;;  %v973_v53 = vadd.f32 %v3094_v10, %v922_v26  ;;  %v1274_v13 = vadd.f32 %v3118_v28, %v1223_v40  ;;  %v1479_v12 = vadd.f32 %v3096_v11, %v1428_v15 }
 0x229   : > { %v2582_v4 = vpack.c.bf16 %v1954_v43, %v1953_v36  ;;  %v923_v25 = vmul.f32 %v3084_v5, %v4371_v24  ;;  %v1429_v47 = vmul.f32 %v3086_v6, %v4371_v24  ;;  %v1199_v31 = vadd.f32 %v3108_v19, %v1148_v55 }
 0x22a   : > { %v1275_v1 = vadd.f32 %v3118_v28, %v1224_v51  ;;  %v1200_v9 = vadd.f32 %v3108_v19, %v1149_v30  ;;  %v1806_v35 = vand.u32 2147483647, %v1756_v54  ;;  %v1023_v7 = vmul.f32 %v973_v53, %v4359_v63 }
 0x22b   : > { %2611 = vst [vmem:[%s3321_s27 + $0xb8] sm:$0xff] %v2582_v4   ;;  %v1529_v32 = vmul.f32 %v1479_v12, %v4359_v63  ;;  %v974_v37 = vadd.f32 %v3094_v10, %v923_v25  ;;  %v1480_v33 = vadd.f32 %v3096_v11, %v1429_v47  ;;  %2848 = vrcp.f32 %v1855_v2 }
 0x22c   : > { %v1856_v5 = vadd.f32 1.0, %v1806_v35  ;;  %v1324_v49 = vmul.f32 %v1274_v13, %v4260_v42  ;;  %v1249_v59 = vmul.f32 %v1199_v31, %v4283_v45  ;;  %v1325_v50 = vmul.f32 %v1275_v1, %v4290_v3 }
 0x22d   : > { %v1580_v6 = vadd.f32 %v3110_v20, %v1529_v32  ;;  %v1024_v61 = vmul.f32 %v974_v37, %v4371_v24  ;;  %v1530_v39 = vmul.f32 %v1480_v33, %v4371_v24  ;;  %v1250_v34 = vmul.f32 %v1200_v9, %v4302_v16 }
 0x22e   : > { %2850 = vrcp.f32 %v1856_v5  ;;  %v1074_v10 = vadd.f32 %v3106_v18, %v1023_v7  ;;  %v1375_v62 = vadd.f32 %v3120_v29, %v1324_v49  ;;  %v1300_v3 = vadd.f32 %v3118_v28, %v1249_v59 }
 0x22f   : > { %v1630_v11 = vmul.f32 %v1580_v6, %v4359_v63  ;;  %v1075_v38 = vadd.f32 %v3106_v18, %v1024_v61  ;;  %v1581_v42 = vadd.f32 %v3110_v20, %v1530_v39  ;;  %v1376_v58 = vadd.f32 %v3120_v29, %v1325_v50 }
 0x230   : > { %v1301_v57 = vadd.f32 %v3118_v28, %v1250_v34  ;;  %v1124_v46 = vmul.f32 %v1074_v10, %v4359_v63  ;;  %v1350_v44 = vmul.f32 %v1300_v3, %v4283_v45 }
 0x231   : > { %v2845_v52 = vpop.eup %2844  ;;  %v1681_v56 = vadd.f32 %v3112_v21, %v1630_v11  ;;  %v1631_v0 = vmul.f32 %v1581_v42, %v4371_v24  ;;  %v1125_v20 = vmul.f32 %v1075_v38, %v4371_v24 }
 0x232   : > { %v1929_v14 = vmul.f32 %v2845_v52, %v1375_v62  ;;  %v1351_v60 = vmul.f32 %v1301_v57, %v4302_v16  ;;  %v1175_v8 = vadd.f32 %v3108_v19, %v1124_v46  ;;  %v1401_v30 = vadd.f32 %v3120_v29, %v1350_v44 }
 0x233   : > { %v1731_v18 = vmul.f32 %v1681_v56, %v4359_v63  ;;  %v1682_v23 = vadd.f32 %v3112_v21, %v1631_v0  ;;  %v1176_v43 = vadd.f32 %v3108_v19, %v1125_v20 }
 0x234   : > { %v2847_v22 = vpop.eup %2846  ;;  %v1402_v27 = vadd.f32 %v3120_v29, %v1351_v60  ;;  %v1225_v45 = vmul.f32 %v1175_v8, %v4359_v63 }
 0x235   : > { %v1930_v48 = vmul.f32 %v2847_v22, %v1376_v58  ;;  %v1781_v41 = vand.u32 2147483647, %v1731_v18  ;;  %v1732_v40 = vmul.f32 %v1682_v23, %v4371_v24  ;;  %v1226_v16 = vmul.f32 %v1176_v43, %v4371_v24 }
 0x236   : > { %v1276_v2 = vadd.f32 %v3118_v28, %v1225_v45 }
 0x237   : > { %v2522_v17 = vpack.c.bf16 %v1930_v48, %v1929_v14  ;;  %v1831_v36 = vadd.f32 1.0, %v1781_v41  ;;  %v1782_v55 = vand.u32 2147483647, %v1732_v40  ;;  %v1277_v54 = vadd.f32 %v3118_v28, %v1226_v16 }
 0x238   : > { %v2849_v51 = vpop.eup %2848  ;;  %v1326_v53 = vmul.f32 %v1276_v2, %v4359_v63 }
 0x239   : > { %2599 = vst [vmem:[%s3321_s27 + $0x58] sm:$0xff] %v2522_v17   ;;  %2852 = vrcp.f32 %v1831_v36  ;;  %v1832_v21 = vadd.f32 1.0, %v1782_v55  ;;  %v1955_v4 = vmul.f32 %v2849_v51, %v1401_v30  ;;  %v1327_v13 = vmul.f32 %v1277_v54, %v4371_v24 }
 0x23a   : > { %v1377_v25 = vadd.f32 %v3120_v29, %v1326_v53 }
 0x23b   : > { %v2851_v26 = vpop.eup %2850  ;;  %2854 = vrcp.f32 %v1832_v21  ;;  %v1378_v47 = vadd.f32 %v3120_v29, %v1327_v13 }
 0x23c   : > { %v1956_v15 = vmul.f32 %v2851_v26, %v1402_v27 }
 0x23e   : > { %v2587_v19 = vpack.c.bf16 %v1956_v15, %v1955_v4 }
 0x240   : > { %2612 = vst [vmem:[%s3321_s27 + $0xc0] sm:$0xff] %v2587_v19  }
 0x246   : > { %v2853_v12 = vpop.eup %2852 }
 0x247   : > { %v1931_v1 = vmul.f32 %v2853_v12, %v1377_v25 }
 0x248   : > { %v2855_v31 = vpop.eup %2854 }
 0x249   : > { %v1932_v9 = vmul.f32 %v2855_v31, %v1378_v47 }
 0x24b   : > { %v2527_v35 = vpack.c.bf16 %v1932_v9, %v1931_v1 }
 0x24d   : > { %2600 = vst [vmem:[%s3321_s27 + $0x60] sm:$0xff] %v2527_v35  }
 0x24e PF: > { %s15_s15 = sadd.s32 1, %s2883_s15  }
 0x24f   : > { %p12_p1 = scmp.ge.s32.totalorder %s15_s15, 4  }
 0x251   :  { %14 = sbr.rel (!%p12_p1) target bundleno = 1 (0x1), region = 71 }
 0x256   :  { %2229 = vsyncpa [#allocation3], 1 }
 0x257   :  { %2231 = vsyncpa [#allocation3 + $0x1], 1 }

// kernel: rational_network_forward.5
= control target key start
LH: loop header
LB: loop body
LE: loop exit
PB: predicated region body
PF: predicated region fallthrough
CT: control target
= control target key end

     0   :  { %9 = vsyncpa [#allocation3], 0  ;;  %s1340_s15 = smov 0   ;;  %s1719_s0 = inlined_call_operand.vmem [shape: f32[10], index: 0, kind: input, shape index: {}]   ;;  %s1720_s1 = inlined_call_operand.vmem [shape: bf16[192,512], index: 1, kind: input, shape index: {}]   ;;  %s1721_s2 = inlined_call_operand.vmem [shape: bf16[512,128], index: 2, kind: input, shape index: {}]   ;;  %s1722_s3 = inlined_call_operand.vmem [shape: f32[1,128], index: 3, kind: input, shape index: {}]   ;;  %s1723_s4 = inlined_call_operand.vmem [shape: bf16[192,128], index: 4, kind: output, shape index: {}]  }
   0x1 LB: > { %s1004_s16 = sadd.s32 4294967295, %s1312_s15   ;;  %p1006_p0 = scmp.ge.s32.totalorder %s1312_s15, 1  ;;  %s1312_s15 = sphi %s1340_s15, %s15_s15  }
   0x2   : > { %p135_p1 = scmp.lt.s32.totalorder %s1312_s15, 4  ;;  %s148_s19 = sshll.u32 %s1719_s0, 4  ;;  %s149_s19 = int_to_ptr.vmem [resolvable:$true] %s148_s19 }
   0x3   : > { %p1357_p3 = scmp.eq.s32.totalorder %s1004_s16, 0  ;;  %s1287_s22 = scalar_lea.vmem %s149_s19, 16 }
   0x4   : > { %p1351_p2 = pnand %p1006_p0, %p135_p1  ;;  %p1288_p6 = scmp.ne.s32.totalorder %s149_s19, %s1287_s22 }
   0x5   : > { %p1295_p10 = scmp.lt.s32.totalorder %s149_s19, %s149_s19  ;;  %p1296_p11 = scmp.lt.s32.totalorder %s1287_s22, %s1287_s22 }
   0x6   : > { %p1200_p4 = pneg %p1351_p2 }
   0x7   : > { %p1297_p12 = por %p1296_p11, %p1295_p10 }
   0x8   : > { %p1201_p5 = pnand %p1357_p3, %p1200_p4 }
   0xa   : > { %p1289_p7 = pneg %p1201_p5 }
   0xc   : > { %p1290_p8 = pnand %p1289_p7, %p1288_p6 }
   0xe   : > { %p1291_p9 = pneg %p1290_p8 }
  0x10   : > { %p1298_p13 = pnand %p1297_p12, %p1291_p9 }
  0x12   : > { %1301 = shalt.err (!%p1298_p13)
}
  0x13   : > { %s1314_s23 = smov [#allocation2]   ;;  %177 = sbr.rel (%p1351_p2) target bundleno = 337 (0x151), region = 36 }
  0x14   : > { %1203 = dma.vmem_to_smem (!%p1201_p5), %s149_s19, 16, %s1314_s23, [#allocation3]  }
  0x18   : > { %1307 = dma.done.wait (%p1357_p3), [#allocation3], 16  }
  0x19   : > { %1309 = vsyncadd (%p1357_p3), [#allocation3], 4294967280 }
  0x1a   : > { %183 = sfence }
  0x1b   : > { %v1215_v0 = vld [vmem:[%s1721_s2 + $0x78] sm:$0xff]   ;;  %v1219_v4 = vld [vmem:[%s1721_s2 + $0x70] sm:$0xff]   ;;  %v1223_v8 = vld [vmem:[%s1721_s2 + $0x68] sm:$0xff]   ;;  %s1011_s6 = sshll.u32 %s1004_s16, 3  ;;  %s1069_s20 = sld [smem:[#allocation2 + $0x5]] }
  0x1c   : > { %v1216_v1 = vld [vmem:[%s1721_s2 + $0xf8] sm:$0xff]   ;;  %1116 = vmatprep.subr.bf16.mxu0 %v1215_v0  ;;  %v1220_v5 = vld [vmem:[%s1721_s2 + $0xf0] sm:$0xff]   ;;  %v1224_v9 = vld [vmem:[%s1721_s2 + $0xe8] sm:$0xff]   ;;  %p206_p0 = scmp.lt.s32.totalorder %s1011_s6, 23  ;;  %s1073_s21 = sld [smem:[#allocation2 + $0x9]] }
  0x1d   : > { %v1217_v2 = vld [vmem:[%s1721_s2 + $0x38] sm:$0xff]   ;;  %1156 = vmatprep.subr.bf16.mxu1 %v1216_v1  ;;  %v1221_v6 = vld [vmem:[%s1721_s2 + $0x30] sm:$0xff]   ;;  %v1225_v10 = vld [vmem:[%s1721_s2 + $0x28] sm:$0xff]   ;;  %s1068_s22 = sld [smem:[#allocation2 + $0x4]] }
  0x1e   : > { %v1218_v3 = vld [vmem:[%s1721_s2 + $0xb8] sm:$0xff]   ;;  %1117 = vmatpush3.bf16.msra.mxu0 %v1217_v2  ;;  %v1222_v7 = vld [vmem:[%s1721_s2 + $0xb0] sm:$0xff]   ;;  %v1226_v11 = vld [vmem:[%s1721_s2 + $0xa8] sm:$0xff]   ;;  %s1727_s6 = smov (!%p206_p0, %s1011_s6), 23  ;;  %s1072_s23 = sld [smem:[#allocation2 + $0x8]] }
  0x1f   : > { %1157 = vmatpush3.bf16.msra.mxu1 %v1218_v3  ;;  %1118 = vmatprep.subr.bf16.mxu0 %v1219_v4  ;;  %v1227_v12 = vld [vmem:[%s1721_s2 + $0x60] sm:$0xff]   ;;  %v1231_v16 = vld [vmem:[%s1721_s2 + $0x58] sm:$0xff]   ;;  %v1235_v20 = vld [vmem:[%s1721_s2 + $0x50] sm:$0xff]   ;;  %s1084_s30 = sshll.u32 %s1727_s6, 4  ;;  %s1067_s26 = sld [smem:[#allocation2 + $0x3]] }
  0x20   : > { %1158 = vmatprep.subr.bf16.mxu1 %v1220_v5  ;;  %v1228_v13 = vld [vmem:[%s1721_s2 + $0xe0] sm:$0xff]   ;;  %v1232_v17 = vld [vmem:[%s1721_s2 + $0xd8] sm:$0xff]   ;;  %v1236_v21 = vld [vmem:[%s1721_s2 + $0xd0] sm:$0xff]   ;;  %s1469_s14 = scalar_lea.vmem %s1720_s1, %s1084_s30  ;;  %s1071_s27 = sld [smem:[#allocation2 + $0x7]] }
  0x21   : > { %v1229_v14 = vld [vmem:[%s1721_s2 + $0x20] sm:$0xff]   ;;  %v1233_v18 = vld [vmem:[%s1721_s2 + $0x18] sm:$0xff]   ;;  %v1237_v22 = vld [vmem:[%s1721_s2 + $0x10] sm:$0xff]   ;;  %v1499_v58 = vstv %s1069_s20  ;;  %s1505_s28 = sld [smem:[#allocation2 + $0x2]]  ;;  %s1015_s7 = sshll.u32 %s1727_s6, 2 }
  0x22   : > { %1119 = vmatpush3.bf16.msra.mxu0 %v1221_v6  ;;  %v1230_v15 = vld [vmem:[%s1721_s2 + $0xa0] sm:$0xff]   ;;  %v1234_v19 = vld [vmem:[%s1721_s2 + $0x98] sm:$0xff]   ;;  %v1238_v23 = vld [vmem:[%s1721_s2 + $0x90] sm:$0xff]   ;;  %v1501_v59 = vstv %s1073_s21  ;;  %s1507_s29 = sld [smem:[#allocation2 + $0x6]]  ;;  %s1656_s9 = scalar_lea.vmem %s1723_s4, %s1015_s7 }
  0x23   : > { %1159 = vmatpush3.bf16.msra.mxu1 %v1222_v7  ;;  %1120 = vmatprep.subr.bf16.mxu0 %v1223_v8  ;;  %v1239_v24 = vld [vmem:[%s1721_s2 + $0x48] sm:$0xff]   ;;  %v1243_v28 = vld [vmem:[%s1721_s2 + $0x40] sm:$0xff]   ;;  %v1509_v0 = vstv %s1068_s22  ;;  %s1554_s30 = sld [smem:[#allocation2 + $0x1]] }
  0x24   : > { %1160 = vmatprep.subr.bf16.mxu1 %v1224_v9  ;;  %v1240_v25 = vld [vmem:[%s1721_s2 + $0xc8] sm:$0xff]   ;;  %v1244_v29 = vld [vmem:[%s1721_s2 + $0xc0] sm:$0xff]   ;;  %v1511_v1 = vstv %s1072_s23  ;;  %s1580_s5 = sld [smem:[#allocation2]] }
  0x25   : > { %v1241_v26 = vld [vmem:[%s1721_s2 + $0x8] sm:$0xff]   ;;  %v1245_v30 = vld [vmem:[%s1721_s2] sm:$0xff]  }
  0x26   : > { %1121 = vmatpush3.bf16.msra.mxu0 %v1225_v10  ;;  %v1242_v27 = vld [vmem:[%s1721_s2 + $0x88] sm:$0xff]   ;;  %v1246_v31 = vld [vmem:[%s1721_s2 + $0x80] sm:$0xff]  }
  0x27   : > { %1161 = vmatpush3.bf16.msra.mxu1 %v1226_v11  ;;  %1122 = vmatprep.subr.bf16.mxu0 %v1227_v12  ;;  %v1247_v32 = vld [vmem:[%s1469_s14] ss:$16 sps:$4 sm:$0xff]   ;;  %v1249_v33 = vld [vmem:[%s1469_s14 + $0x4] ss:$16 sps:$4 sm:$0xff]   ;;  %v1250_v34 = vld [vmem:[%s1469_s14 + $0x8] ss:$16 sps:$4 sm:$0xff]  }
  0x28   : > { %1162 = vmatprep.subr.bf16.mxu1 %v1228_v13  ;;  %v1252_v35 = vld [vmem:[%s1469_s14 + $0xc] ss:$16 sps:$4 sm:$0xff]   ;;  %610 = vmatprep.mubr.bf16.mxu0 %v1249_v33  ;;  %v1253_v36 = vld [vmem:[%s1469_s14 + $0x24] ss:$16 sps:$4 sm:$0xff]   ;;  %v1257_v38 = vld [vmem:[%s1469_s14 + $0x20] ss:$16 sps:$4 sm:$0xff]  }
  0x29   : > { %675 = vmatprep.mubr.bf16.mxu1 %v1252_v35  ;;  %v1255_v37 = vld [vmem:[%s1469_s14 + $0x2c] ss:$16 sps:$4 sm:$0xff]   ;;  %v1258_v39 = vld [vmem:[%s1469_s14 + $0x28] ss:$16 sps:$4 sm:$0xff]   ;;  %v1259_v40 = vld [vmem:[%s1469_s14 + $0x44] ss:$16 sps:$4 sm:$0xff]  }
  0x2a   : > { %1123 = vmatpush3.bf16.msra.mxu0 %v1229_v14  ;;  %v1261_v41 = vld [vmem:[%s1469_s14 + $0x4c] ss:$16 sps:$4 sm:$0xff]   ;;  %v1263_v42 = vld [vmem:[%s1469_s14 + $0x40] ss:$16 sps:$4 sm:$0xff]   ;;  %v1264_v43 = vld [vmem:[%s1469_s14 + $0x48] ss:$16 sps:$4 sm:$0xff]   ;;  %v1522_v14 = vstv %s1067_s26 }
  0x2b   : > { %1163 = vmatpush3.bf16.msra.mxu1 %v1230_v15  ;;  %1124 = vmatprep.subr.bf16.mxu0 %v1231_v16  ;;  %v1265_v44 = vld [vmem:[%s1469_s14 + $0x64] ss:$16 sps:$4 sm:$0xff]   ;;  %v1267_v45 = vld [vmem:[%s1469_s14 + $0x6c] ss:$16 sps:$4 sm:$0xff]   ;;  %v1269_v46 = vld [vmem:[%s1469_s14 + $0x60] ss:$16 sps:$4 sm:$0xff]   ;;  %v1524_v15 = vstv %s1071_s27 }
  0x2c   : > { %1164 = vmatprep.subr.bf16.mxu1 %v1232_v17  ;;  %v1270_v47 = vld [vmem:[%s1469_s14 + $0x68] ss:$16 sps:$4 sm:$0xff]   ;;  %v1496_v50 = vld [vmem:[%s1722_s3] ss:$0 sm:$0xff] }
  0x2e   : > { %1125 = vmatpush3.bf16.msra.mxu0 %v1233_v18 }
  0x2f   : > { %1165 = vmatpush3.bf16.msra.mxu1 %v1234_v19  ;;  %1126 = vmatprep.subr.bf16.mxu0 %v1235_v20 }
  0x30   : > { %1166 = vmatprep.subr.bf16.mxu1 %v1236_v21 }
  0x32   : > { %1127 = vmatpush3.bf16.msra.mxu0 %v1237_v22 }
  0x33   : > { %1167 = vmatpush3.bf16.msra.mxu1 %v1238_v23  ;;  %1128 = vmatprep.subr.bf16.mxu0 %v1239_v24 }
  0x34   : > { %1168 = vmatprep.subr.bf16.mxu1 %v1240_v25 }
  0x36   : > { %1129 = vmatpush3.bf16.msra.mxu0 %v1241_v26 }
  0x37   : > { %1169 = vmatpush3.bf16.msra.mxu1 %v1242_v27  ;;  %1130 = vmatprep.subr.bf16.mxu0 %v1243_v28 }
  0x38   : > { %1170 = vmatprep.subr.bf16.mxu1 %v1244_v29 }
  0x3a   : > { %1131 = vmatpush3.bf16.msra.mxu0 %v1245_v30  ;;  %v1538_v30 = vstv %s1505_s28 }
  0x3b   : > { %1171 = vmatpush3.bf16.msra.mxu1 %v1246_v31  ;;  %v1541_v31 = vstv %s1507_s29 }
  0x3d   : > { %611 = vmatmul.mubr.bf16.vlgmr.msra.gmra.mxu0 %v1247_v32 }
  0x3e   : > { %676 = vmatmul.mubr.bf16.vlgmr.msra.gmra.mxu1 %v1250_v34  ;;  %618 = vmatprep.mubr.bf16.mxu0 %v1253_v36 }
  0x3f   : > { %683 = vmatprep.mubr.bf16.mxu1 %v1255_v37 }
  0x45   : > { %619 = vmatmul.mubr.bf16.gmra.mxu0 %v1257_v38 }
  0x46   : > { %684 = vmatmul.mubr.bf16.gmra.mxu1 %v1258_v39  ;;  %626 = vmatprep.mubr.bf16.mxu0 %v1259_v40 }
  0x47   : > { %691 = vmatprep.mubr.bf16.mxu1 %v1261_v41 }
  0x4d   : > { %627 = vmatmul.mubr.bf16.gmra.mxu0 %v1263_v42 }
  0x4e   : > { %692 = vmatmul.mubr.bf16.gmra.mxu1 %v1264_v43  ;;  %634 = vmatprep.mubr.bf16.mxu0 %v1265_v44 }
  0x4f   : > { %699 = vmatprep.mubr.bf16.mxu1 %v1267_v45 }
  0x55   : > { %635 = vmatmul.mubr.bf16.gmra.mxu0 %v1269_v46 }
  0x56   : > { %700 = vmatmul.mubr.bf16.gmra.mxu1 %v1270_v47 }
  0xfd   : > { %v1132_v48 = vpop.f32.mrf.mxu0 }
  0xfe   : > { %v1172_v49 = vpop.f32.mrf.mxu1 }
  0xff   : > { %v1133_v51 = vpop.f32.mrf.mxu0 }
 0x100   : > { %v1134_v52 = vadd.f32 %v1133_v51, %v1132_v48  ;;  %v1173_v53 = vpop.f32.mrf.mxu1 }
 0x101   : > { %v1135_v54 = vpop.f32.mrf.mxu0  ;;  %v1174_v56 = vadd.f32 %v1173_v53, %v1172_v49 }
 0x102   : > { %v613_v55 = vadd.f32 %v1134_v52, %v1496_v50  ;;  %v1175_v57 = vpop.f32.mrf.mxu1 }
 0x103   : > { %v1136_v60 = vpop.f32.mrf.mxu0 }
 0x104   : > { %v1503_v61 = vadd.f32 %v1174_v56, %v613_v55  ;;  %v1137_v62 = vadd.f32 %v1136_v60, %v1135_v54  ;;  %v1176_v63 = vpop.f32.mrf.mxu1 }
 0x105   : > { %v1138_v2 = vpop.f32.mrf.mxu0  ;;  %v1177_v6 = vadd.f32 %v1176_v63, %v1175_v57 }
 0x106   : > { %v719_v3 = vmul.f32 %v1499_v58, %v1503_v61  ;;  %v805_v4 = vmul.f32 %v1501_v59, %v1503_v61  ;;  %v616_v5 = vadd.f32 %v1137_v62, %v1496_v50  ;;  %v1178_v7 = vpop.f32.mrf.mxu1 }
 0x107   : > { %v1139_v8 = vpop.f32.mrf.mxu0 }
 0x108   : > { %v728_v9 = vadd.f32 %v1509_v0, %v719_v3  ;;  %v814_v10 = vadd.f32 %v1511_v1, %v805_v4  ;;  %v1520_v11 = vadd.f32 %v1177_v6, %v616_v5  ;;  %v1140_v12 = vadd.f32 %v1139_v8, %v1138_v2  ;;  %v1179_v13 = vpop.f32.mrf.mxu1 }
 0x109   : > { %v1141_v16 = vpop.f32.mrf.mxu0  ;;  %v1180_v23 = vadd.f32 %v1179_v13, %v1178_v7 }
 0x10a   : > { %v736_v17 = vmul.f32 %v728_v9, %v1503_v61  ;;  %v822_v18 = vmul.f32 %v814_v10, %v1503_v61  ;;  %v720_v19 = vmul.f32 %v1499_v58, %v1520_v11  ;;  %v806_v20 = vmul.f32 %v1501_v59, %v1520_v11  ;;  %v1181_v21 = vpop.f32.mrf.mxu1 }
 0x10b   : > { %v621_v22 = vadd.f32 %v1140_v12, %v1496_v50  ;;  %v1142_v24 = vpop.f32.mrf.mxu0 }
 0x10c   : > { %v745_v25 = vadd.f32 %v1522_v14, %v736_v17  ;;  %v831_v26 = vadd.f32 %v1524_v15, %v822_v18  ;;  %v729_v27 = vadd.f32 %v1509_v0, %v720_v19  ;;  %v815_v28 = vadd.f32 %v1511_v1, %v806_v20  ;;  %v1182_v29 = vpop.f32.mrf.mxu1 }
 0x10d   : > { %v1543_v32 = vadd.f32 %v1180_v23, %v621_v22  ;;  %v1143_v33 = vadd.f32 %v1142_v24, %v1141_v16  ;;  %v1144_v34 = vpop.f32.mrf.mxu0  ;;  %v1183_v43 = vadd.f32 %v1182_v29, %v1181_v21  ;;  %v1587_v24 = vstv %s1554_s30 }
 0x10e   : > { %v753_v35 = vmul.f32 %v745_v25, %v1503_v61  ;;  %v839_v36 = vmul.f32 %v831_v26, %v1503_v61  ;;  %v737_v37 = vmul.f32 %v729_v27, %v1520_v11  ;;  %v823_v38 = vmul.f32 %v815_v28, %v1520_v11  ;;  %v1184_v39 = vpop.f32.mrf.mxu1 }
 0x10f   : > { %v721_v40 = vmul.f32 %v1499_v58, %v1543_v32  ;;  %v807_v41 = vmul.f32 %v1501_v59, %v1543_v32  ;;  %v624_v42 = vadd.f32 %v1143_v33, %v1496_v50  ;;  %v1145_v44 = vpop.f32.mrf.mxu0 }
 0x110   : > { %v848_v45 = vadd.f32 %v1541_v31, %v839_v36  ;;  %v746_v46 = vadd.f32 %v1522_v14, %v737_v37  ;;  %v832_v47 = vadd.f32 %v1524_v15, %v823_v38  ;;  %v1185_v48 = vpop.f32.mrf.mxu1  ;;  %v762_v54 = vadd.f32 %v1538_v30, %v753_v35 }
 0x111   : > { %v730_v49 = vadd.f32 %v1509_v0, %v721_v40  ;;  %v816_v51 = vadd.f32 %v1511_v1, %v807_v41  ;;  %v1561_v52 = vadd.f32 %v1183_v43, %v624_v42  ;;  %v1147_v53 = vpop.f32.mrf.mxu0  ;;  %v1146_v17 = vadd.f32 %v1145_v44, %v1144_v34 }
 0x112   : > { %v856_v55 = vmul.f32 %v848_v45, %v1503_v61  ;;  %v754_v56 = vmul.f32 %v746_v46, %v1520_v11  ;;  %v840_v57 = vmul.f32 %v832_v47, %v1520_v11  ;;  %v1187_v60 = vpop.f32.mrf.mxu1  ;;  %v770_v20 = vmul.f32 %v762_v54, %v1503_v61 }
 0x113   : > { %v738_v62 = vmul.f32 %v730_v49, %v1543_v32  ;;  %v824_v63 = vmul.f32 %v816_v51, %v1543_v32  ;;  %v722_v2 = vmul.f32 %v1499_v58, %v1561_v52  ;;  %v808_v3 = vmul.f32 %v1501_v59, %v1561_v52  ;;  %v1148_v4 = vpop.f32.mrf.mxu0 }
 0x114   : > { %v864_v5 = vand.u32 2147483647, %v856_v55  ;;  %v763_v6 = vadd.f32 %v1538_v30, %v754_v56  ;;  %v849_v7 = vadd.f32 %v1541_v31, %v840_v57  ;;  %v1188_v18 = vpop.f32.mrf.mxu1  ;;  %v629_v35 = vadd.f32 %v1146_v17, %v1496_v50 }
 0x115   : > { %v747_v8 = vadd.f32 %v1522_v14, %v738_v62  ;;  %v833_v9 = vadd.f32 %v1524_v15, %v824_v63  ;;  %v731_v10 = vadd.f32 %v1509_v0, %v722_v2  ;;  %v817_v12 = vadd.f32 %v1511_v1, %v808_v3  ;;  %v1150_v19 = vpop.f32.mrf.mxu0 }
 0x116   : > { %v872_v13 = vadd.f32 1.0, %v864_v5  ;;  %v857_v16 = vmul.f32 %v849_v7, %v1520_v11  ;;  %v771_v25 = vmul.f32 %v763_v6, %v1520_v11  ;;  %v1186_v36 = vadd.f32 %v1185_v48, %v1184_v39  ;;  %v1190_v37 = vpop.f32.mrf.mxu1 }
 0x117   : > { %v841_v21 = vmul.f32 %v833_v9, %v1543_v32  ;;  %v739_v22 = vmul.f32 %v731_v10, %v1561_v52  ;;  %v825_v23 = vmul.f32 %v817_v12, %v1561_v52  ;;  %v755_v27 = vmul.f32 %v747_v8, %v1543_v32  ;;  %v1151_v38 = vpop.f32.mrf.mxu0 }
 0x118   : > { %v865_v26 = vand.u32 2147483647, %v857_v16  ;;  %1271 = vrcp.f32 %v872_v13  ;;  %v779_v40 = vadd.f32 %v1587_v24, %v770_v20  ;;  %v780_v44 = vadd.f32 %v1587_v24, %v771_v25  ;;  %v1191_v57 = vpop.f32.mrf.mxu1 }
 0x119   : > { %v850_v28 = vadd.f32 %v1541_v31, %v841_v21  ;;  %v748_v29 = vadd.f32 %v1522_v14, %v739_v22  ;;  %v834_v33 = vadd.f32 %v1524_v15, %v825_v23  ;;  %v1600_v45 = vadd.f32 %v1186_v36, %v629_v35  ;;  %v1153_v62 = vpop.f32.mrf.mxu0 }
 0x11a   : > { %v873_v34 = vadd.f32 1.0, %v865_v26  ;;  %v1149_v46 = vadd.f32 %v1148_v4, %v1147_v53  ;;  %v764_v47 = vadd.f32 %v1538_v30, %v755_v27  ;;  %v1189_v56 = vadd.f32 %v1188_v18, %v1187_v60  ;;  %v1193_v17 = vpop.f32.mrf.mxu1 }
 0x11b   : > { %v858_v41 = vmul.f32 %v850_v28, %v1543_v32  ;;  %v756_v42 = vmul.f32 %v748_v29, %v1561_v52  ;;  %v842_v43 = vmul.f32 %v834_v33, %v1561_v52  ;;  %v723_v51 = vmul.f32 %v1499_v58, %v1600_v45  ;;  %v1154_v18 = vpop.f32.mrf.mxu0 }
 0x11c   : > { %1273 = vrcp.f32 %v873_v34  ;;  %v809_v54 = vmul.f32 %v1501_v59, %v1600_v45  ;;  %v632_v55 = vadd.f32 %v1149_v46, %v1496_v50  ;;  %v1611_v63 = vstv %s1580_s5  ;;  %v1194_v33 = vpop.f32.mrf.mxu1 }
 0x11d   : > { %v866_v39 = vand.u32 2147483647, %v858_v41  ;;  %v765_v48 = vadd.f32 %v1538_v30, %v756_v42  ;;  %v851_v49 = vadd.f32 %v1541_v31, %v842_v43  ;;  %v732_v3 = vadd.f32 %v1509_v0, %v723_v51 }
 0x11e   : > { %v818_v4 = vadd.f32 %v1511_v1, %v809_v54  ;;  %v1616_v5 = vadd.f32 %v1189_v56, %v632_v55  ;;  %v1152_v6 = vadd.f32 %v1151_v38, %v1150_v19  ;;  %v787_v7 = vmul.f32 %v779_v40, %v1503_v61 }
 0x11f   : > { %v874_v53 = vadd.f32 1.0, %v866_v39  ;;  %v859_v2 = vmul.f32 %v851_v49, %v1561_v52  ;;  %v788_v8 = vmul.f32 %v780_v44, %v1520_v11  ;;  %v772_v60 = vmul.f32 %v764_v47, %v1543_v32 }
 0x120   : > { %v773_v10 = vmul.f32 %v765_v48, %v1561_v52  ;;  %v826_v12 = vmul.f32 %v818_v4, %v1600_v45  ;;  %v724_v13 = vmul.f32 %v1499_v58, %v1616_v5  ;;  %v810_v16 = vmul.f32 %v1501_v59, %v1616_v5 }
 0x121   : > { %v867_v9 = vand.u32 2147483647, %v859_v2  ;;  %1275 = vrcp.f32 %v874_v53  ;;  %v637_v61 = vadd.f32 %v1152_v6, %v1496_v50  ;;  %v1192_v11 = vadd.f32 %v1191_v57, %v1190_v37 }
 0x122   : > { %v740_v20 = vmul.f32 %v732_v3, %v1600_v45  ;;  %v835_v21 = vadd.f32 %v1524_v15, %v826_v12  ;;  %v733_v22 = vadd.f32 %v1509_v0, %v724_v13  ;;  %v819_v23 = vadd.f32 %v1511_v1, %v810_v16 }
 0x123   : > { %v875_v19 = vadd.f32 1.0, %v867_v9  ;;  %v1632_v25 = vadd.f32 %v1192_v11, %v637_v61  ;;  %v1155_v26 = vadd.f32 %v1154_v18, %v1153_v62  ;;  %v796_v27 = vadd.f32 %v1611_v63, %v787_v7 }
 0x124   : > { %v843_v28 = vmul.f32 %v835_v21, %v1600_v45  ;;  %v741_v29 = vmul.f32 %v733_v22, %v1616_v5  ;;  %v781_v35 = vadd.f32 %v1587_v24, %v772_v60  ;;  %v827_v36 = vmul.f32 %v819_v23, %v1616_v5 }
 0x125   : > { %1277 = vrcp.f32 %v875_v19  ;;  %v1272_v34 = vpop.eup %1271  ;;  %v811_v37 = vmul.f32 %v1501_v59, %v1632_v25  ;;  %v640_v38 = vadd.f32 %v1155_v26, %v1496_v50  ;;  %v797_v40 = vadd.f32 %v1611_v63, %v788_v8 }
 0x126   : > { %v782_v41 = vadd.f32 %v1587_v24, %v773_v10  ;;  %v749_v42 = vadd.f32 %v1522_v14, %v740_v20  ;;  %v852_v43 = vadd.f32 %v1541_v31, %v843_v28  ;;  %v750_v46 = vadd.f32 %v1522_v14, %v741_v29 }
 0x127   : > { %v836_v47 = vadd.f32 %v1524_v15, %v827_v36  ;;  %v820_v39 = vadd.f32 %v1511_v1, %v811_v37  ;;  %v1195_v48 = vadd.f32 %v1194_v33, %v1193_v17  ;;  %v888_v49 = vmul.f32 %v1272_v34, %v796_v27 }
 0x128   : > { %v860_v50 = vmul.f32 %v852_v43, %v1600_v45  ;;  %v725_v54 = vmul.f32 %v1499_v58, %v1632_v25  ;;  %v789_v55 = vmul.f32 %v781_v35, %v1543_v32  ;;  %v790_v2 = vmul.f32 %v782_v41, %v1561_v52 }
 0x129   : > { %v1274_v44 = vpop.eup %1273  ;;  %v844_v56 = vmul.f32 %v836_v47, %v1616_v5  ;;  %v828_v57 = vmul.f32 %v820_v39, %v1632_v25  ;;  %v1661_v62 = vadd.f32 %v1195_v48, %v640_v38  ;;  %v757_v3 = vmul.f32 %v749_v42, %v1600_v45 }
 0x12a   : > { %v889_v51 = vmul.f32 %v1274_v44, %v797_v40  ;;  %v868_v4 = vand.u32 2147483647, %v860_v50  ;;  %v758_v6 = vmul.f32 %v750_v46, %v1616_v5  ;;  %v734_v60 = vadd.f32 %v1509_v0, %v725_v54 }
 0x12b   : > { %v853_v7 = vadd.f32 %v1541_v31, %v844_v56  ;;  %v837_v8 = vadd.f32 %v1524_v15, %v828_v57  ;;  %v726_v32 = vmul.f32 %v1499_v58, %v1661_v62  ;;  %v812_v9 = vmul.f32 %v1501_v59, %v1661_v62 }
 0x12c   : > { %v1096_v53 = vpack.c.bf16 %v889_v51, %v888_v49  ;;  %v876_v10 = vadd.f32 1.0, %v868_v4  ;;  %v798_v16 = vadd.f32 %v1611_v63, %v789_v55  ;;  %v799_v17 = vadd.f32 %v1611_v63, %v790_v2 }
 0x12d   : > { %v861_v52 = vmul.f32 %v853_v7, %v1616_v5  ;;  %v845_v12 = vmul.f32 %v837_v8, %v1632_v25  ;;  %v766_v18 = vadd.f32 %v1538_v30, %v757_v3  ;;  %v735_v58 = vadd.f32 %v1509_v0, %v726_v32 }
 0x12e   : > { %1097 = vst [vmem:[%s1656_s9] sm:$0xff] %v1096_v53   ;;  %v1276_v13 = vpop.eup %1275  ;;  %v767_v19 = vadd.f32 %v1538_v30, %v758_v6  ;;  %v821_v59 = vadd.f32 %v1511_v1, %v812_v9  ;;  %v742_v21 = vmul.f32 %v734_v60, %v1632_v25  ;;  %1279 = vrcp.f32 %v876_v10 }
 0x12f   : > { %v869_v61 = vand.u32 2147483647, %v861_v52  ;;  %v854_v11 = vadd.f32 %v1541_v31, %v845_v12  ;;  %v743_v22 = vmul.f32 %v735_v58, %v1661_v62  ;;  %v890_v23 = vmul.f32 %v1276_v13, %v798_v16 }
 0x130   : > { %v829_v0 = vmul.f32 %v821_v59, %v1661_v62  ;;  %v774_v33 = vmul.f32 %v766_v18, %v1600_v45  ;;  %v775_v34 = vmul.f32 %v767_v19, %v1616_v5  ;;  %v751_v1 = vadd.f32 %v1522_v14, %v742_v21 }
 0x131   : > { %v877_v27 = vadd.f32 1.0, %v869_v61  ;;  %v862_v28 = vmul.f32 %v854_v11, %v1632_v25  ;;  %v752_v35 = vadd.f32 %v1522_v14, %v743_v22 }
 0x132   : > { %v1278_v20 = vpop.eup %1277  ;;  %v838_v36 = vadd.f32 %v1524_v15, %v829_v0  ;;  %v783_v40 = vadd.f32 %v1587_v24, %v774_v33  ;;  %v784_v41 = vadd.f32 %v1587_v24, %v775_v34  ;;  %v759_v42 = vmul.f32 %v751_v1, %v1632_v25 }
 0x133   : > { %v891_v26 = vmul.f32 %v1278_v20, %v799_v17  ;;  %1281 = vrcp.f32 %v877_v27  ;;  %v870_v37 = vand.u32 2147483647, %v862_v28  ;;  %v760_v43 = vmul.f32 %v752_v35, %v1661_v62 }
 0x134   : > { %v846_v38 = vmul.f32 %v838_v36, %v1661_v62  ;;  %v791_v14 = vmul.f32 %v783_v40, %v1600_v45  ;;  %v792_v15 = vmul.f32 %v784_v41, %v1616_v5  ;;  %v768_v39 = vadd.f32 %v1538_v30, %v759_v42 }
 0x135   : > { %v1101_v29 = vpack.c.bf16 %v891_v26, %v890_v23  ;;  %v878_v46 = vadd.f32 1.0, %v870_v37  ;;  %v769_v48 = vadd.f32 %v1538_v30, %v760_v43 }
 0x136   : > { %v855_v44 = vadd.f32 %v1541_v31, %v846_v38  ;;  %v800_v54 = vadd.f32 %v1611_v63, %v791_v14  ;;  %v801_v31 = vadd.f32 %v1611_v63, %v792_v15  ;;  %v776_v56 = vmul.f32 %v768_v39, %v1632_v25 }
 0x137   : > { %1113 = vst [vmem:[%s1656_s9 + $0x8] sm:$0xff] %v1101_v29   ;;  %1283 = vrcp.f32 %v878_v46  ;;  %v777_v45 = vmul.f32 %v769_v48, %v1661_v62 }
 0x138   : > { %v863_v47 = vmul.f32 %v855_v44, %v1661_v62  ;;  %v785_v30 = vadd.f32 %v1587_v24, %v776_v56 }
 0x139   : > { %v786_v2 = vadd.f32 %v1587_v24, %v777_v45 }
 0x13a   : > { %v871_v49 = vand.u32 2147483647, %v863_v47  ;;  %v793_v3 = vmul.f32 %v785_v30, %v1632_v25 }
 0x13b   : > { %v1280_v51 = vpop.eup %1279  ;;  %v794_v4 = vmul.f32 %v786_v2, %v1661_v62 }
 0x13c   : > { %v879_v50 = vadd.f32 1.0, %v871_v49  ;;  %v892_v5 = vmul.f32 %v1280_v51, %v800_v54  ;;  %v802_v7 = vadd.f32 %v1611_v63, %v793_v3 }
 0x13d   : > { %v803_v8 = vadd.f32 %v1611_v63, %v794_v4 }
 0x13e   : > { %1285 = vrcp.f32 %v879_v50 }
 0x140   : > { %v1282_v55 = vpop.eup %1281 }
 0x141   : > { %v893_v57 = vmul.f32 %v1282_v55, %v801_v31 }
 0x143   : > { %v1106_v53 = vpack.c.bf16 %v893_v57, %v892_v5 }
 0x144   : > { %v1284_v6 = vpop.eup %1283 }
 0x145   : > { %1114 = vst [vmem:[%s1656_s9 + $0x10] sm:$0xff] %v1106_v53   ;;  %v894_v60 = vmul.f32 %v1284_v6, %v802_v7 }
 0x14b   : > { %v1286_v32 = vpop.eup %1285 }
 0x14c   : > { %v895_v9 = vmul.f32 %v1286_v32, %v803_v8 }
 0x14e   : > { %v1111_v10 = vpack.c.bf16 %v895_v9, %v894_v60 }
 0x150   : > { %1115 = vst [vmem:[%s1656_s9 + $0x18] sm:$0xff] %v1111_v10  }
 0x151 PF: > { %s15_s15 = sadd.s32 1, %s1312_s15  }
 0x152   : > { %p12_p1 = scmp.ge.s32.totalorder %s15_s15, 5  }
 0x154   :  { %14 = sbr.rel (!%p12_p1) target bundleno = 1 (0x1), region = 71 }
 0x159   :  { %958 = vsyncpa [#allocation3], 1 }
 0x15a   :  { %960 = vsyncpa [#allocation3 + $0x1], 1 }

// kernel: rational_network_forward.6
= control target key start
LH: loop header
LB: loop body
LE: loop exit
PB: predicated region body
PF: predicated region fallthrough
CT: control target
= control target key end

     0   :  { %9 = vsyncpa [#allocation3], 0  ;;  %s1217_s15 = smov 0   ;;  %s1430_s0 = inlined_call_operand.vmem [shape: f32[10], index: 0, kind: input, shape index: {}]   ;;  %s1431_s1 = inlined_call_operand.vmem [shape: bf16[128,576], index: 1, kind: input, shape index: {}]   ;;  %s1432_s2 = inlined_call_operand.vmem [shape: bf16[576,128], index: 2, kind: input, shape index: {}]   ;;  %s1433_s3 = inlined_call_operand.vmem [shape: f32[1,128], index: 3, kind: input, shape index: {}]   ;;  %s1434_s4 = inlined_call_operand.vmem [shape: bf16[128,128], index: 4, kind: output, shape index: {}]  }
   0x1 LB: > { %s922_s16 = sadd.s32 4294967295, %s1189_s15   ;;  %p924_p0 = scmp.ge.s32.totalorder %s1189_s15, 1  ;;  %s1189_s15 = sphi %s1217_s15, %s15_s15  }
   0x2   : > { %p135_p1 = scmp.lt.s32.totalorder %s1189_s15, 5  ;;  %s148_s19 = sshll.u32 %s1430_s0, 4  ;;  %s149_s19 = int_to_ptr.vmem [resolvable:$true] %s148_s19 }
   0x3   : > { %p1234_p3 = scmp.eq.s32.totalorder %s922_s16, 0  ;;  %s1164_s22 = scalar_lea.vmem %s149_s19, 16 }
   0x4   : > { %p1228_p2 = pnand %p924_p0, %p135_p1  ;;  %p1165_p6 = scmp.ne.s32.totalorder %s149_s19, %s1164_s22 }
   0x5   : > { %p1172_p10 = scmp.lt.s32.totalorder %s149_s19, %s149_s19  ;;  %p1173_p11 = scmp.lt.s32.totalorder %s1164_s22, %s1164_s22 }
   0x6   : > { %p1091_p4 = pneg %p1228_p2 }
   0x7   : > { %p1174_p12 = por %p1173_p11, %p1172_p10 }
   0x8   : > { %p1092_p5 = pnand %p1234_p3, %p1091_p4 }
   0xa   : > { %p1166_p7 = pneg %p1092_p5 }
   0xc   : > { %p1167_p8 = pnand %p1166_p7, %p1165_p6 }
   0xe   : > { %p1168_p9 = pneg %p1167_p8 }
  0x10   : > { %p1175_p13 = pnand %p1174_p12, %p1168_p9 }
  0x12   : > { %1178 = shalt.err (!%p1175_p13)
}
  0x13   : > { %s1191_s23 = smov [#allocation2]   ;;  %177 = sbr.rel (%p1228_p2) target bundleno = 316 (0x13c), region = 36 }
  0x14   : > { %1094 = dma.vmem_to_smem (!%p1092_p5), %s149_s19, 16, %s1191_s23, [#allocation3]  }
  0x18   : > { %1184 = dma.done.wait (%p1234_p3), [#allocation3], 16  }
  0x19   : > { %1186 = vsyncadd (%p1234_p3), [#allocation3], 4294967280 }
  0x1a   : > { %183 = sfence }
  0x1b   : > { %v1106_v0 = vld [vmem:[%s1432_s2 + $0x78] sm:$0xff]   ;;  %v1110_v4 = vld [vmem:[%s1432_s2 + $0x70] sm:$0xff]   ;;  %v1114_v8 = vld [vmem:[%s1432_s2 + $0x68] sm:$0xff]   ;;  %s929_s30 = sshll.u32 %s922_s16, 2  ;;  %vm576_vm0 = vcmask 523264   ;;  %s990_s29 = sld [smem:[#allocation2 + $0x9]] }
  0x1c   : > { %v1107_v1 = vld [vmem:[%s1432_s2 + $0xf8] sm:$0xff]   ;;  %1012 = vmatprep.subr.bf16.mxu0 %v1106_v0  ;;  %v1111_v5 = vld [vmem:[%s1432_s2 + $0xf0] sm:$0xff]   ;;  %v1115_v9 = vld [vmem:[%s1432_s2 + $0xe8] sm:$0xff]   ;;  %p206_p0 = scmp.lt.s32.totalorder %s929_s30, 15  ;;  %s985_s5 = sld [smem:[#allocation2 + $0x4]] }
  0x1d   : > { %v1108_v2 = vld [vmem:[%s1432_s2 + $0x38] sm:$0xff]   ;;  %1040 = vmatprep.subr.bf16.mxu1 %v1107_v1  ;;  %v1112_v6 = vld [vmem:[%s1432_s2 + $0x30] sm:$0xff]   ;;  %v1116_v10 = vld [vmem:[%s1432_s2 + $0x28] sm:$0xff]   ;;  %s989_s8 = sld [smem:[#allocation2 + $0x8]] }
  0x1e   : > { %v1109_v3 = vld [vmem:[%s1432_s2 + $0xb8] sm:$0xff]   ;;  %1013 = vmatpush3.bf16.msra.mxu0 %v1108_v2  ;;  %v1113_v7 = vld [vmem:[%s1432_s2 + $0xb0] sm:$0xff]   ;;  %v1117_v11 = vld [vmem:[%s1432_s2 + $0xa8] sm:$0xff]   ;;  %s1438_s30 = smov (!%p206_p0, %s929_s30), 15  ;;  %s988_s9 = sld [smem:[#allocation2 + $0x7]] }
  0x1f   : > { %1041 = vmatpush3.bf16.msra.mxu1 %v1109_v3  ;;  %1014 = vmatprep.subr.bf16.mxu0 %v1110_v4  ;;  %v1118_v12 = vld [vmem:[%s1432_s2 + $0x60] sm:$0xff]   ;;  %v1122_v16 = vld [vmem:[%s1432_s2 + $0x58] sm:$0xff]   ;;  %v1126_v20 = vld [vmem:[%s1432_s2 + $0x50] sm:$0xff]   ;;  %s1086_s28 = smul.u32 20, %s1438_s30  ;;  %s984_s10 = sld [smem:[#allocation2 + $0x3]] }
  0x20   : > { %1042 = vmatprep.subr.bf16.mxu1 %v1111_v5  ;;  %v1119_v13 = vld [vmem:[%s1432_s2 + $0xe0] sm:$0xff]   ;;  %v1123_v17 = vld [vmem:[%s1432_s2 + $0xd8] sm:$0xff]   ;;  %v1127_v21 = vld [vmem:[%s1432_s2 + $0xd0] sm:$0xff]   ;;  %s987_s11 = sld [smem:[#allocation2 + $0x6]]  ;;  %s932_s14 = sshll.u32 %s1438_s30, 2 }
  0x21   : > { %v1120_v14 = vld [vmem:[%s1432_s2 + $0x20] sm:$0xff]   ;;  %v1124_v18 = vld [vmem:[%s1432_s2 + $0x18] sm:$0xff]   ;;  %v1128_v22 = vld [vmem:[%s1432_s2 + $0x10] sm:$0xff]   ;;  %s1346_s13 = scalar_lea.vmem %s1431_s1, %s1086_s28  ;;  %s986_s28 = sld [smem:[#allocation2 + $0x5]] }
  0x22   : > { %1015 = vmatpush3.bf16.msra.mxu0 %v1112_v6  ;;  %v1121_v15 = vld [vmem:[%s1432_s2 + $0xa0] sm:$0xff]   ;;  %v1125_v19 = vld [vmem:[%s1432_s2 + $0x98] sm:$0xff]   ;;  %v1129_v23 = vld [vmem:[%s1432_s2 + $0x90] sm:$0xff]   ;;  %s983_s12 = sld [smem:[#allocation2 + $0x2]]  ;;  %s216_s19 = scalar_lea.vmem %s1434_s4, %s932_s14 }
  0x23   : > { %1043 = vmatpush3.bf16.msra.mxu1 %v1113_v7  ;;  %1016 = vmatprep.subr.bf16.mxu0 %v1114_v8  ;;  %v1130_v24 = vld [vmem:[%s1432_s2 + $0x48] sm:$0xff]   ;;  %v1134_v28 = vld [vmem:[%s1432_s2 + $0x40] sm:$0xff]   ;;  %v1144_v36 = vld [vmem:[%s1432_s2 + $0x118] sm:$0xff]   ;;  %s982_s16 = sld [smem:[#allocation2 + $0x1]] }
  0x24   : > { %1044 = vmatprep.subr.bf16.mxu1 %v1115_v9  ;;  %v1131_v25 = vld [vmem:[%s1432_s2 + $0xc8] sm:$0xff]   ;;  %v1135_v29 = vld [vmem:[%s1432_s2 + $0xc0] sm:$0xff]   ;;  %v1145_v37 = vld [vmem:[%s1432_s2 + $0x110] sm:$0xff]  }
  0x25   : > { %v1132_v26 = vld [vmem:[%s1432_s2 + $0x8] sm:$0xff]   ;;  %v1136_v30 = vld [vmem:[%s1432_s2] sm:$0xff]  }
  0x26   : > { %1017 = vmatpush3.bf16.msra.mxu0 %v1116_v10  ;;  %v1133_v27 = vld [vmem:[%s1432_s2 + $0x88] sm:$0xff]   ;;  %v1137_v31 = vld [vmem:[%s1432_s2 + $0x80] sm:$0xff]  }
  0x27   : > { %1045 = vmatpush3.bf16.msra.mxu1 %v1117_v11  ;;  %1018 = vmatprep.subr.bf16.mxu0 %v1118_v12  ;;  %v1138_v32 = vld [vmem:[%s1346_s13] ss:$20 sps:$4 sm:$0xff]   ;;  %v1140_v33 = vld [vmem:[%s1346_s13 + $0x4] ss:$20 sps:$4 sm:$0xff]   ;;  %v1141_v34 = vld [vmem:[%s1346_s13 + $0x8] ss:$20 sps:$4 sm:$0xff]   ;;  %v740_v11 = vstv %s986_s28 }
  0x28   : > { %1046 = vmatprep.subr.bf16.mxu1 %v1119_v13  ;;  %v1143_v35 = vld [vmem:[%s1346_s13 + $0xc] ss:$20 sps:$4 sm:$0xff]   ;;  %615 = vmatprep.mubr.bf16.mxu0 %v1140_v33  ;;  %v1148_v39 = vld [vmem:[%s1346_s13 + $0x34] ss:$20 sps:$4 sm:$0xff]   ;;  %v1151_v42 = vld [vmem:[%s1346_s13 + $0x30] ss:$20 sps:$4 sm:$0xff]   ;;  %v786_v12 = vstv %s990_s29 }
  0x29   : > { %664 = vmatprep.mubr.bf16.mxu1 %v1143_v35  ;;  %v1146_v38 = vld [vmem:[%s1346_s13 + $0x2c] ss:$20 sps:$4 sm:$0xff]   ;;  %v1150_v40 = vld [vmem:[%s1346_s13 + $0x28] ss:$20 sps:$4 sm:$0xff]   ;;  %v1154_v43 = vld [vmem:[%s1346_s13 + $0x10] ss:$20 sps:$4 sm:$0xff]  }
  0x2a   : > { %1019 = vmatpush3.bf16.msra.mxu0 %v1120_v14  ;;  %v1152_v41 = vld [vmem:[%s1432_s2 + $0x108] sm:$0xff]   ;;  %v1153_v44 = vld [vmem:[%s1432_s2 + $0x100] sm:$0xff]  }
  0x2b   : > { %1047 = vmatpush3.bf16.msra.mxu1 %v1121_v15  ;;  %1020 = vmatprep.subr.bf16.mxu0 %v1122_v16  ;;  %v1155_v45 = vld [vmem:[%s1346_s13 + $0x38] ss:$20 sps:$4 sm:$0xff]   ;;  %v933_v58 = vld [vmem:[%s1433_s3] ss:$0 sm:$0xff]  ;;  %v745_v16 = vstv %s985_s5  ;;  %s730_s13 = sld [smem:[#allocation2]] }
  0x2c   : > { %1048 = vmatprep.subr.bf16.mxu1 %v1123_v17  ;;  %v791_v17 = vstv %s989_s8 }
  0x2e   : > { %1021 = vmatpush3.bf16.msra.mxu0 %v1124_v18 }
  0x2f   : > { %1049 = vmatpush3.bf16.msra.mxu1 %v1125_v19  ;;  %1022 = vmatprep.subr.bf16.mxu0 %v1126_v20 }
  0x30   : > { %1050 = vmatprep.subr.bf16.mxu1 %v1127_v21 }
  0x32   : > { %1023 = vmatpush3.bf16.msra.mxu0 %v1128_v22 }
  0x33   : > { %1051 = vmatpush3.bf16.msra.mxu1 %v1129_v23  ;;  %1024 = vmatprep.subr.bf16.mxu0 %v1130_v24 }
  0x34   : > { %1052 = vmatprep.subr.bf16.mxu1 %v1131_v25 }
  0x36   : > { %1025 = vmatpush3.bf16.msra.mxu0 %v1132_v26 }
  0x37   : > { %1053 = vmatpush3.bf16.msra.mxu1 %v1133_v27  ;;  %1026 = vmatprep.subr.bf16.mxu0 %v1134_v28 }
  0x38   : > { %1054 = vmatprep.subr.bf16.mxu1 %v1135_v29  ;;  %v800_v29 = vstv %s988_s9 }
  0x3a   : > { %1027 = vmatpush3.bf16.msra.mxu0 %v1136_v30 }
  0x3b   : > { %1055 = vmatpush3.bf16.msra.mxu1 %v1137_v31  ;;  %1074 = vmatprep.subr.bf16.mxu0 %v1144_v36 }
  0x3d   : > { %616 = vmatmul.mubr.bf16.vlgmr.msra.gmra.mxu0 %v1138_v32 }
  0x3e   : > { %665 = vmatmul.mubr.bf16.vlgmr.msra.gmra.mxu1 %v1141_v34  ;;  %1075 = vmatpush3.bf16.msra.mxu0 %v1144_v36  ;;  %v754_v36 = vstv %s984_s10 }
  0x3f   : > { %1076 = vmatprep.subr.bf16.mxu0 %v1145_v37  ;;  %623 = vmatprep.mubr.bf16.mxu0 %v1146_v38 }
  0x40   : > { %672 = vmatprep.mubr.bf16.mxu1 %v1148_v39 }
  0x42   : > { %1077 = vmatpush3.bf16.msra.mxu0 %v1145_v37 }
  0x43   : > { %1078 = vmatprep.subr.bf16.mxu0 %v1152_v41 }
  0x45   : > { %624 = vmatmul.mubr.bf16.gmra.mxu0 %v1150_v40 }
  0x46   : > { %673 = vmatmul.mubr.bf16.gmra.mxu1 %v1151_v42  ;;  %1082 = vmatprep.mubr.msk.bf16.mxu0 %vm576_vm0, %v1154_v43  ;;  %v809_v42 = vstv %s987_s11 }
  0x47   : > { %1079 = vmatpush3.bf16.msra.mxu0 %v1152_v41 }
  0x48   : > { %1080 = vmatprep.subr.bf16.mxu0 %v1153_v44 }
  0x4b   : > { %1081 = vmatpush3.bf16.msra.mxu0 %v1153_v44 }
  0x4e   : > { %1083 = vmatmul.mubr.msk.bf16.vlgmr.msra.gmra.mxu0 %vm576_vm0, %v1155_v45 }
  0xfd   : > { %v1028_v46 = vpop.f32.mrf.mxu0 }
  0xfe   : > { %v1056_v47 = vpop.f32.mrf.mxu1 }
  0xff   : > { %v1029_v48 = vpop.f32.mrf.mxu0 }
 0x100   : > { %v1057_v49 = vpop.f32.mrf.mxu1  ;;  %v1030_v56 = vadd.f32 %v1029_v48, %v1028_v46 }
 0x101   : > { %v1031_v50 = vpop.f32.mrf.mxu0  ;;  %v1058_v2 = vadd.f32 %v1057_v49, %v1056_v47 }
 0x102   : > { %v1059_v51 = vpop.f32.mrf.mxu1  ;;  %v618_v1 = vadd.f32 %v1030_v56, %v933_v58 }
 0x103   : > { %v1032_v52 = vpop.f32.mrf.mxu0 }
 0x104   : > { %v1060_v53 = vpop.f32.mrf.mxu1  ;;  %v1033_v4 = vadd.f32 %v1032_v52, %v1031_v50  ;;  %v667_v14 = vadd.f32 %v1058_v2, %v618_v1 }
 0x105   : > { %v1034_v54 = vpop.f32.mrf.mxu0  ;;  %v1061_v23 = vadd.f32 %v1060_v53, %v1059_v51 }
 0x106   : > { %v1062_v55 = vpop.f32.mrf.mxu1  ;;  %v621_v15 = vadd.f32 %v1033_v4, %v933_v58 }
 0x107   : > { %v1035_v57 = vpop.f32.mrf.mxu0 }
 0x108   : > { %v1036_v59 = vadd.f32 %v1035_v57, %v1034_v54  ;;  %v1063_v60 = vpop.f32.mrf.mxu1  ;;  %v670_v31 = vadd.f32 %v1061_v23, %v621_v15 }
 0x109   : > { %v1064_v61 = vadd.f32 %v1063_v60, %v1062_v55  ;;  %v1037_v62 = vpop.f32.mrf.mxu0 }
 0x10a   : > { %v626_v63 = vadd.f32 %v1036_v59, %v933_v58  ;;  %v1065_v0 = vpop.f32.mrf.mxu1 }
 0x10b   : > { %v1038_v3 = vpop.f32.mrf.mxu0 }
 0x10c   : > { %v1039_v5 = vadd.f32 %v1038_v3, %v1037_v62  ;;  %v1066_v6 = vpop.f32.mrf.mxu1  ;;  %v675_v7 = vadd.f32 %v1064_v61, %v626_v63 }
 0x10d   : > { %v1067_v9 = vadd.f32 %v1066_v6, %v1065_v0 }
 0x10e   : > { %v629_v8 = vadd.f32 %v1039_v5, %v933_v58  ;;  %v1084_v10 = vpop.f32.mrf.mxu0 }
 0x10f   : > { %v1379_v13 = vadd.f32 %v1084_v10, %v675_v7  ;;  %v763_v10 = vstv %s983_s12 }
 0x110   : > { %v715_v18 = vpop.f32.mrf.mxu0  ;;  %v678_v19 = vadd.f32 %v1067_v9, %v629_v8 }
 0x111   : > { %v743_v20 = vmul.f32 %v740_v11, %v1379_v13  ;;  %v789_v21 = vmul.f32 %v786_v12, %v1379_v13  ;;  %v1383_v22 = vadd.f32 %v715_v18, %v667_v14 }
 0x112   : > { %v1085_v24 = vpop.f32.mrf.mxu0 }
 0x113   : > { %v748_v25 = vadd.f32 %v745_v16, %v743_v20  ;;  %v794_v26 = vadd.f32 %v791_v17, %v789_v21  ;;  %v741_v27 = vmul.f32 %v740_v11, %v1383_v22  ;;  %v787_v28 = vmul.f32 %v786_v12, %v1383_v22 }
 0x114   : > { %v1387_v30 = vadd.f32 %v1085_v24, %v678_v19  ;;  %v718_v32 = vpop.f32.mrf.mxu0 }
 0x115   : > { %v798_v33 = vmul.f32 %v794_v26, %v1379_v13  ;;  %v746_v34 = vadd.f32 %v745_v16, %v741_v27  ;;  %v792_v35 = vadd.f32 %v791_v17, %v787_v28  ;;  %v1392_v39 = vadd.f32 %v718_v32, %v670_v31 }
 0x116   : > { %v744_v37 = vmul.f32 %v740_v11, %v1387_v30  ;;  %v790_v38 = vmul.f32 %v786_v12, %v1387_v30  ;;  %v752_v40 = vmul.f32 %v748_v25, %v1379_v13  ;;  %v772_v32 = vstv %s982_s16 }
 0x117   : > { %v803_v41 = vadd.f32 %v800_v29, %v798_v33  ;;  %v796_v43 = vmul.f32 %v792_v35, %v1383_v22  ;;  %v742_v46 = vmul.f32 %v740_v11, %v1392_v39  ;;  %v788_v47 = vmul.f32 %v786_v12, %v1392_v39 }
 0x118   : > { %v749_v44 = vadd.f32 %v745_v16, %v744_v37  ;;  %v795_v45 = vadd.f32 %v791_v17, %v790_v38  ;;  %v750_v49 = vmul.f32 %v746_v34, %v1383_v22  ;;  %v757_v55 = vadd.f32 %v754_v36, %v752_v40 }
 0x119   : > { %v807_v48 = vmul.f32 %v803_v41, %v1379_v13  ;;  %v801_v50 = vadd.f32 %v800_v29, %v796_v43  ;;  %v747_v53 = vadd.f32 %v745_v16, %v742_v46  ;;  %v793_v54 = vadd.f32 %v791_v17, %v788_v47 }
 0x11a   : > { %v753_v51 = vmul.f32 %v749_v44, %v1387_v30  ;;  %v799_v52 = vmul.f32 %v795_v45, %v1387_v30  ;;  %v755_v63 = vadd.f32 %v754_v36, %v750_v49  ;;  %v761_v6 = vmul.f32 %v757_v55, %v1379_v13 }
 0x11b   : > { %v812_v56 = vadd.f32 %v809_v42, %v807_v48  ;;  %v805_v57 = vmul.f32 %v801_v50, %v1383_v22  ;;  %v751_v60 = vmul.f32 %v747_v53, %v1392_v39  ;;  %v797_v61 = vmul.f32 %v793_v54, %v1392_v39 }
 0x11c   : > { %v758_v58 = vadd.f32 %v754_v36, %v753_v51  ;;  %v804_v59 = vadd.f32 %v800_v29, %v799_v52  ;;  %v759_v11 = vmul.f32 %v755_v63, %v1383_v22  ;;  %v766_v19 = vadd.f32 %v763_v10, %v761_v6 }
 0x11d   : > { %v816_v62 = vmul.f32 %v812_v56, %v1379_v13  ;;  %v810_v0 = vadd.f32 %v809_v42, %v805_v57  ;;  %v756_v2 = vadd.f32 %v754_v36, %v751_v60  ;;  %v802_v3 = vadd.f32 %v800_v29, %v797_v61 }
 0x11e   : > { %v808_v1 = vmul.f32 %v804_v59, %v1387_v30  ;;  %v762_v7 = vmul.f32 %v758_v58, %v1387_v30  ;;  %v764_v24 = vadd.f32 %v763_v10, %v759_v11  ;;  %v770_v28 = vmul.f32 %v766_v19, %v1379_v13 }
 0x11f   : > { %v820_v4 = vand.u32 2147483647, %v816_v62  ;;  %v814_v5 = vmul.f32 %v810_v0, %v1383_v22  ;;  %v806_v9 = vmul.f32 %v802_v3, %v1392_v39  ;;  %v760_v16 = vmul.f32 %v756_v2, %v1392_v39 }
 0x120   : > { %v813_v8 = vadd.f32 %v809_v42, %v808_v1  ;;  %v767_v20 = vadd.f32 %v763_v10, %v762_v7  ;;  %v768_v33 = vmul.f32 %v764_v24, %v1383_v22  ;;  %v775_v35 = vadd.f32 %v772_v32, %v770_v28 }
 0x121   : > { %v818_v12 = vand.u32 2147483647, %v814_v5  ;;  %v824_v14 = vadd.f32 1.0, %v820_v4  ;;  %v811_v17 = vadd.f32 %v809_v42, %v806_v9  ;;  %v765_v26 = vadd.f32 %v763_v10, %v760_v16 }
 0x122   : > { %v817_v15 = vmul.f32 %v813_v8, %v1387_v30  ;;  %v771_v29 = vmul.f32 %v767_v20, %v1387_v30  ;;  %v773_v37 = vadd.f32 %v772_v32, %v768_v33  ;;  %v779_v40 = vmul.f32 %v775_v35, %v1379_v13 }
 0x123   : > { %v822_v18 = vadd.f32 1.0, %v818_v12  ;;  %v815_v23 = vmul.f32 %v811_v17, %v1392_v39  ;;  %1156 = vrcp.f32 %v824_v14  ;;  %v769_v34 = vmul.f32 %v765_v26, %v1392_v39 }
 0x124   : > { %v821_v21 = vand.u32 2147483647, %v817_v15  ;;  %v776_v36 = vadd.f32 %v772_v32, %v771_v29  ;;  %v781_v42 = vstv %s730_s13  ;;  %v777_v43 = vmul.f32 %v773_v37, %v1383_v22 }
 0x125   : > { %v819_v27 = vand.u32 2147483647, %v815_v23  ;;  %1158 = vrcp.f32 %v822_v18  ;;  %v774_v38 = vadd.f32 %v772_v32, %v769_v34  ;;  %v784_v47 = vadd.f32 %v781_v42, %v779_v40 }
 0x126   : > { %v825_v25 = vadd.f32 1.0, %v821_v21  ;;  %v780_v41 = vmul.f32 %v776_v36, %v1387_v30  ;;  %v782_v51 = vadd.f32 %v781_v42, %v777_v43 }
 0x127   : > { %v823_v31 = vadd.f32 1.0, %v819_v27  ;;  %v778_v44 = vmul.f32 %v774_v38, %v1392_v39 }
 0x128   : > { %1160 = vrcp.f32 %v825_v25  ;;  %v785_v48 = vadd.f32 %v781_v42, %v780_v41 }
 0x129   : > { %1162 = vrcp.f32 %v823_v31  ;;  %v783_v53 = vadd.f32 %v781_v42, %v778_v44 }
 0x130   : > { %v1157_v45 = vpop.eup %1156 }
 0x131   : > { %v832_v50 = vmul.f32 %v1157_v45, %v784_v47 }
 0x132   : > { %v1159_v46 = vpop.eup %1158 }
 0x133   : > { %v830_v13 = vmul.f32 %v1159_v46, %v782_v51 }
 0x135   : > { %v1161_v49 = vpop.eup %1160 }
 0x136   : > { %v833_v52 = vmul.f32 %v1161_v49, %v785_v48  ;;  %v1163_v54 = vpop.eup %1162 }
 0x137   : > { %v831_v22 = vmul.f32 %v1163_v54, %v783_v53 }
 0x138   : > { %v1009_v30 = vpack.c.bf16 %v833_v52, %v832_v50 }
 0x139   : > { %v1004_v39 = vpack.c.bf16 %v831_v22, %v830_v13 }
 0x13a   : > { %1011 = vst [vmem:[%s216_s19 + $0x8] sm:$0xff] %v1009_v30  }
 0x13b   : > { %1005 = vst [vmem:[%s216_s19] sm:$0xff] %v1004_v39  }
 0x13c PF: > { %s15_s15 = sadd.s32 1, %s1189_s15  }
 0x13d   : > { %p12_p1 = scmp.ge.s32.totalorder %s15_s15, 6  }
 0x13f   :  { %14 = sbr.rel (!%p12_p1) target bundleno = 1 (0x1), region = 71 }
 0x144   :  { %876 = vsyncpa [#allocation3], 1 }
 0x145   :  { %878 = vsyncpa [#allocation3 + $0x1], 1 }

// kernel: rational_network_forward.7
= control target key start
LH: loop header
LB: loop body
LE: loop exit
PB: predicated region body
PF: predicated region fallthrough
CT: control target
= control target key end

     0   :  { %11 = vsyncpa [#allocation3], 0  ;;  %s11789_s0 = inlined_call_operand.vmem [shape: f32[10], index: 0, kind: input, shape index: {}]   ;;  %s11790_s1 = inlined_call_operand.vmem [shape: bf16[16,3136], index: 1, kind: input, shape index: {}]   ;;  %s11791_s2 = inlined_call_operand.vmem [shape: bf16[3136,512], index: 2, kind: input, shape index: {}]   ;;  %s11792_s3 = inlined_call_operand.vmem [shape: f32[1,512], index: 3, kind: input, shape index: {}]   ;;  %s11793_s4 = inlined_call_operand.vmem [shape: bf16[512,128], index: 4, kind: input, shape index: {}]   ;;  %s11794_s5 = inlined_call_operand.vmem [shape: f32[1,128], index: 5, kind: input, shape index: {}]   ;;  %s11795_s6 = inlined_call_operand.vmem [shape: f32[16,128], index: 6, kind: output, shape index: {}]  }
   0x1   :  { %s18_s23 = sshll.u32 %s11789_s0, 4  ;;  %s19_s23 = int_to_ptr.vmem [resolvable:$true] %s18_s23 }
   0x2   :  { %s8765_s24 = scalar_lea.vmem %s19_s23, 16  ;;  %p8770_p1 = scmp.lt.s32.totalorder %s19_s23, %s19_s23 }
   0x3   :  { %p8766_p0 = scmp.ne.s32.totalorder %s19_s23, %s8765_s24  ;;  %p8771_p2 = scmp.lt.s32.totalorder %s8765_s24, %s8765_s24 }
   0x5   :  { %p8772_p3 = por %p8771_p2, %p8770_p1 }
   0x7   :  { %p8773_p4 = pnand %p8772_p3, %p8766_p0 }
   0x9   :  { %8776 = shalt.err (!%p8773_p4)
}
   0xa   :  { %s8779_s25 = smov [#allocation2]  }
   0xb   :  { %21 = dma.vmem_to_smem %s19_s23, 16, %s8779_s25, [#allocation3]  }
   0xc   :  { %8777 = dma.done.wait [#allocation3], 16  }
   0xd   :  { %8778 = vsyncadd [#allocation3], 4294967280 }
   0xe   :  { %35 = sfence }
   0xf   :  { %v7479_v0 = vld [vmem:[%s11791_s2 + $0xe4] ss:$16 sps:$4 sm:$0xff]   ;;  %v7483_v2 = vld [vmem:[%s11791_s2 + $0xe0] ss:$16 sps:$4 sm:$0xff]   ;;  %vm4914_vm0 = vcmask 523264   ;;  %s11254_s17 = sld [smem:[#allocation2 + $0x9]] }
  0x10   :  { %v7481_v1 = vld [vmem:[%s11791_s2 + $0x2e4] ss:$16 sps:$4 sm:$0xff]   ;;  %4918 = vmatprep.subr.bf16.mxu0 %v7479_v0  ;;  %v7484_v3 = vld [vmem:[%s11791_s2 + $0x2e0] ss:$16 sps:$4 sm:$0xff]   ;;  %s11274_s27 = sld [smem:[#allocation2 + $0x8]] }
  0x11   :  { %4961 = vmatprep.subr.bf16.mxu1 %v7481_v1  ;;  %v7485_v4 = vld [vmem:[%s11791_s2 + $0xc4] ss:$16 sps:$4 sm:$0xff]   ;;  %4919 = vmatpush1.bf16.msra.mxu0 %v7483_v2  ;;  %v7489_v6 = vld [vmem:[%s11791_s2 + $0xc0] ss:$16 sps:$4 sm:$0xff]   ;;  %s7397_s20 = sld [smem:[#allocation2 + $0x7]] }
  0x12   :  { %4962 = vmatpush1.bf16.msra.mxu1 %v7484_v3  ;;  %v7487_v5 = vld [vmem:[%s11791_s2 + $0x2c4] ss:$16 sps:$4 sm:$0xff]   ;;  %4920 = vmatprep.subr.bf16.mxu0 %v7485_v4  ;;  %v7490_v7 = vld [vmem:[%s11791_s2 + $0x2c0] ss:$16 sps:$4 sm:$0xff]   ;;  %s7395_s21 = sld [smem:[#allocation2 + $0x5]] }
  0x13   :  { %4963 = vmatprep.subr.bf16.mxu1 %v7487_v5  ;;  %v7491_v8 = vld [vmem:[%s11791_s2 + $0xa4] ss:$16 sps:$4 sm:$0xff]   ;;  %v7495_v10 = vld [vmem:[%s11791_s2 + $0xa0] ss:$16 sps:$4 sm:$0xff]   ;;  %v7578_v5 = vld [vmem:[%s11790_s1 + $0x8] ss:$100 sps:$4 sm:$0xff]  }
  0x14   :  { %v7493_v9 = vld [vmem:[%s11791_s2 + $0x2a4] ss:$16 sps:$4 sm:$0xff]   ;;  %v7496_v11 = vld [vmem:[%s11791_s2 + $0x2a0] ss:$16 sps:$4 sm:$0xff]   ;;  %s11342_s0 = sld [smem:[#allocation2 + $0x4]] }
  0x15   :  { %4921 = vmatpush1.bf16.msra.mxu0 %v7489_v6  ;;  %v7497_v12 = vld [vmem:[%s11791_s2 + $0x84] ss:$16 sps:$4 sm:$0xff]   ;;  %v7501_v14 = vld [vmem:[%s11791_s2 + $0x80] ss:$16 sps:$4 sm:$0xff]   ;;  %s11358_s14 = sld [smem:[#allocation2 + $0x6]] }
  0x16   :  { %4964 = vmatpush1.bf16.msra.mxu1 %v7490_v7  ;;  %4922 = vmatprep.subr.bf16.mxu0 %v7491_v8  ;;  %v7499_v13 = vld [vmem:[%s11791_s2 + $0x284] ss:$16 sps:$4 sm:$0xff]   ;;  %v7502_v15 = vld [vmem:[%s11791_s2 + $0x280] ss:$16 sps:$4 sm:$0xff]   ;;  %s11387_s22 = sld [smem:[#allocation2 + $0x3]] }
  0x17   :  { %4965 = vmatprep.subr.bf16.mxu1 %v7493_v9  ;;  %v7503_v16 = vld [vmem:[%s11791_s2 + $0x64] ss:$16 sps:$4 sm:$0xff]   ;;  %v7507_v18 = vld [vmem:[%s11791_s2 + $0x60] ss:$16 sps:$4 sm:$0xff]   ;;  %s6036_s23 = sld [smem:[#allocation2]] }
  0x18   :  { %v7505_v17 = vld [vmem:[%s11791_s2 + $0x264] ss:$16 sps:$4 sm:$0xff]   ;;  %v7508_v19 = vld [vmem:[%s11791_s2 + $0x260] ss:$16 sps:$4 sm:$0xff]  }
  0x19   :  { %4923 = vmatpush1.bf16.msra.mxu0 %v7495_v10  ;;  %v7509_v20 = vld [vmem:[%s11791_s2 + $0x44] ss:$16 sps:$4 sm:$0xff]   ;;  %v7513_v22 = vld [vmem:[%s11791_s2 + $0x40] ss:$16 sps:$4 sm:$0xff]  }
  0x1a   :  { %4966 = vmatpush1.bf16.msra.mxu1 %v7496_v11  ;;  %4924 = vmatprep.subr.bf16.mxu0 %v7497_v12  ;;  %v7511_v21 = vld [vmem:[%s11791_s2 + $0x244] ss:$16 sps:$4 sm:$0xff]   ;;  %v7514_v23 = vld [vmem:[%s11791_s2 + $0x240] ss:$16 sps:$4 sm:$0xff]  }
  0x1b   :  { %4967 = vmatprep.subr.bf16.mxu1 %v7499_v13  ;;  %v7515_v24 = vld [vmem:[%s11791_s2 + $0x24] ss:$16 sps:$4 sm:$0xff]   ;;  %v7519_v26 = vld [vmem:[%s11791_s2 + $0x20] ss:$16 sps:$4 sm:$0xff]  }
  0x1c   :  { %v7517_v25 = vld [vmem:[%s11791_s2 + $0x224] ss:$16 sps:$4 sm:$0xff]   ;;  %v7520_v27 = vld [vmem:[%s11791_s2 + $0x220] ss:$16 sps:$4 sm:$0xff]  }
  0x1d   :  { %4925 = vmatpush1.bf16.msra.mxu0 %v7501_v14  ;;  %v7521_v28 = vld [vmem:[%s11791_s2 + $0x4] ss:$16 sps:$4 sm:$0xff]   ;;  %v7525_v30 = vld [vmem:[%s11791_s2] ss:$16 sps:$4 sm:$0xff]  }
  0x1e   :  { %4968 = vmatpush1.bf16.msra.mxu1 %v7502_v15  ;;  %4926 = vmatprep.subr.bf16.mxu0 %v7503_v16  ;;  %v7523_v29 = vld [vmem:[%s11791_s2 + $0x204] ss:$16 sps:$4 sm:$0xff]   ;;  %v7526_v31 = vld [vmem:[%s11791_s2 + $0x200] ss:$16 sps:$4 sm:$0xff]  }
  0x1f   :  { %4969 = vmatprep.subr.bf16.mxu1 %v7505_v17  ;;  %v7527_v32 = vld [vmem:[%s11791_s2 + $0x1e4] ss:$16 sps:$4 sm:$0xff]   ;;  %v7531_v34 = vld [vmem:[%s11791_s2 + $0x1e0] ss:$16 sps:$4 sm:$0xff]  }
  0x20   :  { %v7529_v33 = vld [vmem:[%s11791_s2 + $0x3e4] ss:$16 sps:$4 sm:$0xff]   ;;  %v7532_v35 = vld [vmem:[%s11791_s2 + $0x3e0] ss:$16 sps:$4 sm:$0xff]  }
  0x21   :  { %4927 = vmatpush1.bf16.msra.mxu0 %v7507_v18  ;;  %v7533_v36 = vld [vmem:[%s11791_s2 + $0x1c4] ss:$16 sps:$4 sm:$0xff]   ;;  %v7537_v38 = vld [vmem:[%s11791_s2 + $0x1c0] ss:$16 sps:$4 sm:$0xff]  }
  0x22   :  { %4970 = vmatpush1.bf16.msra.mxu1 %v7508_v19  ;;  %4928 = vmatprep.subr.bf16.mxu0 %v7509_v20  ;;  %v7535_v37 = vld [vmem:[%s11791_s2 + $0x3c4] ss:$16 sps:$4 sm:$0xff]   ;;  %v7538_v39 = vld [vmem:[%s11791_s2 + $0x3c0] ss:$16 sps:$4 sm:$0xff]  }
  0x23   :  { %4971 = vmatprep.subr.bf16.mxu1 %v7511_v21  ;;  %v7539_v40 = vld [vmem:[%s11791_s2 + $0x1a4] ss:$16 sps:$4 sm:$0xff]   ;;  %v7543_v42 = vld [vmem:[%s11791_s2 + $0x1a0] ss:$16 sps:$4 sm:$0xff]  }
  0x24   :  { %v7541_v41 = vld [vmem:[%s11791_s2 + $0x3a4] ss:$16 sps:$4 sm:$0xff]   ;;  %v7544_v43 = vld [vmem:[%s11791_s2 + $0x3a0] ss:$16 sps:$4 sm:$0xff]  }
  0x25   :  { %4929 = vmatpush1.bf16.msra.mxu0 %v7513_v22  ;;  %v7545_v44 = vld [vmem:[%s11791_s2 + $0x184] ss:$16 sps:$4 sm:$0xff]   ;;  %v7549_v46 = vld [vmem:[%s11791_s2 + $0x180] ss:$16 sps:$4 sm:$0xff]  }
  0x26   :  { %4972 = vmatpush1.bf16.msra.mxu1 %v7514_v23  ;;  %4930 = vmatprep.subr.bf16.mxu0 %v7515_v24  ;;  %v7547_v45 = vld [vmem:[%s11791_s2 + $0x384] ss:$16 sps:$4 sm:$0xff]   ;;  %v7550_v47 = vld [vmem:[%s11791_s2 + $0x380] ss:$16 sps:$4 sm:$0xff]  }
  0x27   :  { %4973 = vmatprep.subr.bf16.mxu1 %v7517_v25  ;;  %v7551_v48 = vld [vmem:[%s11791_s2 + $0x164] ss:$16 sps:$4 sm:$0xff]   ;;  %v7580_v51 = vld [vmem:[%s11790_s1 + $0xc] ss:$100 sps:$4 sm:$0xff]  }
  0x28   :  { %v7577_v49 = vld [vmem:[%s11790_s1 + $0x4] ss:$100 sps:$4 sm:$0xff]   ;;  %v7555_v52 = vld [vmem:[%s11791_s2 + $0x160] ss:$16 sps:$4 sm:$0xff]   ;;  %4993 = vmatprep.mubr.bf16.mxu1 %v7580_v51 }
  0x29   :  { %4931 = vmatpush1.bf16.msra.mxu0 %v7519_v26  ;;  %v7553_v50 = vld [vmem:[%s11791_s2 + $0x364] ss:$16 sps:$4 sm:$0xff]   ;;  %4950 = vmatprep.mubr.bf16.mxu0 %v7577_v49  ;;  %v7556_v53 = vld [vmem:[%s11791_s2 + $0x360] ss:$16 sps:$4 sm:$0xff]  }
  0x2a   :  { %4974 = vmatpush1.bf16.msra.mxu1 %v7520_v27  ;;  %4932 = vmatprep.subr.bf16.mxu0 %v7521_v28  ;;  %v7557_v54 = vld [vmem:[%s11791_s2 + $0x144] ss:$16 sps:$4 sm:$0xff]   ;;  %v7561_v56 = vld [vmem:[%s11791_s2 + $0x140] ss:$16 sps:$4 sm:$0xff]  }
  0x2b   :  { %4975 = vmatprep.subr.bf16.mxu1 %v7523_v29  ;;  %v7559_v55 = vld [vmem:[%s11791_s2 + $0x344] ss:$16 sps:$4 sm:$0xff]   ;;  %v7562_v57 = vld [vmem:[%s11791_s2 + $0x340] ss:$16 sps:$4 sm:$0xff]  }
  0x2c   :  { %v7563_v58 = vld [vmem:[%s11791_s2 + $0x124] ss:$16 sps:$4 sm:$0xff]   ;;  %v7567_v60 = vld [vmem:[%s11791_s2 + $0x120] ss:$16 sps:$4 sm:$0xff]  }
  0x2d   :  { %4933 = vmatpush1.bf16.msra.mxu0 %v7525_v30  ;;  %v7565_v59 = vld [vmem:[%s11791_s2 + $0x324] ss:$16 sps:$4 sm:$0xff]   ;;  %v7568_v61 = vld [vmem:[%s11791_s2 + $0x320] ss:$16 sps:$4 sm:$0xff]  }
  0x2e   :  { %4976 = vmatpush1.bf16.msra.mxu1 %v7526_v31  ;;  %4934 = vmatprep.subr.bf16.mxu0 %v7527_v32  ;;  %v7569_v62 = vld [vmem:[%s11791_s2 + $0x104] ss:$16 sps:$4 sm:$0xff]   ;;  %v7573_v0 = vld [vmem:[%s11791_s2 + $0x100] ss:$16 sps:$4 sm:$0xff]  }
  0x2f   :  { %4977 = vmatprep.subr.bf16.mxu1 %v7529_v33  ;;  %v7571_v63 = vld [vmem:[%s11791_s2 + $0x304] ss:$16 sps:$4 sm:$0xff]   ;;  %v7574_v1 = vld [vmem:[%s11791_s2 + $0x300] ss:$16 sps:$4 sm:$0xff]  }
  0x30   :  { %v7583_v2 = vld [vmem:[%s11791_s2 + $0x4e4] ss:$16 sps:$4 sm:$0xff]   ;;  %v7581_v6 = vld [vmem:[%s11791_s2 + $0x4e0] ss:$16 sps:$4 sm:$0xff]  }
  0x31   :  { %4935 = vmatpush2.bf16.msra.mxu0 %v7531_v34  ;;  %v7586_v3 = vld [vmem:[%s11791_s2 + $0x6e4] ss:$16 sps:$4 sm:$0xff]   ;;  %v7584_v7 = vld [vmem:[%s11791_s2 + $0x6e0] ss:$16 sps:$4 sm:$0xff]  }
  0x32   :  { %4978 = vmatpush2.bf16.msra.mxu1 %v7532_v35  ;;  %4936 = vmatprep.subr.bf16.mxu0 %v7533_v36  ;;  %v7575_v4 = vld [vmem:[%s11790_s1] ss:$100 sps:$4 sm:$0xff]   ;;  %v7679_v34 = vld [vmem:[%s11790_s1 + $0x14] ss:$100 sps:$4 sm:$0xff]  }
  0x33   :  { %4979 = vmatprep.subr.bf16.mxu1 %v7535_v37  ;;  %v7589_v8 = vld [vmem:[%s11791_s2 + $0x4c4] ss:$16 sps:$4 sm:$0xff]   ;;  %v7587_v10 = vld [vmem:[%s11791_s2 + $0x4c0] ss:$16 sps:$4 sm:$0xff]  }
  0x34   :  { %v7592_v9 = vld [vmem:[%s11791_s2 + $0x6c4] ss:$16 sps:$4 sm:$0xff]   ;;  %v7590_v11 = vld [vmem:[%s11791_s2 + $0x6c0] ss:$16 sps:$4 sm:$0xff]  }
  0x35   :  { %4937 = vmatpush2.bf16.msra.mxu0 %v7537_v38  ;;  %v7595_v12 = vld [vmem:[%s11791_s2 + $0x4a4] ss:$16 sps:$4 sm:$0xff]   ;;  %v7593_v14 = vld [vmem:[%s11791_s2 + $0x4a0] ss:$16 sps:$4 sm:$0xff]  }
  0x36   :  { %4980 = vmatpush2.bf16.msra.mxu1 %v7538_v39  ;;  %4938 = vmatprep.subr.bf16.mxu0 %v7539_v40  ;;  %v7598_v13 = vld [vmem:[%s11791_s2 + $0x6a4] ss:$16 sps:$4 sm:$0xff]   ;;  %v7596_v15 = vld [vmem:[%s11791_s2 + $0x6a0] ss:$16 sps:$4 sm:$0xff]  }
  0x37   :  { %4981 = vmatprep.subr.bf16.mxu1 %v7541_v41  ;;  %v7601_v16 = vld [vmem:[%s11791_s2 + $0x484] ss:$16 sps:$4 sm:$0xff]   ;;  %v7599_v18 = vld [vmem:[%s11791_s2 + $0x480] ss:$16 sps:$4 sm:$0xff]  }
  0x38   :  { %v7604_v17 = vld [vmem:[%s11791_s2 + $0x684] ss:$16 sps:$4 sm:$0xff]   ;;  %v7602_v19 = vld [vmem:[%s11791_s2 + $0x680] ss:$16 sps:$4 sm:$0xff]  }
  0x39   :  { %4939 = vmatpush2.bf16.msra.mxu0 %v7543_v42  ;;  %v7607_v20 = vld [vmem:[%s11791_s2 + $0x464] ss:$16 sps:$4 sm:$0xff]   ;;  %v7605_v22 = vld [vmem:[%s11791_s2 + $0x460] ss:$16 sps:$4 sm:$0xff]  }
  0x3a   :  { %4982 = vmatpush2.bf16.msra.mxu1 %v7544_v43  ;;  %4940 = vmatprep.subr.bf16.mxu0 %v7545_v44  ;;  %v7610_v21 = vld [vmem:[%s11791_s2 + $0x664] ss:$16 sps:$4 sm:$0xff]   ;;  %v7608_v23 = vld [vmem:[%s11791_s2 + $0x660] ss:$16 sps:$4 sm:$0xff]  }
  0x3b   :  { %4983 = vmatprep.subr.bf16.mxu1 %v7547_v45  ;;  %v7613_v24 = vld [vmem:[%s11791_s2 + $0x444] ss:$16 sps:$4 sm:$0xff]   ;;  %v7611_v26 = vld [vmem:[%s11791_s2 + $0x440] ss:$16 sps:$4 sm:$0xff]  }
  0x3c   :  { %v7616_v25 = vld [vmem:[%s11791_s2 + $0x644] ss:$16 sps:$4 sm:$0xff]   ;;  %v7614_v27 = vld [vmem:[%s11791_s2 + $0x640] ss:$16 sps:$4 sm:$0xff]  }
  0x3d   :  { %4941 = vmatpush2.bf16.msra.mxu0 %v7549_v46  ;;  %v7619_v28 = vld [vmem:[%s11791_s2 + $0x424] ss:$16 sps:$4 sm:$0xff]   ;;  %v7617_v30 = vld [vmem:[%s11791_s2 + $0x420] ss:$16 sps:$4 sm:$0xff]  }
  0x3e   :  { %4984 = vmatpush2.bf16.msra.mxu1 %v7550_v47  ;;  %4942 = vmatprep.subr.bf16.mxu0 %v7551_v48  ;;  %v7622_v29 = vld [vmem:[%s11791_s2 + $0x624] ss:$16 sps:$4 sm:$0xff]   ;;  %v7620_v31 = vld [vmem:[%s11791_s2 + $0x620] ss:$16 sps:$4 sm:$0xff]  }
  0x3f   :  { %4985 = vmatprep.subr.bf16.mxu1 %v7553_v50  ;;  %v7625_v32 = vld [vmem:[%s11791_s2 + $0x404] ss:$16 sps:$4 sm:$0xff]   ;;  %v7682_v35 = vld [vmem:[%s11790_s1 + $0x1c] ss:$100 sps:$4 sm:$0xff]  }
  0x40   :  { %v7628_v33 = vld [vmem:[%s11791_s2 + $0x604] ss:$16 sps:$4 sm:$0xff]   ;;  %v7623_v36 = vld [vmem:[%s11791_s2 + $0x400] ss:$16 sps:$4 sm:$0xff]  }
  0x41   :  { %4943 = vmatpush2.bf16.msra.mxu0 %v7555_v52  ;;  %v7626_v37 = vld [vmem:[%s11791_s2 + $0x600] ss:$16 sps:$4 sm:$0xff]   ;;  %v7631_v38 = vld [vmem:[%s11791_s2 + $0x5e4] ss:$16 sps:$4 sm:$0xff]  }
  0x42   :  { %4986 = vmatpush2.bf16.msra.mxu1 %v7556_v53  ;;  %4944 = vmatprep.subr.bf16.mxu0 %v7557_v54  ;;  %v7634_v39 = vld [vmem:[%s11791_s2 + $0x7e4] ss:$16 sps:$4 sm:$0xff]   ;;  %v7629_v40 = vld [vmem:[%s11791_s2 + $0x5e0] ss:$16 sps:$4 sm:$0xff]  }
  0x43   :  { %4987 = vmatprep.subr.bf16.mxu1 %v7559_v55  ;;  %v7632_v41 = vld [vmem:[%s11791_s2 + $0x7e0] ss:$16 sps:$4 sm:$0xff]   ;;  %v7637_v42 = vld [vmem:[%s11791_s2 + $0x5c4] ss:$16 sps:$4 sm:$0xff]  }
  0x44   :  { %v7640_v43 = vld [vmem:[%s11791_s2 + $0x7c4] ss:$16 sps:$4 sm:$0xff]   ;;  %v7635_v44 = vld [vmem:[%s11791_s2 + $0x5c0] ss:$16 sps:$4 sm:$0xff]  }
  0x45   :  { %4945 = vmatpush2.bf16.msra.mxu0 %v7561_v56  ;;  %v7638_v45 = vld [vmem:[%s11791_s2 + $0x7c0] ss:$16 sps:$4 sm:$0xff]   ;;  %v7643_v46 = vld [vmem:[%s11791_s2 + $0x5a4] ss:$16 sps:$4 sm:$0xff]  }
  0x46   :  { %4988 = vmatpush2.bf16.msra.mxu1 %v7562_v57  ;;  %4946 = vmatprep.subr.bf16.mxu0 %v7563_v58  ;;  %v7646_v47 = vld [vmem:[%s11791_s2 + $0x7a4] ss:$16 sps:$4 sm:$0xff]   ;;  %v7641_v48 = vld [vmem:[%s11791_s2 + $0x5a0] ss:$16 sps:$4 sm:$0xff]  }
  0x47   :  { %4989 = vmatprep.subr.bf16.mxu1 %v7565_v59  ;;  %v7644_v49 = vld [vmem:[%s11791_s2 + $0x7a0] ss:$16 sps:$4 sm:$0xff]   ;;  %v7649_v50 = vld [vmem:[%s11791_s2 + $0x584] ss:$16 sps:$4 sm:$0xff]  }
  0x48   :  { %v7652_v51 = vld [vmem:[%s11791_s2 + $0x784] ss:$16 sps:$4 sm:$0xff]   ;;  %v7647_v52 = vld [vmem:[%s11791_s2 + $0x580] ss:$16 sps:$4 sm:$0xff]  }
  0x49   :  { %4947 = vmatpush2.bf16.msra.mxu0 %v7567_v60  ;;  %v7650_v53 = vld [vmem:[%s11791_s2 + $0x780] ss:$16 sps:$4 sm:$0xff]   ;;  %v7655_v54 = vld [vmem:[%s11791_s2 + $0x564] ss:$16 sps:$4 sm:$0xff]  }
  0x4a   :  { %4990 = vmatpush2.bf16.msra.mxu1 %v7568_v61  ;;  %4948 = vmatprep.subr.bf16.mxu0 %v7569_v62  ;;  %v7658_v55 = vld [vmem:[%s11791_s2 + $0x764] ss:$16 sps:$4 sm:$0xff]   ;;  %v7653_v56 = vld [vmem:[%s11791_s2 + $0x560] ss:$16 sps:$4 sm:$0xff]  }
  0x4b   :  { %4991 = vmatprep.subr.bf16.mxu1 %v7571_v63  ;;  %v7656_v57 = vld [vmem:[%s11791_s2 + $0x760] ss:$16 sps:$4 sm:$0xff]   ;;  %v7661_v58 = vld [vmem:[%s11791_s2 + $0x544] ss:$16 sps:$4 sm:$0xff]  }
  0x4c   :  { %v7664_v59 = vld [vmem:[%s11791_s2 + $0x744] ss:$16 sps:$4 sm:$0xff]   ;;  %v7659_v60 = vld [vmem:[%s11791_s2 + $0x540] ss:$16 sps:$4 sm:$0xff]  }
  0x4d   :  { %4949 = vmatpush2.bf16.msra.mxu0 %v7573_v0  ;;  %v7662_v61 = vld [vmem:[%s11791_s2 + $0x740] ss:$16 sps:$4 sm:$0xff]   ;;  %v7667_v62 = vld [vmem:[%s11791_s2 + $0x524] ss:$16 sps:$4 sm:$0xff]  }
  0x4e   :  { %4992 = vmatpush2.bf16.msra.mxu1 %v7574_v1  ;;  %5004 = vmatprep.subr.bf16.mxu0 %v7583_v2  ;;  %v7670_v63 = vld [vmem:[%s11791_s2 + $0x724] ss:$16 sps:$4 sm:$0xff]   ;;  %v7665_v0 = vld [vmem:[%s11791_s2 + $0x520] ss:$16 sps:$4 sm:$0xff]  }
  0x4f   :  { %5047 = vmatprep.subr.bf16.mxu1 %v7586_v3  ;;  %v7668_v1 = vld [vmem:[%s11791_s2 + $0x720] ss:$16 sps:$4 sm:$0xff]   ;;  %v7673_v2 = vld [vmem:[%s11791_s2 + $0x504] ss:$16 sps:$4 sm:$0xff]  }
  0x50   :  { %4951 = vmatmul.mubr.bf16.vlgmr.msra.gmra.mxu0 %v7575_v4  ;;  %v7676_v3 = vld [vmem:[%s11791_s2 + $0x704] ss:$16 sps:$4 sm:$0xff]   ;;  %v7671_v4 = vld [vmem:[%s11791_s2 + $0x500] ss:$16 sps:$4 sm:$0xff]  }
  0x51   :  { %4994 = vmatmul.mubr.bf16.vlgmr.msra.gmra.mxu1 %v7578_v5  ;;  %5005 = vmatpush1.bf16.msra.mxu0 %v7581_v6  ;;  %v7674_v5 = vld [vmem:[%s11791_s2 + $0x700] ss:$16 sps:$4 sm:$0xff]   ;;  %v7685_v6 = vld [vmem:[%s11791_s2 + $0x8e4] ss:$16 sps:$4 sm:$0xff]  }
  0x52   :  { %5048 = vmatpush1.bf16.msra.mxu1 %v7584_v7  ;;  %5006 = vmatprep.subr.bf16.mxu0 %v7589_v8  ;;  %v7688_v7 = vld [vmem:[%s11791_s2 + $0xae4] ss:$16 sps:$4 sm:$0xff]  }
  0x53   :  { %5049 = vmatprep.subr.bf16.mxu1 %v7592_v9  ;;  %5036 = vmatprep.mubr.bf16.mxu0 %v7679_v34  ;;  %v7677_v8 = vld [vmem:[%s11790_s1 + $0x10] ss:$100 sps:$4 sm:$0xff]   ;;  %v7680_v9 = vld [vmem:[%s11790_s1 + $0x18] ss:$100 sps:$4 sm:$0xff]  }
  0x54   :  { %5079 = vmatprep.mubr.bf16.mxu1 %v7682_v35  ;;  %v7721_v34 = vld [vmem:[%s11791_s2 + $0x824] ss:$16 sps:$4 sm:$0xff]  }
  0x55   :  { %5007 = vmatpush1.bf16.msra.mxu0 %v7587_v10  ;;  %v7683_v10 = vld [vmem:[%s11791_s2 + $0x8e0] ss:$16 sps:$4 sm:$0xff]   ;;  %v7724_v35 = vld [vmem:[%s11791_s2 + $0xa24] ss:$16 sps:$4 sm:$0xff]  }
  0x56   :  { %5050 = vmatpush1.bf16.msra.mxu1 %v7590_v11  ;;  %5008 = vmatprep.subr.bf16.mxu0 %v7595_v12  ;;  %v7686_v11 = vld [vmem:[%s11791_s2 + $0xae0] ss:$16 sps:$4 sm:$0xff]   ;;  %v7691_v12 = vld [vmem:[%s11791_s2 + $0x8c4] ss:$16 sps:$4 sm:$0xff]  }
  0x57   :  { %5051 = vmatprep.subr.bf16.mxu1 %v7598_v13  ;;  %v7694_v13 = vld [vmem:[%s11791_s2 + $0xac4] ss:$16 sps:$4 sm:$0xff]  }
  0x59   :  { %5009 = vmatpush1.bf16.msra.mxu0 %v7593_v14  ;;  %v7689_v14 = vld [vmem:[%s11791_s2 + $0x8c0] ss:$16 sps:$4 sm:$0xff]  }
  0x5a   :  { %5052 = vmatpush1.bf16.msra.mxu1 %v7596_v15  ;;  %5010 = vmatprep.subr.bf16.mxu0 %v7601_v16  ;;  %v7692_v15 = vld [vmem:[%s11791_s2 + $0xac0] ss:$16 sps:$4 sm:$0xff]   ;;  %v7697_v16 = vld [vmem:[%s11791_s2 + $0x8a4] ss:$16 sps:$4 sm:$0xff]  }
  0x5b   :  { %5053 = vmatprep.subr.bf16.mxu1 %v7604_v17  ;;  %v7700_v17 = vld [vmem:[%s11791_s2 + $0xaa4] ss:$16 sps:$4 sm:$0xff]  }
  0x5d   :  { %5011 = vmatpush1.bf16.msra.mxu0 %v7599_v18  ;;  %v7695_v18 = vld [vmem:[%s11791_s2 + $0x8a0] ss:$16 sps:$4 sm:$0xff]  }
  0x5e   :  { %5054 = vmatpush1.bf16.msra.mxu1 %v7602_v19  ;;  %5012 = vmatprep.subr.bf16.mxu0 %v7607_v20  ;;  %v7781_v19 = vld [vmem:[%s11790_s1 + $0x24] ss:$100 sps:$4 sm:$0xff]   ;;  %v7698_v20 = vld [vmem:[%s11791_s2 + $0xaa0] ss:$16 sps:$4 sm:$0xff]  }
  0x5f   :  { %5055 = vmatprep.subr.bf16.mxu1 %v7610_v21  ;;  %v7784_v21 = vld [vmem:[%s11790_s1 + $0x2c] ss:$100 sps:$4 sm:$0xff]  }
  0x61   :  { %5013 = vmatpush1.bf16.msra.mxu0 %v7605_v22  ;;  %v7703_v22 = vld [vmem:[%s11791_s2 + $0x884] ss:$16 sps:$4 sm:$0xff]  }
  0x62   :  { %5056 = vmatpush1.bf16.msra.mxu1 %v7608_v23  ;;  %5014 = vmatprep.subr.bf16.mxu0 %v7613_v24  ;;  %v7706_v23 = vld [vmem:[%s11791_s2 + $0xa84] ss:$16 sps:$4 sm:$0xff]   ;;  %v7701_v24 = vld [vmem:[%s11791_s2 + $0x880] ss:$16 sps:$4 sm:$0xff]  }
  0x63   :  { %5057 = vmatprep.subr.bf16.mxu1 %v7616_v25  ;;  %v7704_v25 = vld [vmem:[%s11791_s2 + $0xa80] ss:$16 sps:$4 sm:$0xff]  }
  0x65   :  { %5015 = vmatpush1.bf16.msra.mxu0 %v7611_v26  ;;  %v7709_v26 = vld [vmem:[%s11791_s2 + $0x864] ss:$16 sps:$4 sm:$0xff]  }
  0x66   :  { %5058 = vmatpush1.bf16.msra.mxu1 %v7614_v27  ;;  %5016 = vmatprep.subr.bf16.mxu0 %v7619_v28  ;;  %v7712_v27 = vld [vmem:[%s11791_s2 + $0xa64] ss:$16 sps:$4 sm:$0xff]   ;;  %v7707_v28 = vld [vmem:[%s11791_s2 + $0x860] ss:$16 sps:$4 sm:$0xff]  }
  0x67   :  { %5059 = vmatprep.subr.bf16.mxu1 %v7622_v29  ;;  %v7710_v29 = vld [vmem:[%s11791_s2 + $0xa60] ss:$16 sps:$4 sm:$0xff]  }
  0x69   :  { %5017 = vmatpush1.bf16.msra.mxu0 %v7617_v30  ;;  %v7715_v30 = vld [vmem:[%s11791_s2 + $0x844] ss:$16 sps:$4 sm:$0xff]  }
  0x6a   :  { %5060 = vmatpush1.bf16.msra.mxu1 %v7620_v31  ;;  %5018 = vmatprep.subr.bf16.mxu0 %v7625_v32  ;;  %v7718_v31 = vld [vmem:[%s11791_s2 + $0xa44] ss:$16 sps:$4 sm:$0xff]   ;;  %v7713_v32 = vld [vmem:[%s11791_s2 + $0x840] ss:$16 sps:$4 sm:$0xff]  }
  0x6b   :  { %5061 = vmatprep.subr.bf16.mxu1 %v7628_v33  ;;  %v7716_v33 = vld [vmem:[%s11791_s2 + $0xa40] ss:$16 sps:$4 sm:$0xff]  }
  0x6d   :  { %5019 = vmatpush1.bf16.msra.mxu0 %v7623_v36  ;;  %v7719_v36 = vld [vmem:[%s11791_s2 + $0x820] ss:$16 sps:$4 sm:$0xff]  }
  0x6e   :  { %5062 = vmatpush1.bf16.msra.mxu1 %v7626_v37  ;;  %5020 = vmatprep.subr.bf16.mxu0 %v7631_v38  ;;  %v7722_v37 = vld [vmem:[%s11791_s2 + $0xa20] ss:$16 sps:$4 sm:$0xff]   ;;  %v7727_v38 = vld [vmem:[%s11791_s2 + $0x804] ss:$16 sps:$4 sm:$0xff]  }
  0x6f   :  { %5063 = vmatprep.subr.bf16.mxu1 %v7634_v39  ;;  %v7730_v39 = vld [vmem:[%s11791_s2 + $0xa04] ss:$16 sps:$4 sm:$0xff]  }
  0x71   :  { %5021 = vmatpush2.bf16.msra.mxu0 %v7629_v40  ;;  %v7725_v40 = vld [vmem:[%s11791_s2 + $0x800] ss:$16 sps:$4 sm:$0xff]  }
  0x72   :  { %5064 = vmatpush2.bf16.msra.mxu1 %v7632_v41  ;;  %5022 = vmatprep.subr.bf16.mxu0 %v7637_v42  ;;  %v7728_v41 = vld [vmem:[%s11791_s2 + $0xa00] ss:$16 sps:$4 sm:$0xff]   ;;  %v7733_v42 = vld [vmem:[%s11791_s2 + $0x9e4] ss:$16 sps:$4 sm:$0xff]  }
  0x73   :  { %5065 = vmatprep.subr.bf16.mxu1 %v7640_v43  ;;  %v7736_v43 = vld [vmem:[%s11791_s2 + $0xbe4] ss:$16 sps:$4 sm:$0xff]  }
  0x75   :  { %5023 = vmatpush2.bf16.msra.mxu0 %v7635_v44  ;;  %v7731_v44 = vld [vmem:[%s11791_s2 + $0x9e0] ss:$16 sps:$4 sm:$0xff]  }
  0x76   :  { %5066 = vmatpush2.bf16.msra.mxu1 %v7638_v45  ;;  %5024 = vmatprep.subr.bf16.mxu0 %v7643_v46  ;;  %v7734_v45 = vld [vmem:[%s11791_s2 + $0xbe0] ss:$16 sps:$4 sm:$0xff]   ;;  %v7739_v46 = vld [vmem:[%s11791_s2 + $0x9c4] ss:$16 sps:$4 sm:$0xff]  }
  0x77   :  { %5067 = vmatprep.subr.bf16.mxu1 %v7646_v47  ;;  %v7742_v47 = vld [vmem:[%s11791_s2 + $0xbc4] ss:$16 sps:$4 sm:$0xff]  }
  0x79   :  { %5025 = vmatpush2.bf16.msra.mxu0 %v7641_v48  ;;  %v7737_v48 = vld [vmem:[%s11791_s2 + $0x9c0] ss:$16 sps:$4 sm:$0xff]  }
  0x7a   :  { %5068 = vmatpush2.bf16.msra.mxu1 %v7644_v49  ;;  %5026 = vmatprep.subr.bf16.mxu0 %v7649_v50  ;;  %v7740_v49 = vld [vmem:[%s11791_s2 + $0xbc0] ss:$16 sps:$4 sm:$0xff]   ;;  %v7745_v50 = vld [vmem:[%s11791_s2 + $0x9a4] ss:$16 sps:$4 sm:$0xff]  }
  0x7b   :  { %5069 = vmatprep.subr.bf16.mxu1 %v7652_v51  ;;  %v7748_v51 = vld [vmem:[%s11791_s2 + $0xba4] ss:$16 sps:$4 sm:$0xff]  }
  0x7d   :  { %5027 = vmatpush2.bf16.msra.mxu0 %v7647_v52  ;;  %v7743_v52 = vld [vmem:[%s11791_s2 + $0x9a0] ss:$16 sps:$4 sm:$0xff]  }
  0x7e   :  { %5070 = vmatpush2.bf16.msra.mxu1 %v7650_v53  ;;  %5028 = vmatprep.subr.bf16.mxu0 %v7655_v54  ;;  %v7746_v53 = vld [vmem:[%s11791_s2 + $0xba0] ss:$16 sps:$4 sm:$0xff]   ;;  %v7751_v54 = vld [vmem:[%s11791_s2 + $0x984] ss:$16 sps:$4 sm:$0xff]  }
  0x7f   :  { %5071 = vmatprep.subr.bf16.mxu1 %v7658_v55  ;;  %v7754_v55 = vld [vmem:[%s11791_s2 + $0xb84] ss:$16 sps:$4 sm:$0xff]  }
  0x81   :  { %5029 = vmatpush2.bf16.msra.mxu0 %v7653_v56  ;;  %v7749_v56 = vld [vmem:[%s11791_s2 + $0x980] ss:$16 sps:$4 sm:$0xff]  }
  0x82   :  { %5072 = vmatpush2.bf16.msra.mxu1 %v7656_v57  ;;  %5030 = vmatprep.subr.bf16.mxu0 %v7661_v58  ;;  %v7752_v57 = vld [vmem:[%s11791_s2 + $0xb80] ss:$16 sps:$4 sm:$0xff]   ;;  %v7757_v58 = vld [vmem:[%s11791_s2 + $0x964] ss:$16 sps:$4 sm:$0xff]  }
  0x83   :  { %5073 = vmatprep.subr.bf16.mxu1 %v7664_v59  ;;  %v7760_v59 = vld [vmem:[%s11791_s2 + $0xb64] ss:$16 sps:$4 sm:$0xff]  }
  0x85   :  { %5031 = vmatpush2.bf16.msra.mxu0 %v7659_v60  ;;  %v7755_v60 = vld [vmem:[%s11791_s2 + $0x960] ss:$16 sps:$4 sm:$0xff]  }
  0x86   :  { %5074 = vmatpush2.bf16.msra.mxu1 %v7662_v61  ;;  %5032 = vmatprep.subr.bf16.mxu0 %v7667_v62  ;;  %v7758_v61 = vld [vmem:[%s11791_s2 + $0xb60] ss:$16 sps:$4 sm:$0xff]   ;;  %v7763_v62 = vld [vmem:[%s11791_s2 + $0x944] ss:$16 sps:$4 sm:$0xff]  }
  0x87   :  { %5075 = vmatprep.subr.bf16.mxu1 %v7670_v63  ;;  %v7766_v63 = vld [vmem:[%s11791_s2 + $0xb44] ss:$16 sps:$4 sm:$0xff]  }
  0x89   :  { %5033 = vmatpush2.bf16.msra.mxu0 %v7665_v0  ;;  %v7761_v0 = vld [vmem:[%s11791_s2 + $0x940] ss:$16 sps:$4 sm:$0xff]  }
  0x8a   :  { %5076 = vmatpush2.bf16.msra.mxu1 %v7668_v1  ;;  %5034 = vmatprep.subr.bf16.mxu0 %v7673_v2  ;;  %v7764_v1 = vld [vmem:[%s11791_s2 + $0xb40] ss:$16 sps:$4 sm:$0xff]   ;;  %v7769_v2 = vld [vmem:[%s11791_s2 + $0x924] ss:$16 sps:$4 sm:$0xff]  }
  0x8b   :  { %5077 = vmatprep.subr.bf16.mxu1 %v7676_v3  ;;  %v7772_v3 = vld [vmem:[%s11791_s2 + $0xb24] ss:$16 sps:$4 sm:$0xff]  }
  0x8d   :  { %5035 = vmatpush2.bf16.msra.mxu0 %v7671_v4  ;;  %v7767_v4 = vld [vmem:[%s11791_s2 + $0x920] ss:$16 sps:$4 sm:$0xff]  }
  0x8e   :  { %5078 = vmatpush2.bf16.msra.mxu1 %v7674_v5  ;;  %5090 = vmatprep.subr.bf16.mxu0 %v7685_v6  ;;  %v7770_v5 = vld [vmem:[%s11791_s2 + $0xb20] ss:$16 sps:$4 sm:$0xff]   ;;  %v7775_v6 = vld [vmem:[%s11791_s2 + $0x904] ss:$16 sps:$4 sm:$0xff]  }
  0x8f   :  { %5133 = vmatprep.subr.bf16.mxu1 %v7688_v7  ;;  %v7778_v7 = vld [vmem:[%s11791_s2 + $0xb04] ss:$16 sps:$4 sm:$0xff]  }
  0x90   :  { %5037 = vmatmul.mubr.bf16.vlgmr.msra.gmra.mxu0 %v7677_v8  ;;  %v7773_v8 = vld [vmem:[%s11791_s2 + $0x900] ss:$16 sps:$4 sm:$0xff]  }
  0x91   :  { %5080 = vmatmul.mubr.bf16.vlgmr.msra.gmra.mxu1 %v7680_v9  ;;  %5091 = vmatpush1.bf16.msra.mxu0 %v7683_v10  ;;  %v7776_v9 = vld [vmem:[%s11791_s2 + $0xb00] ss:$16 sps:$4 sm:$0xff]   ;;  %v7787_v10 = vld [vmem:[%s11791_s2 + $0xce4] ss:$16 sps:$4 sm:$0xff]  }
  0x92   :  { %5134 = vmatpush1.bf16.msra.mxu1 %v7686_v11  ;;  %5092 = vmatprep.subr.bf16.mxu0 %v7691_v12  ;;  %v7790_v11 = vld [vmem:[%s11791_s2 + $0xee4] ss:$16 sps:$4 sm:$0xff]  }
  0x93   :  { %5135 = vmatprep.subr.bf16.mxu1 %v7694_v13  ;;  %5122 = vmatprep.mubr.bf16.mxu0 %v7781_v19  ;;  %v7779_v12 = vld [vmem:[%s11790_s1 + $0x20] ss:$100 sps:$4 sm:$0xff]   ;;  %v7782_v13 = vld [vmem:[%s11790_s1 + $0x28] ss:$100 sps:$4 sm:$0xff]  }
  0x94   :  { %5165 = vmatprep.mubr.bf16.mxu1 %v7784_v21  ;;  %v7886_v19 = vld [vmem:[%s11790_s1 + $0x3c] ss:$100 sps:$4 sm:$0xff]  }
  0x95   :  { %5093 = vmatpush1.bf16.msra.mxu0 %v7689_v14  ;;  %v7785_v14 = vld [vmem:[%s11791_s2 + $0xce0] ss:$16 sps:$4 sm:$0xff]  }
  0x96   :  { %5136 = vmatpush1.bf16.msra.mxu1 %v7692_v15  ;;  %5094 = vmatprep.subr.bf16.mxu0 %v7697_v16  ;;  %v7788_v15 = vld [vmem:[%s11791_s2 + $0xee0] ss:$16 sps:$4 sm:$0xff]   ;;  %v7793_v16 = vld [vmem:[%s11791_s2 + $0xcc4] ss:$16 sps:$4 sm:$0xff]  }
  0x97   :  { %5137 = vmatprep.subr.bf16.mxu1 %v7700_v17  ;;  %v7796_v17 = vld [vmem:[%s11791_s2 + $0xec4] ss:$16 sps:$4 sm:$0xff]   ;;  %v7794_v21 = vld [vmem:[%s11791_s2 + $0xec0] ss:$16 sps:$4 sm:$0xff]  }
  0x99   :  { %5095 = vmatpush1.bf16.msra.mxu0 %v7695_v18  ;;  %v7883_v18 = vld [vmem:[%s11790_s1 + $0x34] ss:$100 sps:$4 sm:$0xff]  }
  0x9a   :  { %5138 = vmatpush1.bf16.msra.mxu1 %v7698_v20  ;;  %5096 = vmatprep.subr.bf16.mxu0 %v7703_v22  ;;  %v7791_v20 = vld [vmem:[%s11791_s2 + $0xcc0] ss:$16 sps:$4 sm:$0xff]   ;;  %v7799_v22 = vld [vmem:[%s11791_s2 + $0xca4] ss:$16 sps:$4 sm:$0xff]  }
  0x9b   :  { %5139 = vmatprep.subr.bf16.mxu1 %v7706_v23  ;;  %v7802_v23 = vld [vmem:[%s11791_s2 + $0xea4] ss:$16 sps:$4 sm:$0xff]  }
  0x9d   :  { %5097 = vmatpush1.bf16.msra.mxu0 %v7701_v24  ;;  %v7797_v24 = vld [vmem:[%s11791_s2 + $0xca0] ss:$16 sps:$4 sm:$0xff]  }
  0x9e   :  { %5140 = vmatpush1.bf16.msra.mxu1 %v7704_v25  ;;  %5098 = vmatprep.subr.bf16.mxu0 %v7709_v26  ;;  %v7800_v25 = vld [vmem:[%s11791_s2 + $0xea0] ss:$16 sps:$4 sm:$0xff]   ;;  %v7805_v26 = vld [vmem:[%s11791_s2 + $0xc84] ss:$16 sps:$4 sm:$0xff]  }
  0x9f   :  { %5141 = vmatprep.subr.bf16.mxu1 %v7712_v27  ;;  %v7808_v27 = vld [vmem:[%s11791_s2 + $0xe84] ss:$16 sps:$4 sm:$0xff]  }
  0xa1   :  { %5099 = vmatpush1.bf16.msra.mxu0 %v7707_v28  ;;  %v7803_v28 = vld [vmem:[%s11791_s2 + $0xc80] ss:$16 sps:$4 sm:$0xff]  }
  0xa2   :  { %5142 = vmatpush1.bf16.msra.mxu1 %v7710_v29  ;;  %5100 = vmatprep.subr.bf16.mxu0 %v7715_v30  ;;  %v7806_v29 = vld [vmem:[%s11791_s2 + $0xe80] ss:$16 sps:$4 sm:$0xff]   ;;  %v7811_v30 = vld [vmem:[%s11791_s2 + $0xc64] ss:$16 sps:$4 sm:$0xff]  }
  0xa3   :  { %5143 = vmatprep.subr.bf16.mxu1 %v7718_v31  ;;  %v7814_v31 = vld [vmem:[%s11791_s2 + $0xe64] ss:$16 sps:$4 sm:$0xff]  }
  0xa5   :  { %5101 = vmatpush1.bf16.msra.mxu0 %v7713_v32  ;;  %v7809_v32 = vld [vmem:[%s11791_s2 + $0xc60] ss:$16 sps:$4 sm:$0xff]  }
  0xa6   :  { %5144 = vmatpush1.bf16.msra.mxu1 %v7716_v33  ;;  %5102 = vmatprep.subr.bf16.mxu0 %v7721_v34  ;;  %v7812_v33 = vld [vmem:[%s11791_s2 + $0xe60] ss:$16 sps:$4 sm:$0xff]   ;;  %v7817_v34 = vld [vmem:[%s11791_s2 + $0xc44] ss:$16 sps:$4 sm:$0xff]  }
  0xa7   :  { %5145 = vmatprep.subr.bf16.mxu1 %v7724_v35  ;;  %v7820_v35 = vld [vmem:[%s11791_s2 + $0xe44] ss:$16 sps:$4 sm:$0xff]  }
  0xa9   :  { %5103 = vmatpush1.bf16.msra.mxu0 %v7719_v36  ;;  %v7815_v36 = vld [vmem:[%s11791_s2 + $0xc40] ss:$16 sps:$4 sm:$0xff]  }
  0xaa   :  { %5146 = vmatpush1.bf16.msra.mxu1 %v7722_v37  ;;  %5104 = vmatprep.subr.bf16.mxu0 %v7727_v38  ;;  %v7818_v37 = vld [vmem:[%s11791_s2 + $0xe40] ss:$16 sps:$4 sm:$0xff]   ;;  %v7823_v38 = vld [vmem:[%s11791_s2 + $0xc24] ss:$16 sps:$4 sm:$0xff]  }
  0xab   :  { %5147 = vmatprep.subr.bf16.mxu1 %v7730_v39  ;;  %v7826_v39 = vld [vmem:[%s11791_s2 + $0xe24] ss:$16 sps:$4 sm:$0xff]  }
  0xad   :  { %5105 = vmatpush1.bf16.msra.mxu0 %v7725_v40  ;;  %v7821_v40 = vld [vmem:[%s11791_s2 + $0xc20] ss:$16 sps:$4 sm:$0xff]  }
  0xae   :  { %5148 = vmatpush1.bf16.msra.mxu1 %v7728_v41  ;;  %5106 = vmatprep.subr.bf16.mxu0 %v7733_v42  ;;  %v7824_v41 = vld [vmem:[%s11791_s2 + $0xe20] ss:$16 sps:$4 sm:$0xff]   ;;  %v7829_v42 = vld [vmem:[%s11791_s2 + $0xc04] ss:$16 sps:$4 sm:$0xff]  }
  0xaf   :  { %5149 = vmatprep.subr.bf16.mxu1 %v7736_v43  ;;  %v7832_v43 = vld [vmem:[%s11791_s2 + $0xe04] ss:$16 sps:$4 sm:$0xff]  }
  0xb1   :  { %5107 = vmatpush2.bf16.msra.mxu0 %v7731_v44  ;;  %v7827_v44 = vld [vmem:[%s11791_s2 + $0xc00] ss:$16 sps:$4 sm:$0xff]  }
  0xb2   :  { %5150 = vmatpush2.bf16.msra.mxu1 %v7734_v45  ;;  %5108 = vmatprep.subr.bf16.mxu0 %v7739_v46  ;;  %v7830_v45 = vld [vmem:[%s11791_s2 + $0xe00] ss:$16 sps:$4 sm:$0xff]   ;;  %v7835_v46 = vld [vmem:[%s11791_s2 + $0xde4] ss:$16 sps:$4 sm:$0xff]  }
  0xb3   :  { %5151 = vmatprep.subr.bf16.mxu1 %v7742_v47  ;;  %v7838_v47 = vld [vmem:[%s11791_s2 + $0xfe4] ss:$16 sps:$4 sm:$0xff]  }
  0xb5   :  { %5109 = vmatpush2.bf16.msra.mxu0 %v7737_v48  ;;  %v7833_v48 = vld [vmem:[%s11791_s2 + $0xde0] ss:$16 sps:$4 sm:$0xff]  }
  0xb6   :  { %5152 = vmatpush2.bf16.msra.mxu1 %v7740_v49  ;;  %5110 = vmatprep.subr.bf16.mxu0 %v7745_v50  ;;  %v7836_v49 = vld [vmem:[%s11791_s2 + $0xfe0] ss:$16 sps:$4 sm:$0xff]   ;;  %v7841_v50 = vld [vmem:[%s11791_s2 + $0xdc4] ss:$16 sps:$4 sm:$0xff]  }
  0xb7   :  { %5153 = vmatprep.subr.bf16.mxu1 %v7748_v51  ;;  %v7844_v51 = vld [vmem:[%s11791_s2 + $0xfc4] ss:$16 sps:$4 sm:$0xff]  }
  0xb9   :  { %5111 = vmatpush2.bf16.msra.mxu0 %v7743_v52  ;;  %v7839_v52 = vld [vmem:[%s11791_s2 + $0xdc0] ss:$16 sps:$4 sm:$0xff]  }
  0xba   :  { %5154 = vmatpush2.bf16.msra.mxu1 %v7746_v53  ;;  %5112 = vmatprep.subr.bf16.mxu0 %v7751_v54  ;;  %v7842_v53 = vld [vmem:[%s11791_s2 + $0xfc0] ss:$16 sps:$4 sm:$0xff]   ;;  %v7847_v54 = vld [vmem:[%s11791_s2 + $0xda4] ss:$16 sps:$4 sm:$0xff]  }
  0xbb   :  { %5155 = vmatprep.subr.bf16.mxu1 %v7754_v55  ;;  %v7850_v55 = vld [vmem:[%s11791_s2 + $0xfa4] ss:$16 sps:$4 sm:$0xff]  }
  0xbd   :  { %5113 = vmatpush2.bf16.msra.mxu0 %v7749_v56  ;;  %v7845_v56 = vld [vmem:[%s11791_s2 + $0xda0] ss:$16 sps:$4 sm:$0xff]  }
  0xbe   :  { %5156 = vmatpush2.bf16.msra.mxu1 %v7752_v57  ;;  %5114 = vmatprep.subr.bf16.mxu0 %v7757_v58  ;;  %v7848_v57 = vld [vmem:[%s11791_s2 + $0xfa0] ss:$16 sps:$4 sm:$0xff]   ;;  %v7853_v58 = vld [vmem:[%s11791_s2 + $0xd84] ss:$16 sps:$4 sm:$0xff]  }
  0xbf   :  { %5157 = vmatprep.subr.bf16.mxu1 %v7760_v59  ;;  %v7856_v59 = vld [vmem:[%s11791_s2 + $0xf84] ss:$16 sps:$4 sm:$0xff]  }
  0xc1   :  { %5115 = vmatpush2.bf16.msra.mxu0 %v7755_v60  ;;  %v7851_v60 = vld [vmem:[%s11791_s2 + $0xd80] ss:$16 sps:$4 sm:$0xff]  }
  0xc2   :  { %5158 = vmatpush2.bf16.msra.mxu1 %v7758_v61  ;;  %5116 = vmatprep.subr.bf16.mxu0 %v7763_v62  ;;  %v7854_v61 = vld [vmem:[%s11791_s2 + $0xf80] ss:$16 sps:$4 sm:$0xff]   ;;  %v7859_v62 = vld [vmem:[%s11791_s2 + $0xd64] ss:$16 sps:$4 sm:$0xff]  }
  0xc3   :  { %5159 = vmatprep.subr.bf16.mxu1 %v7766_v63  ;;  %v7862_v63 = vld [vmem:[%s11791_s2 + $0xf64] ss:$16 sps:$4 sm:$0xff]  }
  0xc5   :  { %5117 = vmatpush2.bf16.msra.mxu0 %v7761_v0  ;;  %v7857_v0 = vld [vmem:[%s11791_s2 + $0xd60] ss:$16 sps:$4 sm:$0xff]  }
  0xc6   :  { %5160 = vmatpush2.bf16.msra.mxu1 %v7764_v1  ;;  %5118 = vmatprep.subr.bf16.mxu0 %v7769_v2  ;;  %v7860_v1 = vld [vmem:[%s11791_s2 + $0xf60] ss:$16 sps:$4 sm:$0xff]   ;;  %v7865_v2 = vld [vmem:[%s11791_s2 + $0xd44] ss:$16 sps:$4 sm:$0xff]  }
  0xc7   :  { %5161 = vmatprep.subr.bf16.mxu1 %v7772_v3  ;;  %v7868_v3 = vld [vmem:[%s11791_s2 + $0xf44] ss:$16 sps:$4 sm:$0xff]  }
  0xc9   :  { %5119 = vmatpush2.bf16.msra.mxu0 %v7767_v4  ;;  %v7863_v4 = vld [vmem:[%s11791_s2 + $0xd40] ss:$16 sps:$4 sm:$0xff]  }
  0xca   :  { %5162 = vmatpush2.bf16.msra.mxu1 %v7770_v5  ;;  %5120 = vmatprep.subr.bf16.mxu0 %v7775_v6  ;;  %v7866_v5 = vld [vmem:[%s11791_s2 + $0xf40] ss:$16 sps:$4 sm:$0xff]   ;;  %v7871_v6 = vld [vmem:[%s11791_s2 + $0xd24] ss:$16 sps:$4 sm:$0xff]  }
  0xcb   :  { %5163 = vmatprep.subr.bf16.mxu1 %v7778_v7  ;;  %v7874_v7 = vld [vmem:[%s11791_s2 + $0xf24] ss:$16 sps:$4 sm:$0xff]  }
  0xcd   :  { %5121 = vmatpush2.bf16.msra.mxu0 %v7773_v8  ;;  %v7869_v8 = vld [vmem:[%s11791_s2 + $0xd20] ss:$16 sps:$4 sm:$0xff]  }
  0xce   :  { %5164 = vmatpush2.bf16.msra.mxu1 %v7776_v9  ;;  %5176 = vmatprep.subr.bf16.mxu0 %v7787_v10  ;;  %v7872_v9 = vld [vmem:[%s11791_s2 + $0xf20] ss:$16 sps:$4 sm:$0xff]   ;;  %v7877_v10 = vld [vmem:[%s11791_s2 + $0xd04] ss:$16 sps:$4 sm:$0xff]  }
  0xcf   :  { %5219 = vmatprep.subr.bf16.mxu1 %v7790_v11  ;;  %v7880_v11 = vld [vmem:[%s11791_s2 + $0xf04] ss:$16 sps:$4 sm:$0xff]  }
  0xd0   :  { %5123 = vmatmul.mubr.bf16.vlgmr.msra.gmra.mxu0 %v7779_v12  ;;  %v7875_v12 = vld [vmem:[%s11791_s2 + $0xd00] ss:$16 sps:$4 sm:$0xff]  }
  0xd1   :  { %5166 = vmatmul.mubr.bf16.vlgmr.msra.gmra.mxu1 %v7782_v13  ;;  %5177 = vmatpush1.bf16.msra.mxu0 %v7785_v14  ;;  %v7878_v13 = vld [vmem:[%s11791_s2 + $0xf00] ss:$16 sps:$4 sm:$0xff]   ;;  %v7889_v14 = vld [vmem:[%s11791_s2 + $0x10e4] ss:$16 sps:$4 sm:$0xff]  }
  0xd2   :  { %5220 = vmatpush1.bf16.msra.mxu1 %v7788_v15  ;;  %5178 = vmatprep.subr.bf16.mxu0 %v7793_v16  ;;  %v7892_v15 = vld [vmem:[%s11791_s2 + $0x12e4] ss:$16 sps:$4 sm:$0xff]  }
  0xd3   :  { %5221 = vmatprep.subr.bf16.mxu1 %v7796_v17  ;;  %5208 = vmatprep.mubr.bf16.mxu0 %v7883_v18  ;;  %v7881_v16 = vld [vmem:[%s11790_s1 + $0x30] ss:$100 sps:$4 sm:$0xff]   ;;  %v7884_v17 = vld [vmem:[%s11790_s1 + $0x38] ss:$100 sps:$4 sm:$0xff]  }
  0xd4   :  { %5251 = vmatprep.mubr.bf16.mxu1 %v7886_v19  ;;  %v7887_v18 = vld [vmem:[%s11791_s2 + $0x10e0] ss:$16 sps:$4 sm:$0xff]  }
  0xd5   :  { %5179 = vmatpush1.bf16.msra.mxu0 %v7791_v20  ;;  %v7890_v19 = vld [vmem:[%s11791_s2 + $0x12e0] ss:$16 sps:$4 sm:$0xff]   ;;  %v7895_v20 = vld [vmem:[%s11791_s2 + $0x10c4] ss:$16 sps:$4 sm:$0xff]  }
  0xd6   :  { %5222 = vmatpush1.bf16.msra.mxu1 %v7794_v21  ;;  %5180 = vmatprep.subr.bf16.mxu0 %v7799_v22  ;;  %v7898_v21 = vld [vmem:[%s11791_s2 + $0x12c4] ss:$16 sps:$4 sm:$0xff]  }
  0xd7   :  { %5223 = vmatprep.subr.bf16.mxu1 %v7802_v23  ;;  %v7985_v22 = vld [vmem:[%s11790_s1 + $0x44] ss:$100 sps:$4 sm:$0xff]   ;;  %v7988_v23 = vld [vmem:[%s11790_s1 + $0x4c] ss:$100 sps:$4 sm:$0xff]  }
  0xd9   :  { %5181 = vmatpush1.bf16.msra.mxu0 %v7797_v24  ;;  %v7893_v24 = vld [vmem:[%s11791_s2 + $0x10c0] ss:$16 sps:$4 sm:$0xff]  }
  0xda   :  { %5224 = vmatpush1.bf16.msra.mxu1 %v7800_v25  ;;  %5182 = vmatprep.subr.bf16.mxu0 %v7805_v26  ;;  %v7896_v25 = vld [vmem:[%s11791_s2 + $0x12c0] ss:$16 sps:$4 sm:$0xff]   ;;  %v7901_v26 = vld [vmem:[%s11791_s2 + $0x10a4] ss:$16 sps:$4 sm:$0xff]  }
  0xdb   :  { %5225 = vmatprep.subr.bf16.mxu1 %v7808_v27  ;;  %v7904_v27 = vld [vmem:[%s11791_s2 + $0x12a4] ss:$16 sps:$4 sm:$0xff]  }
  0xdd   :  { %5183 = vmatpush1.bf16.msra.mxu0 %v7803_v28  ;;  %v7899_v28 = vld [vmem:[%s11791_s2 + $0x10a0] ss:$16 sps:$4 sm:$0xff]  }
  0xde   :  { %5226 = vmatpush1.bf16.msra.mxu1 %v7806_v29  ;;  %5184 = vmatprep.subr.bf16.mxu0 %v7811_v30  ;;  %v7902_v29 = vld [vmem:[%s11791_s2 + $0x12a0] ss:$16 sps:$4 sm:$0xff]   ;;  %v7907_v30 = vld [vmem:[%s11791_s2 + $0x1084] ss:$16 sps:$4 sm:$0xff]  }
  0xdf   :  { %5227 = vmatprep.subr.bf16.mxu1 %v7814_v31  ;;  %v7910_v31 = vld [vmem:[%s11791_s2 + $0x1284] ss:$16 sps:$4 sm:$0xff]  }
  0xe1   :  { %5185 = vmatpush1.bf16.msra.mxu0 %v7809_v32  ;;  %v7905_v32 = vld [vmem:[%s11791_s2 + $0x1080] ss:$16 sps:$4 sm:$0xff]  }
  0xe2   :  { %5228 = vmatpush1.bf16.msra.mxu1 %v7812_v33  ;;  %5186 = vmatprep.subr.bf16.mxu0 %v7817_v34  ;;  %v7908_v33 = vld [vmem:[%s11791_s2 + $0x1280] ss:$16 sps:$4 sm:$0xff]   ;;  %v7913_v34 = vld [vmem:[%s11791_s2 + $0x1064] ss:$16 sps:$4 sm:$0xff]  }
  0xe3   :  { %5229 = vmatprep.subr.bf16.mxu1 %v7820_v35  ;;  %v7916_v35 = vld [vmem:[%s11791_s2 + $0x1264] ss:$16 sps:$4 sm:$0xff]  }
  0xe5   :  { %5187 = vmatpush1.bf16.msra.mxu0 %v7815_v36  ;;  %v7911_v36 = vld [vmem:[%s11791_s2 + $0x1060] ss:$16 sps:$4 sm:$0xff]  }
  0xe6   :  { %5230 = vmatpush1.bf16.msra.mxu1 %v7818_v37  ;;  %5188 = vmatprep.subr.bf16.mxu0 %v7823_v38  ;;  %v7914_v37 = vld [vmem:[%s11791_s2 + $0x1260] ss:$16 sps:$4 sm:$0xff]   ;;  %v7919_v38 = vld [vmem:[%s11791_s2 + $0x1044] ss:$16 sps:$4 sm:$0xff]  }
  0xe7   :  { %5231 = vmatprep.subr.bf16.mxu1 %v7826_v39  ;;  %v7922_v39 = vld [vmem:[%s11791_s2 + $0x1244] ss:$16 sps:$4 sm:$0xff]  }
  0xe9   :  { %5189 = vmatpush1.bf16.msra.mxu0 %v7821_v40  ;;  %v7917_v40 = vld [vmem:[%s11791_s2 + $0x1040] ss:$16 sps:$4 sm:$0xff]  }
  0xea   :  { %5232 = vmatpush1.bf16.msra.mxu1 %v7824_v41  ;;  %5190 = vmatprep.subr.bf16.mxu0 %v7829_v42  ;;  %v7920_v41 = vld [vmem:[%s11791_s2 + $0x1240] ss:$16 sps:$4 sm:$0xff]   ;;  %v7925_v42 = vld [vmem:[%s11791_s2 + $0x1024] ss:$16 sps:$4 sm:$0xff]  }
  0xeb   :  { %5233 = vmatprep.subr.bf16.mxu1 %v7832_v43  ;;  %v7928_v43 = vld [vmem:[%s11791_s2 + $0x1224] ss:$16 sps:$4 sm:$0xff]  }
  0xed   :  { %5191 = vmatpush1.bf16.msra.mxu0 %v7827_v44  ;;  %v7923_v44 = vld [vmem:[%s11791_s2 + $0x1020] ss:$16 sps:$4 sm:$0xff]  }
  0xee   :  { %5234 = vmatpush1.bf16.msra.mxu1 %v7830_v45  ;;  %5192 = vmatprep.subr.bf16.mxu0 %v7835_v46  ;;  %v7926_v45 = vld [vmem:[%s11791_s2 + $0x1220] ss:$16 sps:$4 sm:$0xff]   ;;  %v7931_v46 = vld [vmem:[%s11791_s2 + $0x1004] ss:$16 sps:$4 sm:$0xff]  }
  0xef   :  { %5235 = vmatprep.subr.bf16.mxu1 %v7838_v47  ;;  %v7934_v47 = vld [vmem:[%s11791_s2 + $0x1204] ss:$16 sps:$4 sm:$0xff]  }
  0xf1   :  { %5193 = vmatpush2.bf16.msra.mxu0 %v7833_v48  ;;  %v7929_v48 = vld [vmem:[%s11791_s2 + $0x1000] ss:$16 sps:$4 sm:$0xff]  }
  0xf2   :  { %5236 = vmatpush2.bf16.msra.mxu1 %v7836_v49  ;;  %5194 = vmatprep.subr.bf16.mxu0 %v7841_v50  ;;  %v7932_v49 = vld [vmem:[%s11791_s2 + $0x1200] ss:$16 sps:$4 sm:$0xff]   ;;  %v7937_v50 = vld [vmem:[%s11791_s2 + $0x11e4] ss:$16 sps:$4 sm:$0xff]  }
  0xf3   :  { %5237 = vmatprep.subr.bf16.mxu1 %v7844_v51  ;;  %v7940_v51 = vld [vmem:[%s11791_s2 + $0x13e4] ss:$16 sps:$4 sm:$0xff]  }
  0xf5   :  { %5195 = vmatpush2.bf16.msra.mxu0 %v7839_v52  ;;  %v7935_v52 = vld [vmem:[%s11791_s2 + $0x11e0] ss:$16 sps:$4 sm:$0xff]  }
  0xf6   :  { %5238 = vmatpush2.bf16.msra.mxu1 %v7842_v53  ;;  %5196 = vmatprep.subr.bf16.mxu0 %v7847_v54  ;;  %v7938_v53 = vld [vmem:[%s11791_s2 + $0x13e0] ss:$16 sps:$4 sm:$0xff]   ;;  %v7943_v54 = vld [vmem:[%s11791_s2 + $0x11c4] ss:$16 sps:$4 sm:$0xff]  }
  0xf7   :  { %5239 = vmatprep.subr.bf16.mxu1 %v7850_v55  ;;  %v7946_v55 = vld [vmem:[%s11791_s2 + $0x13c4] ss:$16 sps:$4 sm:$0xff]  }
  0xf9   :  { %5197 = vmatpush2.bf16.msra.mxu0 %v7845_v56  ;;  %v7941_v56 = vld [vmem:[%s11791_s2 + $0x11c0] ss:$16 sps:$4 sm:$0xff]  }
  0xfa   :  { %5240 = vmatpush2.bf16.msra.mxu1 %v7848_v57  ;;  %5198 = vmatprep.subr.bf16.mxu0 %v7853_v58  ;;  %v7944_v57 = vld [vmem:[%s11791_s2 + $0x13c0] ss:$16 sps:$4 sm:$0xff]   ;;  %v7949_v58 = vld [vmem:[%s11791_s2 + $0x11a4] ss:$16 sps:$4 sm:$0xff]  }
  0xfb   :  { %5241 = vmatprep.subr.bf16.mxu1 %v7856_v59  ;;  %v7952_v59 = vld [vmem:[%s11791_s2 + $0x13a4] ss:$16 sps:$4 sm:$0xff]  }
  0xfd   :  { %5199 = vmatpush2.bf16.msra.mxu0 %v7851_v60  ;;  %v7947_v60 = vld [vmem:[%s11791_s2 + $0x11a0] ss:$16 sps:$4 sm:$0xff]  }
  0xfe   :  { %5242 = vmatpush2.bf16.msra.mxu1 %v7854_v61  ;;  %5200 = vmatprep.subr.bf16.mxu0 %v7859_v62  ;;  %v7950_v61 = vld [vmem:[%s11791_s2 + $0x13a0] ss:$16 sps:$4 sm:$0xff]   ;;  %v7955_v62 = vld [vmem:[%s11791_s2 + $0x1184] ss:$16 sps:$4 sm:$0xff]  }
  0xff   :  { %5243 = vmatprep.subr.bf16.mxu1 %v7862_v63  ;;  %v7958_v63 = vld [vmem:[%s11791_s2 + $0x1384] ss:$16 sps:$4 sm:$0xff]  }
 0x101   :  { %5201 = vmatpush2.bf16.msra.mxu0 %v7857_v0  ;;  %v7953_v0 = vld [vmem:[%s11791_s2 + $0x1180] ss:$16 sps:$4 sm:$0xff]  }
 0x102   :  { %5244 = vmatpush2.bf16.msra.mxu1 %v7860_v1  ;;  %5202 = vmatprep.subr.bf16.mxu0 %v7865_v2  ;;  %v7956_v1 = vld [vmem:[%s11791_s2 + $0x1380] ss:$16 sps:$4 sm:$0xff]   ;;  %v7961_v2 = vld [vmem:[%s11791_s2 + $0x1164] ss:$16 sps:$4 sm:$0xff]  }
 0x103   :  { %5245 = vmatprep.subr.bf16.mxu1 %v7868_v3  ;;  %v7964_v3 = vld [vmem:[%s11791_s2 + $0x1364] ss:$16 sps:$4 sm:$0xff]  }
 0x105   :  { %5203 = vmatpush2.bf16.msra.mxu0 %v7863_v4  ;;  %v7959_v4 = vld [vmem:[%s11791_s2 + $0x1160] ss:$16 sps:$4 sm:$0xff]  }
 0x106   :  { %5246 = vmatpush2.bf16.msra.mxu1 %v7866_v5  ;;  %5204 = vmatprep.subr.bf16.mxu0 %v7871_v6  ;;  %v7962_v5 = vld [vmem:[%s11791_s2 + $0x1360] ss:$16 sps:$4 sm:$0xff]   ;;  %v7967_v6 = vld [vmem:[%s11791_s2 + $0x1144] ss:$16 sps:$4 sm:$0xff]  }
 0x107   :  { %5247 = vmatprep.subr.bf16.mxu1 %v7874_v7  ;;  %v7970_v7 = vld [vmem:[%s11791_s2 + $0x1344] ss:$16 sps:$4 sm:$0xff]  }
 0x109   :  { %5205 = vmatpush2.bf16.msra.mxu0 %v7869_v8  ;;  %v7965_v8 = vld [vmem:[%s11791_s2 + $0x1140] ss:$16 sps:$4 sm:$0xff]  }
 0x10a   :  { %5248 = vmatpush2.bf16.msra.mxu1 %v7872_v9  ;;  %5206 = vmatprep.subr.bf16.mxu0 %v7877_v10  ;;  %v7968_v9 = vld [vmem:[%s11791_s2 + $0x1340] ss:$16 sps:$4 sm:$0xff]   ;;  %v7973_v10 = vld [vmem:[%s11791_s2 + $0x1124] ss:$16 sps:$4 sm:$0xff]  }
 0x10b   :  { %5249 = vmatprep.subr.bf16.mxu1 %v7880_v11  ;;  %v7976_v11 = vld [vmem:[%s11791_s2 + $0x1324] ss:$16 sps:$4 sm:$0xff]  }
 0x10d   :  { %5207 = vmatpush2.bf16.msra.mxu0 %v7875_v12  ;;  %v7971_v12 = vld [vmem:[%s11791_s2 + $0x1120] ss:$16 sps:$4 sm:$0xff]  }
 0x10e   :  { %5250 = vmatpush2.bf16.msra.mxu1 %v7878_v13  ;;  %5262 = vmatprep.subr.bf16.mxu0 %v7889_v14  ;;  %v7974_v13 = vld [vmem:[%s11791_s2 + $0x1320] ss:$16 sps:$4 sm:$0xff]   ;;  %v7979_v14 = vld [vmem:[%s11791_s2 + $0x1104] ss:$16 sps:$4 sm:$0xff]  }
 0x10f   :  { %5305 = vmatprep.subr.bf16.mxu1 %v7892_v15  ;;  %v7982_v15 = vld [vmem:[%s11791_s2 + $0x1304] ss:$16 sps:$4 sm:$0xff]  }
 0x110   :  { %5209 = vmatmul.mubr.bf16.vlgmr.msra.gmra.mxu0 %v7881_v16  ;;  %v7977_v16 = vld [vmem:[%s11791_s2 + $0x1100] ss:$16 sps:$4 sm:$0xff]  }
 0x111   :  { %5252 = vmatmul.mubr.bf16.vlgmr.msra.gmra.mxu1 %v7884_v17  ;;  %5263 = vmatpush1.bf16.msra.mxu0 %v7887_v18  ;;  %v7980_v17 = vld [vmem:[%s11791_s2 + $0x1300] ss:$16 sps:$4 sm:$0xff]  }
 0x112   :  { %5306 = vmatpush1.bf16.msra.mxu1 %v7890_v19  ;;  %5264 = vmatprep.subr.bf16.mxu0 %v7895_v20  ;;  %v7983_v18 = vld [vmem:[%s11790_s1 + $0x40] ss:$100 sps:$4 sm:$0xff]   ;;  %v7986_v19 = vld [vmem:[%s11790_s1 + $0x48] ss:$100 sps:$4 sm:$0xff]  }
 0x113   :  { %5307 = vmatprep.subr.bf16.mxu1 %v7898_v21  ;;  %5294 = vmatprep.mubr.bf16.mxu0 %v7985_v22  ;;  %v7991_v20 = vld [vmem:[%s11791_s2 + $0x14e4] ss:$16 sps:$4 sm:$0xff]   ;;  %v7989_v22 = vld [vmem:[%s11791_s2 + $0x14e0] ss:$16 sps:$4 sm:$0xff]  }
 0x114   :  { %5337 = vmatprep.mubr.bf16.mxu1 %v7988_v23  ;;  %v7994_v21 = vld [vmem:[%s11791_s2 + $0x16e4] ss:$16 sps:$4 sm:$0xff]   ;;  %v7992_v23 = vld [vmem:[%s11791_s2 + $0x16e0] ss:$16 sps:$4 sm:$0xff]  }
 0x115   :  { %5265 = vmatpush1.bf16.msra.mxu0 %v7893_v24  ;;  %v7997_v24 = vld [vmem:[%s11791_s2 + $0x14c4] ss:$16 sps:$4 sm:$0xff]  }
 0x116   :  { %5308 = vmatpush1.bf16.msra.mxu1 %v7896_v25  ;;  %5266 = vmatprep.subr.bf16.mxu0 %v7901_v26  ;;  %v8000_v25 = vld [vmem:[%s11791_s2 + $0x16c4] ss:$16 sps:$4 sm:$0xff]   ;;  %v7995_v26 = vld [vmem:[%s11791_s2 + $0x14c0] ss:$16 sps:$4 sm:$0xff]  }
 0x117   :  { %5309 = vmatprep.subr.bf16.mxu1 %v7904_v27  ;;  %v7998_v27 = vld [vmem:[%s11791_s2 + $0x16c0] ss:$16 sps:$4 sm:$0xff]  }
 0x119   :  { %5267 = vmatpush1.bf16.msra.mxu0 %v7899_v28  ;;  %v8087_v28 = vld [vmem:[%s11790_s1 + $0x54] ss:$100 sps:$4 sm:$0xff]  }
 0x11a   :  { %5310 = vmatpush1.bf16.msra.mxu1 %v7902_v29  ;;  %5268 = vmatprep.subr.bf16.mxu0 %v7907_v30  ;;  %v8090_v29 = vld [vmem:[%s11790_s1 + $0x5c] ss:$100 sps:$4 sm:$0xff]   ;;  %v8003_v30 = vld [vmem:[%s11791_s2 + $0x14a4] ss:$16 sps:$4 sm:$0xff]  }
 0x11b   :  { %5311 = vmatprep.subr.bf16.mxu1 %v7910_v31  ;;  %v8006_v31 = vld [vmem:[%s11791_s2 + $0x16a4] ss:$16 sps:$4 sm:$0xff]  }
 0x11d   :  { %5269 = vmatpush1.bf16.msra.mxu0 %v7905_v32  ;;  %v8001_v32 = vld [vmem:[%s11791_s2 + $0x14a0] ss:$16 sps:$4 sm:$0xff]  }
 0x11e   :  { %5312 = vmatpush1.bf16.msra.mxu1 %v7908_v33  ;;  %5270 = vmatprep.subr.bf16.mxu0 %v7913_v34  ;;  %v8004_v33 = vld [vmem:[%s11791_s2 + $0x16a0] ss:$16 sps:$4 sm:$0xff]   ;;  %v8009_v34 = vld [vmem:[%s11791_s2 + $0x1484] ss:$16 sps:$4 sm:$0xff]  }
 0x11f   :  { %5313 = vmatprep.subr.bf16.mxu1 %v7916_v35  ;;  %v8012_v35 = vld [vmem:[%s11791_s2 + $0x1684] ss:$16 sps:$4 sm:$0xff]  }
 0x121   :  { %5271 = vmatpush1.bf16.msra.mxu0 %v7911_v36  ;;  %v8007_v36 = vld [vmem:[%s11791_s2 + $0x1480] ss:$16 sps:$4 sm:$0xff]  }
 0x122   :  { %5314 = vmatpush1.bf16.msra.mxu1 %v7914_v37  ;;  %5272 = vmatprep.subr.bf16.mxu0 %v7919_v38  ;;  %v8010_v37 = vld [vmem:[%s11791_s2 + $0x1680] ss:$16 sps:$4 sm:$0xff]   ;;  %v8015_v38 = vld [vmem:[%s11791_s2 + $0x1464] ss:$16 sps:$4 sm:$0xff]  }
 0x123   :  { %5315 = vmatprep.subr.bf16.mxu1 %v7922_v39  ;;  %v8018_v39 = vld [vmem:[%s11791_s2 + $0x1664] ss:$16 sps:$4 sm:$0xff]  }
 0x125   :  { %5273 = vmatpush1.bf16.msra.mxu0 %v7917_v40  ;;  %v8013_v40 = vld [vmem:[%s11791_s2 + $0x1460] ss:$16 sps:$4 sm:$0xff]  }
 0x126   :  { %5316 = vmatpush1.bf16.msra.mxu1 %v7920_v41  ;;  %5274 = vmatprep.subr.bf16.mxu0 %v7925_v42  ;;  %v8016_v41 = vld [vmem:[%s11791_s2 + $0x1660] ss:$16 sps:$4 sm:$0xff]   ;;  %v8021_v42 = vld [vmem:[%s11791_s2 + $0x1444] ss:$16 sps:$4 sm:$0xff]  }
 0x127   :  { %5317 = vmatprep.subr.bf16.mxu1 %v7928_v43  ;;  %v8024_v43 = vld [vmem:[%s11791_s2 + $0x1644] ss:$16 sps:$4 sm:$0xff]  }
 0x129   :  { %5275 = vmatpush1.bf16.msra.mxu0 %v7923_v44  ;;  %v8019_v44 = vld [vmem:[%s11791_s2 + $0x1440] ss:$16 sps:$4 sm:$0xff]  }
 0x12a   :  { %5318 = vmatpush1.bf16.msra.mxu1 %v7926_v45  ;;  %5276 = vmatprep.subr.bf16.mxu0 %v7931_v46  ;;  %v8022_v45 = vld [vmem:[%s11791_s2 + $0x1640] ss:$16 sps:$4 sm:$0xff]   ;;  %v8027_v46 = vld [vmem:[%s11791_s2 + $0x1424] ss:$16 sps:$4 sm:$0xff]  }
 0x12b   :  { %5319 = vmatprep.subr.bf16.mxu1 %v7934_v47  ;;  %v8030_v47 = vld [vmem:[%s11791_s2 + $0x1624] ss:$16 sps:$4 sm:$0xff]  }
 0x12d   :  { %5277 = vmatpush1.bf16.msra.mxu0 %v7929_v48  ;;  %v8025_v48 = vld [vmem:[%s11791_s2 + $0x1420] ss:$16 sps:$4 sm:$0xff]  }
 0x12e   :  { %5320 = vmatpush1.bf16.msra.mxu1 %v7932_v49  ;;  %5278 = vmatprep.subr.bf16.mxu0 %v7937_v50  ;;  %v8028_v49 = vld [vmem:[%s11791_s2 + $0x1620] ss:$16 sps:$4 sm:$0xff]   ;;  %v8033_v50 = vld [vmem:[%s11791_s2 + $0x1404] ss:$16 sps:$4 sm:$0xff]  }
 0x12f   :  { %5321 = vmatprep.subr.bf16.mxu1 %v7940_v51  ;;  %v8036_v51 = vld [vmem:[%s11791_s2 + $0x1604] ss:$16 sps:$4 sm:$0xff]  }
 0x131   :  { %5279 = vmatpush2.bf16.msra.mxu0 %v7935_v52  ;;  %v8031_v52 = vld [vmem:[%s11791_s2 + $0x1400] ss:$16 sps:$4 sm:$0xff]  }
 0x132   :  { %5322 = vmatpush2.bf16.msra.mxu1 %v7938_v53  ;;  %5280 = vmatprep.subr.bf16.mxu0 %v7943_v54  ;;  %v8034_v53 = vld [vmem:[%s11791_s2 + $0x1600] ss:$16 sps:$4 sm:$0xff]   ;;  %v8039_v54 = vld [vmem:[%s11791_s2 + $0x15e4] ss:$16 sps:$4 sm:$0xff]  }
 0x133   :  { %5323 = vmatprep.subr.bf16.mxu1 %v7946_v55  ;;  %v8042_v55 = vld [vmem:[%s11791_s2 + $0x17e4] ss:$16 sps:$4 sm:$0xff]  }
 0x135   :  { %5281 = vmatpush2.bf16.msra.mxu0 %v7941_v56  ;;  %v8037_v56 = vld [vmem:[%s11791_s2 + $0x15e0] ss:$16 sps:$4 sm:$0xff]  }
 0x136   :  { %5324 = vmatpush2.bf16.msra.mxu1 %v7944_v57  ;;  %5282 = vmatprep.subr.bf16.mxu0 %v7949_v58  ;;  %v8040_v57 = vld [vmem:[%s11791_s2 + $0x17e0] ss:$16 sps:$4 sm:$0xff]   ;;  %v8045_v58 = vld [vmem:[%s11791_s2 + $0x15c4] ss:$16 sps:$4 sm:$0xff]  }
 0x137   :  { %5325 = vmatprep.subr.bf16.mxu1 %v7952_v59  ;;  %v8048_v59 = vld [vmem:[%s11791_s2 + $0x17c4] ss:$16 sps:$4 sm:$0xff]  }
 0x139   :  { %5283 = vmatpush2.bf16.msra.mxu0 %v7947_v60  ;;  %v8043_v60 = vld [vmem:[%s11791_s2 + $0x15c0] ss:$16 sps:$4 sm:$0xff]  }
 0x13a   :  { %5326 = vmatpush2.bf16.msra.mxu1 %v7950_v61  ;;  %5284 = vmatprep.subr.bf16.mxu0 %v7955_v62  ;;  %v8046_v61 = vld [vmem:[%s11791_s2 + $0x17c0] ss:$16 sps:$4 sm:$0xff]   ;;  %v8051_v62 = vld [vmem:[%s11791_s2 + $0x15a4] ss:$16 sps:$4 sm:$0xff]  }
 0x13b   :  { %5327 = vmatprep.subr.bf16.mxu1 %v7958_v63  ;;  %v8054_v63 = vld [vmem:[%s11791_s2 + $0x17a4] ss:$16 sps:$4 sm:$0xff]  }
 0x13d   :  { %5285 = vmatpush2.bf16.msra.mxu0 %v7953_v0  ;;  %v8049_v0 = vld [vmem:[%s11791_s2 + $0x15a0] ss:$16 sps:$4 sm:$0xff]  }
 0x13e   :  { %5328 = vmatpush2.bf16.msra.mxu1 %v7956_v1  ;;  %5286 = vmatprep.subr.bf16.mxu0 %v7961_v2  ;;  %v8052_v1 = vld [vmem:[%s11791_s2 + $0x17a0] ss:$16 sps:$4 sm:$0xff]   ;;  %v8057_v2 = vld [vmem:[%s11791_s2 + $0x1584] ss:$16 sps:$4 sm:$0xff]  }
 0x13f   :  { %5329 = vmatprep.subr.bf16.mxu1 %v7964_v3  ;;  %v8060_v3 = vld [vmem:[%s11791_s2 + $0x1784] ss:$16 sps:$4 sm:$0xff]  }
 0x141   :  { %5287 = vmatpush2.bf16.msra.mxu0 %v7959_v4  ;;  %v8055_v4 = vld [vmem:[%s11791_s2 + $0x1580] ss:$16 sps:$4 sm:$0xff]  }
 0x142   :  { %5330 = vmatpush2.bf16.msra.mxu1 %v7962_v5  ;;  %5288 = vmatprep.subr.bf16.mxu0 %v7967_v6  ;;  %v8058_v5 = vld [vmem:[%s11791_s2 + $0x1780] ss:$16 sps:$4 sm:$0xff]   ;;  %v8063_v6 = vld [vmem:[%s11791_s2 + $0x1564] ss:$16 sps:$4 sm:$0xff]  }
 0x143   :  { %5331 = vmatprep.subr.bf16.mxu1 %v7970_v7  ;;  %v8066_v7 = vld [vmem:[%s11791_s2 + $0x1764] ss:$16 sps:$4 sm:$0xff]  }
 0x145   :  { %5289 = vmatpush2.bf16.msra.mxu0 %v7965_v8  ;;  %v8061_v8 = vld [vmem:[%s11791_s2 + $0x1560] ss:$16 sps:$4 sm:$0xff]  }
 0x146   :  { %5332 = vmatpush2.bf16.msra.mxu1 %v7968_v9  ;;  %5290 = vmatprep.subr.bf16.mxu0 %v7973_v10  ;;  %v8064_v9 = vld [vmem:[%s11791_s2 + $0x1760] ss:$16 sps:$4 sm:$0xff]   ;;  %v8069_v10 = vld [vmem:[%s11791_s2 + $0x1544] ss:$16 sps:$4 sm:$0xff]  }
 0x147   :  { %5333 = vmatprep.subr.bf16.mxu1 %v7976_v11  ;;  %v8072_v11 = vld [vmem:[%s11791_s2 + $0x1744] ss:$16 sps:$4 sm:$0xff]  }
 0x149   :  { %5291 = vmatpush2.bf16.msra.mxu0 %v7971_v12  ;;  %v8067_v12 = vld [vmem:[%s11791_s2 + $0x1540] ss:$16 sps:$4 sm:$0xff]  }
 0x14a   :  { %5334 = vmatpush2.bf16.msra.mxu1 %v7974_v13  ;;  %5292 = vmatprep.subr.bf16.mxu0 %v7979_v14  ;;  %v8070_v13 = vld [vmem:[%s11791_s2 + $0x1740] ss:$16 sps:$4 sm:$0xff]   ;;  %v8075_v14 = vld [vmem:[%s11791_s2 + $0x1524] ss:$16 sps:$4 sm:$0xff]  }
 0x14b   :  { %5335 = vmatprep.subr.bf16.mxu1 %v7982_v15  ;;  %v8078_v15 = vld [vmem:[%s11791_s2 + $0x1724] ss:$16 sps:$4 sm:$0xff]  }
 0x14d   :  { %5293 = vmatpush2.bf16.msra.mxu0 %v7977_v16  ;;  %v8073_v16 = vld [vmem:[%s11791_s2 + $0x1520] ss:$16 sps:$4 sm:$0xff]  }
 0x14e   :  { %5336 = vmatpush2.bf16.msra.mxu1 %v7980_v17  ;;  %5348 = vmatprep.subr.bf16.mxu0 %v7991_v20  ;;  %v8076_v17 = vld [vmem:[%s11791_s2 + $0x1720] ss:$16 sps:$4 sm:$0xff]  }
 0x14f   :  { %5391 = vmatprep.subr.bf16.mxu1 %v7994_v21  ;;  %v8079_v20 = vld [vmem:[%s11791_s2 + $0x1500] ss:$16 sps:$4 sm:$0xff]  }
 0x150   :  { %5295 = vmatmul.mubr.bf16.vlgmr.msra.gmra.mxu0 %v7983_v18  ;;  %v8081_v18 = vld [vmem:[%s11791_s2 + $0x1504] ss:$16 sps:$4 sm:$0xff]   ;;  %v8082_v21 = vld [vmem:[%s11791_s2 + $0x1700] ss:$16 sps:$4 sm:$0xff]  }
 0x151   :  { %5338 = vmatmul.mubr.bf16.vlgmr.msra.gmra.mxu1 %v7986_v19  ;;  %5349 = vmatpush1.bf16.msra.mxu0 %v7989_v22  ;;  %v8084_v19 = vld [vmem:[%s11791_s2 + $0x1704] ss:$16 sps:$4 sm:$0xff]  }
 0x152   :  { %5392 = vmatpush1.bf16.msra.mxu1 %v7992_v23  ;;  %5350 = vmatprep.subr.bf16.mxu0 %v7997_v24  ;;  %v8085_v22 = vld [vmem:[%s11790_s1 + $0x50] ss:$100 sps:$4 sm:$0xff]   ;;  %v8088_v23 = vld [vmem:[%s11790_s1 + $0x58] ss:$100 sps:$4 sm:$0xff]  }
 0x153   :  { %5393 = vmatprep.subr.bf16.mxu1 %v8000_v25  ;;  %5380 = vmatprep.mubr.bf16.mxu0 %v8087_v28  ;;  %v8093_v24 = vld [vmem:[%s11791_s2 + $0x1864] ss:$16 sps:$4 sm:$0xff]   ;;  %v8096_v25 = vld [vmem:[%s11791_s2 + $0xec] ss:$16 sps:$4 sm:$0xff]  }
 0x154   :  { %5423 = vmatprep.mubr.bf16.mxu1 %v8090_v29  ;;  %v8099_v28 = vld [vmem:[%s11791_s2 + $0x1844] ss:$16 sps:$4 sm:$0xff]   ;;  %v8102_v29 = vld [vmem:[%s11791_s2 + $0xcc] ss:$16 sps:$4 sm:$0xff]  }
 0x155   :  { %5351 = vmatpush1.bf16.msra.mxu0 %v7995_v26  ;;  %v8091_v26 = vld [vmem:[%s11791_s2 + $0x1860] ss:$16 sps:$4 sm:$0xff]  }
 0x156   :  { %5394 = vmatpush1.bf16.msra.mxu1 %v7998_v27  ;;  %5352 = vmatprep.subr.bf16.mxu0 %v8003_v30  ;;  %v8094_v27 = vld [vmem:[%s11791_s2 + $0xe8] ss:$16 sps:$4 sm:$0xff]   ;;  %v8097_v30 = vld [vmem:[%s11791_s2 + $0x1840] ss:$16 sps:$4 sm:$0xff]  }
 0x157   :  { %5395 = vmatprep.subr.bf16.mxu1 %v8006_v31  ;;  %v8100_v31 = vld [vmem:[%s11791_s2 + $0xc8] ss:$16 sps:$4 sm:$0xff]  }
 0x159   :  { %5353 = vmatpush1.bf16.msra.mxu0 %v8001_v32  ;;  %v8105_v32 = vld [vmem:[%s11791_s2 + $0x1824] ss:$16 sps:$4 sm:$0xff]  }
 0x15a   :  { %5396 = vmatpush1.bf16.msra.mxu1 %v8004_v33  ;;  %5354 = vmatprep.subr.bf16.mxu0 %v8009_v34  ;;  %v8108_v33 = vld [vmem:[%s11791_s2 + $0xac] ss:$16 sps:$4 sm:$0xff]   ;;  %v8103_v34 = vld [vmem:[%s11791_s2 + $0x1820] ss:$16 sps:$4 sm:$0xff]  }
 0x15b   :  { %5397 = vmatprep.subr.bf16.mxu1 %v8012_v35  ;;  %v8106_v35 = vld [vmem:[%s11791_s2 + $0xa8] ss:$16 sps:$4 sm:$0xff]  }
 0x15d   :  { %5355 = vmatpush1.bf16.msra.mxu0 %v8007_v36  ;;  %v8780_v36 = vmov 0  }
 0x15e   :  { %5398 = vmatpush1.bf16.msra.mxu1 %v8010_v37  ;;  %5356 = vmatprep.subr.bf16.mxu0 %v8015_v38  ;;  %v8740_v37 = vld [vmem:[%s11790_s1 + $0x4] ss:$100 sps:$4 sm:$0xff]  }
 0x15f   :  { %5399 = vmatprep.subr.bf16.mxu1 %v8018_v39  ;;  %v8111_v38 = vld [vmem:[%s11791_s2 + $0x1804] ss:$16 sps:$4 sm:$0xff]   ;;  %v8114_v39 = vld [vmem:[%s11791_s2 + $0x8c] ss:$16 sps:$4 sm:$0xff]  }
 0x161   :  { %5357 = vmatpush1.bf16.msra.mxu0 %v8013_v40  ;;  %v8109_v40 = vld [vmem:[%s11791_s2 + $0x1800] ss:$16 sps:$4 sm:$0xff]  }
 0x162   :  { %5400 = vmatpush1.bf16.msra.mxu1 %v8016_v41  ;;  %5358 = vmatprep.subr.bf16.mxu0 %v8021_v42  ;;  %v8112_v41 = vld [vmem:[%s11791_s2 + $0x88] ss:$16 sps:$4 sm:$0xff]   ;;  %v8115_v42 = vld [vmem:[%s11790_s1 + $0x60] ss:$100 sps:$4 sm:$0xff]  }
 0x163   :  { %5401 = vmatprep.subr.bf16.mxu1 %v8024_v43  ;;  %v8118_v43 = vld [vmem:[%s11791_s2 + $0x6c] ss:$16 sps:$4 sm:$0xff]  }
 0x165   :  { %5359 = vmatpush1.bf16.msra.mxu0 %v8019_v44  ;;  %v8121_v44 = vld [vmem:[%s11791_s2 + $0x2ec] ss:$16 sps:$4 sm:$0xff]  }
 0x166   :  { %5402 = vmatpush1.bf16.msra.mxu1 %v8022_v45  ;;  %5360 = vmatprep.subr.bf16.mxu0 %v8027_v46  ;;  %v8116_v45 = vld [vmem:[%s11791_s2 + $0x68] ss:$16 sps:$4 sm:$0xff]  }
 0x167   :  { %5403 = vmatprep.subr.bf16.mxu1 %v8030_v47  ;;  %v8119_v46 = vld [vmem:[%s11791_s2 + $0x2e8] ss:$16 sps:$4 sm:$0xff]   ;;  %v8124_v47 = vld [vmem:[%s11791_s2 + $0x4c] ss:$16 sps:$4 sm:$0xff]  }
 0x169   :  { %5361 = vmatpush1.bf16.msra.mxu0 %v8025_v48  ;;  %v8127_v48 = vld [vmem:[%s11791_s2 + $0x2cc] ss:$16 sps:$4 sm:$0xff]  }
 0x16a   :  { %5404 = vmatpush1.bf16.msra.mxu1 %v8028_v49  ;;  %5362 = vmatprep.subr.bf16.mxu0 %v8033_v50  ;;  %v8122_v49 = vld [vmem:[%s11791_s2 + $0x48] ss:$16 sps:$4 sm:$0xff]  }
 0x16b   :  { %5405 = vmatprep.subr.bf16.mxu1 %v8036_v51  ;;  %v8125_v50 = vld [vmem:[%s11791_s2 + $0x2c8] ss:$16 sps:$4 sm:$0xff]   ;;  %v8130_v51 = vld [vmem:[%s11791_s2 + $0x2c] ss:$16 sps:$4 sm:$0xff]  }
 0x16d   :  { %5363 = vmatpush1.bf16.msra.mxu0 %v8031_v52  ;;  %v8133_v52 = vld [vmem:[%s11791_s2 + $0x2ac] ss:$16 sps:$4 sm:$0xff]  }
 0x16e   :  { %5406 = vmatpush1.bf16.msra.mxu1 %v8034_v53  ;;  %5364 = vmatprep.subr.bf16.mxu0 %v8039_v54  ;;  %v8741_v53 = vld [vmem:[%s11790_s1 + $0xc] ss:$100 sps:$4 sm:$0xff]   ;;  %v8128_v54 = vld [vmem:[%s11791_s2 + $0x28] ss:$16 sps:$4 sm:$0xff]  }
 0x16f   :  { %5407 = vmatprep.subr.bf16.mxu1 %v8042_v55  ;;  %v8131_v55 = vld [vmem:[%s11791_s2 + $0x2a8] ss:$16 sps:$4 sm:$0xff]  }
 0x171   :  { %5365 = vmatpush2.bf16.msra.mxu0 %v8037_v56  ;;  %v8136_v56 = vld [vmem:[%s11791_s2 + $0xc] ss:$16 sps:$4 sm:$0xff]  }
 0x172   :  { %5408 = vmatpush2.bf16.msra.mxu1 %v8040_v57  ;;  %5366 = vmatprep.subr.bf16.mxu0 %v8045_v58  ;;  %v8139_v57 = vld [vmem:[%s11791_s2 + $0x28c] ss:$16 sps:$4 sm:$0xff]   ;;  %v8134_v58 = vld [vmem:[%s11791_s2 + $0x8] ss:$16 sps:$4 sm:$0xff]  }
 0x173   :  { %5409 = vmatprep.subr.bf16.mxu1 %v8048_v59  ;;  %v8137_v59 = vld [vmem:[%s11791_s2 + $0x288] ss:$16 sps:$4 sm:$0xff]  }
 0x175   :  { %5367 = vmatpush2.bf16.msra.mxu0 %v8043_v60  ;;  %v8142_v60 = vld [vmem:[%s11791_s2 + $0x1ec] ss:$16 sps:$4 sm:$0xff]  }
 0x176   :  { %5410 = vmatpush2.bf16.msra.mxu1 %v8046_v61  ;;  %5368 = vmatprep.subr.bf16.mxu0 %v8051_v62  ;;  %v8145_v61 = vld [vmem:[%s11791_s2 + $0x26c] ss:$16 sps:$4 sm:$0xff]   ;;  %v8140_v62 = vld [vmem:[%s11791_s2 + $0x1e8] ss:$16 sps:$4 sm:$0xff]  }
 0x177   :  { %5411 = vmatprep.subr.bf16.mxu1 %v8054_v63  ;;  %v8143_v63 = vld [vmem:[%s11791_s2 + $0x268] ss:$16 sps:$4 sm:$0xff]  }
 0x179   :  { %5369 = vmatpush2.bf16.msra.mxu0 %v8049_v0  ;;  %v8148_v0 = vld [vmem:[%s11791_s2 + $0x1cc] ss:$16 sps:$4 sm:$0xff]  }
 0x17a   :  { %5412 = vmatpush2.bf16.msra.mxu1 %v8052_v1  ;;  %5370 = vmatprep.subr.bf16.mxu0 %v8057_v2  ;;  %v8151_v1 = vld [vmem:[%s11791_s2 + $0x24c] ss:$16 sps:$4 sm:$0xff]   ;;  %v8146_v2 = vld [vmem:[%s11791_s2 + $0x1c8] ss:$16 sps:$4 sm:$0xff]  }
 0x17b   :  { %5413 = vmatprep.subr.bf16.mxu1 %v8060_v3  ;;  %v8149_v3 = vld [vmem:[%s11791_s2 + $0x248] ss:$16 sps:$4 sm:$0xff]  }
 0x17d   :  { %5371 = vmatpush2.bf16.msra.mxu0 %v8055_v4  ;;  %v8154_v4 = vld [vmem:[%s11791_s2 + $0x1ac] ss:$16 sps:$4 sm:$0xff]  }
 0x17e   :  { %5414 = vmatpush2.bf16.msra.mxu1 %v8058_v5  ;;  %5372 = vmatprep.subr.bf16.mxu0 %v8063_v6  ;;  %v8157_v5 = vld [vmem:[%s11791_s2 + $0x22c] ss:$16 sps:$4 sm:$0xff]   ;;  %v8152_v6 = vld [vmem:[%s11791_s2 + $0x1a8] ss:$16 sps:$4 sm:$0xff]  }
 0x17f   :  { %5415 = vmatprep.subr.bf16.mxu1 %v8066_v7  ;;  %v8155_v7 = vld [vmem:[%s11791_s2 + $0x228] ss:$16 sps:$4 sm:$0xff]  }
 0x181   :  { %5373 = vmatpush2.bf16.msra.mxu0 %v8061_v8  ;;  %v8160_v8 = vld [vmem:[%s11791_s2 + $0x18c] ss:$16 sps:$4 sm:$0xff]  }
 0x182   :  { %5416 = vmatpush2.bf16.msra.mxu1 %v8064_v9  ;;  %5374 = vmatprep.subr.bf16.mxu0 %v8069_v10  ;;  %v8163_v9 = vld [vmem:[%s11791_s2 + $0x20c] ss:$16 sps:$4 sm:$0xff]   ;;  %v8158_v10 = vld [vmem:[%s11791_s2 + $0x188] ss:$16 sps:$4 sm:$0xff]  }
 0x183   :  { %5417 = vmatprep.subr.bf16.mxu1 %v8072_v11  ;;  %v8161_v11 = vld [vmem:[%s11791_s2 + $0x208] ss:$16 sps:$4 sm:$0xff]  }
 0x185   :  { %5375 = vmatpush2.bf16.msra.mxu0 %v8067_v12  ;;  %v8166_v12 = vld [vmem:[%s11791_s2 + $0x16c] ss:$16 sps:$4 sm:$0xff]  }
 0x186   :  { %5418 = vmatpush2.bf16.msra.mxu1 %v8070_v13  ;;  %5376 = vmatprep.subr.bf16.mxu0 %v8075_v14  ;;  %v8169_v13 = vld [vmem:[%s11791_s2 + $0x3ec] ss:$16 sps:$4 sm:$0xff]   ;;  %v8164_v14 = vld [vmem:[%s11791_s2 + $0x168] ss:$16 sps:$4 sm:$0xff]  }
 0x187   :  { %5419 = vmatprep.subr.bf16.mxu1 %v8078_v15  ;;  %v8167_v15 = vld [vmem:[%s11791_s2 + $0x3e8] ss:$16 sps:$4 sm:$0xff]  }
 0x189   :  { %5377 = vmatpush2.bf16.msra.mxu0 %v8073_v16  ;;  %v8172_v16 = vld [vmem:[%s11791_s2 + $0x14c] ss:$16 sps:$4 sm:$0xff]  }
 0x18a   :  { %5420 = vmatpush2.bf16.msra.mxu1 %v8076_v17  ;;  %5378 = vmatprep.subr.bf16.mxu0 %v8081_v18  ;;  %v8175_v17 = vld [vmem:[%s11791_s2 + $0x3cc] ss:$16 sps:$4 sm:$0xff]   ;;  %v8170_v18 = vld [vmem:[%s11791_s2 + $0x148] ss:$16 sps:$4 sm:$0xff]  }
 0x18b   :  { %5421 = vmatprep.subr.bf16.mxu1 %v8084_v19  ;;  %v8173_v19 = vld [vmem:[%s11791_s2 + $0x3c8] ss:$16 sps:$4 sm:$0xff]  }
 0x18d   :  { %5379 = vmatpush2.bf16.msra.mxu0 %v8079_v20  ;;  %v8178_v20 = vld [vmem:[%s11791_s2 + $0x12c] ss:$16 sps:$4 sm:$0xff]  }
 0x18e   :  { %5422 = vmatpush2.bf16.msra.mxu1 %v8082_v21  ;;  %5442 = vmatprep.subr.bf16.mxu0 %v8093_v24  ;;  %v8181_v21 = vld [vmem:[%s11791_s2 + $0x3ac] ss:$16 sps:$4 sm:$0xff]  }
 0x18f   :  { %5477 = vmatprep.subr.bf16.mxu1 %v8096_v25  ;;  %v8184_v24 = vld [vmem:[%s11791_s2 + $0x10c] ss:$16 sps:$4 sm:$0xff]  }
 0x190   :  { %5381 = vmatmul.mubr.bf16.vlgmr.msra.gmra.mxu0 %v8085_v22  ;;  %v8176_v22 = vld [vmem:[%s11791_s2 + $0x128] ss:$16 sps:$4 sm:$0xff]   ;;  %v8187_v25 = vld [vmem:[%s11791_s2 + $0x38c] ss:$16 sps:$4 sm:$0xff]  }
 0x191   :  { %5424 = vmatmul.mubr.bf16.vlgmr.msra.gmra.mxu1 %v8088_v23  ;;  %5443 = vmatpush1.bf16.msra.mxu0 %v8091_v26  ;;  %v8179_v23 = vld [vmem:[%s11791_s2 + $0x3a8] ss:$16 sps:$4 sm:$0xff]  }
 0x192   :  { %5478 = vmatpush1.bf16.msra.mxu1 %v8094_v27  ;;  %5444 = vmatprep.subr.bf16.mxu0 %v8099_v28  ;;  %v8182_v26 = vld [vmem:[%s11791_s2 + $0x108] ss:$16 sps:$4 sm:$0xff]   ;;  %v8190_v28 = vld [vmem:[%s11791_s2 + $0x36c] ss:$16 sps:$4 sm:$0xff]  }
 0x193   :  { %5479 = vmatprep.subr.bf16.mxu1 %v8102_v29  ;;  %5466 = vmatprep.mubr.bf16.mxu0 %v8780_v36  ;;  %v8185_v27 = vld [vmem:[%s11791_s2 + $0x388] ss:$16 sps:$4 sm:$0xff]   ;;  %v8193_v29 = vld [vmem:[%s11791_s2 + $0x4ec] ss:$16 sps:$4 sm:$0xff]  }
 0x194   :  { %5509 = vmatprep.mubr.bf16.mxu1 %v8740_v37  ;;  %v8742_v37 = vld [vmem:[%s11790_s1] ss:$100 sps:$4 sm:$0xff]  }
 0x195   :  { %5445 = vmatpush1.bf16.msra.mxu0 %v8097_v30  ;;  %v8188_v30 = vld [vmem:[%s11791_s2 + $0x368] ss:$16 sps:$4 sm:$0xff]  }
 0x196   :  { %5480 = vmatpush1.bf16.msra.mxu1 %v8100_v31  ;;  %5446 = vmatprep.subr.bf16.mxu0 %v8105_v32  ;;  %v8191_v31 = vld [vmem:[%s11791_s2 + $0x4e8] ss:$16 sps:$4 sm:$0xff]   ;;  %v8196_v32 = vld [vmem:[%s11791_s2 + $0x34c] ss:$16 sps:$4 sm:$0xff]  }
 0x197   :  { %5481 = vmatprep.subr.bf16.mxu1 %v8108_v33  ;;  %v8199_v33 = vld [vmem:[%s11791_s2 + $0x4cc] ss:$16 sps:$4 sm:$0xff]  }
 0x199   :  { %5447 = vmatpush1.bf16.msra.mxu0 %v8103_v34  ;;  %v8194_v34 = vld [vmem:[%s11791_s2 + $0x348] ss:$16 sps:$4 sm:$0xff]  }
 0x19a   :  { %5482 = vmatpush1.bf16.msra.mxu1 %v8106_v35  ;;  %5448 = vmatprep.subr.bf16.mxu0 %v8111_v38  ;;  %v8197_v35 = vld [vmem:[%s11791_s2 + $0x4c8] ss:$16 sps:$4 sm:$0xff]   ;;  %v8202_v38 = vld [vmem:[%s11791_s2 + $0x32c] ss:$16 sps:$4 sm:$0xff]  }
 0x19b   :  { %5483 = vmatprep.subr.bf16.mxu1 %v8114_v39  ;;  %v8205_v39 = vld [vmem:[%s11791_s2 + $0x4ac] ss:$16 sps:$4 sm:$0xff]  }
 0x19d   :  { %5449 = vmatpush1.bf16.msra.mxu0 %v8109_v40  ;;  %v8200_v40 = vld [vmem:[%s11791_s2 + $0x328] ss:$16 sps:$4 sm:$0xff]  }
 0x19e   :  { %5484 = vmatpush1.bf16.msra.mxu1 %v8112_v41  ;;  %5520 = vmatprep.subr.bf16.mxu0 %v8121_v44  ;;  %v8203_v41 = vld [vmem:[%s11791_s2 + $0x4a8] ss:$16 sps:$4 sm:$0xff]   ;;  %v8211_v44 = vld [vmem:[%s11791_s2 + $0x48c] ss:$16 sps:$4 sm:$0xff]  }
 0x19f   :  { %5485 = vmatprep.subr.bf16.mxu1 %v8118_v43  ;;  %v8208_v43 = vld [vmem:[%s11791_s2 + $0x30c] ss:$16 sps:$4 sm:$0xff]  }
 0x1a0   :  { %7389 = vmatmul.mubr.msk.bf16.vlgmr.msra.gmra.mxu0 %vm4914_vm0, %v8115_v42  ;;  %v8743_v42 = vld [vmem:[%s11790_s1 + $0x14] ss:$100 sps:$4 sm:$0xff]  }
 0x1a1   :  { %5521 = vmatpush1.bf16.msra.mxu0 %v8119_v46  ;;  %5552 = vmatprep.mubr.bf16.mxu0 %v8741_v53  ;;  %v8209_v46 = vld [vmem:[%s11791_s2 + $0x488] ss:$16 sps:$4 sm:$0xff]  }
 0x1a2   :  { %5486 = vmatpush1.bf16.msra.mxu1 %v8116_v45  ;;  %5522 = vmatprep.subr.bf16.mxu0 %v8127_v48  ;;  %v8206_v45 = vld [vmem:[%s11791_s2 + $0x308] ss:$16 sps:$4 sm:$0xff]   ;;  %v8217_v48 = vld [vmem:[%s11791_s2 + $0x6ec] ss:$16 sps:$4 sm:$0xff]  }
 0x1a3   :  { %5487 = vmatprep.subr.bf16.mxu1 %v8124_v47  ;;  %v8214_v47 = vld [vmem:[%s11791_s2 + $0x46c] ss:$16 sps:$4 sm:$0xff]   ;;  %v8218_v53 = vld [vmem:[%s11791_s2 + $0x448] ss:$16 sps:$4 sm:$0xff]  }
 0x1a5   :  { %5523 = vmatpush1.bf16.msra.mxu0 %v8125_v50  ;;  %v8215_v50 = vld [vmem:[%s11791_s2 + $0x6e8] ss:$16 sps:$4 sm:$0xff]  }
 0x1a6   :  { %5488 = vmatpush1.bf16.msra.mxu1 %v8122_v49  ;;  %5524 = vmatprep.subr.bf16.mxu0 %v8133_v52  ;;  %v8212_v49 = vld [vmem:[%s11791_s2 + $0x468] ss:$16 sps:$4 sm:$0xff]   ;;  %v8223_v52 = vld [vmem:[%s11791_s2 + $0x6cc] ss:$16 sps:$4 sm:$0xff]  }
 0x1a7   :  { %5489 = vmatprep.subr.bf16.mxu1 %v8130_v51  ;;  %v8220_v51 = vld [vmem:[%s11791_s2 + $0x44c] ss:$16 sps:$4 sm:$0xff]  }
 0x1a9   :  { %5525 = vmatpush1.bf16.msra.mxu0 %v8131_v55  ;;  %v8744_v55 = vld [vmem:[%s11790_s1 + $0x8] ss:$100 sps:$4 sm:$0xff]  }
 0x1aa   :  { %5490 = vmatpush1.bf16.msra.mxu1 %v8128_v54  ;;  %5526 = vmatprep.subr.bf16.mxu0 %v8139_v57  ;;  %v8221_v54 = vld [vmem:[%s11791_s2 + $0x6c8] ss:$16 sps:$4 sm:$0xff]   ;;  %v8229_v57 = vld [vmem:[%s11791_s2 + $0x6ac] ss:$16 sps:$4 sm:$0xff]  }
 0x1ab   :  { %5491 = vmatprep.subr.bf16.mxu1 %v8136_v56  ;;  %v8226_v56 = vld [vmem:[%s11791_s2 + $0x42c] ss:$16 sps:$4 sm:$0xff]  }
 0x1ad   :  { %5527 = vmatpush1.bf16.msra.mxu0 %v8137_v59  ;;  %v8227_v59 = vld [vmem:[%s11791_s2 + $0x6a8] ss:$16 sps:$4 sm:$0xff]  }
 0x1ae   :  { %5492 = vmatpush1.bf16.msra.mxu1 %v8134_v58  ;;  %5528 = vmatprep.subr.bf16.mxu0 %v8145_v61  ;;  %v8224_v58 = vld [vmem:[%s11791_s2 + $0x428] ss:$16 sps:$4 sm:$0xff]   ;;  %v8232_v61 = vld [vmem:[%s11791_s2 + $0x40c] ss:$16 sps:$4 sm:$0xff]  }
 0x1af   :  { %5493 = vmatprep.subr.bf16.mxu1 %v8142_v60  ;;  %v8745_v60 = vld [vmem:[%s11790_s1 + $0x1c] ss:$100 sps:$4 sm:$0xff]  }
 0x1b1   :  { %5529 = vmatpush1.bf16.msra.mxu0 %v8143_v63  ;;  %v8230_v63 = vld [vmem:[%s11791_s2 + $0x408] ss:$16 sps:$4 sm:$0xff]  }
 0x1b2   :  { %5494 = vmatpush2.bf16.msra.mxu1 %v8140_v62  ;;  %5530 = vmatprep.subr.bf16.mxu0 %v8151_v1  ;;  %v8235_v62 = vld [vmem:[%s11791_s2 + $0x68c] ss:$16 sps:$4 sm:$0xff]  }
 0x1b3   :  { %5495 = vmatprep.subr.bf16.mxu1 %v8148_v0  ;;  %v8233_v0 = vld [vmem:[%s11791_s2 + $0x688] ss:$16 sps:$4 sm:$0xff]   ;;  %v8238_v1 = vld [vmem:[%s11791_s2 + $0x5ec] ss:$16 sps:$4 sm:$0xff]  }
 0x1b5   :  { %5531 = vmatpush1.bf16.msra.mxu0 %v8149_v3  ;;  %v8236_v3 = vld [vmem:[%s11791_s2 + $0x5e8] ss:$16 sps:$4 sm:$0xff]  }
 0x1b6   :  { %5496 = vmatpush2.bf16.msra.mxu1 %v8146_v2  ;;  %5532 = vmatprep.subr.bf16.mxu0 %v8157_v5  ;;  %v8241_v2 = vld [vmem:[%s11791_s2 + $0x66c] ss:$16 sps:$4 sm:$0xff]  }
 0x1b7   :  { %5497 = vmatprep.subr.bf16.mxu1 %v8154_v4  ;;  %v8239_v4 = vld [vmem:[%s11791_s2 + $0x668] ss:$16 sps:$4 sm:$0xff]   ;;  %v8244_v5 = vld [vmem:[%s11791_s2 + $0x5cc] ss:$16 sps:$4 sm:$0xff]  }
 0x1b9   :  { %5533 = vmatpush1.bf16.msra.mxu0 %v8155_v7  ;;  %v8242_v7 = vld [vmem:[%s11791_s2 + $0x5c8] ss:$16 sps:$4 sm:$0xff]  }
 0x1ba   :  { %5498 = vmatpush2.bf16.msra.mxu1 %v8152_v6  ;;  %5534 = vmatprep.subr.bf16.mxu0 %v8163_v9  ;;  %v8247_v6 = vld [vmem:[%s11791_s2 + $0x64c] ss:$16 sps:$4 sm:$0xff]  }
 0x1bb   :  { %5499 = vmatprep.subr.bf16.mxu1 %v8160_v8  ;;  %v8245_v8 = vld [vmem:[%s11791_s2 + $0x648] ss:$16 sps:$4 sm:$0xff]   ;;  %v8250_v9 = vld [vmem:[%s11791_s2 + $0x5ac] ss:$16 sps:$4 sm:$0xff]  }
 0x1bd   :  { %5535 = vmatpush1.bf16.msra.mxu0 %v8161_v11  ;;  %v8248_v11 = vld [vmem:[%s11791_s2 + $0x5a8] ss:$16 sps:$4 sm:$0xff]  }
 0x1be   :  { %5500 = vmatpush2.bf16.msra.mxu1 %v8158_v10  ;;  %5536 = vmatprep.subr.bf16.mxu0 %v8169_v13  ;;  %v8253_v10 = vld [vmem:[%s11791_s2 + $0x62c] ss:$16 sps:$4 sm:$0xff]  }
 0x1bf   :  { %5501 = vmatprep.subr.bf16.mxu1 %v8166_v12  ;;  %v8251_v12 = vld [vmem:[%s11791_s2 + $0x628] ss:$16 sps:$4 sm:$0xff]   ;;  %v8256_v13 = vld [vmem:[%s11791_s2 + $0x58c] ss:$16 sps:$4 sm:$0xff]  }
 0x1c1   :  { %5537 = vmatpush2.bf16.msra.mxu0 %v8167_v15  ;;  %v8254_v15 = vld [vmem:[%s11791_s2 + $0x588] ss:$16 sps:$4 sm:$0xff]  }
 0x1c2   :  { %5502 = vmatpush2.bf16.msra.mxu1 %v8164_v14  ;;  %5538 = vmatprep.subr.bf16.mxu0 %v8175_v17  ;;  %v8259_v14 = vld [vmem:[%s11791_s2 + $0x60c] ss:$16 sps:$4 sm:$0xff]  }
 0x1c3   :  { %5503 = vmatprep.subr.bf16.mxu1 %v8172_v16  ;;  %v8257_v16 = vld [vmem:[%s11791_s2 + $0x608] ss:$16 sps:$4 sm:$0xff]   ;;  %v8262_v17 = vld [vmem:[%s11791_s2 + $0x56c] ss:$16 sps:$4 sm:$0xff]  }
 0x1c5   :  { %5539 = vmatpush2.bf16.msra.mxu0 %v8173_v19  ;;  %v8260_v19 = vld [vmem:[%s11791_s2 + $0x568] ss:$16 sps:$4 sm:$0xff]  }
 0x1c6   :  { %5504 = vmatpush2.bf16.msra.mxu1 %v8170_v18  ;;  %5540 = vmatprep.subr.bf16.mxu0 %v8181_v21  ;;  %v8265_v18 = vld [vmem:[%s11791_s2 + $0x7ec] ss:$16 sps:$4 sm:$0xff]  }
 0x1c7   :  { %5505 = vmatprep.subr.bf16.mxu1 %v8178_v20  ;;  %v8263_v20 = vld [vmem:[%s11791_s2 + $0x7e8] ss:$16 sps:$4 sm:$0xff]   ;;  %v8268_v21 = vld [vmem:[%s11791_s2 + $0x54c] ss:$16 sps:$4 sm:$0xff]  }
 0x1c9   :  { %5541 = vmatpush2.bf16.msra.mxu0 %v8179_v23  ;;  %v8266_v23 = vld [vmem:[%s11791_s2 + $0x548] ss:$16 sps:$4 sm:$0xff]  }
 0x1ca   :  { %5506 = vmatpush2.bf16.msra.mxu1 %v8176_v22  ;;  %5542 = vmatprep.subr.bf16.mxu0 %v8187_v25  ;;  %v8271_v22 = vld [vmem:[%s11791_s2 + $0x7cc] ss:$16 sps:$4 sm:$0xff]  }
 0x1cb   :  { %5507 = vmatprep.subr.bf16.mxu1 %v8184_v24  ;;  %v8269_v24 = vld [vmem:[%s11791_s2 + $0x7c8] ss:$16 sps:$4 sm:$0xff]   ;;  %v8274_v25 = vld [vmem:[%s11791_s2 + $0x52c] ss:$16 sps:$4 sm:$0xff]  }
 0x1cd   :  { %5543 = vmatpush2.bf16.msra.mxu0 %v8185_v27  ;;  %v8272_v27 = vld [vmem:[%s11791_s2 + $0x528] ss:$16 sps:$4 sm:$0xff]  }
 0x1ce   :  { %5508 = vmatpush2.bf16.msra.mxu1 %v8182_v26  ;;  %5544 = vmatprep.subr.bf16.mxu0 %v8190_v28  ;;  %v8277_v26 = vld [vmem:[%s11791_s2 + $0x7ac] ss:$16 sps:$4 sm:$0xff]   ;;  %v8275_v28 = vld [vmem:[%s11791_s2 + $0x7a8] ss:$16 sps:$4 sm:$0xff]  }
 0x1cf   :  { %5563 = vmatprep.subr.bf16.mxu1 %v8193_v29  ;;  %v8280_v29 = vld [vmem:[%s11791_s2 + $0x50c] ss:$16 sps:$4 sm:$0xff]  }
 0x1d1   :  { %5510 = vmatmul.mubr.bf16.vlgmr.msra.gmra.mxu1 %v8742_v37  ;;  %5545 = vmatpush2.bf16.msra.mxu0 %v8188_v30  ;;  %v8283_v30 = vld [vmem:[%s11791_s2 + $0x78c] ss:$16 sps:$4 sm:$0xff]   ;;  %v8287_v37 = vld [vmem:[%s11791_s2 + $0x8e8] ss:$16 sps:$4 sm:$0xff]  }
 0x1d2   :  { %5564 = vmatpush1.bf16.msra.mxu1 %v8191_v31  ;;  %5546 = vmatprep.subr.bf16.mxu0 %v8196_v32  ;;  %v8278_v31 = vld [vmem:[%s11791_s2 + $0x508] ss:$16 sps:$4 sm:$0xff]  }
 0x1d3   :  { %5565 = vmatprep.subr.bf16.mxu1 %v8199_v33  ;;  %5595 = vmatprep.mubr.bf16.mxu1 %v8743_v42  ;;  %v8281_v32 = vld [vmem:[%s11791_s2 + $0x788] ss:$16 sps:$4 sm:$0xff]   ;;  %v8286_v33 = vld [vmem:[%s11791_s2 + $0x76c] ss:$16 sps:$4 sm:$0xff]  }
 0x1d4   :  { %v8293_v42 = vld [vmem:[%s11791_s2 + $0x8c8] ss:$16 sps:$4 sm:$0xff]  }
 0x1d5   :  { %5547 = vmatpush2.bf16.msra.mxu0 %v8194_v34  ;;  %v8289_v34 = vld [vmem:[%s11791_s2 + $0x8ec] ss:$16 sps:$4 sm:$0xff]  }
 0x1d6   :  { %5566 = vmatpush1.bf16.msra.mxu1 %v8197_v35  ;;  %5548 = vmatprep.subr.bf16.mxu0 %v8202_v38  ;;  %v8284_v35 = vld [vmem:[%s11791_s2 + $0x768] ss:$16 sps:$4 sm:$0xff]   ;;  %v8292_v38 = vld [vmem:[%s11791_s2 + $0x74c] ss:$16 sps:$4 sm:$0xff]  }
 0x1d7   :  { %5567 = vmatprep.subr.bf16.mxu1 %v8205_v39  ;;  %v8295_v39 = vld [vmem:[%s11791_s2 + $0x8cc] ss:$16 sps:$4 sm:$0xff]  }
 0x1d9   :  { %5549 = vmatpush2.bf16.msra.mxu0 %v8200_v40  ;;  %v8746_v40 = vld [vmem:[%s11790_s1 + $0x10] ss:$100 sps:$4 sm:$0xff]  }
 0x1da   :  { %5568 = vmatpush1.bf16.msra.mxu1 %v8203_v41  ;;  %5550 = vmatprep.subr.bf16.mxu0 %v8208_v43  ;;  %v8290_v41 = vld [vmem:[%s11791_s2 + $0x748] ss:$16 sps:$4 sm:$0xff]   ;;  %v8298_v43 = vld [vmem:[%s11791_s2 + $0x72c] ss:$16 sps:$4 sm:$0xff]  }
 0x1db   :  { %5569 = vmatprep.subr.bf16.mxu1 %v8211_v44  ;;  %v8301_v44 = vld [vmem:[%s11791_s2 + $0x8ac] ss:$16 sps:$4 sm:$0xff]  }
 0x1dd   :  { %5551 = vmatpush2.bf16.msra.mxu0 %v8206_v45  ;;  %v8747_v45 = vld [vmem:[%s11790_s1 + $0x24] ss:$100 sps:$4 sm:$0xff]  }
 0x1de   :  { %5570 = vmatpush1.bf16.msra.mxu1 %v8209_v46  ;;  %5606 = vmatprep.subr.bf16.mxu0 %v8217_v48  ;;  %v8296_v46 = vld [vmem:[%s11791_s2 + $0x728] ss:$16 sps:$4 sm:$0xff]   ;;  %v8304_v48 = vld [vmem:[%s11791_s2 + $0x70c] ss:$16 sps:$4 sm:$0xff]  }
 0x1df   :  { %5571 = vmatprep.subr.bf16.mxu1 %v8214_v47  ;;  %v8299_v47 = vld [vmem:[%s11791_s2 + $0x8a8] ss:$16 sps:$4 sm:$0xff]  }
 0x1e0   :  { %5553 = vmatmul.mubr.bf16.vlgmr.msra.gmra.mxu0 %v8744_v55  ;;  %v8311_v55 = vld [vmem:[%s11791_s2 + $0xae8] ss:$16 sps:$4 sm:$0xff]  }
 0x1e1   :  { %5607 = vmatpush1.bf16.msra.mxu0 %v8215_v50  ;;  %5638 = vmatprep.mubr.bf16.mxu0 %v8745_v60  ;;  %v8302_v50 = vld [vmem:[%s11791_s2 + $0x708] ss:$16 sps:$4 sm:$0xff]  }
 0x1e2   :  { %5572 = vmatpush1.bf16.msra.mxu1 %v8212_v49  ;;  %5608 = vmatprep.subr.bf16.mxu0 %v8223_v52  ;;  %v8307_v49 = vld [vmem:[%s11791_s2 + $0x88c] ss:$16 sps:$4 sm:$0xff]   ;;  %v8317_v60 = vld [vmem:[%s11791_s2 + $0xac8] ss:$16 sps:$4 sm:$0xff]  }
 0x1e3   :  { %5573 = vmatprep.subr.bf16.mxu1 %v8220_v51  ;;  %v8305_v51 = vld [vmem:[%s11791_s2 + $0x888] ss:$16 sps:$4 sm:$0xff]   ;;  %v8310_v52 = vld [vmem:[%s11791_s2 + $0x86c] ss:$16 sps:$4 sm:$0xff]  }
 0x1e5   :  { %5609 = vmatpush1.bf16.msra.mxu0 %v8221_v54  ;;  %v8308_v54 = vld [vmem:[%s11791_s2 + $0x868] ss:$16 sps:$4 sm:$0xff]  }
 0x1e6   :  { %5574 = vmatpush1.bf16.msra.mxu1 %v8218_v53  ;;  %5610 = vmatprep.subr.bf16.mxu0 %v8229_v57  ;;  %v8313_v53 = vld [vmem:[%s11791_s2 + $0xaec] ss:$16 sps:$4 sm:$0xff]  }
 0x1e7   :  { %5575 = vmatprep.subr.bf16.mxu1 %v8226_v56  ;;  %v8316_v56 = vld [vmem:[%s11791_s2 + $0x84c] ss:$16 sps:$4 sm:$0xff]  }
 0x1e8   :  { %v8319_v57 = vld [vmem:[%s11791_s2 + $0xacc] ss:$16 sps:$4 sm:$0xff]  }
 0x1e9   :  { %5611 = vmatpush1.bf16.msra.mxu0 %v8227_v59  ;;  %v8314_v59 = vld [vmem:[%s11791_s2 + $0x848] ss:$16 sps:$4 sm:$0xff]  }
 0x1ea   :  { %5576 = vmatpush1.bf16.msra.mxu1 %v8224_v58  ;;  %5612 = vmatprep.subr.bf16.mxu0 %v8235_v62  ;;  %v8748_v58 = vld [vmem:[%s11790_s1 + $0x18] ss:$100 sps:$4 sm:$0xff]  }
 0x1eb   :  { %5577 = vmatprep.subr.bf16.mxu1 %v8232_v61  ;;  %v8322_v61 = vld [vmem:[%s11791_s2 + $0x82c] ss:$16 sps:$4 sm:$0xff]  }
 0x1ec   :  { %v8325_v62 = vld [vmem:[%s11791_s2 + $0xaac] ss:$16 sps:$4 sm:$0xff]  }
 0x1ed   :  { %5613 = vmatpush1.bf16.msra.mxu0 %v8233_v0  ;;  %v8320_v0 = vld [vmem:[%s11791_s2 + $0x828] ss:$16 sps:$4 sm:$0xff]  }
 0x1ee   :  { %5578 = vmatpush1.bf16.msra.mxu1 %v8230_v63  ;;  %5614 = vmatprep.subr.bf16.mxu0 %v8241_v2  ;;  %v8749_v63 = vld [vmem:[%s11790_s1 + $0x2c] ss:$100 sps:$4 sm:$0xff]  }
 0x1ef   :  { %5579 = vmatprep.subr.bf16.mxu1 %v8238_v1  ;;  %v8323_v1 = vld [vmem:[%s11791_s2 + $0xaa8] ss:$16 sps:$4 sm:$0xff]   ;;  %v8328_v2 = vld [vmem:[%s11791_s2 + $0x80c] ss:$16 sps:$4 sm:$0xff]  }
 0x1f1   :  { %5615 = vmatpush1.bf16.msra.mxu0 %v8239_v4  ;;  %v8326_v4 = vld [vmem:[%s11791_s2 + $0x808] ss:$16 sps:$4 sm:$0xff]  }
 0x1f2   :  { %5580 = vmatpush2.bf16.msra.mxu1 %v8236_v3  ;;  %5616 = vmatprep.subr.bf16.mxu0 %v8247_v6  ;;  %v8331_v3 = vld [vmem:[%s11791_s2 + $0xa8c] ss:$16 sps:$4 sm:$0xff]  }
 0x1f3   :  { %5581 = vmatprep.subr.bf16.mxu1 %v8244_v5  ;;  %v8329_v5 = vld [vmem:[%s11791_s2 + $0xa88] ss:$16 sps:$4 sm:$0xff]   ;;  %v8334_v6 = vld [vmem:[%s11791_s2 + $0x9ec] ss:$16 sps:$4 sm:$0xff]  }
 0x1f5   :  { %5617 = vmatpush1.bf16.msra.mxu0 %v8245_v8  ;;  %v8332_v8 = vld [vmem:[%s11791_s2 + $0x9e8] ss:$16 sps:$4 sm:$0xff]  }
 0x1f6   :  { %5582 = vmatpush2.bf16.msra.mxu1 %v8242_v7  ;;  %5618 = vmatprep.subr.bf16.mxu0 %v8253_v10  ;;  %v8337_v7 = vld [vmem:[%s11791_s2 + $0xa6c] ss:$16 sps:$4 sm:$0xff]  }
 0x1f7   :  { %5583 = vmatprep.subr.bf16.mxu1 %v8250_v9  ;;  %v8335_v9 = vld [vmem:[%s11791_s2 + $0xa68] ss:$16 sps:$4 sm:$0xff]   ;;  %v8340_v10 = vld [vmem:[%s11791_s2 + $0x9cc] ss:$16 sps:$4 sm:$0xff]  }
 0x1f9   :  { %5619 = vmatpush1.bf16.msra.mxu0 %v8251_v12  ;;  %v8338_v12 = vld [vmem:[%s11791_s2 + $0x9c8] ss:$16 sps:$4 sm:$0xff]  }
 0x1fa   :  { %5584 = vmatpush2.bf16.msra.mxu1 %v8248_v11  ;;  %5620 = vmatprep.subr.bf16.mxu0 %v8259_v14  ;;  %v8343_v11 = vld [vmem:[%s11791_s2 + $0xa4c] ss:$16 sps:$4 sm:$0xff]  }
 0x1fb   :  { %5585 = vmatprep.subr.bf16.mxu1 %v8256_v13  ;;  %v8341_v13 = vld [vmem:[%s11791_s2 + $0xa48] ss:$16 sps:$4 sm:$0xff]   ;;  %v8346_v14 = vld [vmem:[%s11791_s2 + $0x9ac] ss:$16 sps:$4 sm:$0xff]  }
 0x1fd   :  { %5621 = vmatpush1.bf16.msra.mxu0 %v8257_v16  ;;  %v8344_v16 = vld [vmem:[%s11791_s2 + $0x9a8] ss:$16 sps:$4 sm:$0xff]  }
 0x1fe   :  { %5586 = vmatpush2.bf16.msra.mxu1 %v8254_v15  ;;  %5622 = vmatprep.subr.bf16.mxu0 %v8265_v18  ;;  %v8349_v15 = vld [vmem:[%s11791_s2 + $0xa2c] ss:$16 sps:$4 sm:$0xff]  }
 0x1ff   :  { %5587 = vmatprep.subr.bf16.mxu1 %v8262_v17  ;;  %v8347_v17 = vld [vmem:[%s11791_s2 + $0xa28] ss:$16 sps:$4 sm:$0xff]   ;;  %v8352_v18 = vld [vmem:[%s11791_s2 + $0x98c] ss:$16 sps:$4 sm:$0xff]  }
 0x201   :  { %5623 = vmatpush2.bf16.msra.mxu0 %v8263_v20  ;;  %v8350_v20 = vld [vmem:[%s11791_s2 + $0x988] ss:$16 sps:$4 sm:$0xff]  }
 0x202   :  { %5588 = vmatpush2.bf16.msra.mxu1 %v8260_v19  ;;  %5624 = vmatprep.subr.bf16.mxu0 %v8271_v22  ;;  %v8355_v19 = vld [vmem:[%s11791_s2 + $0xa0c] ss:$16 sps:$4 sm:$0xff]  }
 0x203   :  { %5589 = vmatprep.subr.bf16.mxu1 %v8268_v21  ;;  %v8353_v21 = vld [vmem:[%s11791_s2 + $0xa08] ss:$16 sps:$4 sm:$0xff]   ;;  %v8358_v22 = vld [vmem:[%s11791_s2 + $0x96c] ss:$16 sps:$4 sm:$0xff]  }
 0x205   :  { %5625 = vmatpush2.bf16.msra.mxu0 %v8269_v24  ;;  %v8356_v24 = vld [vmem:[%s11791_s2 + $0x968] ss:$16 sps:$4 sm:$0xff]  }
 0x206   :  { %5590 = vmatpush2.bf16.msra.mxu1 %v8266_v23  ;;  %5626 = vmatprep.subr.bf16.mxu0 %v8277_v26  ;;  %v8361_v23 = vld [vmem:[%s11791_s2 + $0xbec] ss:$16 sps:$4 sm:$0xff]  }
 0x207   :  { %5591 = vmatprep.subr.bf16.mxu1 %v8274_v25  ;;  %v8359_v25 = vld [vmem:[%s11791_s2 + $0xbe8] ss:$16 sps:$4 sm:$0xff]   ;;  %v8364_v26 = vld [vmem:[%s11791_s2 + $0x94c] ss:$16 sps:$4 sm:$0xff]  }
 0x209   :  { %5627 = vmatpush2.bf16.msra.mxu0 %v8275_v28  ;;  %v8362_v28 = vld [vmem:[%s11791_s2 + $0x948] ss:$16 sps:$4 sm:$0xff]  }
 0x20a   :  { %5592 = vmatpush2.bf16.msra.mxu1 %v8272_v27  ;;  %5628 = vmatprep.subr.bf16.mxu0 %v8283_v30  ;;  %v8367_v27 = vld [vmem:[%s11791_s2 + $0xbcc] ss:$16 sps:$4 sm:$0xff]  }
 0x20b   :  { %5593 = vmatprep.subr.bf16.mxu1 %v8280_v29  ;;  %v8365_v29 = vld [vmem:[%s11791_s2 + $0xbc8] ss:$16 sps:$4 sm:$0xff]   ;;  %v8370_v30 = vld [vmem:[%s11791_s2 + $0x92c] ss:$16 sps:$4 sm:$0xff]  }
 0x20d   :  { %5629 = vmatpush2.bf16.msra.mxu0 %v8281_v32  ;;  %v8368_v32 = vld [vmem:[%s11791_s2 + $0x928] ss:$16 sps:$4 sm:$0xff]  }
 0x20e   :  { %5594 = vmatpush2.bf16.msra.mxu1 %v8278_v31  ;;  %5630 = vmatprep.subr.bf16.mxu0 %v8286_v33  ;;  %v8373_v31 = vld [vmem:[%s11791_s2 + $0xbac] ss:$16 sps:$4 sm:$0xff]   ;;  %v8371_v33 = vld [vmem:[%s11791_s2 + $0xba8] ss:$16 sps:$4 sm:$0xff]  }
 0x20f   :  { %5649 = vmatprep.subr.bf16.mxu1 %v8289_v34  ;;  %v8376_v34 = vld [vmem:[%s11791_s2 + $0x90c] ss:$16 sps:$4 sm:$0xff]  }
 0x211   :  { %5596 = vmatmul.mubr.bf16.vlgmr.msra.gmra.mxu1 %v8746_v40  ;;  %5631 = vmatpush2.bf16.msra.mxu0 %v8284_v35  ;;  %v8379_v35 = vld [vmem:[%s11791_s2 + $0xb8c] ss:$16 sps:$4 sm:$0xff]  }
 0x212   :  { %5650 = vmatpush1.bf16.msra.mxu1 %v8287_v37  ;;  %5632 = vmatprep.subr.bf16.mxu0 %v8292_v38  ;;  %v8374_v37 = vld [vmem:[%s11791_s2 + $0x908] ss:$16 sps:$4 sm:$0xff]   ;;  %v8385_v40 = vld [vmem:[%s11791_s2 + $0xcec] ss:$16 sps:$4 sm:$0xff]  }
 0x213   :  { %5651 = vmatprep.subr.bf16.mxu1 %v8295_v39  ;;  %5681 = vmatprep.mubr.bf16.mxu1 %v8747_v45  ;;  %v8377_v38 = vld [vmem:[%s11791_s2 + $0xb88] ss:$16 sps:$4 sm:$0xff]   ;;  %v8382_v39 = vld [vmem:[%s11791_s2 + $0xb6c] ss:$16 sps:$4 sm:$0xff]   ;;  %v8750_v45 = vld [vmem:[%s11790_s1 + $0x20] ss:$100 sps:$4 sm:$0xff]  }
 0x215   :  { %5633 = vmatpush2.bf16.msra.mxu0 %v8290_v41  ;;  %v8380_v41 = vld [vmem:[%s11791_s2 + $0xb68] ss:$16 sps:$4 sm:$0xff]  }
 0x216   :  { %5652 = vmatpush1.bf16.msra.mxu1 %v8293_v42  ;;  %5634 = vmatprep.subr.bf16.mxu0 %v8298_v43  ;;  %v8383_v42 = vld [vmem:[%s11791_s2 + $0xce8] ss:$16 sps:$4 sm:$0xff]   ;;  %v8388_v43 = vld [vmem:[%s11791_s2 + $0xb4c] ss:$16 sps:$4 sm:$0xff]  }
 0x217   :  { %5653 = vmatprep.subr.bf16.mxu1 %v8301_v44  ;;  %v8391_v44 = vld [vmem:[%s11791_s2 + $0xccc] ss:$16 sps:$4 sm:$0xff]  }
 0x219   :  { %5635 = vmatpush2.bf16.msra.mxu0 %v8296_v46  ;;  %v8386_v46 = vld [vmem:[%s11791_s2 + $0xb48] ss:$16 sps:$4 sm:$0xff]  }
 0x21a   :  { %5654 = vmatpush1.bf16.msra.mxu1 %v8299_v47  ;;  %5636 = vmatprep.subr.bf16.mxu0 %v8304_v48  ;;  %v8389_v47 = vld [vmem:[%s11791_s2 + $0xcc8] ss:$16 sps:$4 sm:$0xff]   ;;  %v8394_v48 = vld [vmem:[%s11791_s2 + $0xb2c] ss:$16 sps:$4 sm:$0xff]  }
 0x21b   :  { %5655 = vmatprep.subr.bf16.mxu1 %v8307_v49  ;;  %v8397_v49 = vld [vmem:[%s11791_s2 + $0xcac] ss:$16 sps:$4 sm:$0xff]  }
 0x21d   :  { %5637 = vmatpush2.bf16.msra.mxu0 %v8302_v50  ;;  %v8751_v50 = vld [vmem:[%s11790_s1 + $0x34] ss:$100 sps:$4 sm:$0xff]  }
 0x21e   :  { %5656 = vmatpush1.bf16.msra.mxu1 %v8305_v51  ;;  %5692 = vmatprep.subr.bf16.mxu0 %v8313_v53  ;;  %v8392_v51 = vld [vmem:[%s11791_s2 + $0xb28] ss:$16 sps:$4 sm:$0xff]   ;;  %v8400_v53 = vld [vmem:[%s11791_s2 + $0xb0c] ss:$16 sps:$4 sm:$0xff]  }
 0x21f   :  { %5657 = vmatprep.subr.bf16.mxu1 %v8310_v52  ;;  %v8395_v52 = vld [vmem:[%s11791_s2 + $0xca8] ss:$16 sps:$4 sm:$0xff]  }
 0x220   :  { %5639 = vmatmul.mubr.bf16.vlgmr.msra.gmra.mxu0 %v8748_v58  ;;  %v8409_v58 = vld [vmem:[%s11791_s2 + $0xeec] ss:$16 sps:$4 sm:$0xff]  }
 0x221   :  { %5693 = vmatpush1.bf16.msra.mxu0 %v8311_v55  ;;  %5724 = vmatprep.mubr.bf16.mxu0 %v8749_v63  ;;  %v8398_v55 = vld [vmem:[%s11791_s2 + $0xb08] ss:$16 sps:$4 sm:$0xff]  }
 0x222   :  { %5658 = vmatpush1.bf16.msra.mxu1 %v8308_v54  ;;  %5694 = vmatprep.subr.bf16.mxu0 %v8319_v57  ;;  %v8403_v54 = vld [vmem:[%s11791_s2 + $0xc8c] ss:$16 sps:$4 sm:$0xff]  }
 0x223   :  { %5659 = vmatprep.subr.bf16.mxu1 %v8316_v56  ;;  %v8401_v56 = vld [vmem:[%s11791_s2 + $0xc88] ss:$16 sps:$4 sm:$0xff]   ;;  %v8406_v57 = vld [vmem:[%s11791_s2 + $0xc6c] ss:$16 sps:$4 sm:$0xff]  }
 0x224   :  { %v8752_v63 = vld [vmem:[%s11790_s1 + $0x28] ss:$100 sps:$4 sm:$0xff]  }
 0x225   :  { %5695 = vmatpush1.bf16.msra.mxu0 %v8317_v60  ;;  %v8407_v60 = vld [vmem:[%s11791_s2 + $0xee8] ss:$16 sps:$4 sm:$0xff]  }
 0x226   :  { %5660 = vmatpush1.bf16.msra.mxu1 %v8314_v59  ;;  %5696 = vmatprep.subr.bf16.mxu0 %v8325_v62  ;;  %v8404_v59 = vld [vmem:[%s11791_s2 + $0xc68] ss:$16 sps:$4 sm:$0xff]   ;;  %v8415_v62 = vld [vmem:[%s11791_s2 + $0xecc] ss:$16 sps:$4 sm:$0xff]  }
 0x227   :  { %5661 = vmatprep.subr.bf16.mxu1 %v8322_v61  ;;  %v8412_v61 = vld [vmem:[%s11791_s2 + $0xc4c] ss:$16 sps:$4 sm:$0xff]  }
 0x229   :  { %5697 = vmatpush1.bf16.msra.mxu0 %v8323_v1  ;;  %v8413_v1 = vld [vmem:[%s11791_s2 + $0xec8] ss:$16 sps:$4 sm:$0xff]  }
 0x22a   :  { %5662 = vmatpush1.bf16.msra.mxu1 %v8320_v0  ;;  %5698 = vmatprep.subr.bf16.mxu0 %v8331_v3  ;;  %v8410_v0 = vld [vmem:[%s11791_s2 + $0xc48] ss:$16 sps:$4 sm:$0xff]   ;;  %v8421_v3 = vld [vmem:[%s11791_s2 + $0xeac] ss:$16 sps:$4 sm:$0xff]  }
 0x22b   :  { %5663 = vmatprep.subr.bf16.mxu1 %v8328_v2  ;;  %v8418_v2 = vld [vmem:[%s11791_s2 + $0xc2c] ss:$16 sps:$4 sm:$0xff]  }
 0x22d   :  { %5699 = vmatpush1.bf16.msra.mxu0 %v8329_v5  ;;  %v8416_v5 = vld [vmem:[%s11791_s2 + $0xc28] ss:$16 sps:$4 sm:$0xff]  }
 0x22e   :  { %5664 = vmatpush1.bf16.msra.mxu1 %v8326_v4  ;;  %5700 = vmatprep.subr.bf16.mxu0 %v8337_v7  ;;  %v8753_v4 = vld [vmem:[%s11790_s1 + $0x3c] ss:$100 sps:$4 sm:$0xff]  }
 0x22f   :  { %5665 = vmatprep.subr.bf16.mxu1 %v8334_v6  ;;  %v8419_v6 = vld [vmem:[%s11791_s2 + $0xea8] ss:$16 sps:$4 sm:$0xff]   ;;  %v8424_v7 = vld [vmem:[%s11791_s2 + $0xc0c] ss:$16 sps:$4 sm:$0xff]  }
 0x231   :  { %5701 = vmatpush1.bf16.msra.mxu0 %v8335_v9  ;;  %v8422_v9 = vld [vmem:[%s11791_s2 + $0xc08] ss:$16 sps:$4 sm:$0xff]  }
 0x232   :  { %5666 = vmatpush2.bf16.msra.mxu1 %v8332_v8  ;;  %5702 = vmatprep.subr.bf16.mxu0 %v8343_v11  ;;  %v8427_v8 = vld [vmem:[%s11791_s2 + $0xe8c] ss:$16 sps:$4 sm:$0xff]  }
 0x233   :  { %5667 = vmatprep.subr.bf16.mxu1 %v8340_v10  ;;  %v8425_v10 = vld [vmem:[%s11791_s2 + $0xe88] ss:$16 sps:$4 sm:$0xff]   ;;  %v8430_v11 = vld [vmem:[%s11791_s2 + $0xdec] ss:$16 sps:$4 sm:$0xff]  }
 0x235   :  { %5703 = vmatpush1.bf16.msra.mxu0 %v8341_v13  ;;  %v8428_v13 = vld [vmem:[%s11791_s2 + $0xde8] ss:$16 sps:$4 sm:$0xff]  }
 0x236   :  { %5668 = vmatpush2.bf16.msra.mxu1 %v8338_v12  ;;  %5704 = vmatprep.subr.bf16.mxu0 %v8349_v15  ;;  %v8433_v12 = vld [vmem:[%s11791_s2 + $0xe6c] ss:$16 sps:$4 sm:$0xff]  }
 0x237   :  { %5669 = vmatprep.subr.bf16.mxu1 %v8346_v14  ;;  %v8431_v14 = vld [vmem:[%s11791_s2 + $0xe68] ss:$16 sps:$4 sm:$0xff]   ;;  %v8436_v15 = vld [vmem:[%s11791_s2 + $0xdcc] ss:$16 sps:$4 sm:$0xff]  }
 0x239   :  { %5705 = vmatpush1.bf16.msra.mxu0 %v8347_v17  ;;  %v8434_v17 = vld [vmem:[%s11791_s2 + $0xdc8] ss:$16 sps:$4 sm:$0xff]  }
 0x23a   :  { %5670 = vmatpush2.bf16.msra.mxu1 %v8344_v16  ;;  %5706 = vmatprep.subr.bf16.mxu0 %v8355_v19  ;;  %v8439_v16 = vld [vmem:[%s11791_s2 + $0xe4c] ss:$16 sps:$4 sm:$0xff]  }
 0x23b   :  { %5671 = vmatprep.subr.bf16.mxu1 %v8352_v18  ;;  %v8437_v18 = vld [vmem:[%s11791_s2 + $0xe48] ss:$16 sps:$4 sm:$0xff]   ;;  %v8442_v19 = vld [vmem:[%s11791_s2 + $0xdac] ss:$16 sps:$4 sm:$0xff]  }
 0x23d   :  { %5707 = vmatpush1.bf16.msra.mxu0 %v8353_v21  ;;  %v8440_v21 = vld [vmem:[%s11791_s2 + $0xda8] ss:$16 sps:$4 sm:$0xff]  }
 0x23e   :  { %5672 = vmatpush2.bf16.msra.mxu1 %v8350_v20  ;;  %5708 = vmatprep.subr.bf16.mxu0 %v8361_v23  ;;  %v8445_v20 = vld [vmem:[%s11791_s2 + $0xe2c] ss:$16 sps:$4 sm:$0xff]  }
 0x23f   :  { %5673 = vmatprep.subr.bf16.mxu1 %v8358_v22  ;;  %v8443_v22 = vld [vmem:[%s11791_s2 + $0xe28] ss:$16 sps:$4 sm:$0xff]   ;;  %v8448_v23 = vld [vmem:[%s11791_s2 + $0xd8c] ss:$16 sps:$4 sm:$0xff]  }
 0x241   :  { %5709 = vmatpush2.bf16.msra.mxu0 %v8359_v25  ;;  %v8446_v25 = vld [vmem:[%s11791_s2 + $0xd88] ss:$16 sps:$4 sm:$0xff]  }
 0x242   :  { %5674 = vmatpush2.bf16.msra.mxu1 %v8356_v24  ;;  %5710 = vmatprep.subr.bf16.mxu0 %v8367_v27  ;;  %v8451_v24 = vld [vmem:[%s11791_s2 + $0xe0c] ss:$16 sps:$4 sm:$0xff]  }
 0x243   :  { %5675 = vmatprep.subr.bf16.mxu1 %v8364_v26  ;;  %v8449_v26 = vld [vmem:[%s11791_s2 + $0xe08] ss:$16 sps:$4 sm:$0xff]   ;;  %v8454_v27 = vld [vmem:[%s11791_s2 + $0xd6c] ss:$16 sps:$4 sm:$0xff]  }
 0x245   :  { %5711 = vmatpush2.bf16.msra.mxu0 %v8365_v29  ;;  %v8452_v29 = vld [vmem:[%s11791_s2 + $0xd68] ss:$16 sps:$4 sm:$0xff]  }
 0x246   :  { %5676 = vmatpush2.bf16.msra.mxu1 %v8362_v28  ;;  %5712 = vmatprep.subr.bf16.mxu0 %v8373_v31  ;;  %v8457_v28 = vld [vmem:[%s11791_s2 + $0xfec] ss:$16 sps:$4 sm:$0xff]  }
 0x247   :  { %5677 = vmatprep.subr.bf16.mxu1 %v8370_v30  ;;  %v8455_v30 = vld [vmem:[%s11791_s2 + $0xfe8] ss:$16 sps:$4 sm:$0xff]   ;;  %v8460_v31 = vld [vmem:[%s11791_s2 + $0xd4c] ss:$16 sps:$4 sm:$0xff]  }
 0x249   :  { %5713 = vmatpush2.bf16.msra.mxu0 %v8371_v33  ;;  %v10828_v33 = vpop.f32.mrf.mxu0 }
 0x24a   :  { %5678 = vmatpush2.bf16.msra.mxu1 %v8368_v32  ;;  %5714 = vmatprep.subr.bf16.mxu0 %v8379_v35  ;;  %v8463_v32 = vld [vmem:[%s11791_s2 + $0xfcc] ss:$16 sps:$4 sm:$0xff]   ;;  %v8461_v35 = vld [vmem:[%s11791_s2 + $0xfc8] ss:$16 sps:$4 sm:$0xff]  }
 0x24b   :  { %5679 = vmatprep.subr.bf16.mxu1 %v8376_v34  ;;  %v8458_v34 = vld [vmem:[%s11791_s2 + $0xd48] ss:$16 sps:$4 sm:$0xff]  }
 0x24d   :  { %5715 = vmatpush2.bf16.msra.mxu0 %v8377_v38  ;;  %v8469_v38 = vld [vmem:[%s11791_s2 + $0xfac] ss:$16 sps:$4 sm:$0xff]  }
 0x24e   :  { %5680 = vmatpush2.bf16.msra.mxu1 %v8374_v37  ;;  %5716 = vmatprep.subr.bf16.mxu0 %v8382_v39  ;;  %v8466_v37 = vld [vmem:[%s11791_s2 + $0xd2c] ss:$16 sps:$4 sm:$0xff]   ;;  %v10842_v39 = vpop.f32.mrf.mxu0 }
 0x24f   :  { %5735 = vmatprep.subr.bf16.mxu1 %v8385_v40  ;;  %v8464_v40 = vld [vmem:[%s11791_s2 + $0xd28] ss:$16 sps:$4 sm:$0xff]  }
 0x251   :  { %5682 = vmatmul.mubr.bf16.vlgmr.msra.gmra.mxu1 %v8750_v45  ;;  %5717 = vmatpush2.bf16.msra.mxu0 %v8380_v41  ;;  %v8467_v41 = vld [vmem:[%s11791_s2 + $0xfa8] ss:$16 sps:$4 sm:$0xff]  }
 0x252   :  { %5736 = vmatpush1.bf16.msra.mxu1 %v8383_v42  ;;  %5718 = vmatprep.subr.bf16.mxu0 %v8388_v43  ;;  %v8472_v42 = vld [vmem:[%s11791_s2 + $0xd0c] ss:$16 sps:$4 sm:$0xff]   ;;  %v8470_v45 = vld [vmem:[%s11791_s2 + $0xd08] ss:$16 sps:$4 sm:$0xff]  }
 0x253   :  { %5737 = vmatprep.subr.bf16.mxu1 %v8391_v44  ;;  %5767 = vmatprep.mubr.bf16.mxu1 %v8751_v50  ;;  %v8475_v43 = vld [vmem:[%s11791_s2 + $0xf8c] ss:$16 sps:$4 sm:$0xff]   ;;  %v10856_v44 = vpop.f32.mrf.mxu0  ;;  %v8476_v50 = vld [vmem:[%s11791_s2 + $0xf68] ss:$16 sps:$4 sm:$0xff]  }
 0x255   :  { %5719 = vmatpush2.bf16.msra.mxu0 %v8386_v46  ;;  %v8473_v46 = vld [vmem:[%s11791_s2 + $0xf88] ss:$16 sps:$4 sm:$0xff]  }
 0x256   :  { %5738 = vmatpush1.bf16.msra.mxu1 %v8389_v47  ;;  %5720 = vmatprep.subr.bf16.mxu0 %v8394_v48  ;;  %v8478_v47 = vld [vmem:[%s11791_s2 + $0xf6c] ss:$16 sps:$4 sm:$0xff]  }
 0x257   :  { %5739 = vmatprep.subr.bf16.mxu1 %v8397_v49  ;;  %v8481_v48 = vld [vmem:[%s11791_s2 + $0x10ec] ss:$16 sps:$4 sm:$0xff]   ;;  %v10870_v49 = vpop.f32.mrf.mxu0 }
 0x259   :  { %5721 = vmatpush2.bf16.msra.mxu0 %v8392_v51  ;;  %v8479_v51 = vld [vmem:[%s11791_s2 + $0x10e8] ss:$16 sps:$4 sm:$0xff]  }
 0x25a   :  { %5740 = vmatpush1.bf16.msra.mxu1 %v8395_v52  ;;  %5722 = vmatprep.subr.bf16.mxu0 %v8400_v53  ;;  %v10878_v52 = vpop.f32.mrf.mxu1  ;;  %v10880_v53 = vpop.f32.mrf.mxu0 }
 0x25b   :  { %5741 = vmatprep.subr.bf16.mxu1 %v8403_v54  ;;  %v8484_v54 = vld [vmem:[%s11791_s2 + $0xf4c] ss:$16 sps:$4 sm:$0xff]  }
 0x25d   :  { %5723 = vmatpush2.bf16.msra.mxu0 %v8398_v55  ;;  %v8487_v55 = vld [vmem:[%s11791_s2 + $0x10cc] ss:$16 sps:$4 sm:$0xff]  }
 0x25e   :  { %5742 = vmatpush1.bf16.msra.mxu1 %v8401_v56  ;;  %5778 = vmatprep.subr.bf16.mxu0 %v8409_v58  ;;  %v8754_v56 = vld [vmem:[%s11790_s1 + $0x30] ss:$100 sps:$4 sm:$0xff]   ;;  %v8485_v58 = vld [vmem:[%s11791_s2 + $0x10c8] ss:$16 sps:$4 sm:$0xff]  }
 0x25f   :  { %5743 = vmatprep.subr.bf16.mxu1 %v8406_v57  ;;  %v8482_v57 = vld [vmem:[%s11791_s2 + $0xf48] ss:$16 sps:$4 sm:$0xff]  }
 0x260   :  { %5725 = vmatmul.mubr.bf16.vlgmr.msra.gmra.mxu0 %v8752_v63  ;;  %v8755_v63 = vld [vmem:[%s11790_s1 + $0x44] ss:$100 sps:$4 sm:$0xff]  }
 0x261   :  { %5779 = vmatpush1.bf16.msra.mxu0 %v8407_v60  ;;  %5810 = vmatprep.mubr.bf16.mxu0 %v8753_v4  ;;  %v10899_v60 = vpop.f32.mrf.mxu0  ;;  %v8496_v4 = vld [vmem:[%s11791_s2 + $0xf0c] ss:$16 sps:$4 sm:$0xff]  }
 0x262   :  { %5744 = vmatpush1.bf16.msra.mxu1 %v8404_v59  ;;  %5780 = vmatprep.subr.bf16.mxu0 %v8415_v62  ;;  %v10897_v59 = vpop.f32.mrf.mxu1  ;;  %v8493_v62 = vld [vmem:[%s11791_s2 + $0x10ac] ss:$16 sps:$4 sm:$0xff]  }
 0x263   :  { %5745 = vmatprep.subr.bf16.mxu1 %v8412_v61  ;;  %v8490_v61 = vld [vmem:[%s11791_s2 + $0xf2c] ss:$16 sps:$4 sm:$0xff]  }
 0x265   :  { %5781 = vmatpush1.bf16.msra.mxu0 %v8413_v1  ;;  %v8491_v1 = vld [vmem:[%s11791_s2 + $0x10a8] ss:$16 sps:$4 sm:$0xff]  }
 0x266   :  { %5746 = vmatpush1.bf16.msra.mxu1 %v8410_v0  ;;  %5782 = vmatprep.subr.bf16.mxu0 %v8421_v3  ;;  %v8488_v0 = vld [vmem:[%s11791_s2 + $0xf28] ss:$16 sps:$4 sm:$0xff]   ;;  %v10918_v3 = vpop.f32.mrf.mxu0 }
 0x267   :  { %5747 = vmatprep.subr.bf16.mxu1 %v8418_v2  ;;  %v10916_v2 = vpop.f32.mrf.mxu1 }
 0x269   :  { %5783 = vmatpush1.bf16.msra.mxu0 %v8419_v6  ;;  %v8494_v6 = vld [vmem:[%s11791_s2 + $0xf08] ss:$16 sps:$4 sm:$0xff]  }
 0x26a   :  { %5748 = vmatpush1.bf16.msra.mxu1 %v8416_v5  ;;  %5784 = vmatprep.subr.bf16.mxu0 %v8427_v8  ;;  %v8499_v5 = vld [vmem:[%s11791_s2 + $0x108c] ss:$16 sps:$4 sm:$0xff]   ;;  %v10932_v8 = vpop.f32.mrf.mxu1 }
 0x26b   :  { %5749 = vmatprep.subr.bf16.mxu1 %v8424_v7  ;;  %v8497_v7 = vld [vmem:[%s11791_s2 + $0x1088] ss:$16 sps:$4 sm:$0xff]  }
 0x26d   :  { %5785 = vmatpush1.bf16.msra.mxu0 %v8425_v10  ;;  %v8502_v10 = vld [vmem:[%s11791_s2 + $0x106c] ss:$16 sps:$4 sm:$0xff]  }
 0x26e   :  { %5750 = vmatpush1.bf16.msra.mxu1 %v8422_v9  ;;  %5786 = vmatprep.subr.bf16.mxu0 %v8433_v12  ;;  %v10934_v9 = vpop.f32.mrf.mxu0  ;;  %v10942_v12 = vpop.f32.mrf.mxu1 }
 0x26f   :  { %5751 = vmatprep.subr.bf16.mxu1 %v8430_v11  ;;  %v8505_v11 = vld [vmem:[%s11791_s2 + $0x12ec] ss:$16 sps:$4 sm:$0xff]  }
 0x271   :  { %5787 = vmatpush1.bf16.msra.mxu0 %v8431_v14  ;;  %v8500_v14 = vld [vmem:[%s11791_s2 + $0x1068] ss:$16 sps:$4 sm:$0xff]  }
 0x272   :  { %5752 = vmatpush2.bf16.msra.mxu1 %v8428_v13  ;;  %5788 = vmatprep.subr.bf16.mxu0 %v8439_v16  ;;  %v10944_v13 = vpop.f32.mrf.mxu0  ;;  %v8508_v16 = vld [vmem:[%s11791_s2 + $0x104c] ss:$16 sps:$4 sm:$0xff]  }
 0x273   :  { %5753 = vmatprep.subr.bf16.mxu1 %v8436_v15  ;;  %v8503_v15 = vld [vmem:[%s11791_s2 + $0x12e8] ss:$16 sps:$4 sm:$0xff]  }
 0x275   :  { %5789 = vmatpush1.bf16.msra.mxu0 %v8437_v18  ;;  %v10958_v18 = vpop.f32.mrf.mxu1 }
 0x276   :  { %5754 = vmatpush2.bf16.msra.mxu1 %v8434_v17  ;;  %5790 = vmatprep.subr.bf16.mxu0 %v8445_v20  ;;  %v8511_v17 = vld [vmem:[%s11791_s2 + $0x12cc] ss:$16 sps:$4 sm:$0xff]  }
 0x277   :  { %5755 = vmatprep.subr.bf16.mxu1 %v8442_v19  ;;  %v10960_v19 = vpop.f32.mrf.mxu0  ;;  %v8756_v20 = vld [vmem:[%s11790_s1 + $0x38] ss:$100 sps:$4 sm:$0xff]  }
 0x279   :  { %5791 = vmatpush1.bf16.msra.mxu0 %v8443_v22  ;;  %v8509_v22 = vld [vmem:[%s11791_s2 + $0x12c8] ss:$16 sps:$4 sm:$0xff]  }
 0x27a   :  { %5756 = vmatpush2.bf16.msra.mxu1 %v8440_v21  ;;  %5792 = vmatprep.subr.bf16.mxu0 %v8451_v24  ;;  %v8506_v21 = vld [vmem:[%s11791_s2 + $0x1048] ss:$16 sps:$4 sm:$0xff]   ;;  %v8517_v24 = vld [vmem:[%s11791_s2 + $0x12ac] ss:$16 sps:$4 sm:$0xff]  }
 0x27b   :  { %5757 = vmatprep.subr.bf16.mxu1 %v8448_v23  ;;  %v8514_v23 = vld [vmem:[%s11791_s2 + $0x102c] ss:$16 sps:$4 sm:$0xff]  }
 0x27d   :  { %5793 = vmatpush1.bf16.msra.mxu0 %v8449_v26  ;;  %v10980_v26 = vpop.f32.mrf.mxu1 }
 0x27e   :  { %5758 = vmatpush2.bf16.msra.mxu1 %v8446_v25  ;;  %5794 = vmatprep.subr.bf16.mxu0 %v8457_v28  ;;  %v8757_v25 = vld [vmem:[%s11790_s1 + $0x4c] ss:$100 sps:$4 sm:$0xff]   ;;  %v8512_v28 = vld [vmem:[%s11791_s2 + $0x1028] ss:$16 sps:$4 sm:$0xff]  }
 0x27f   :  { %5759 = vmatprep.subr.bf16.mxu1 %v8454_v27  ;;  %v10982_v27 = vpop.f32.mrf.mxu0 }
 0x281   :  { %5795 = vmatpush2.bf16.msra.mxu0 %v8455_v30  ;;  %v8520_v30 = vld [vmem:[%s11791_s2 + $0x100c] ss:$16 sps:$4 sm:$0xff]  }
 0x282   :  { %5760 = vmatpush2.bf16.msra.mxu1 %v8452_v29  ;;  %5796 = vmatprep.subr.bf16.mxu0 %v8463_v32  ;;  %v8515_v29 = vld [vmem:[%s11791_s2 + $0x12a8] ss:$16 sps:$4 sm:$0xff]   ;;  %v10996_v32 = vpop.f32.mrf.mxu1 }
 0x283   :  { %5761 = vmatprep.subr.bf16.mxu1 %v8460_v31  ;;  %v8523_v31 = vld [vmem:[%s11791_s2 + $0x128c] ss:$16 sps:$4 sm:$0xff]  }
 0x285   :  { %5797 = vmatpush2.bf16.msra.mxu0 %v8461_v35  ;;  %v8518_v35 = vld [vmem:[%s11791_s2 + $0x1008] ss:$16 sps:$4 sm:$0xff]  }
 0x286   :  { %5762 = vmatpush2.bf16.msra.mxu1 %v8458_v34  ;;  %5798 = vmatprep.subr.bf16.mxu0 %v8469_v38  ;;  %v10998_v34 = vpop.f32.mrf.mxu0  ;;  %v11006_v38 = vpop.f32.mrf.mxu1 }
 0x287   :  { %5763 = vmatprep.subr.bf16.mxu1 %v8466_v37  ;;  %v8521_v37 = vld [vmem:[%s11791_s2 + $0x1288] ss:$16 sps:$4 sm:$0xff]  }
 0x289   :  { %5799 = vmatpush2.bf16.msra.mxu0 %v8467_v41  ;;  %v8526_v41 = vld [vmem:[%s11791_s2 + $0x11ec] ss:$16 sps:$4 sm:$0xff]  }
 0x28a   :  { %5764 = vmatpush2.bf16.msra.mxu1 %v8464_v40  ;;  %5800 = vmatprep.subr.bf16.mxu0 %v8475_v43  ;;  %v11008_v40 = vpop.f32.mrf.mxu0  ;;  %v8524_v43 = vld [vmem:[%s11791_s2 + $0x11e8] ss:$16 sps:$4 sm:$0xff]  }
 0x28b   :  { %5765 = vmatprep.subr.bf16.mxu1 %v8472_v42  ;;  %v8529_v42 = vld [vmem:[%s11791_s2 + $0x126c] ss:$16 sps:$4 sm:$0xff]  }
 0x28d   :  { %5801 = vmatpush2.bf16.msra.mxu0 %v8473_v46  ;;  %v11022_v46 = vpop.f32.mrf.mxu1 }
 0x28e   :  { %5766 = vmatpush2.bf16.msra.mxu1 %v8470_v45  ;;  %5802 = vmatprep.subr.bf16.mxu0 %v8478_v47  ;;  %v8527_v45 = vld [vmem:[%s11791_s2 + $0x1268] ss:$16 sps:$4 sm:$0xff]   ;;  %v11024_v47 = vpop.f32.mrf.mxu0 }
 0x28f   :  { %5821 = vmatprep.subr.bf16.mxu1 %v8481_v48  ;;  %v8532_v48 = vld [vmem:[%s11791_s2 + $0x11cc] ss:$16 sps:$4 sm:$0xff]  }
 0x291   :  { %5768 = vmatmul.mubr.bf16.vlgmr.msra.gmra.mxu1 %v8754_v56  ;;  %5803 = vmatpush2.bf16.msra.mxu0 %v8476_v50  ;;  %v8535_v50 = vld [vmem:[%s11791_s2 + $0x124c] ss:$16 sps:$4 sm:$0xff]   ;;  %v11038_v56 = vpop.f32.mrf.mxu1 }
 0x292   :  { %5822 = vmatpush1.bf16.msra.mxu1 %v8479_v51  ;;  %5804 = vmatprep.subr.bf16.mxu0 %v8484_v54  ;;  %v849_v51 = vlaneseq  ;;  %v8530_v54 = vld [vmem:[%s11791_s2 + $0x11c8] ss:$16 sps:$4 sm:$0xff]  }
 0x293   :  { %5823 = vmatprep.subr.bf16.mxu1 %v8487_v55  ;;  %5853 = vmatprep.mubr.bf16.mxu1 %v8755_v63  ;;  %v8533_v55 = vld [vmem:[%s11791_s2 + $0x1248] ss:$16 sps:$4 sm:$0xff]  }
 0x294   :  { %v8536_v63 = vld [vmem:[%s11791_s2 + $0x11a8] ss:$16 sps:$4 sm:$0xff]  }
 0x295   :  { %5805 = vmatpush2.bf16.msra.mxu0 %v8482_v57  ;;  %v11040_v57 = vpop.f32.mrf.mxu0 }
 0x296   :  { %5824 = vmatpush1.bf16.msra.mxu1 %v8485_v58  ;;  %5806 = vmatprep.subr.bf16.mxu0 %v8490_v61  ;;  %v8538_v58 = vld [vmem:[%s11791_s2 + $0x11ac] ss:$16 sps:$4 sm:$0xff]  }
 0x297   :  { %5825 = vmatprep.subr.bf16.mxu1 %v8493_v62  ;;  %v8541_v61 = vld [vmem:[%s11791_s2 + $0x122c] ss:$16 sps:$4 sm:$0xff]   ;;  %v11048_v62 = vshrl.u32 %v849_v51, 7 }
 0x299   :  { %5807 = vmatpush2.bf16.msra.mxu0 %v8488_v0  ;;  %v8539_v0 = vld [vmem:[%s11791_s2 + $0x1228] ss:$16 sps:$4 sm:$0xff]  }
 0x29a   :  { %5826 = vmatpush1.bf16.msra.mxu1 %v8491_v1  ;;  %5808 = vmatprep.subr.bf16.mxu0 %v8496_v4  ;;  %v11056_v1 = vpop.f32.mrf.mxu1  ;;  %v11058_v4 = vpop.f32.mrf.mxu0 }
 0x29b   :  { %5827 = vmatprep.subr.bf16.mxu1 %v8499_v5  ;;  %v8544_v5 = vld [vmem:[%s11791_s2 + $0x118c] ss:$16 sps:$4 sm:$0xff]  }
 0x29d   :  { %5809 = vmatpush2.bf16.msra.mxu0 %v8494_v6  ;;  %v8547_v6 = vld [vmem:[%s11791_s2 + $0x120c] ss:$16 sps:$4 sm:$0xff]  }
 0x29e   :  { %5828 = vmatpush1.bf16.msra.mxu1 %v8497_v7  ;;  %5864 = vmatprep.subr.bf16.mxu0 %v8505_v11  ;;  %v11066_v7 = vpop.f32.mrf.mxu1  ;;  %v855_v11 = vsub.s32 1, %v11048_v62 }
 0x29f   :  { %5829 = vmatprep.subr.bf16.mxu1 %v8502_v10  ;;  %v11068_v10 = vpop.f32.mrf.mxu0 }
 0x2a0   :  { %5811 = vmatmul.mubr.bf16.vlgmr.msra.gmra.mxu0 %v8756_v20  ;;  %v8553_v20 = vld [vmem:[%s11791_s2 + $0x13ec] ss:$16 sps:$4 sm:$0xff]  }
 0x2a1   :  { %5865 = vmatpush1.bf16.msra.mxu0 %v8503_v15  ;;  %5896 = vmatprep.mubr.bf16.mxu0 %v8757_v25  ;;  %v8545_v15 = vld [vmem:[%s11791_s2 + $0x1208] ss:$16 sps:$4 sm:$0xff]  }
 0x2a2   :  { %5830 = vmatpush1.bf16.msra.mxu1 %v8500_v14  ;;  %5866 = vmatprep.subr.bf16.mxu0 %v8511_v17  ;;  %v8542_v14 = vld [vmem:[%s11791_s2 + $0x1188] ss:$16 sps:$4 sm:$0xff]   ;;  %v8550_v17 = vld [vmem:[%s11791_s2 + $0x116c] ss:$16 sps:$4 sm:$0xff]  }
 0x2a3   :  { %5831 = vmatprep.subr.bf16.mxu1 %v8508_v16  ;;  %v11080_v16 = vld [vmem:[%s11792_s3] sm:$0xf]  ;;  %v8551_v25 = vld [vmem:[%s11791_s2 + $0x13e8] ss:$16 sps:$4 sm:$0xff]  }
 0x2a5   :  { %5867 = vmatpush1.bf16.msra.mxu0 %v8509_v22  ;;  %v11090_v22 = vpop.f32.mrf.mxu0 }
 0x2a6   :  { %5832 = vmatpush1.bf16.msra.mxu1 %v8506_v21  ;;  %5868 = vmatprep.subr.bf16.mxu0 %v8517_v24  ;;  %v11088_v21 = vpop.f32.mrf.mxu1  ;;  %v8548_v24 = vld [vmem:[%s11791_s2 + $0x1168] ss:$16 sps:$4 sm:$0xff]  }
 0x2a7   :  { %5833 = vmatprep.subr.bf16.mxu1 %v8514_v23  ;;  %v856_v23 = vrot.slane %v11080_v16, %v855_v11 }
 0x2a9   :  { %5869 = vmatpush1.bf16.msra.mxu0 %v8515_v29  ;;  %v8559_v29 = vld [vmem:[%s11791_s2 + $0x13cc] ss:$16 sps:$4 sm:$0xff]  }
 0x2aa   :  { %5834 = vmatpush1.bf16.msra.mxu1 %v8512_v28  ;;  %5870 = vmatprep.subr.bf16.mxu0 %v8523_v31  ;;  %v8556_v28 = vld [vmem:[%s11791_s2 + $0x114c] ss:$16 sps:$4 sm:$0xff]   ;;  %v11106_v31 = vpop.f32.mrf.mxu1 }
 0x2ab   :  { %5835 = vmatprep.subr.bf16.mxu1 %v8520_v30  ;;  %v4959_v30 = vadd.f32 %v10870_v49, %v856_v23  ;;  %v8562_v49 = vld [vmem:[%s11791_s2 + $0x112c] ss:$16 sps:$4 sm:$0xff]  }
 0x2ad   :  { %5871 = vmatpush1.bf16.msra.mxu0 %v8521_v37  ;;  %v4955_v37 = vadd.f32 %v10842_v39, %v856_v23  ;;  %v8565_v39 = vld [vmem:[%s11791_s2 + $0x13ac] ss:$16 sps:$4 sm:$0xff]   ;;  %v8575_v23 = vld [vmem:[%s11791_s2 + $0x14e8] ss:$16 sps:$4 sm:$0xff]  }
 0x2ae   :  { %5836 = vmatpush1.bf16.msra.mxu1 %v8518_v35  ;;  %5872 = vmatprep.subr.bf16.mxu0 %v8529_v42  ;;  %v11108_v35 = vpop.f32.mrf.mxu0  ;;  %v8557_v42 = vld [vmem:[%s11791_s2 + $0x13c8] ss:$16 sps:$4 sm:$0xff]  }
 0x2af   :  { %5837 = vmatprep.subr.bf16.mxu1 %v8526_v41  ;;  %v8554_v41 = vld [vmem:[%s11791_s2 + $0x1148] ss:$16 sps:$4 sm:$0xff]  }
 0x2b1   :  { %5873 = vmatpush1.bf16.msra.mxu0 %v8527_v45  ;;  %v5259_v45 = vpop.f32.mrf.mxu1 }
 0x2b2   :  { %5838 = vmatpush2.bf16.msra.mxu1 %v8524_v43  ;;  %5874 = vmatprep.subr.bf16.mxu0 %v8535_v50  ;;  %v5002_v43 = vadd.f32 %v10932_v8, %v4959_v30  ;;  %v4998_v50 = vadd.f32 %v10897_v59, %v4955_v37  ;;  %v8568_v59 = vld [vmem:[%s11791_s2 + $0x110c] ss:$16 sps:$4 sm:$0xff]   ;;  %v8578_v37 = vld [vmem:[%s11791_s2 + $0x1348] ss:$16 sps:$4 sm:$0xff]  }
 0x2b3   :  { %5839 = vmatprep.subr.bf16.mxu1 %v8532_v48  ;;  %v11124_v48 = vpop.f32.mrf.mxu0 }
 0x2b4   :  { %v5045_v51 = vadd.f32 %v10934_v9, %v5002_v43  ;;  %v8571_v9 = vld [vmem:[%s11791_s2 + $0x138c] ss:$16 sps:$4 sm:$0xff]  }
 0x2b5   :  { %5875 = vmatpush1.bf16.msra.mxu0 %v8533_v55  ;;  %v8563_v55 = vld [vmem:[%s11791_s2 + $0x13a8] ss:$16 sps:$4 sm:$0xff]   ;;  %v11136_v8 = vpop.f32.mrf.mxu0 }
 0x2b6   :  { %5840 = vmatpush2.bf16.msra.mxu1 %v8530_v54  ;;  %5876 = vmatprep.subr.bf16.mxu0 %v8541_v61  ;;  %v8560_v54 = vld [vmem:[%s11791_s2 + $0x1128] ss:$16 sps:$4 sm:$0xff]   ;;  %v5041_v61 = vadd.f32 %v10899_v60, %v4998_v50  ;;  %v8574_v60 = vld [vmem:[%s11791_s2 + $0x136c] ss:$16 sps:$4 sm:$0xff]  }
 0x2b7   :  { %5841 = vmatprep.subr.bf16.mxu1 %v8538_v58  ;;  %v11134_v58 = vpop.f32.mrf.mxu1  ;;  %v11154_v11 = vpop.f32.mrf.mxu0 }
 0x2b9   :  { %5877 = vmatpush1.bf16.msra.mxu0 %v8539_v0  ;;  %v8566_v0 = vld [vmem:[%s11791_s2 + $0x1108] ss:$16 sps:$4 sm:$0xff]  }
 0x2ba   :  { %5842 = vmatpush2.bf16.msra.mxu1 %v8536_v63  ;;  %5878 = vmatprep.subr.bf16.mxu0 %v8547_v6  ;;  %v5088_v63 = vadd.f32 %v10996_v32, %v5045_v51  ;;  %v11152_v6 = vpop.f32.mrf.mxu1  ;;  %v8577_v32 = vld [vmem:[%s11791_s2 + $0x14ec] ss:$16 sps:$4 sm:$0xff]  }
 0x2bb   :  { %5843 = vmatprep.subr.bf16.mxu1 %v8544_v5  ;;  %v8569_v5 = vld [vmem:[%s11791_s2 + $0x1388] ss:$16 sps:$4 sm:$0xff]  }
 0x2bd   :  { %5879 = vmatpush1.bf16.msra.mxu0 %v8545_v15  ;;  %v5131_v15 = vadd.f32 %v10998_v34, %v5088_v63 }
 0x2be   :  { %5844 = vmatpush2.bf16.msra.mxu1 %v8542_v14  ;;  %5880 = vmatprep.subr.bf16.mxu0 %v8553_v20  ;;  %v5084_v14 = vadd.f32 %v10958_v18, %v5041_v61  ;;  %v8572_v20 = vld [vmem:[%s11791_s2 + $0x1368] ss:$16 sps:$4 sm:$0xff]   ;;  %v8580_v18 = vld [vmem:[%s11791_s2 + $0x134c] ss:$16 sps:$4 sm:$0xff]   ;;  %v851_v61 = vsub.s32 0, %v11048_v62 }
 0x2bf   :  { %5845 = vmatprep.subr.bf16.mxu1 %v8550_v17  ;;  %v5174_v34 = vadd.f32 %v11056_v1, %v5131_v15 }
 0x2c0   :  { %v5127_v17 = vadd.f32 %v10960_v19, %v5084_v14  ;;  %v8583_v19 = vld [vmem:[%s11791_s2 + $0x14cc] ss:$16 sps:$4 sm:$0xff]   ;;  %v852_v14 = vrot.slane %v11080_v16, %v851_v61 }
 0x2c1   :  { %5881 = vmatpush2.bf16.msra.mxu0 %v8551_v25  ;;  %v11173_v25 = vpop.f32.mrf.mxu0  ;;  %v5217_v30 = vadd.f32 %v11058_v4, %v5174_v34  ;;  %v8589_v4 = vld [vmem:[%s11791_s2 + $0x14ac] ss:$16 sps:$4 sm:$0xff]  }
 0x2c2   :  { %5846 = vmatpush2.bf16.msra.mxu1 %v8548_v24  ;;  %5882 = vmatprep.subr.bf16.mxu0 %v8559_v29  ;;  %v11171_v24 = vpop.f32.mrf.mxu1  ;;  %v5170_v29 = vadd.f32 %v11022_v46, %v5127_v17  ;;  %v8586_v46 = vld [vmem:[%s11791_s2 + $0x132c] ss:$16 sps:$4 sm:$0xff]   ;;  %v4957_v34 = vadd.f32 %v10856_v44, %v852_v14 }
 0x2c3   :  { %5847 = vmatprep.subr.bf16.mxu1 %v8556_v28  ;;  %v8758_v28 = vld [vmem:[%s11790_s1 + $0x40] ss:$100 sps:$4 sm:$0xff]   ;;  %v5260_v51 = vadd.f32 %v5259_v45, %v5217_v30  ;;  %v8595_v45 = vld [vmem:[%s11791_s2 + $0x148c] ss:$16 sps:$4 sm:$0xff]   ;;  %v4953_v30 = vadd.f32 %v10828_v33, %v852_v14 }
 0x2c4   :  { %v5345_v1 = vpop.f32.mrf.mxu1  ;;  %v8760_v44 = vld [vmem:[%s11790_s1 + $0x48] ss:$100 sps:$4 sm:$0xff]   ;;  %v5000_v33 = vadd.f32 %v10916_v2, %v4957_v34  ;;  %v8761_v2 = vld [vmem:[%s11790_s1 + $0x5c] ss:$100 sps:$4 sm:$0xff]  }
 0x2c5   :  { %5883 = vmatpush2.bf16.msra.mxu0 %v8557_v42  ;;  %v5388_v42 = vpop.f32.mrf.mxu0 }
 0x2c6   :  { %5848 = vmatpush2.bf16.msra.mxu1 %v8554_v41  ;;  %5884 = vmatprep.subr.bf16.mxu0 %v8565_v39  ;;  %v8581_v41 = vld [vmem:[%s11791_s2 + $0x14c8] ss:$16 sps:$4 sm:$0xff]   ;;  %v11203_v43 = vpop.f32.mrf.mxu1 }
 0x2c7   :  { %5849 = vmatprep.subr.bf16.mxu1 %v8562_v49  ;;  %v5213_v49 = vadd.f32 %v11024_v47, %v5170_v29  ;;  %v8759_v39 = vld [vmem:[%s11790_s1 + $0x54] ss:$100 sps:$4 sm:$0xff]   ;;  %v11205_v50 = vpop.f32.mrf.mxu0 }
 0x2c8   :  { %v8587_v47 = vld [vmem:[%s11791_s2 + $0x14a8] ss:$16 sps:$4 sm:$0xff]   ;;  %v5427_v63 = vpop.f32.mrf.mxu1 }
 0x2c9   :  { %5885 = vmatpush2.bf16.msra.mxu0 %v8563_v55  ;;  %v8592_v55 = vld [vmem:[%s11791_s2 + $0x130c] ss:$16 sps:$4 sm:$0xff]  }
 0x2ca   :  { %5850 = vmatpush2.bf16.msra.mxu1 %v8560_v54  ;;  %5886 = vmatprep.subr.bf16.mxu0 %v8571_v9  ;;  %v8584_v54 = vld [vmem:[%s11791_s2 + $0x1328] ss:$16 sps:$4 sm:$0xff]   ;;  %v5303_v9 = vadd.f32 %v11124_v48, %v5260_v51  ;;  %v11236_v15 = vpop.f32.mrf.mxu1  ;;  %v4996_v51 = vadd.f32 %v10878_v52, %v4953_v30  ;;  %v8616_v52 = vld [vmem:[%s11791_s2 + $0x140c] ss:$16 sps:$4 sm:$0xff]  }
 0x2cb   :  { %5851 = vmatprep.subr.bf16.mxu1 %v8568_v59  ;;  %v5256_v59 = vadd.f32 %v11088_v21, %v5213_v49  ;;  %v8598_v21 = vld [vmem:[%s11791_s2 + $0x146c] ss:$16 sps:$4 sm:$0xff]  }
 0x2cc   :  { %v5346_v48 = vadd.f32 %v5345_v1, %v5303_v9  ;;  %v11299_v9 = vstv %s11254_s17 }
 0x2cd   :  { %5887 = vmatpush2.bf16.msra.mxu0 %v8569_v5  ;;  %v5299_v5 = vadd.f32 %v11090_v22, %v5256_v59  ;;  %v8601_v22 = vld [vmem:[%s11791_s2 + $0x16ec] ss:$16 sps:$4 sm:$0xff]   ;;  %v5039_v59 = vadd.f32 %v10880_v53, %v4996_v51  ;;  %v8614_v53 = vld [vmem:[%s11791_s2 + $0x1408] ss:$16 sps:$4 sm:$0xff]  }
 0x2ce   :  { %5852 = vmatpush2.bf16.msra.mxu1 %v8566_v0  ;;  %5888 = vmatprep.subr.bf16.mxu0 %v8574_v60  ;;  %v5470_v0 = vpop.f32.mrf.mxu0  ;;  %v8590_v60 = vld [vmem:[%s11791_s2 + $0x1308] ss:$16 sps:$4 sm:$0xff]  }
 0x2cf   :  { %5907 = vmatprep.subr.bf16.mxu1 %v8577_v32  ;;  %v8593_v32 = vld [vmem:[%s11791_s2 + $0x1488] ss:$16 sps:$4 sm:$0xff]  }
 0x2d0   :  { %v11238_v17 = vpop.f32.mrf.mxu0 }
 0x2d1   :  { %5854 = vmatmul.mubr.bf16.vlgmr.msra.gmra.mxu1 %v8758_v28  ;;  %5889 = vmatpush2.bf16.msra.mxu0 %v8572_v20  ;;  %v5342_v20 = vadd.f32 %v11152_v6, %v5299_v5  ;;  %v8604_v28 = vld [vmem:[%s11791_s2 + $0x144c] ss:$16 sps:$4 sm:$0xff]  }
 0x2d2   :  { %5908 = vmatpush1.bf16.msra.mxu1 %v8575_v23  ;;  %5890 = vmatprep.subr.bf16.mxu0 %v8580_v18  ;;  %v5389_v23 = vadd.f32 %v5388_v42, %v5346_v48  ;;  %v8596_v18 = vld [vmem:[%s11791_s2 + $0x1468] ss:$16 sps:$4 sm:$0xff]   ;;  %v8607_v6 = vld [vmem:[%s11791_s2 + $0x16cc] ss:$16 sps:$4 sm:$0xff]  }
 0x2d3   :  { %5909 = vmatprep.subr.bf16.mxu1 %v8583_v19  ;;  %5939 = vmatprep.mubr.bf16.mxu1 %v8759_v39  ;;  %v8599_v19 = vld [vmem:[%s11791_s2 + $0x16e8] ss:$16 sps:$4 sm:$0xff]   ;;  %v5385_v29 = vadd.f32 %v11154_v11, %v5342_v20 }
 0x2d4   :  { %v8602_v42 = vld [vmem:[%s11791_s2 + $0x1448] ss:$16 sps:$4 sm:$0xff]  }
 0x2d5   :  { %5891 = vmatpush2.bf16.msra.mxu0 %v8578_v37  ;;  %v5431_v37 = vpop.f32.mrf.mxu1  ;;  %v8605_v11 = vld [vmem:[%s11791_s2 + $0x16c8] ss:$16 sps:$4 sm:$0xff]   ;;  %v5428_v49 = vadd.f32 %v5427_v63, %v5385_v29 }
 0x2d6   :  { %5910 = vmatpush1.bf16.msra.mxu1 %v8581_v41  ;;  %5892 = vmatprep.subr.bf16.mxu0 %v8586_v46  ;;  %v5474_v41 = vpop.f32.mrf.mxu0  ;;  %v5432_v1 = vadd.f32 %v5431_v37, %v5389_v23  ;;  %v8610_v46 = vld [vmem:[%s11791_s2 + $0x142c] ss:$16 sps:$4 sm:$0xff]   ;;  %v11360_v37 = vstv %s7397_s20 }
 0x2d7   :  { %5911 = vmatprep.subr.bf16.mxu1 %v8589_v4  ;;  %v8613_v4 = vld [vmem:[%s11791_s2 + $0x16ac] ss:$16 sps:$4 sm:$0xff]  }
 0x2d8   :  { %v11276_v39 = vadd.f32 %v5474_v41, %v5432_v1  ;;  %v11364_v1 = vstv %s7395_s21 }
 0x2d9   :  { %5893 = vmatpush2.bf16.msra.mxu0 %v8584_v54  ;;  %v5043_v54 = vadd.f32 %v10918_v3, %v5000_v33  ;;  %v8619_v3 = vld [vmem:[%s11791_s2 + $0x168c] ss:$16 sps:$4 sm:$0xff]  }
 0x2da   :  { %5912 = vmatpush1.bf16.msra.mxu1 %v8587_v47  ;;  %5894 = vmatprep.subr.bf16.mxu0 %v8592_v55  ;;  %v11283_v47 = vadd.f32 %v5470_v0, %v5428_v49  ;;  %v8608_v55 = vld [vmem:[%s11791_s2 + $0x1428] ss:$16 sps:$4 sm:$0xff]   ;;  %v6138_v61 = vmul.f32 %v11299_v9, %v11276_v39  ;;  %v8643_v49 = vld [vmem:[%s11791_s2 + $0x160c] ss:$16 sps:$4 sm:$0xff]  }
 0x2db   :  { %5913 = vmatprep.subr.bf16.mxu1 %v8595_v45  ;;  %v8611_v45 = vld [vmem:[%s11791_s2 + $0x16a8] ss:$16 sps:$4 sm:$0xff]   ;;  %v5086_v63 = vadd.f32 %v10980_v26, %v5043_v54  ;;  %v8622_v26 = vld [vmem:[%s11791_s2 + $0x15ec] ss:$16 sps:$4 sm:$0xff]  }
 0x2dc   :  { %v8617_v0 = vld [vmem:[%s11791_s2 + $0x1688] ss:$16 sps:$4 sm:$0xff]   ;;  %v6134_v5 = vmul.f32 %v11299_v9, %v11283_v47 }
 0x2dd   :  { %5895 = vmatpush2.bf16.msra.mxu0 %v8590_v60  ;;  %v5082_v60 = vadd.f32 %v10942_v12, %v5039_v59  ;;  %v8620_v12 = vld [vmem:[%s11791_s2 + $0x15e8] ss:$16 sps:$4 sm:$0xff]  }
 0x2de   :  { %5914 = vmatpush1.bf16.msra.mxu1 %v8593_v32  ;;  %5950 = vmatprep.subr.bf16.mxu0 %v8601_v22  ;;  %v5129_v32 = vadd.f32 %v10982_v27, %v5086_v63  ;;  %v11321_v22 = vstv %s11274_s27  ;;  %v8623_v27 = vld [vmem:[%s11791_s2 + $0x1668] ss:$16 sps:$4 sm:$0xff]  }
 0x2df   :  { %5915 = vmatprep.subr.bf16.mxu1 %v8598_v21  ;;  %v8625_v21 = vld [vmem:[%s11791_s2 + $0x166c] ss:$16 sps:$4 sm:$0xff]   ;;  %v6147_v48 = vadd.f32 %v11321_v22, %v6138_v61  ;;  %v5125_v14 = vadd.f32 %v10944_v13, %v5082_v60  ;;  %v6143_v20 = vadd.f32 %v11321_v22, %v6134_v5  ;;  %v8638_v54 = vld [vmem:[%s11791_s2 + $0x1588] ss:$16 sps:$4 sm:$0xff]   ;;  %v11408_v61 = vstv %s11358_s14  ;;  %s11432_s14 = sld [smem:[#allocation2 + $0x2]] }
 0x2e0   :  { %5897 = vmatmul.mubr.bf16.vlgmr.msra.gmra.mxu0 %v8760_v44  ;;  %v5172_v23 = vadd.f32 %v11038_v56, %v5129_v32  ;;  %v8628_v13 = vld [vmem:[%s11791_s2 + $0x15cc] ss:$16 sps:$4 sm:$0xff]   ;;  %v8626_v56 = vld [vmem:[%s11791_s2 + $0x15c8] ss:$16 sps:$4 sm:$0xff]  }
 0x2e1   :  { %5951 = vmatpush1.bf16.msra.mxu0 %v8599_v19  ;;  %5982 = vmatprep.mubr.bf16.mxu0 %v8761_v2  ;;  %v6155_v19 = vmul.f32 %v6147_v48, %v11276_v39  ;;  %v5168_v34 = vadd.f32 %v11006_v38, %v5125_v14  ;;  %v6151_v29 = vmul.f32 %v6143_v20, %v11283_v47  ;;  %v8634_v38 = vld [vmem:[%s11791_s2 + $0x15ac] ss:$16 sps:$4 sm:$0xff]   ;;  %v8644_v5 = vld [vmem:[%s11791_s2 + $0x1568] ss:$16 sps:$4 sm:$0xff]  }
 0x2e2   :  { %5916 = vmatpush1.bf16.msra.mxu1 %v8596_v18  ;;  %5952 = vmatprep.subr.bf16.mxu0 %v8607_v6  ;;  %v8631_v18 = vld [vmem:[%s11791_s2 + $0x164c] ss:$16 sps:$4 sm:$0xff]   ;;  %v8629_v6 = vld [vmem:[%s11791_s2 + $0x1648] ss:$16 sps:$4 sm:$0xff]   ;;  %v6048_v2 = vmul.f32 %v11364_v1, %v11283_v47 }
 0x2e3   :  { %5917 = vmatprep.subr.bf16.mxu1 %v8604_v28  ;;  %v5215_v28 = vadd.f32 %v11040_v57, %v5172_v23  ;;  %v5211_v30 = vadd.f32 %v11008_v40, %v5168_v34  ;;  %v8637_v57 = vld [vmem:[%s11791_s2 + $0x162c] ss:$16 sps:$4 sm:$0xff]   ;;  %v6164_v41 = vadd.f32 %v11360_v37, %v6155_v19  ;;  %v8632_v40 = vld [vmem:[%s11791_s2 + $0x15a8] ss:$16 sps:$4 sm:$0xff]   ;;  %v6160_v33 = vadd.f32 %v11360_v37, %v6151_v29 }
 0x2e4   :  { %v8647_v60 = vld [vmem:[%s11791_s2 + $0x17e8] ss:$16 sps:$4 sm:$0xff]   ;;  %v8658_v19 = vld [vmem:[%s11791_s2 + $0x152c] ss:$16 sps:$4 sm:$0xff]  }
 0x2e5   :  { %5953 = vmatpush1.bf16.msra.mxu0 %v8605_v11  ;;  %v5258_v44 = vadd.f32 %v11106_v31, %v5215_v28  ;;  %v6052_v11 = vmul.f32 %v11364_v1, %v11276_v39  ;;  %v5254_v31 = vadd.f32 %v11066_v7, %v5211_v30  ;;  %v6172_v51 = vmul.f32 %v6164_v41, %v11276_v39  ;;  %v8653_v20 = vld [vmem:[%s11791_s2 + $0x17c8] ss:$16 sps:$4 sm:$0xff]   ;;  %v8661_v34 = vld [vmem:[%s11791_s2 + $0x17ac] ss:$16 sps:$4 sm:$0xff]  }
 0x2e6   :  { %5918 = vmatpush1.bf16.msra.mxu1 %v8602_v42  ;;  %5954 = vmatprep.subr.bf16.mxu0 %v8613_v4  ;;  %v8635_v42 = vld [vmem:[%s11791_s2 + $0x1628] ss:$16 sps:$4 sm:$0xff]   ;;  %v8640_v4 = vld [vmem:[%s11791_s2 + $0x158c] ss:$16 sps:$4 sm:$0xff]   ;;  %v6168_v59 = vmul.f32 %v6160_v33, %v11283_v47 }
 0x2e7   :  { %5919 = vmatprep.subr.bf16.mxu1 %v8610_v46  ;;  %v5301_v46 = vadd.f32 %v11108_v35, %v5258_v44  ;;  %v5297_v7 = vadd.f32 %v11068_v10, %v5254_v31  ;;  %v11390_v35 = vstv %s11342_s0  ;;  %s11475_s0 = sld [smem:[#allocation2 + $0x1]]  ;;  %v8665_v33 = vld [vmem:[%s11791_s2 + $0x1788] ss:$16 sps:$4 sm:$0xff]  }
 0x2e8   :  { %v6057_v63 = vadd.f32 %v11390_v35, %v6048_v2 }
 0x2e9   :  { %5955 = vmatpush1.bf16.msra.mxu0 %v8611_v45  ;;  %v6061_v45 = vadd.f32 %v11390_v35, %v6052_v11  ;;  %v5344_v10 = vadd.f32 %v11171_v24, %v5301_v46  ;;  %v8662_v11 = vld [vmem:[%s11791_s2 + $0x1508] ss:$16 sps:$4 sm:$0xff]  }
 0x2ea   :  { %5920 = vmatpush1.bf16.msra.mxu1 %v8608_v55  ;;  %5956 = vmatprep.subr.bf16.mxu0 %v8619_v3  ;;  %v8641_v55 = vld [vmem:[%s11791_s2 + $0x1608] ss:$16 sps:$4 sm:$0xff]   ;;  %v8649_v3 = vld [vmem:[%s11791_s2 + $0x17ec] ss:$16 sps:$4 sm:$0xff]   ;;  %v6065_v48 = vmul.f32 %v6057_v63, %v11283_v47  ;;  %v8762_v63 = vld [vmem:[%s11790_s1 + $0x50] ss:$100 sps:$4 sm:$0xff]  }
 0x2eb   :  { %5921 = vmatprep.subr.bf16.mxu1 %v8616_v52  ;;  %v8646_v52 = vld [vmem:[%s11791_s2 + $0x156c] ss:$16 sps:$4 sm:$0xff]   ;;  %v5387_v24 = vadd.f32 %v11173_v25, %v5344_v10  ;;  %v6069_v32 = vmul.f32 %v6061_v45, %v11276_v39 }
 0x2ec   :  { %v8655_v25 = vld [vmem:[%s11791_s2 + $0x17cc] ss:$16 sps:$4 sm:$0xff]  }
 0x2ed   :  { %5957 = vmatpush1.bf16.msra.mxu0 %v8617_v0  ;;  %v5340_v0 = vadd.f32 %v11134_v58, %v5297_v7  ;;  %v8652_v58 = vld [vmem:[%s11791_s2 + $0x154c] ss:$16 sps:$4 sm:$0xff]  }
 0x2ee   :  { %5922 = vmatpush1.bf16.msra.mxu1 %v8614_v53  ;;  %5958 = vmatprep.subr.bf16.mxu0 %v8625_v21  ;;  %v6181_v53 = vadd.f32 %v11408_v61, %v6172_v51  ;;  %v8679_v10 = vld [vmem:[%s11791_s2 + $0x184c] ss:$16 sps:$4 sm:$0xff]  }
 0x2ef   :  { %5923 = vmatprep.subr.bf16.mxu1 %v8622_v26  ;;  %v6177_v26 = vadd.f32 %v11408_v61, %v6168_v59  ;;  %v5383_v21 = vadd.f32 %v11136_v8, %v5340_v0  ;;  %v8650_v8 = vld [vmem:[%s11791_s2 + $0x1548] ss:$16 sps:$4 sm:$0xff]   ;;  %v8676_v59 = vld [vmem:[%s11791_s2 + $0x174c] ss:$16 sps:$4 sm:$0xff]  }
 0x2f0   :  { %v6189_v14 = vmul.f32 %v6181_v53, %v11276_v39  ;;  %v11517_v53 = vstv %s11475_s0 }
 0x2f1   :  { %5959 = vmatpush1.bf16.msra.mxu0 %v8623_v27  ;;  %v11435_v27 = vstv %s11387_s22  ;;  %11800 = vst [vmem:[#allocation5_spill] sm:$0xff] %v11517_v53 }
 0x2f2   :  { %5924 = vmatpush2.bf16.msra.mxu1 %v8620_v12  ;;  %5960 = vmatprep.subr.bf16.mxu0 %v8631_v18  ;;  %v5430_v12 = vadd.f32 %v11236_v15, %v5387_v24  ;;  %v6078_v23 = vadd.f32 %v11435_v27, %v6069_v32  ;;  %v5426_v15 = vadd.f32 %v11203_v43, %v5383_v21  ;;  %v8656_v43 = vld [vmem:[%s11791_s2 + $0x1528] ss:$16 sps:$4 sm:$0xff]   ;;  %v8682_v32 = vld [vmem:[%s11791_s2 + $0x172c] ss:$16 sps:$4 sm:$0xff]  }
 0x2f3   :  { %5925 = vmatprep.subr.bf16.mxu1 %v8628_v13  ;;  %v6185_v13 = vmul.f32 %v6177_v26, %v11283_v47  ;;  %v6074_v28 = vadd.f32 %v11435_v27, %v6065_v48  ;;  %v8674_v24 = vld [vmem:[%s11791_s2 + $0x1748] ss:$16 sps:$4 sm:$0xff]   ;;  %v8685_v26 = vld [vmem:[%s11791_s2 + $0x182c] ss:$16 sps:$4 sm:$0xff]  }
 0x2f4   :  { %v11447_v18 = vadd.f32 %v11238_v17, %v5430_v12  ;;  %v8659_v17 = vld [vmem:[%s11791_s2 + $0x17a8] ss:$16 sps:$4 sm:$0xff]   ;;  %v6086_v29 = vmul.f32 %v6078_v23, %v11276_v39 }
 0x2f5   :  { %5961 = vmatpush1.bf16.msra.mxu0 %v8629_v6  ;;  %v11457_v6 = vadd.f32 %v11205_v50, %v5426_v15  ;;  %v6193_v30 = vand.u32 2147483647, %v6185_v13  ;;  %v8664_v50 = vld [vmem:[%s11791_s2 + $0x150c] ss:$16 sps:$4 sm:$0xff]   ;;  %v6082_v41 = vmul.f32 %v6074_v28, %v11283_v47  ;;  %v8683_v12 = vld [vmem:[%s11791_s2 + $0x1828] ss:$16 sps:$4 sm:$0xff]  }
 0x2f6   :  { %5926 = vmatpush2.bf16.msra.mxu1 %v8626_v56  ;;  %5962 = vmatprep.subr.bf16.mxu0 %v8637_v57  ;;  %v6197_v56 = vand.u32 2147483647, %v6189_v14  ;;  %v6137_v57 = vmul.f32 %v11299_v9, %v11447_v18  ;;  %v8680_v14 = vld [vmem:[%s11791_s2 + $0x1728] ss:$16 sps:$4 sm:$0xff]  }
 0x2f7   :  { %5927 = vmatprep.subr.bf16.mxu1 %v8634_v38  ;;  %v8667_v38 = vld [vmem:[%s11791_s2 + $0x178c] ss:$16 sps:$4 sm:$0xff]   ;;  %v6201_v46 = vadd.f32 1.0, %v6193_v30  ;;  %v6047_v23 = vmul.f32 %v11364_v1, %v11457_v6 }
 0x2f8   :  { %v6205_v44 = vadd.f32 1.0, %v6197_v56  ;;  %v6146_v2 = vadd.f32 %v11321_v22, %v6137_v57  ;;  %v8686_v56 = vld [vmem:[%s11791_s2 + $0x1708] ss:$16 sps:$4 sm:$0xff]  }
 0x2f9   :  { %5963 = vmatpush1.bf16.msra.mxu0 %v8635_v42  ;;  %v6133_v42 = vmul.f32 %v11299_v9, %v11457_v6  ;;  %v6056_v30 = vadd.f32 %v11390_v35, %v6047_v23 }
 0x2fa   :  { %5928 = vmatpush2.bf16.msra.mxu1 %v8632_v40  ;;  %5964 = vmatprep.subr.bf16.mxu0 %v8643_v49  ;;  %v11478_v40 = vstv %s11432_s14  ;;  %v8673_v49 = vld [vmem:[%s11791_s2 + $0x186c] ss:$16 sps:$4 sm:$0xff]   ;;  %8724 = vrcp.f32 %v6205_v44 }
 0x2fb   :  { %5929 = vmatprep.subr.bf16.mxu1 %v8640_v4  ;;  %v6095_v31 = vadd.f32 %v11478_v40, %v6086_v29  ;;  %v8670_v4 = vld [vmem:[%s11791_s2 + $0x176c] ss:$16 sps:$4 sm:$0xff]   ;;  %v6091_v51 = vadd.f32 %v11478_v40, %v6082_v41  ;;  %v6142_v7 = vadd.f32 %v11321_v22, %v6133_v42  ;;  %8726 = vrcp.f32 %v6201_v46 }
 0x2fc   :  { %v8692_v29 = vld [vmem:[%s11793_s4 + $0x78] sm:$0xff]  }
 0x2fd   :  { %5965 = vmatpush1.bf16.msra.mxu0 %v8641_v55  ;;  %v8671_v55 = vld [vmem:[%s11791_s2 + $0x1868] ss:$16 sps:$4 sm:$0xff]   ;;  %v6103_v45 = vmul.f32 %v6095_v31, %v11276_v39  ;;  %v6150_v0 = vmul.f32 %v6142_v7, %v11457_v6  ;;  %v6064_v31 = vmul.f32 %v6056_v30, %v11457_v6 }
 0x2fe   :  { %5930 = vmatpush2.bf16.msra.mxu1 %v8638_v54  ;;  %5966 = vmatprep.subr.bf16.mxu0 %v8649_v3  ;;  %v8668_v54 = vld [vmem:[%s11791_s2 + $0x1768] ss:$16 sps:$4 sm:$0xff]   ;;  %v6099_v3 = vmul.f32 %v6091_v51, %v11283_v47 }
 0x2ff   :  { %5931 = vmatprep.subr.bf16.mxu1 %v8646_v52  ;;  %v6154_v52 = vmul.f32 %v6146_v2, %v11447_v18  ;;  %v6159_v48 = vadd.f32 %v11360_v37, %v6150_v0  ;;  %v8693_v42 = vld [vmem:[%s11793_s4 + $0x38] sm:$0xff]   ;;  %v8764_v2 = vld [vmem:[%s11790_s1 + $0x60] ss:$100 sps:$4 sm:$0xff]  }
 0x300   :  { %v8709_v30 = vld [vmem:[%s11793_s4 + $0xb8] sm:$0xff]  }
 0x301   :  { %5967 = vmatpush2.bf16.msra.mxu0 %v8647_v60  ;;  %v6112_v60 = vadd.f32 %v11517_v53, %v6103_v45  ;;  %v6163_v21 = vadd.f32 %v11360_v37, %v6154_v52  ;;  %v6167_v28 = vmul.f32 %v6159_v48, %v11457_v6  ;;  %v6073_v45 = vadd.f32 %v11435_v27, %v6064_v31  ;;  %v8702_v48 = vld [vmem:[%s11793_s4 + $0x50] sm:$0xff]  }
 0x302   :  { %5932 = vmatpush2.bf16.msra.mxu1 %v8644_v5  ;;  %5968 = vmatprep.subr.bf16.mxu0 %v8655_v25  ;;  %v8677_v5 = vld [vmem:[%s11791_s2 + $0x1848] ss:$16 sps:$4 sm:$0xff]   ;;  %v6051_v25 = vmul.f32 %v11364_v1, %v11447_v18  ;;  %v8718_v31 = vld [vmem:[%s11793_s4 + $0xd0] sm:$0xff]  }
 0x303   :  { %5933 = vmatprep.subr.bf16.mxu1 %v8652_v58  ;;  %v6108_v58 = vadd.f32 %v11517_v53, %v6099_v3  ;;  %v6171_v13 = vmul.f32 %v6163_v21, %v11447_v18  ;;  %v6176_v44 = vadd.f32 %v11408_v61, %v6167_v28  ;;  %v8697_v3 = vld [vmem:[%s11793_s4 + $0x28] sm:$0xff]   ;;  %v6081_v0 = vmul.f32 %v6073_v45, %v11457_v6 }
 0x305   :  { %5969 = vmatpush2.bf16.msra.mxu0 %v8653_v20  ;;  %v8691_v20 = vld [vmem:[%s11791_s2 + $0x180c] ss:$16 sps:$4 sm:$0xff]   ;;  %v6116_v15 = vmul.f32 %v6108_v58, %v11283_v47  ;;  %v6184_v7 = vmul.f32 %v6176_v44, %v11457_v6  ;;  %v6090_v21 = vadd.f32 %v11478_v40, %v6081_v0  ;;  %v8714_v44 = vld [vmem:[%s11793_s4 + $0xe0] sm:$0xff]  }
 0x306   :  { %5934 = vmatpush2.bf16.msra.mxu1 %v8650_v8  ;;  %5970 = vmatprep.subr.bf16.mxu0 %v8661_v34  ;;  %v6120_v8 = vmul.f32 %v6112_v60, %v11276_v39  ;;  %v11556_v34 = vstv %s6036_s23  ;;  %v6060_v39 = vadd.f32 %v11390_v35, %v6051_v25  ;;  %v8701_v25 = vld [vmem:[%s11793_s4 + $0x18] sm:$0xff]  }
 0x307   :  { %5935 = vmatprep.subr.bf16.mxu1 %v8658_v19  ;;  %v8725_v19 = vpop.eup %8724  ;;  %11801 = vst [vmem:[#allocation6_spill] sm:$0xff] %v11556_v34  ;;  %v6192_v52 = vand.u32 2147483647, %v6184_v7  ;;  %v8723_v7 = vld [vmem:[%s11793_s4 + $0x80] sm:$0xff]  }
 0x308   :  { %v8727_v47 = vpop.eup %8726  ;;  %v6068_v41 = vmul.f32 %v6060_v39, %v11447_v18 }
 0x309   :  { %5971 = vmatpush2.bf16.msra.mxu0 %v8659_v17  ;;  %v6129_v17 = vadd.f32 %v11556_v34, %v6120_v8  ;;  %v6200_v60 = vadd.f32 1.0, %v6192_v52  ;;  %v8703_v8 = vld [vmem:[%s11793_s4 + $0x10] sm:$0xff]  }
 0x30a   :  { %5936 = vmatpush2.bf16.msra.mxu1 %v8656_v43  ;;  %5972 = vmatprep.subr.bf16.mxu0 %v8667_v38  ;;  %v8689_v43 = vld [vmem:[%s11791_s2 + $0x1808] ss:$16 sps:$4 sm:$0xff]   ;;  %v6125_v38 = vadd.f32 %v11556_v34, %v6116_v15  ;;  %v6077_v51 = vadd.f32 %v11435_v27, %v6068_v41  ;;  %v8706_v15 = vld [vmem:[%s11793_s4 + $0x40] sm:$0xff]  }
 0x30b   :  { %5937 = vmatprep.subr.bf16.mxu1 %v8664_v50  ;;  %v6180_v50 = vadd.f32 %v11408_v61, %v6171_v13  ;;  %v6221_v57 = vmul.f32 %v8725_v19, %v6129_v17  ;;  %v8705_v13 = vld [vmem:[%s11793_s4 + $0x8] sm:$0xff]  }
 0x30c   :  { %v8713_v41 = vld [vmem:[%s11793_s4 + $0xa8] sm:$0xff]  }
 0x30d   :  { %5973 = vmatpush2.bf16.msra.mxu0 %v8665_v33  ;;  %v8694_v33 = vld [vmem:[%s11793_s4 + $0x70] sm:$0xff]   ;;  %v6188_v46 = vmul.f32 %v6180_v50, %v11447_v18 }
 0x30e   :  { %5938 = vmatpush2.bf16.msra.mxu1 %v8662_v11  ;;  %5974 = vmatprep.subr.bf16.mxu0 %v8670_v4  ;;  %v6217_v11 = vmul.f32 %v8727_v47, %v6125_v38  ;;  %v8710_v50 = vld [vmem:[%s11793_s4 + $0xf0] sm:$0xff]  }
 0x30f   :  { %6001 = vmatprep.subr.bf16.mxu1 %v8673_v49  ;;  %v8763_v49 = vld [vmem:[%s11790_s1 + $0x58] ss:$100 sps:$4 sm:$0xff]   ;;  %v8711_v38 = vld [vmem:[%s11793_s4 + $0xb0] sm:$0xff]  }
 0x310   :  { %v6225_v4 = vpack.c.bf16 %v6221_v57, %v6217_v11  ;;  %v8712_v57 = vld [vmem:[%s11793_s4 + $0xe8] sm:$0xff]   ;;  %v8716_v11 = vld [vmem:[%s11793_s4 + $0xd8] sm:$0xff]  }
 0x311   :  { %5940 = vmatmul.mubr.bf16.vlgmr.msra.gmra.mxu1 %v8762_v63  ;;  %5975 = vmatpush2.bf16.msra.mxu0 %v8668_v54  ;;  %v8695_v54 = vld [vmem:[%s11793_s4 + $0x30] sm:$0xff]   ;;  %v8698_v63 = vld [vmem:[%s11793_s4 + $0x60] sm:$0xff]  }
 0x312   :  { %6002 = vmatpush1.bf16.msra.mxu1 %v8671_v55  ;;  %5976 = vmatprep.subr.bf16.mxu0 %v8676_v59  ;;  %v8696_v55 = vld [vmem:[%s11793_s4 + $0x68] sm:$0xff]   ;;  %v6196_v59 = vand.u32 2147483647, %v6188_v46  ;;  %v8719_v46 = vld [vmem:[%s11793_s4 + $0x90] sm:$0xff]  }
 0x313   :  { %6003 = vmatprep.subr.bf16.mxu1 %v8679_v10  ;;  %6025 = vmatprep.mubr.bf16.mxu1 %v8780_v36  ;;  %v8688_v36 = vld [vmem:[%s11791_s2 + $0x170c] ss:$16 sps:$4 sm:$0xff]   ;;  %v6085_v10 = vmul.f32 %v6077_v51, %v11447_v18  ;;  %v5511_v51 = vpop.f32.mrf.mxu1 }
 0x315   :  { %5977 = vmatpush2.bf16.msra.mxu0 %v8674_v24  ;;  %v6204_v24 = vadd.f32 1.0, %v6196_v59  ;;  %v5554_v59 = vpop.f32.mrf.mxu0 }
 0x316   :  { %6004 = vmatpush1.bf16.msra.mxu1 %v8677_v5  ;;  %5978 = vmatprep.subr.bf16.mxu0 %v8682_v32  ;;  %v6094_v5 = vadd.f32 %v11478_v40, %v6085_v10  ;;  %v8699_v32 = vld [vmem:[%s11793_s4 + $0x20] sm:$0xff]  }
 0x317   :  { %6005 = vmatprep.subr.bf16.mxu1 %v8685_v26  ;;  %v8700_v26 = vld [vmem:[%s11793_s4 + $0x58] sm:$0xff]   ;;  %8728 = vrcp.f32 %v6204_v24  ;;  %v5556_v52 = vpop.f32.mrf.mxu0 }
 0x318   :  { %v6102_v58 = vmul.f32 %v6094_v5, %v11447_v18  ;;  %8730 = vrcp.f32 %v6200_v60 }
 0x319   :  { %5979 = vmatpush2.bf16.msra.mxu0 %v8680_v14  ;;  %v6098_v14 = vmul.f32 %v6090_v21, %v11457_v6 }
 0x31a   :  { %6006 = vmatpush1.bf16.msra.mxu1 %v8683_v12  ;;  %5980 = vmatprep.subr.bf16.mxu0 %v8688_v36  ;;  %v6111_v12 = vadd.f32 %v11517_v53, %v6102_v58  ;;  %v8704_v36 = vld [vmem:[%s11793_s4 + $0x48] sm:$0xff]  }
 0x31b   :  { %6007 = vmatprep.subr.bf16.mxu1 %v8691_v20  ;;  %v6107_v20 = vadd.f32 %v11517_v53, %v6098_v14 }
 0x31c   :  { %v6119_v23 = vmul.f32 %v6111_v12, %v11447_v18  ;;  %v8707_v18 = vld [vmem:[%s11793_s4] sm:$0xff]  }
 0x31d   :  { %5981 = vmatpush2.bf16.msra.mxu0 %v8686_v56  ;;  %v6115_v19 = vmul.f32 %v6107_v20, %v11457_v6  ;;  %v8708_v6 = vld [vmem:[%s11793_s4 + $0xf8] sm:$0xff]  }
 0x31e   :  { %6008 = vmatpush1.bf16.msra.mxu1 %v8689_v43  ;;  %7433 = vmatprep.subr.bf16.mxu0 %v8692_v29  ;;  %v6128_v28 = vadd.f32 %v11556_v34, %v6119_v23 }
 0x31f   :  { %v6124_v43 = vadd.f32 %v11556_v34, %v6115_v19  ;;  %7455 = vmatprep.subr.bf16.mxu1 %v8708_v6 }
 0x320   :  { %5983 = vmatmul.mubr.bf16.vlgmr.msra.gmra.mxu0 %v8763_v49  ;;  %v8721_v49 = vld [vmem:[%s11793_s4 + $0x88] sm:$0xff]  }
 0x321   :  { %7390 = vmatmul.mubr.msk.bf16.vlgmr.msra.gmra.mxu1 %vm4914_vm0, %v8764_v2  ;;  %7434 = vmatpush3.bf16.msra.mxu0 %v8693_v42  ;;  %v8715_v42 = vld [vmem:[%s11793_s4 + $0xa0] sm:$0xff]  }
 0x322   :  { %6523 = vmatprep.mubr.bf16.mxu0 %v6225_v4  ;;  %7435 = vmatprep.subr.bf16.mxu0 %v8694_v33  ;;  %v8717_v33 = vld [vmem:[%s11793_s4 + $0x98] sm:$0xff]   ;;  %v8720_v4 = vld [vmem:[%s11793_s4 + $0xc8] sm:$0xff]   ;;  %v8722_v2 = vld [vmem:[%s11793_s4 + $0xc0] sm:$0xff]  }
 0x323   :  { %7456 = vmatpush3.bf16.msra.mxu1 %v8709_v30 }
 0x324   :  { %v8729_v39 = vpop.eup %8728  ;;  %7457 = vmatprep.subr.bf16.mxu1 %v8710_v50 }
 0x325   :  { %7436 = vmatpush3.bf16.msra.mxu0 %v8695_v54  ;;  %v8731_v56 = vpop.eup %8730  ;;  %v6220_v17 = vmul.f32 %v8729_v39, %v6128_v28  ;;  %v5513_v54 = vpop.f32.mrf.mxu1  ;;  %v859_v39 = vsub.s32 2, %v11048_v62 }
 0x326   :  { %7437 = vmatprep.subr.bf16.mxu0 %v8696_v55  ;;  %v6216_v47 = vmul.f32 %v8731_v56, %v6124_v43 }
 0x327   :  { %7458 = vmatpush3.bf16.msra.mxu1 %v8711_v38  ;;  %v5515_v55 = vpop.f32.mrf.mxu1  ;;  %v860_v43 = vrot.slane %v11080_v16, %v859_v39 }
 0x328   :  { %v6224_v29 = vpack.c.bf16 %v6220_v17, %v6216_v47  ;;  %7459 = vmatprep.subr.bf16.mxu1 %v8712_v57 }
 0x329   :  { %7438 = vmatpush3.bf16.msra.mxu0 %v8697_v3  ;;  %v5517_v45 = vpop.f32.mrf.mxu1  ;;  %v5512_v6 = vadd.f32 %v5511_v51, %v860_v43 }
 0x32a   :  { %7439 = vmatprep.subr.bf16.mxu0 %v8698_v63  ;;  %v5558_v63 = vpop.f32.mrf.mxu0 }
 0x32b   :  { %7460 = vmatpush3.bf16.msra.mxu1 %v8713_v41  ;;  %v5597_v10 = vpop.f32.mrf.mxu1  ;;  %v5555_v57 = vadd.f32 %v5554_v59, %v5512_v6  ;;  %v5516_v41 = vadd.f32 %v5515_v55, %v860_v43 }
 0x32c   :  { %7461 = vmatprep.subr.bf16.mxu1 %v8714_v44  ;;  %v5560_v24 = vpop.f32.mrf.mxu0 }
 0x32d   :  { %7440 = vmatpush3.bf16.msra.mxu0 %v8699_v32  ;;  %v5599_v3 = vpop.f32.mrf.mxu1 }
 0x32e   :  { %7441 = vmatprep.subr.bf16.mxu0 %v8700_v26  ;;  %v5640_v60 = vpop.f32.mrf.mxu0 }
 0x32f   :  { %7462 = vmatpush3.bf16.msra.mxu1 %v8715_v42  ;;  %v5601_v0 = vpop.f32.mrf.mxu1  ;;  %v5598_v42 = vadd.f32 %v5597_v10, %v5555_v57 }
 0x330   :  { %7463 = vmatprep.subr.bf16.mxu1 %v8716_v11  ;;  %v5642_v26 = vpop.f32.mrf.mxu0 }
 0x331   :  { %7442 = vmatpush3.bf16.msra.mxu0 %v8701_v25  ;;  %v5603_v5 = vpop.f32.mrf.mxu1 }
 0x332   :  { %7443 = vmatprep.subr.bf16.mxu0 %v8702_v48  ;;  %v5644_v58 = vpop.f32.mrf.mxu0 }
 0x333   :  { %7464 = vmatpush3.bf16.msra.mxu1 %v8717_v33  ;;  %v5683_v32 = vpop.f32.mrf.mxu1 }
 0x334   :  { %7465 = vmatprep.subr.bf16.mxu1 %v8718_v31  ;;  %v5646_v48 = vpop.f32.mrf.mxu0 }
 0x335   :  { %7444 = vmatpush3.bf16.msra.mxu0 %v8703_v8  ;;  %v5685_v21 = vpop.f32.mrf.mxu1 }
 0x336   :  { %7445 = vmatprep.subr.bf16.mxu0 %v8704_v36  ;;  %v5726_v12 = vpop.f32.mrf.mxu0 }
 0x337   :  { %7466 = vmatpush3.bf16.msra.mxu1 %v8719_v46  ;;  %v5687_v25 = vpop.f32.mrf.mxu1  ;;  %v5559_v46 = vadd.f32 %v5558_v63, %v5516_v41 }
 0x338   :  { %7467 = vmatprep.subr.bf16.mxu1 %v8720_v4  ;;  %v5728_v36 = vpop.f32.mrf.mxu0 }
 0x339   :  { %7446 = vmatpush3.bf16.msra.mxu0 %v8705_v13  ;;  %v5689_v14 = vpop.f32.mrf.mxu1  ;;  %v5602_v39 = vadd.f32 %v5601_v0, %v5559_v46 }
 0x33a   :  { %7447 = vmatprep.subr.bf16.mxu0 %v8706_v15  ;;  %v5730_v23 = vpop.f32.mrf.mxu0 }
 0x33b   :  { %7468 = vmatpush3.bf16.msra.mxu1 %v8721_v49 }
 0x33c   :  { %7469 = vmatprep.subr.bf16.mxu1 %v8722_v2  ;;  %v5732_v15 = vpop.f32.mrf.mxu0 }
 0x33d   :  { %7448 = vmatpush3.bf16.msra.mxu0 %v8707_v18  ;;  %v863_v18 = vsub.s32 3, %v11048_v62  ;;  %v5641_v62 = vadd.f32 %v5640_v60, %v5598_v42 }
 0x33f   :  { %7470 = vmatpush3.bf16.msra.mxu1 %v8723_v7 }
 0x340   :  { %6524 = vmatmul.mubr.bf16.vlgmr.msra.gmra.mxu0 %v6224_v29  ;;  %v864_v29 = vrot.slane %v11080_v16, %v863_v18  ;;  %v5684_v16 = vadd.f32 %v5683_v32, %v5641_v62  ;;  %v5645_v18 = vadd.f32 %v5644_v58, %v5602_v39 }
 0x342   :  { %v5514_v38 = vadd.f32 %v5513_v54, %v864_v29  ;;  %v5518_v31 = vadd.f32 %v5517_v45, %v864_v29  ;;  %v5727_v54 = vadd.f32 %v5726_v12, %v5684_v16  ;;  %v5688_v10 = vadd.f32 %v5687_v25, %v5645_v18 }
 0x344   :  { %v5557_v44 = vadd.f32 %v5556_v52, %v5514_v38  ;;  %v5561_v7 = vadd.f32 %v5560_v24, %v5518_v31  ;;  %v5731_v63 = vadd.f32 %v5730_v23, %v5688_v10 }
 0x346   :  { %v5600_v4 = vadd.f32 %v5599_v3, %v5557_v44  ;;  %v5604_v51 = vadd.f32 %v5603_v5, %v5561_v7 }
 0x348   :  { %v5643_v34 = vadd.f32 %v5642_v26, %v5600_v4  ;;  %v5647_v52 = vadd.f32 %v5646_v48, %v5604_v51 }
 0x34a   :  { %v5686_v53 = vadd.f32 %v5685_v21, %v5643_v34  ;;  %v5690_v45 = vadd.f32 %v5689_v14, %v5647_v52 }
 0x34c   :  { %v5729_v43 = vadd.f32 %v5728_v36, %v5686_v53  ;;  %v5733_v24 = vadd.f32 %v5732_v15, %v5690_v45 }
 0x351   :  { %v5769_v8 = vpop.f32.mrf.mxu1 }
 0x352   :  { %v5770_v6 = vadd.f32 %v5769_v8, %v5727_v54 }
 0x353   :  { %v5771_v20 = vpop.f32.mrf.mxu1 }
 0x354   :  { %v5772_v3 = vadd.f32 %v5771_v20, %v5729_v43 }
 0x355   :  { %v5773_v13 = vpop.f32.mrf.mxu1 }
 0x356   :  { %v5774_v0 = vadd.f32 %v5773_v13, %v5731_v63 }
 0x357   :  { %v5775_v19 = vpop.f32.mrf.mxu1 }
 0x358   :  { %v5776_v5 = vadd.f32 %v5775_v19, %v5733_v24 }
 0x360   :  { %v5812_v28 = vpop.f32.mrf.mxu0 }
 0x361   :  { %v5813_v60 = vadd.f32 %v5812_v28, %v5770_v6 }
 0x362   :  { %v5814_v17 = vpop.f32.mrf.mxu0 }
 0x363   :  { %v5815_v26 = vadd.f32 %v5814_v17, %v5772_v3 }
 0x364   :  { %v5816_v30 = vpop.f32.mrf.mxu0 }
 0x365   :  { %v5817_v58 = vadd.f32 %v5816_v30, %v5774_v0 }
 0x366   :  { %v5818_v11 = vpop.f32.mrf.mxu0 }
 0x367   :  { %v5819_v48 = vadd.f32 %v5818_v11, %v5776_v5 }
 0x391   :  { %v5855_v56 = vpop.f32.mrf.mxu1 }
 0x392   :  { %v5856_v32 = vadd.f32 %v5855_v56, %v5813_v60 }
 0x393   :  { %v5857_v47 = vpop.f32.mrf.mxu1 }
 0x394   :  { %v5858_v34 = vadd.f32 %v5857_v47, %v5815_v26 }
 0x395   :  { %v5859_v50 = vpop.f32.mrf.mxu1 }
 0x396   :  { %v5860_v25 = vadd.f32 %v5859_v50, %v5817_v58 }
 0x397   :  { %v5861_v33 = vpop.f32.mrf.mxu1 }
 0x398   :  { %v5862_v20 = vadd.f32 %v5861_v33, %v5819_v48 }
 0x3a0   :  { %v5898_v49 = vpop.f32.mrf.mxu0 }
 0x3a1   :  { %v5899_v21 = vadd.f32 %v5898_v49, %v5856_v32 }
 0x3a2   :  { %v5900_v59 = vpop.f32.mrf.mxu0 }
 0x3a3   :  { %v5901_v53 = vadd.f32 %v5900_v59, %v5858_v34 }
 0x3a4   :  { %v5902_v29 = vpop.f32.mrf.mxu0 }
 0x3a5   :  { %v5903_v23 = vadd.f32 %v5902_v29, %v5860_v25 }
 0x3a6   :  { %v5904_v12 = vpop.f32.mrf.mxu0 }
 0x3a7   :  { %v5905_v17 = vadd.f32 %v5904_v12, %v5862_v20 }
 0x3d1   :  { %v5941_v2 = vpop.f32.mrf.mxu1 }
 0x3d2   :  { %v5942_v8 = vadd.f32 %v5941_v2, %v5899_v21 }
 0x3d3   :  { %v5943_v55 = vpop.f32.mrf.mxu1 }
 0x3d4   :  { %v5944_v28 = vadd.f32 %v5943_v55, %v5901_v53 }
 0x3d5   :  { %v5945_v38 = vpop.f32.mrf.mxu1 }
 0x3d6   :  { %v5946_v56 = vadd.f32 %v5945_v38, %v5903_v23 }
 0x3d7   :  { %v5947_v57 = vpop.f32.mrf.mxu1 }
 0x3d8   :  { %v5948_v42 = vadd.f32 %v5947_v57, %v5905_v17 }
 0x3e0   :  { %v5984_v14 = vpop.f32.mrf.mxu0 }
 0x3e1   :  { %v6027_v36 = vpop.f32.mrf.mxu1  ;;  %v5985_v41 = vadd.f32 %v5984_v14, %v5942_v8 }
 0x3e2   :  { %v5986_v15 = vpop.f32.mrf.mxu0 }
 0x3e3   :  { %v6029_v13 = vpop.f32.mrf.mxu1  ;;  %v11696_v19 = vadd.f32 %v6027_v36, %v5985_v41  ;;  %v5987_v47 = vadd.f32 %v5986_v15, %v5944_v28 }
 0x3e4   :  { %v5988_v30 = vpop.f32.mrf.mxu0 }
 0x3e5   :  { %v6031_v44 = vpop.f32.mrf.mxu1  ;;  %v11698_v11 = vadd.f32 %v6029_v13, %v5987_v47  ;;  %v5989_v50 = vadd.f32 %v5988_v30, %v5946_v56  ;;  %v6135_v31 = vmul.f32 %v11299_v9, %v11696_v19  ;;  %v6049_v46 = vmul.f32 %v11364_v1, %v11696_v19 }
 0x3e6   :  { %v5990_v33 = vpop.f32.mrf.mxu0 }
 0x3e7   :  { %v11704_v4 = vadd.f32 %v6031_v44, %v5989_v50  ;;  %v5991_v62 = vadd.f32 %v5990_v33, %v5948_v42  ;;  %v6050_v49 = vmul.f32 %v11364_v1, %v11698_v11  ;;  %v6136_v2 = vmul.f32 %v11299_v9, %v11698_v11  ;;  %v6033_v7 = vpop.f32.mrf.mxu1 }
 0x3e8   :  { %v6144_v39 = vadd.f32 %v11321_v22, %v6135_v31  ;;  %v6058_v59 = vadd.f32 %v11390_v35, %v6049_v46 }
 0x3e9   :  { %v11711_v16 = vadd.f32 %v6033_v7, %v5991_v62  ;;  %v6059_v51 = vadd.f32 %v11390_v35, %v6050_v49  ;;  %v6145_v18 = vadd.f32 %v11321_v22, %v6136_v2  ;;  %v6053_v54 = vmul.f32 %v11364_v1, %v11704_v4 }
 0x3ea   :  { %v6139_v55 = vmul.f32 %v11299_v9, %v11704_v4  ;;  %v6152_v52 = vmul.f32 %v6144_v39, %v11696_v19 }
 0x3eb   :  { %v6054_v10 = vmul.f32 %v11364_v1, %v11711_v16  ;;  %v6140_v43 = vmul.f32 %v11299_v9, %v11711_v16  ;;  %v6153_v6 = vmul.f32 %v6145_v18, %v11698_v11  ;;  %v6062_v45 = vadd.f32 %v11390_v35, %v6053_v54 }
 0x3ec   :  { %v6148_v63 = vadd.f32 %v11321_v22, %v6139_v55  ;;  %v6161_v3 = vadd.f32 %v11360_v37, %v6152_v52  ;;  %v6067_v29 = vmul.f32 %v6059_v51, %v11698_v11  ;;  %v6066_v1 = vmul.f32 %v6058_v59, %v11696_v19  ;;  %v11802_v51 = vld [vmem:[#allocation5_spill] sm:$0xff] }
 0x3ed   :  { %v6063_v60 = vadd.f32 %v11390_v35, %v6054_v10  ;;  %v6149_v38 = vadd.f32 %v11321_v22, %v6140_v43  ;;  %v6162_v24 = vadd.f32 %v11360_v37, %v6153_v6  ;;  %v6070_v9 = vmul.f32 %v6062_v45, %v11704_v4 }
 0x3ee   :  { %v6156_v0 = vmul.f32 %v6148_v63, %v11704_v4  ;;  %v6169_v26 = vmul.f32 %v6161_v3, %v11696_v19  ;;  %v6076_v21 = vadd.f32 %v11435_v27, %v6067_v29  ;;  %v6075_v25 = vadd.f32 %v11435_v27, %v6066_v1  ;;  %v11803_v63 = vld [vmem:[#allocation6_spill] sm:$0xff] }
 0x3ef   :  { %v6071_v32 = vmul.f32 %v6063_v60, %v11711_v16  ;;  %v6157_v5 = vmul.f32 %v6149_v38, %v11711_v16  ;;  %v6170_v35 = vmul.f32 %v6162_v24, %v11698_v11  ;;  %v6079_v58 = vadd.f32 %v11435_v27, %v6070_v9 }
 0x3f0   :  { %v6165_v22 = vadd.f32 %v11360_v37, %v6156_v0  ;;  %v6178_v34 = vadd.f32 %v11408_v61, %v6169_v26  ;;  %v6084_v41 = vmul.f32 %v6076_v21, %v11698_v11  ;;  %v6083_v13 = vmul.f32 %v6075_v25, %v11696_v19 }
 0x3f1   :  { %v6080_v12 = vadd.f32 %v11435_v27, %v6071_v32  ;;  %v6166_v57 = vadd.f32 %v11360_v37, %v6157_v5  ;;  %v6179_v48 = vadd.f32 %v11408_v61, %v6170_v35  ;;  %v6087_v20 = vmul.f32 %v6079_v58, %v11704_v4  ;;  %v7400_v58 = vld [vmem:[%s11794_s5] ss:$0 sm:$0xff] }
 0x3f2   :  { %v6173_v53 = vmul.f32 %v6165_v22, %v11704_v4  ;;  %v6186_v8 = vmul.f32 %v6178_v34, %v11696_v19  ;;  %v6093_v50 = vadd.f32 %v11478_v40, %v6084_v41  ;;  %v6092_v46 = vadd.f32 %v11478_v40, %v6083_v13 }
 0x3f3   :  { %v6174_v14 = vmul.f32 %v6166_v57, %v11711_v16  ;;  %v6187_v36 = vmul.f32 %v6179_v48, %v11698_v11  ;;  %v6088_v37 = vmul.f32 %v6080_v12, %v11711_v16  ;;  %v6096_v44 = vadd.f32 %v11478_v40, %v6087_v20 }
 0x3f4   :  { %v6182_v23 = vadd.f32 %v11408_v61, %v6173_v53  ;;  %v6194_v28 = vand.u32 2147483647, %v6186_v8  ;;  %v6101_v2 = vmul.f32 %v6093_v50, %v11698_v11  ;;  %v6100_v39 = vmul.f32 %v6092_v46, %v11696_v19 }
 0x3f5   :  { %v6183_v15 = vadd.f32 %v11408_v61, %v6174_v14  ;;  %v6195_v27 = vand.u32 2147483647, %v6187_v36  ;;  %v6097_v31 = vadd.f32 %v11478_v40, %v6088_v37  ;;  %v6104_v49 = vmul.f32 %v6096_v44, %v11704_v4 }
 0x3f6   :  { %v6190_v17 = vmul.f32 %v6182_v23, %v11704_v4  ;;  %v6202_v56 = vadd.f32 1.0, %v6194_v28  ;;  %v6110_v54 = vadd.f32 %v11802_v51, %v6101_v2  ;;  %v6109_v59 = vadd.f32 %v11802_v51, %v6100_v39 }
 0x3f7   :  { %v6191_v47 = vmul.f32 %v6183_v15, %v11711_v16  ;;  %v6203_v30 = vadd.f32 1.0, %v6195_v27  ;;  %v6105_v7 = vmul.f32 %v6097_v31, %v11711_v16  ;;  %v6113_v18 = vadd.f32 %v11802_v51, %v6104_v49 }
 0x3f8   :  { %v6198_v42 = vand.u32 2147483647, %v6190_v17  ;;  %8732 = vrcp.f32 %v6202_v56  ;;  %v6118_v52 = vmul.f32 %v6110_v54, %v11698_v11  ;;  %v6117_v43 = vmul.f32 %v6109_v59, %v11696_v19 }
 0x3f9   :  { %v6199_v33 = vand.u32 2147483647, %v6191_v47  ;;  %8734 = vrcp.f32 %v6203_v30  ;;  %v6114_v40 = vadd.f32 %v11802_v51, %v6105_v7  ;;  %v6121_v55 = vmul.f32 %v6113_v18, %v11704_v4 }
 0x3fa   :  { %v6206_v61 = vadd.f32 1.0, %v6198_v42  ;;  %v6127_v29 = vadd.f32 %v11803_v63, %v6118_v52  ;;  %v6126_v1 = vadd.f32 %v11803_v63, %v6117_v43 }
 0x3fb   :  { %v6207_v62 = vadd.f32 1.0, %v6199_v33  ;;  %v6122_v10 = vmul.f32 %v6114_v40, %v11711_v16  ;;  %v6130_v3 = vadd.f32 %v11803_v63, %v6121_v55 }
 0x3fc   :  { %8736 = vrcp.f32 %v6206_v61 }
 0x3fd   :  { %8738 = vrcp.f32 %v6207_v62  ;;  %v6131_v38 = vadd.f32 %v11803_v63, %v6122_v10 }
 0x400   :  { %v7449_v19 = vpop.f32.mrf.mxu0 }
 0x402   :  { %v7450_v32 = vpop.f32.mrf.mxu0 }
 0x403   :  { %v7451_v35 = vadd.f32 %v7450_v32, %v7449_v19 }
 0x404   :  { %v7452_v5 = vpop.f32.mrf.mxu0 }
 0x405   :  { %v8733_v6 = vpop.eup %8732  ;;  %v6526_v12 = vadd.f32 %v7451_v35, %v7400_v58 }
 0x406   :  { %v8735_v45 = vpop.eup %8734  ;;  %v6218_v11 = vmul.f32 %v8733_v6, %v6126_v1  ;;  %v7453_v22 = vpop.f32.mrf.mxu0 }
 0x407   :  { %v6219_v4 = vmul.f32 %v8735_v45, %v6127_v29  ;;  %v7454_v57 = vadd.f32 %v7453_v22, %v7452_v5 }
 0x409   :  { %v8737_v60 = vpop.eup %8736  ;;  %v6529_v14 = vadd.f32 %v7454_v57, %v7400_v58 }
 0x40a   :  { %v8739_v24 = vpop.eup %8738  ;;  %v6222_v9 = vmul.f32 %v8737_v60, %v6130_v3 }
 0x40b   :  { %v6223_v0 = vmul.f32 %v8739_v24, %v6131_v38 }
 0x40c   :  { %v6226_v16 = vpack.c.bf16 %v6222_v9, %v6218_v11 }
 0x40d   :  { %v6227_v26 = vpack.c.bf16 %v6223_v0, %v6219_v4 }
 0x40f   :  { %6564 = vmatprep.mubr.bf16.mxu1 %v6227_v26 }
 0x410   :  { %6565 = vmatmul.mubr.bf16.vlgmr.msra.gmra.mxu1 %v6226_v16 }
 0x4d0   :  { %v7471_v34 = vpop.f32.mrf.mxu1 }
 0x4d2   :  { %v7472_v21 = vpop.f32.mrf.mxu1 }
 0x4d3   :  { %v7473_v48 = vadd.f32 %v7472_v21, %v7471_v34 }
 0x4d4   :  { %v7474_v25 = vpop.f32.mrf.mxu1 }
 0x4d5   :  { %v6567_v53 = vadd.f32 %v7473_v48, %v6526_v12 }
 0x4d6   :  { %v7475_v8 = vpop.f32.mrf.mxu1 }
 0x4d7   :  { %6573 = vst [vmem:[%s11795_s6] sm:$0xff] %v6567_v53  ;;  %v7476_v36 = vadd.f32 %v7475_v8, %v7474_v25 }
 0x4d9   :  { %v6570_v20 = vadd.f32 %v7476_v36, %v6529_v14 }
 0x4db   :  { %6574 = vst [vmem:[%s11795_s6 + $0x8] sm:$0xff] %v6570_v20 }
 0x4dc   :  { %6579 = vsyncpa [#allocation3], 1 }

</bundles_post_ra>
